<compile_context>
chip_gen: v7x
topology: tpu7x:2x2x1
jax: 0.10.0
libtpu: 0.0.40
codegen_flags: <defaults>
</compile_context>

<pallas_src>
import functools

import jax
import jax.numpy as jnp
from jax.experimental import pallas as pl
from jax.experimental.pallas import tpu as pltpu


def _round_up(x, m):
    return (x + m - 1) // m * m


def _device_defaults():
    """(tile_h, merge_dx, vmem_limit_bytes) tuned per TPU generation."""
    kind = ""
    try:
        kind = jax.devices()[0].device_kind.lower()
    except Exception:
        pass
    is_v5 = "v5" in kind
    is_v7 = ("v7" in kind) or ("tpu7" in kind) or ("7x" in kind)
    merge_dx = not is_v5          # K=3*CinP merge only pays on 256-deep MXUs
    if is_v7:
        return 16, merge_dx, 48 * 1024 * 1024     # 64 MiB VMEM per TensorCore
    if is_v5:
        return 32, merge_dx, 96 * 1024 * 1024     # 128 MiB VMEM
    return 32, merge_dx, 96 * 1024 * 1024         # v6e / default


def _accumulate_taps(read_win, w_ref, merge_dx):
    """3x3 conv as shifted-window MXU matmuls, accumulated in SSA values."""
    acc = None
    if merge_dx:
        # One (M, 3*Cin) x (3*Cin, Cout) matmul per dy: fills the 256-deep MXU.
        for dy in range(3):
            lhs = jnp.concatenate([read_win(dy, dx) for dx in range(3)], axis=-1)
            p = jnp.dot(lhs, w_ref[dy], preferred_element_type=jnp.float32)
            acc = p if acc is None else acc + p
    else:
        # 9 separate K=Cin matmuls (best for v5e's 128-deep MXUs).
        for dy in range(3):
            for dx in range(3):
                p = jnp.dot(read_win(dy, dx), w_ref[dy * 3 + dx],
                            preferred_element_type=jnp.float32)
                acc = p if acc is None else acc + p
    return acc


# ---------------------------------------------------------------------------
# Fused kernel: conv3x3+BN+ReLU -> conv3x3+BN+ReLU for one (batch, row-tile).
#
# x_hbm_ref : (N, (Hpad+5)*WP, CinP) bf16 in HBM (row-flattened padded NHWC);
#             the haloed slab for this tile is DMA'd manually (double-buffered).
# w*_ref    : (3, 3*CinP, CoutP) or (9, CinP, CoutP) bf16 tap weights.
# s*/b*     : (1, CoutP) f32 folded BN scale / shift.
# m_ref     : (1, M1, 1) f32 conv2 zero-padding mask over the h1 halo.
# o_ref     : (1, TH, W, C2P) bf16 lane-dense output tile.
# ---------------------------------------------------------------------------
def _convblock_kernel(x_hbm_ref, w1_ref, s1_ref, b1_ref, w2_ref, s2_ref, b2_ref,
                      m_ref, o_ref, xbuf_ref, h1_ref, sem,
                      *, TH, W, WP, M1, M2, MERGE_DX):
    n = pl.program_id(0)
    t = pl.program_id(1)
    n_tiles = pl.num_programs(1)
    SLAB = (TH + 5) * WP                     # flattened haloed input rows per tile

    def start_fetch(tt, slot):
        pltpu.make_async_copy(
            x_hbm_ref.at[n, pl.ds(tt * TH * WP, SLAB)],
            xbuf_ref.at[slot], sem.at[slot]).start()

    # Prime the double buffer at the start of every batch-row sweep.
    @pl.when(t == 0)
    def _():
        start_fetch(0, 0)

    slot = t % 2
    pltpu.make_async_copy(x_hbm_ref.at[n, pl.ds(0, SLAB)],
                          xbuf_ref.at[slot], sem.at[slot]).wait()

    # Prefetch the next row tile of the same batch element into the other slot.
    @pl.when(t + 1 < n_tiles)
    def _():
        start_fetch(t + 1, 1 - slot)

    # ---- conv1 + folded BN + ReLU -> masked bf16 h1 halo tile in VMEM ----
    def win1(dy, dx):
        off = dy * WP + dx
        return xbuf_ref[slot, off:off + M1, :]

    acc1 = _accumulate_taps(win1, w1_ref, MERGE_DX)
    h1 = jnp.maximum(acc1 * s1_ref[0] + b1_ref[0], 0.0)
    # mask zeroes the halo rows / padding columns that act as conv2's zero pad
    h1_ref[0:M1, :] = (h1 * m_ref[0]).astype(h1_ref.dtype)
    # Invariant: the alignment-slack rows are only read by stripped garbage
    # output columns; zero them explicitly so that stays true under any change.
    h1_ref[M1:, :] = jnp.zeros(
        (h1_ref.shape[0] - M1, h1_ref.shape[1]), h1_ref.dtype)

    # ---- conv2 + folded BN + ReLU over the masked h1 halo tile ----
    def win2(dy, dx):
        off = dy * WP + dx
        return h1_ref[off:off + M2, :]

    acc2 = _accumulate_taps(win2, w2_ref, MERGE_DX)
    y = jnp.maximum(acc2 * s2_ref[0] + b2_ref[0], 0.0).astype(o_ref.dtype)
    # (TH*WP, C2P) -> (TH, WP, C2P); strip padded columns; one lane-dense store.
    y = y.reshape(TH, WP, y.shape[-1])
    o_ref[0] = y[:, :W, :]


# ---------------------------------------------------------------------------
# Forward: NCHW in / NCHW out (PyTorch semantics).
# ---------------------------------------------------------------------------
@functools.partial(jax.jit,
                   static_argnames=("tile_h", "merge_dx", "vmem_limit_bytes"))
def _forward_impl(x_nchw, params, *, tile_h, merge_dx, vmem_limit_bytes):
    w1, w2 = params["w1"], params["w2"]          # (9, Cin, Cout), (9, Cout, Cout)
    s1, b1 = params["scale1"], params["shift1"]
    s2, b2 = params["scale2"], params["shift2"]

    N, Cin, H, W = x_nchw.shape
    Cout1, Cout2 = w1.shape[2], w2.shape[2]
    CinP, C1P, C2P = (_round_up(c, 128) for c in (Cin, Cout1, Cout2))

    # Row tiling: pad H up to a multiple of the tile (no tile shrinking).
    n_tiles = pl.cdiv(H, tile_h)
    th = pl.cdiv(H, n_tiles)
    Hpad = th * n_tiles

    WP = _round_up(W + 4, 8)       # 8-sublane-aligned flattened row pitch
    M1 = (th + 2) * WP             # h1 rows computed (includes conv2's row halo)
    M1P = M1 + 8                   # + zeroed slack rows (multiple-of-8 buffer)
    M2 = th * WP                   # conv2 output rows (incl. padded columns)

    # --- glue: NCHW -> NHWC bf16, spatial+channel zero pad, flatten (H, W) ---
    x = jnp.transpose(x_nchw, (0, 2, 3, 1)).astype(jnp.bfloat16)
    x = jnp.pad(x, ((0, 0), (2, Hpad - H + 3), (2, WP - W - 2), (0, CinP - Cin)))
    x = x.reshape(N, (Hpad + 5) * WP, CinP)     # free reshape; stays in HBM

    # --- weights: tap-major, channel padded; K-merged per dy if requested ---
    def pack_w(w9, cinp, coutp):
        wp = jnp.pad(w9, ((0, 0), (0, cinp - w9.shape[1]),
                          (0, coutp - w9.shape[2])))
        if merge_dx:
            wp = wp.reshape(3, 3 * cinp, coutp)  # K layout: [dx0 | dx1 | dx2]
        return wp.astype(jnp.bfloat16)

    def pad_sb(s, b, coutp):
        c = s.shape[-1]
        sp = jnp.pad(s.reshape(1, c).astype(jnp.float32),
                     ((0, 0), (0, coutp - c)), constant_values=1.0)
        bp = jnp.pad(b.reshape(1, c).astype(jnp.float32), ((0, 0), (0, coutp - c)))
        return sp, bp

    w1p, w2p = pack_w(w1, CinP, C1P), pack_w(w2, C1P, C2P)
    s1p, b1p = pad_sb(s1, b1, C1P)
    s2p, b2p = pad_sb(s2, b2, C2P)

    # --- conv2 zero-padding mask over the h1 halo tile (tiny, per row tile) ---
    r1 = jnp.arange(M1) // WP                   # local h1 row within the tile
    c1 = jnp.arange(M1) % WP                    # local h1 column
    orig_row = (jnp.arange(n_tiles) * th)[:, None] + r1[None, :] - 1
    valid = ((orig_row >= 0) & (orig_row < H)
             & (c1[None, :] >= 1) & (c1[None, :] <= W))
    mask = valid.astype(jnp.float32)[:, :, None]        # (n_tiles, M1, 1)

    w1_shape = (3, 3 * CinP, C1P) if merge_dx else (9, CinP, C1P)
    w2_shape = (3, 3 * C1P, C2P) if merge_dx else (9, C1P, C2P)

    kernel = functools.partial(_convblock_kernel, TH=th, W=W, WP=WP,
                               M1=M1, M2=M2, MERGE_DX=merge_dx)

    out = pl.pallas_call(
        kernel,
        out_shape=jax.ShapeDtypeStruct((N, Hpad, W, C2P), jnp.bfloat16),
        grid=(N, n_tiles),
        in_specs=[
            pl.BlockSpec(memory_space=pl.ANY),                 # input stays in HBM
            pl.BlockSpec(w1_shape, lambda n, t: (0, 0, 0)),
            pl.BlockSpec((1, C1P), lambda n, t: (0, 0)),
            pl.BlockSpec((1, C1P), lambda n, t: (0, 0)),
            pl.BlockSpec(w2_shape, lambda n, t: (0, 0, 0)),
            pl.BlockSpec((1, C2P), lambda n, t: (0, 0)),
            pl.BlockSpec((1, C2P), lambda n, t: (0, 0)),
            pl.BlockSpec((1, M1, 1), lambda n, t: (t, 0, 0)),
        ],
        out_specs=pl.BlockSpec((1, th, W, C2P), lambda n, t: (n, t, 0, 0)),
        scratch_shapes=[
            pltpu.VMEM((2, (th + 5) * WP, CinP), jnp.bfloat16),  # input double buffer
            pltpu.VMEM((M1P, C1P), jnp.bfloat16),                # masked h1 halo tile
            pltpu.SemaphoreType.DMA((2,)),
        ],
        compiler_params=pltpu.CompilerParams(
            dimension_semantics=("parallel", "arbitrary"),
            vmem_limit_bytes=vmem_limit_bytes),
    )(x, w1p, s1p, b1p, w2p, s2p, b2p, mask)

    # glue: drop row/channel padding, restore f32 and NCHW
    out = out[:, :H, :, :Cout2].astype(jnp.float32)
    return jnp.transpose(out, (0, 3, 1, 2))


def unet_conv_block_forward(x_nchw, params, *, tile_h=None, merge_dx=None):
    d_tile, d_merge, d_vmem = _device_defaults()
    return _forward_impl(
        x_nchw, params,
        tile_h=int(tile_h) if tile_h is not None else d_tile,
        merge_dx=bool(merge_dx) if merge_dx is not None else d_merge,
        vmem_limit_bytes=d_vmem)


# ---------------------------------------------------------------------------
# Pure-jnp reference (mirrors the kernel's bf16 operand / f32 accumulate path).
# ---------------------------------------------------------------------------
def _reference(x_nchw, params):
    x = jnp.transpose(x_nchw, (0, 2, 3, 1)).astype(jnp.bfloat16).astype(jnp.float32)

    def conv(xin, w9, s, b):
        n, h, w, cin = xin.shape
        cout = w9.shape[2]
        wb = w9.astype(jnp.bfloat16).astype(jnp.float32)
        xp = jnp.pad(xin, ((0, 0), (1, 1), (1, 1), (0, 0)))
        acc = jnp.zeros((n, h, w, cout), jnp.float32)
        for dy in range(3):
            for dx in range(3):
                acc = acc + jnp.einsum(
                    "nhwc,cd->nhwd", xp[:, dy:dy + h, dx:dx + w, :], wb[dy * 3 + dx],
                    precision=jax.lax.Precision.HIGHEST)
        return jnp.maximum(acc * s.reshape(1, 1, 1, -1) + b.reshape(1, 1, 1, -1), 0.0)

    h1 = conv(x, params["w1"], params["scale1"], params["shift1"])
    h1 = h1.astype(jnp.bfloat16).astype(jnp.float32)
    h2 = conv(h1, params["w2"], params["scale2"], params["shift2"])
    h2 = h2.astype(jnp.bfloat16).astype(jnp.float32)
    return jnp.transpose(h2, (0, 3, 1, 2))


def _make_params(key, in_chans, out_chans):
    ks = jax.random.split(key, 10)

    def bn_fold(kg, kb, km, kv, c):
        gamma = 1.0 + 0.2 * jax.random.normal(kg, (c,), jnp.float32)
        beta = 0.1 * jax.random.normal(kb, (c,), jnp.float32)
        mean = 0.1 * jax.random.normal(km, (c,), jnp.float32)
        var = 0.5 + jax.random.uniform(kv, (c,), jnp.float32)
        scale = gamma / jnp.sqrt(var + 1e-5)
        shift = beta - mean * scale
        return scale, shift

    scale1, shift1 = bn_fold(ks[2], ks[3], ks[4], ks[5], out_chans)
    scale2, shift2 = bn_fold(ks[6], ks[7], ks[8], ks[9], out_chans)
    return {
        # torch conv weight (Cout, Cin, 3, 3) -> tap-major (9, Cin, Cout), k = dy*3+dx
        "w1": 0.1 * jax.random.normal(ks[0], (9, in_chans, out_chans), jnp.float32),
        "w2": 0.1 * jax.random.normal(ks[1], (9, out_chans, out_chans), jnp.float32),
        "scale1": scale1, "shift1": shift1,
        "scale2": scale2, "shift2": shift2,
    }


if __name__ == "__main__":
    in_chans, out_chans = 8, 16
    N, H, W = 2, 16, 16

    key = jax.random.PRNGKey(0)
    kx, kp = jax.random.split(key)
    x = jax.random.normal(kx, (N, in_chans, H, W), jnp.float32)      # NCHW
    params = _make_params(kp, in_chans, out_chans)

    out = jax.block_until_ready(unet_conv_block_forward(x, params))
    ref = jax.block_until_ready(_reference(x, params))

    assert out.shape == (N, out_chans, H, W), out.shape
    err = float(jnp.max(jnp.abs(out - ref)))
    assert err < 2e-2, err
    print("KERNEL_OK")
</pallas_src>

<mosaic_0001>
module attributes {stable_mosaic.version = 11 : i64} {
  func.func @_convblock_kernel(%arg0: i32, %arg1: i32, %arg2: memref<2x504x128xbf16, #tpu.memory_space<any>>, %arg3: memref<3x384x128xbf16, #tpu.memory_space<vmem>>, %arg4: memref<1x128xf32, #tpu.memory_space<vmem>>, %arg5: memref<1x128xf32, #tpu.memory_space<vmem>>, %arg6: memref<3x384x128xbf16, #tpu.memory_space<vmem>>, %arg7: memref<1x128xf32, #tpu.memory_space<vmem>>, %arg8: memref<1x128xf32, #tpu.memory_space<vmem>>, %arg9: memref<1x432x1xf32, #tpu.memory_space<vmem>>, %arg10: memref<1x16x16x128xbf16, #tpu.memory_space<vmem>>, %arg11: memref<2x504x128xbf16, #tpu.memory_space<vmem>>, %arg12: memref<440x128xbf16, #tpu.memory_space<vmem>>, %arg13: memref<2x!tpu.dma_semaphore, #tpu.memory_space<semaphore_mem>>) attributes {dimension_semantics = [#tpu.dimension_semantics<parallel>, #tpu.dimension_semantics<arbitrary>], iteration_bounds = array<i64: 2, 1>, scalar_prefetch = 0 : i64, scratch_operands = 3 : i64, tpu.core_type = #tpu.core_type<tc>, window_params = [{}, {pipeline_mode = #tpu.pipeline_mode<synchronous>, transform_indices = @transform_1, window_bounds = array<i64: 3, 384, 128>}, {pipeline_mode = #tpu.pipeline_mode<synchronous>, transform_indices = @transform_2, window_bounds = array<i64: 1, 128>}, {pipeline_mode = #tpu.pipeline_mode<synchronous>, transform_indices = @transform_3, window_bounds = array<i64: 1, 128>}, {pipeline_mode = #tpu.pipeline_mode<synchronous>, transform_indices = @transform_4, window_bounds = array<i64: 3, 384, 128>}, {pipeline_mode = #tpu.pipeline_mode<synchronous>, transform_indices = @transform_5, window_bounds = array<i64: 1, 128>}, {pipeline_mode = #tpu.pipeline_mode<synchronous>, transform_indices = @transform_6, window_bounds = array<i64: 1, 128>}, {transform_indices = @transform_7, window_bounds = array<i64: 1, 432, 1>}, {transform_indices = @transform_8, window_bounds = array<i64: 1, 16, 16, 128>}]} {
    %c0_i32 = arith.constant 0 : i32
    %0 = arith.cmpi eq, %arg1, %c0_i32 : i32
    %1 = arith.extui %0 : i1 to i32
    %c0_i32_0 = arith.constant 0 : i32
    %2 = arith.cmpi ne, %1, %c0_i32_0 : i32
    scf.if %2 {
      %c0_i32_83 = arith.constant 0 : i32
      %c0_i32_84 = arith.constant 0 : i32
      %c0_i32_85 = arith.constant 0 : i32
      %c0_i32_86 = arith.constant 0 : i32
      %125 = tpu.memref_slice %arg2[%arg0, %c0_i32_85, %c0_i32_86] : memref<2x504x128xbf16, #tpu.memory_space<any>> -> memref<1x504x128xbf16, #tpu.memory_space<any>>
      %126 = tpu.memref_squeeze %125 : memref<1x504x128xbf16, #tpu.memory_space<any>> -> memref<504x128xbf16, #tpu.memory_space<any>>
      %c0_i32_87 = arith.constant 0 : i32
      %c0_i32_88 = arith.constant 0 : i32
      %127 = tpu.memref_slice %arg11[%c0_i32_83, %c0_i32_87, %c0_i32_88] : memref<2x504x128xbf16, #tpu.memory_space<vmem>> -> memref<1x504x128xbf16, #tpu.memory_space<vmem>>
      %128 = tpu.memref_squeeze %127 : memref<1x504x128xbf16, #tpu.memory_space<vmem>> -> memref<504x128xbf16, #tpu.memory_space<vmem>>
      %129 = tpu.memref_slice %arg13[%c0_i32_84] : memref<2x!tpu.dma_semaphore, #tpu.memory_space<semaphore_mem>> -> memref<1x!tpu.dma_semaphore, #tpu.memory_space<semaphore_mem>>
      %130 = tpu.memref_squeeze %129 : memref<1x!tpu.dma_semaphore, #tpu.memory_space<semaphore_mem>> -> memref<!tpu.dma_semaphore, #tpu.memory_space<semaphore_mem>>
      tpu.enqueue_dma source(%126 : memref<504x128xbf16, #tpu.memory_space<any>>) target(%128 : memref<504x128xbf16, #tpu.memory_space<vmem>>) target_semaphore(%130 : memref<!tpu.dma_semaphore, #tpu.memory_space<semaphore_mem>>)
    } else {
    }
    %c2_i32 = arith.constant 2 : i32
    %c0_i32_1 = arith.constant 0 : i32
    %3 = arith.cmpi eq, %c2_i32, %c0_i32_1 : i32
    %c1_i32 = arith.constant 1 : i32
    %4 = arith.select %3, %c1_i32, %c2_i32 : i32
    %5 = arith.remsi %arg1, %4 : i32
    %c0_i32_2 = arith.constant 0 : i32
    %6 = arith.cmpi ne, %5, %c0_i32_2 : i32
    %c0_i32_3 = arith.constant 0 : i32
    %7 = arith.cmpi slt, %5, %c0_i32_3 : i32
    %c0_i32_4 = arith.constant 0 : i32
    %8 = arith.cmpi slt, %4, %c0_i32_4 : i32
    %9 = arith.xori %7, %8 : i1
    %10 = arith.andi %9, %6 : i1
    %11 = arith.addi %5, %4 : i32
    %12 = arith.select %10, %11, %5 : i32
    %c0_i32_5 = arith.constant 0 : i32
    %c0_i32_6 = arith.constant 0 : i32
    %13 = tpu.memref_slice %arg2[%arg0, %c0_i32_5, %c0_i32_6] : memref<2x504x128xbf16, #tpu.memory_space<any>> -> memref<1x504x128xbf16, #tpu.memory_space<any>>
    %14 = tpu.memref_squeeze %13 : memref<1x504x128xbf16, #tpu.memory_space<any>> -> memref<504x128xbf16, #tpu.memory_space<any>>
    %c0_i32_7 = arith.constant 0 : i32
    %c0_i32_8 = arith.constant 0 : i32
    %15 = tpu.memref_slice %arg11[%12, %c0_i32_7, %c0_i32_8] : memref<2x504x128xbf16, #tpu.memory_space<vmem>> -> memref<1x504x128xbf16, #tpu.memory_space<vmem>>
    %16 = tpu.memref_squeeze %15 : memref<1x504x128xbf16, #tpu.memory_space<vmem>> -> memref<504x128xbf16, #tpu.memory_space<vmem>>
    %17 = tpu.memref_slice %arg13[%12] : memref<2x!tpu.dma_semaphore, #tpu.memory_space<semaphore_mem>> -> memref<1x!tpu.dma_semaphore, #tpu.memory_space<semaphore_mem>>
    %18 = tpu.memref_squeeze %17 : memref<1x!tpu.dma_semaphore, #tpu.memory_space<semaphore_mem>> -> memref<!tpu.dma_semaphore, #tpu.memory_space<semaphore_mem>>
    tpu.wait_dma2 semaphore(%18 : memref<!tpu.dma_semaphore, #tpu.memory_space<semaphore_mem>>) src(%14 : memref<504x128xbf16, #tpu.memory_space<any>>) dst(%16 : memref<504x128xbf16, #tpu.memory_space<vmem>>)
    %c1_i32_9 = arith.constant 1 : i32
    %19 = arith.addi %arg1, %c1_i32_9 : i32
    %c1_i32_10 = arith.constant 1 : i32
    %20 = arith.cmpi slt, %19, %c1_i32_10 : i32
    %21 = arith.extui %20 : i1 to i32
    %c0_i32_11 = arith.constant 0 : i32
    %22 = arith.cmpi ne, %21, %c0_i32_11 : i32
    scf.if %22 {
      %c1_i32_83 = arith.constant 1 : i32
      %125 = arith.addi %arg1, %c1_i32_83 : i32
      %c1_i32_84 = arith.constant 1 : i32
      %126 = arith.subi %c1_i32_84, %12 : i32
      %c16_i32 = arith.constant 16 : i32
      %127 = arith.muli %125, %c16_i32 : i32
      %c24_i32 = arith.constant 24 : i32
      %128 = arith.muli %127, %c24_i32 : i32
      %c0_i32_85 = arith.constant 0 : i32
      %129 = tpu.memref_slice %arg2[%arg0, %128, %c0_i32_85] : memref<2x504x128xbf16, #tpu.memory_space<any>> -> memref<1x504x128xbf16, #tpu.memory_space<any>>
      %130 = tpu.memref_squeeze %129 : memref<1x504x128xbf16, #tpu.memory_space<any>> -> memref<504x128xbf16, #tpu.memory_space<any>>
      %c0_i32_86 = arith.constant 0 : i32
      %c0_i32_87 = arith.constant 0 : i32
      %131 = tpu.memref_slice %arg11[%126, %c0_i32_86, %c0_i32_87] : memref<2x504x128xbf16, #tpu.memory_space<vmem>> -> memref<1x504x128xbf16, #tpu.memory_space<vmem>>
      %132 = tpu.memref_squeeze %131 : memref<1x504x128xbf16, #tpu.memory_space<vmem>> -> memref<504x128xbf16, #tpu.memory_space<vmem>>
      %133 = tpu.memref_slice %arg13[%126] : memref<2x!tpu.dma_semaphore, #tpu.memory_space<semaphore_mem>> -> memref<1x!tpu.dma_semaphore, #tpu.memory_space<semaphore_mem>>
      %134 = tpu.memref_squeeze %133 : memref<1x!tpu.dma_semaphore, #tpu.memory_space<semaphore_mem>> -> memref<!tpu.dma_semaphore, #tpu.memory_space<semaphore_mem>>
      tpu.enqueue_dma source(%130 : memref<504x128xbf16, #tpu.memory_space<any>>) target(%132 : memref<504x128xbf16, #tpu.memory_space<vmem>>) target_semaphore(%134 : memref<!tpu.dma_semaphore, #tpu.memory_space<semaphore_mem>>)
    } else {
    }
    %23 = arith.index_cast %12 : i32 to index
    %c0 = arith.constant 0 : index
    %c0_12 = arith.constant 0 : index
    %24 = vector.load %arg11[%23, %c0, %c0_12] : memref<2x504x128xbf16, #tpu.memory_space<vmem>>, vector<1x432x128xbf16>
    %25 = vector.shape_cast %24 : vector<1x432x128xbf16> to vector<432x128xbf16>
    %26 = arith.index_cast %12 : i32 to index
    %c1 = arith.constant 1 : index
    %c0_13 = arith.constant 0 : index
    %27 = vector.load %arg11[%26, %c1, %c0_13] : memref<2x504x128xbf16, #tpu.memory_space<vmem>>, vector<1x432x128xbf16>
    %28 = vector.shape_cast %27 : vector<1x432x128xbf16> to vector<432x128xbf16>
    %29 = arith.index_cast %12 : i32 to index
    %c2 = arith.constant 2 : index
    %c0_14 = arith.constant 0 : index
    %30 = vector.load %arg11[%29, %c2, %c0_14] : memref<2x504x128xbf16, #tpu.memory_space<vmem>>, vector<1x432x128xbf16>
    %31 = vector.shape_cast %30 : vector<1x432x128xbf16> to vector<432x128xbf16>
    %32 = tpu.concatenate %25, %28, %31 in 1 : vector<432x128xbf16>, vector<432x128xbf16>, vector<432x128xbf16> -> vector<432x384xbf16>
    %c0_15 = arith.constant 0 : index
    %c0_16 = arith.constant 0 : index
    %c0_17 = arith.constant 0 : index
    %33 = vector.load %arg3[%c0_15, %c0_16, %c0_17] : memref<3x384x128xbf16, #tpu.memory_space<vmem>>, vector<1x384x128xbf16>
    %34 = vector.shape_cast %33 : vector<1x384x128xbf16> to vector<384x128xbf16>
    %cst = arith.constant dense<0.000000e+00> : vector<432x128xf32>
    %35 = tpu.matmul %32, %34, %cst {dimension_numbers = #tpu.dot_dimension_numbers<[1], [0], [0], [1], [0, 0, 1, 1], [], []>} : vector<432x384xbf16>, vector<384x128xbf16>, vector<432x128xf32> -> vector<432x128xf32>
    %36 = arith.index_cast %12 : i32 to index
    %c24 = arith.constant 24 : index
    %c0_18 = arith.constant 0 : index
    %37 = vector.load %arg11[%36, %c24, %c0_18] : memref<2x504x128xbf16, #tpu.memory_space<vmem>>, vector<1x432x128xbf16>
    %38 = vector.shape_cast %37 : vector<1x432x128xbf16> to vector<432x128xbf16>
    %39 = arith.index_cast %12 : i32 to index
    %c25 = arith.constant 25 : index
    %c0_19 = arith.constant 0 : index
    %40 = vector.load %arg11[%39, %c25, %c0_19] : memref<2x504x128xbf16, #tpu.memory_space<vmem>>, vector<1x432x128xbf16>
    %41 = vector.shape_cast %40 : vector<1x432x128xbf16> to vector<432x128xbf16>
    %42 = arith.index_cast %12 : i32 to index
    %c26 = arith.constant 26 : index
    %c0_20 = arith.constant 0 : index
    %43 = vector.load %arg11[%42, %c26, %c0_20] : memref<2x504x128xbf16, #tpu.memory_space<vmem>>, vector<1x432x128xbf16>
    %44 = vector.shape_cast %43 : vector<1x432x128xbf16> to vector<432x128xbf16>
    %45 = tpu.concatenate %38, %41, %44 in 1 : vector<432x128xbf16>, vector<432x128xbf16>, vector<432x128xbf16> -> vector<432x384xbf16>
    %c1_21 = arith.constant 1 : index
    %c0_22 = arith.constant 0 : index
    %c0_23 = arith.constant 0 : index
    %46 = vector.load %arg3[%c1_21, %c0_22, %c0_23] : memref<3x384x128xbf16, #tpu.memory_space<vmem>>, vector<1x384x128xbf16>
    %47 = vector.shape_cast %46 : vector<1x384x128xbf16> to vector<384x128xbf16>
    %cst_24 = arith.constant dense<0.000000e+00> : vector<432x128xf32>
    %48 = tpu.matmul %45, %47, %cst_24 {dimension_numbers = #tpu.dot_dimension_numbers<[1], [0], [0], [1], [0, 0, 1, 1], [], []>} : vector<432x384xbf16>, vector<384x128xbf16>, vector<432x128xf32> -> vector<432x128xf32>
    %49 = arith.addf %35, %48 : vector<432x128xf32>
    %50 = arith.index_cast %12 : i32 to index
    %c48 = arith.constant 48 : index
    %c0_25 = arith.constant 0 : index
    %51 = vector.load %arg11[%50, %c48, %c0_25] : memref<2x504x128xbf16, #tpu.memory_space<vmem>>, vector<1x432x128xbf16>
    %52 = vector.shape_cast %51 : vector<1x432x128xbf16> to vector<432x128xbf16>
    %53 = arith.index_cast %12 : i32 to index
    %c49 = arith.constant 49 : index
    %c0_26 = arith.constant 0 : index
    %54 = vector.load %arg11[%53, %c49, %c0_26] : memref<2x504x128xbf16, #tpu.memory_space<vmem>>, vector<1x432x128xbf16>
    %55 = vector.shape_cast %54 : vector<1x432x128xbf16> to vector<432x128xbf16>
    %56 = arith.index_cast %12 : i32 to index
    %c50 = arith.constant 50 : index
    %c0_27 = arith.constant 0 : index
    %57 = vector.load %arg11[%56, %c50, %c0_27] : memref<2x504x128xbf16, #tpu.memory_space<vmem>>, vector<1x432x128xbf16>
    %58 = vector.shape_cast %57 : vector<1x432x128xbf16> to vector<432x128xbf16>
    %59 = tpu.concatenate %52, %55, %58 in 1 : vector<432x128xbf16>, vector<432x128xbf16>, vector<432x128xbf16> -> vector<432x384xbf16>
    %c2_28 = arith.constant 2 : index
    %c0_29 = arith.constant 0 : index
    %c0_30 = arith.constant 0 : index
    %60 = vector.load %arg3[%c2_28, %c0_29, %c0_30] : memref<3x384x128xbf16, #tpu.memory_space<vmem>>, vector<1x384x128xbf16>
    %61 = vector.shape_cast %60 : vector<1x384x128xbf16> to vector<384x128xbf16>
    %cst_31 = arith.constant dense<0.000000e+00> : vector<432x128xf32>
    %62 = tpu.matmul %59, %61, %cst_31 {dimension_numbers = #tpu.dot_dimension_numbers<[1], [0], [0], [1], [0, 0, 1, 1], [], []>} : vector<432x384xbf16>, vector<384x128xbf16>, vector<432x128xf32> -> vector<432x128xf32>
    %63 = arith.addf %49, %62 : vector<432x128xf32>
    %c0_32 = arith.constant 0 : index
    %c0_33 = arith.constant 0 : index
    %64 = vector.load %arg4[%c0_32, %c0_33] : memref<1x128xf32, #tpu.memory_space<vmem>>, vector<1x128xf32>
    %65 = vector.shape_cast %64 : vector<1x128xf32> to vector<128xf32>
    %66 = vector.shape_cast %65 : vector<128xf32> to vector<1x128xf32>
    %67 = vector.broadcast %66 : vector<1x128xf32> to vector<432x128xf32>
    %68 = arith.mulf %63, %67 : vector<432x128xf32>
    %c0_34 = arith.constant 0 : index
    %c0_35 = arith.constant 0 : index
    %69 = vector.load %arg5[%c0_34, %c0_35] : memref<1x128xf32, #tpu.memory_space<vmem>>, vector<1x128xf32>
    %70 = vector.shape_cast %69 : vector<1x128xf32> to vector<128xf32>
    %71 = vector.shape_cast %70 : vector<128xf32> to vector<1x128xf32>
    %72 = vector.broadcast %71 : vector<1x128xf32> to vector<432x128xf32>
    %73 = arith.addf %68, %72 : vector<432x128xf32>
    %cst_36 = arith.constant 0.000000e+00 : f32
    %74 = vector.broadcast %cst_36 : f32 to vector<432x128xf32>
    %75 = arith.maximumf %73, %74 : vector<432x128xf32>
    %c0_37 = arith.constant 0 : index
    %c0_38 = arith.constant 0 : index
    %c0_39 = arith.constant 0 : index
    %76 = vector.load %arg9[%c0_37, %c0_38, %c0_39] : memref<1x432x1xf32, #tpu.memory_space<vmem>>, vector<1x432x1xf32>
    %77 = vector.shape_cast %76 : vector<1x432x1xf32> to vector<432x1xf32>
    %78 = vector.broadcast %77 : vector<432x1xf32> to vector<432x128xf32>
    %79 = arith.mulf %75, %78 : vector<432x128xf32>
    %80 = arith.truncf %79 : vector<432x128xf32> to vector<432x128xbf16>
    %c0_40 = arith.constant 0 : index
    %c0_41 = arith.constant 0 : index
    %81 = vector.load %arg12[%c0_40, %c0_41] : memref<440x128xbf16, #tpu.memory_space<vmem>>, vector<432x128xbf16>
    tpu.vector_store %arg12[%c0_40, %c0_41], %80 {strides = array<i32>} : memref<440x128xbf16, #tpu.memory_space<vmem>>, vector<432x128xbf16>,
    %cst_42 = arith.constant 0.000000e+00 : bf16
    %82 = vector.broadcast %cst_42 : bf16 to vector<8x128xbf16>
    %c432 = arith.constant 432 : index
    %c0_43 = arith.constant 0 : index
    %83 = vector.load %arg12[%c432, %c0_43] : memref<440x128xbf16, #tpu.memory_space<vmem>>, vector<8x128xbf16>
    tpu.vector_store %arg12[%c432, %c0_43], %82 {strides = array<i32>} : memref<440x128xbf16, #tpu.memory_space<vmem>>, vector<8x128xbf16>,
    %c0_44 = arith.constant 0 : index
    %c0_45 = arith.constant 0 : index
    %84 = vector.load %arg12[%c0_44, %c0_45] : memref<440x128xbf16, #tpu.memory_space<vmem>>, vector<384x128xbf16>
    %c1_46 = arith.constant 1 : index
    %c0_47 = arith.constant 0 : index
    %85 = vector.load %arg12[%c1_46, %c0_47] : memref<440x128xbf16, #tpu.memory_space<vmem>>, vector<384x128xbf16>
    %c2_48 = arith.constant 2 : index
    %c0_49 = arith.constant 0 : index
    %86 = vector.load %arg12[%c2_48, %c0_49] : memref<440x128xbf16, #tpu.memory_space<vmem>>, vector<384x128xbf16>
    %87 = tpu.concatenate %84, %85, %86 in 1 : vector<384x128xbf16>, vector<384x128xbf16>, vector<384x128xbf16> -> vector<384x384xbf16>
    %c0_50 = arith.constant 0 : index
    %c0_51 = arith.constant 0 : index
    %c0_52 = arith.constant 0 : index
    %88 = vector.load %arg6[%c0_50, %c0_51, %c0_52] : memref<3x384x128xbf16, #tpu.memory_space<vmem>>, vector<1x384x128xbf16>
    %89 = vector.shape_cast %88 : vector<1x384x128xbf16> to vector<384x128xbf16>
    %cst_53 = arith.constant dense<0.000000e+00> : vector<384x128xf32>
    %90 = tpu.matmul %87, %89, %cst_53 {dimension_numbers = #tpu.dot_dimension_numbers<[1], [0], [0], [1], [0, 0, 1, 1], [], []>} : vector<384x384xbf16>, vector<384x128xbf16>, vector<384x128xf32> -> vector<384x128xf32>
    %c24_54 = arith.constant 24 : index
    %c0_55 = arith.constant 0 : index
    %91 = vector.load %arg12[%c24_54, %c0_55] : memref<440x128xbf16, #tpu.memory_space<vmem>>, vector<384x128xbf16>
    %c25_56 = arith.constant 25 : index
    %c0_57 = arith.constant 0 : index
    %92 = vector.load %arg12[%c25_56, %c0_57] : memref<440x128xbf16, #tpu.memory_space<vmem>>, vector<384x128xbf16>
    %c26_58 = arith.constant 26 : index
    %c0_59 = arith.constant 0 : index
    %93 = vector.load %arg12[%c26_58, %c0_59] : memref<440x128xbf16, #tpu.memory_space<vmem>>, vector<384x128xbf16>
    %94 = tpu.concatenate %91, %92, %93 in 1 : vector<384x128xbf16>, vector<384x128xbf16>, vector<384x128xbf16> -> vector<384x384xbf16>
    %c1_60 = arith.constant 1 : index
    %c0_61 = arith.constant 0 : index
    %c0_62 = arith.constant 0 : index
    %95 = vector.load %arg6[%c1_60, %c0_61, %c0_62] : memref<3x384x128xbf16, #tpu.memory_space<vmem>>, vector<1x384x128xbf16>
    %96 = vector.shape_cast %95 : vector<1x384x128xbf16> to vector<384x128xbf16>
    %cst_63 = arith.constant dense<0.000000e+00> : vector<384x128xf32>
    %97 = tpu.matmul %94, %96, %cst_63 {dimension_numbers = #tpu.dot_dimension_numbers<[1], [0], [0], [1], [0, 0, 1, 1], [], []>} : vector<384x384xbf16>, vector<384x128xbf16>, vector<384x128xf32> -> vector<384x128xf32>
    %98 = arith.addf %90, %97 : vector<384x128xf32>
    %c48_64 = arith.constant 48 : index
    %c0_65 = arith.constant 0 : index
    %99 = vector.load %arg12[%c48_64, %c0_65] : memref<440x128xbf16, #tpu.memory_space<vmem>>, vector<384x128xbf16>
    %c49_66 = arith.constant 49 : index
    %c0_67 = arith.constant 0 : index
    %100 = vector.load %arg12[%c49_66, %c0_67] : memref<440x128xbf16, #tpu.memory_space<vmem>>, vector<384x128xbf16>
    %c50_68 = arith.constant 50 : index
    %c0_69 = arith.constant 0 : index
    %101 = vector.load %arg12[%c50_68, %c0_69] : memref<440x128xbf16, #tpu.memory_space<vmem>>, vector<384x128xbf16>
    %102 = tpu.concatenate %99, %100, %101 in 1 : vector<384x128xbf16>, vector<384x128xbf16>, vector<384x128xbf16> -> vector<384x384xbf16>
    %c2_70 = arith.constant 2 : index
    %c0_71 = arith.constant 0 : index
    %c0_72 = arith.constant 0 : index
    %103 = vector.load %arg6[%c2_70, %c0_71, %c0_72] : memref<3x384x128xbf16, #tpu.memory_space<vmem>>, vector<1x384x128xbf16>
    %104 = vector.shape_cast %103 : vector<1x384x128xbf16> to vector<384x128xbf16>
    %cst_73 = arith.constant dense<0.000000e+00> : vector<384x128xf32>
    %105 = tpu.matmul %102, %104, %cst_73 {dimension_numbers = #tpu.dot_dimension_numbers<[1], [0], [0], [1], [0, 0, 1, 1], [], []>} : vector<384x384xbf16>, vector<384x128xbf16>, vector<384x128xf32> -> vector<384x128xf32>
    %106 = arith.addf %98, %105 : vector<384x128xf32>
    %c0_74 = arith.constant 0 : index
    %c0_75 = arith.constant 0 : index
    %107 = vector.load %arg7[%c0_74, %c0_75] : memref<1x128xf32, #tpu.memory_space<vmem>>, vector<1x128xf32>
    %108 = vector.shape_cast %107 : vector<1x128xf32> to vector<128xf32>
    %109 = vector.shape_cast %108 : vector<128xf32> to vector<1x128xf32>
    %110 = vector.broadcast %109 : vector<1x128xf32> to vector<384x128xf32>
    %111 = arith.mulf %106, %110 : vector<384x128xf32>
    %c0_76 = arith.constant 0 : index
    %c0_77 = arith.constant 0 : index
    %112 = vector.load %arg8[%c0_76, %c0_77] : memref<1x128xf32, #tpu.memory_space<vmem>>, vector<1x128xf32>
    %113 = vector.shape_cast %112 : vector<1x128xf32> to vector<128xf32>
    %114 = vector.shape_cast %113 : vector<128xf32> to vector<1x128xf32>
    %115 = vector.broadcast %114 : vector<1x128xf32> to vector<384x128xf32>
    %116 = arith.addf %111, %115 : vector<384x128xf32>
    %cst_78 = arith.constant 0.000000e+00 : f32
    %117 = vector.broadcast %cst_78 : f32 to vector<384x128xf32>
    %118 = arith.maximumf %116, %117 : vector<384x128xf32>
    %119 = arith.truncf %118 : vector<384x128xf32> to vector<384x128xbf16>
    %120 = vector.shape_cast %119 : vector<384x128xbf16> to vector<16x24x128xbf16>
    %121 = vector.extract_strided_slice %120 {offsets = [0, 0, 0], sizes = [16, 16, 128], strides = [1, 1, 1]} : vector<16x24x128xbf16> to vector<16x16x128xbf16>
    %c0_79 = arith.constant 0 : index
    %c0_80 = arith.constant 0 : index
    %c0_81 = arith.constant 0 : index
    %c0_82 = arith.constant 0 : index
    %122 = vector.load %arg10[%c0_79, %c0_80, %c0_81, %c0_82] : memref<1x16x16x128xbf16, #tpu.memory_space<vmem>>, vector<1x16x16x128xbf16>
    %123 = vector.shape_cast %122 : vector<1x16x16x128xbf16> to vector<16x16x128xbf16>
    %124 = vector.shape_cast %121 : vector<16x16x128xbf16> to vector<1x16x16x128xbf16>
    tpu.vector_store %arg10[%c0_79, %c0_80, %c0_81, %c0_82], %124 {strides = array<i32>} : memref<1x16x16x128xbf16, #tpu.memory_space<vmem>>, vector<1x16x16x128xbf16>,
    return
  }
  func.func @transform_1(%arg0: i32, %arg1: i32) -> (i32, i32, i32) {
    %c0_i32 = arith.constant 0 : i32
    %c0_i32_0 = arith.constant 0 : i32
    %c0_i32_1 = arith.constant 0 : i32
    %c0_i32_2 = arith.constant 0 : i32
    return %c0_i32, %c0_i32_0, %c0_i32_1 : i32, i32, i32
  }
  func.func @transform_2(%arg0: i32, %arg1: i32) -> (i32, i32) {
    %c0_i32 = arith.constant 0 : i32
    %c0_i32_0 = arith.constant 0 : i32
    %c0_i32_1 = arith.constant 0 : i32
    return %c0_i32, %c0_i32_0 : i32, i32
  }
  func.func @transform_3(%arg0: i32, %arg1: i32) -> (i32, i32) {
    %c0_i32 = arith.constant 0 : i32
    %c0_i32_0 = arith.constant 0 : i32
    %c0_i32_1 = arith.constant 0 : i32
    return %c0_i32, %c0_i32_0 : i32, i32
  }
  func.func @transform_4(%arg0: i32, %arg1: i32) -> (i32, i32, i32) {
    %c0_i32 = arith.constant 0 : i32
    %c0_i32_0 = arith.constant 0 : i32
    %c0_i32_1 = arith.constant 0 : i32
    %c0_i32_2 = arith.constant 0 : i32
    return %c0_i32, %c0_i32_0, %c0_i32_1 : i32, i32, i32
  }
  func.func @transform_5(%arg0: i32, %arg1: i32) -> (i32, i32) {
    %c0_i32 = arith.constant 0 : i32
    %c0_i32_0 = arith.constant 0 : i32
    %c0_i32_1 = arith.constant 0 : i32
    return %c0_i32, %c0_i32_0 : i32, i32
  }
  func.func @transform_6(%arg0: i32, %arg1: i32) -> (i32, i32) {
    %c0_i32 = arith.constant 0 : i32
    %c0_i32_0 = arith.constant 0 : i32
    %c0_i32_1 = arith.constant 0 : i32
    return %c0_i32, %c0_i32_0 : i32, i32
  }
  func.func @transform_7(%arg0: i32, %arg1: i32) -> (i32, i32, i32) {
    %c0_i32 = arith.constant 0 : i32
    %c0_i32_0 = arith.constant 0 : i32
    %c0_i32_1 = arith.constant 0 : i32
    return %arg1, %c0_i32, %c0_i32_0 : i32, i32, i32
  }
  func.func @transform_8(%arg0: i32, %arg1: i32) -> (i32, i32, i32, i32) {
    %c0_i32 = arith.constant 0 : i32
    %c0_i32_0 = arith.constant 0 : i32
    %c0_i32_1 = arith.constant 0 : i32
    return %arg0, %arg1, %c0_i32, %c0_i32_0 : i32, i32, i32, i32
  }
}

</mosaic_0001>

<bundles_post_ra>
// kernel: _forward_impl.1
= control target key start
LH: loop header
LB: loop body
LE: loop exit
PB: predicated region body
PF: predicated region fallthrough
CT: control target
= control target key end

     0   :  { %s14738_s0 = inlined_call_operand.hbm [shape: bf16[2,504,128], index: 0, kind: input, shape index: {}]   ;;  %s14739_s1 = inlined_call_operand.hbm [shape: bf16[3,384,128], index: 1, kind: input, shape index: {}]   ;;  %s14740_s2 = inlined_call_operand.hbm [shape: f32[1,128], index: 2, kind: input, shape index: {}]   ;;  %s14741_s3 = inlined_call_operand.hbm [shape: f32[1,128], index: 3, kind: input, shape index: {}]   ;;  %s14742_s4 = inlined_call_operand.hbm [shape: bf16[3,384,128], index: 4, kind: input, shape index: {}]   ;;  %s14743_s5 = inlined_call_operand.hbm [shape: f32[1,128], index: 5, kind: input, shape index: {}]   ;;  %s14744_s6 = inlined_call_operand.hbm [shape: f32[1,128], index: 6, kind: input, shape index: {}]   ;;  %s14745_s7 = inlined_call_operand.hbm [shape: f32[1,432,1], index: 7, kind: input, shape index: {}]   ;;  %s14746_s8 = inlined_call_operand.hbm [shape: bf16[2,16,16,128], index: 8, kind: output, shape index: {}]  }
   0x1   :  { %14824 = sst [smem:[#allocation80_spill]] %s14740_s2 }
   0x2   :  { %13 = vsyncpa [#allocation6], 0 }
   0x3   :  { %14 = vsyncpa [#allocation9], 0 }
   0x4   :  { %15 = vsyncpa [#allocation12], 0 }
   0x5   :  { %16 = vsyncpa [#allocation15], 0 }
   0x6   :  { %17 = vsyncpa [#allocation7], 0 }
   0x7   :  { %19 = vsyncpa [#allocation7 + $0x1], 0  ;;  %s11874_s27 = smov 0   ;;  %s11876_s28 = smov 0  }
   0x8   :  { %s11878_s29 = smov 0   ;;  %s11880_s30 = smov 0  }
   0x9   :  { %s11882_s9 = smov 0   ;;  %s11884_s10 = smov 0  }
   0xa LB: > { %14825 = sst [smem:[#allocation30_spill]] %s11797_s29  ;;  %s8897_s11 = sadd.s32 4294967295, %s11809_s10   ;;  %s11809_s10 = sphi %s11884_s10, %s25_s10   ;;  %s11805_s9 = sphi %s11882_s9, %s15058_s9   ;;  %s11801_s30 = sphi %s11880_s30, %s15057_s30   ;;  %s11797_s29 = sphi %s11878_s29, %s15056_s29   ;;  %s11793_s28 = sphi %s11876_s28, %s15060_s28   ;;  %s11789_s27 = sphi %s11874_s27, %s15059_s27  }
   0xb   : > { %14826 = sst [smem:[#allocation31_spill]] %s11805_s9  ;;  %s8898_s12 = sadd.s32 4294967294, %s11809_s10  }
   0xc   : > { %s37_s13 = sadd.s32 1, %s11805_s9  ;;  %s198_s14 = sadd.s32 1, %s11797_s29 }
   0xd   : > { %p39_p0 = scmp.ge.s32.totalorder %s37_s13, 2  ;;  %p208_p1 = scmp.ne.s32.totalorder %s11797_s29, %s11793_s28 }
   0xe   : > { %p209_p2 = scmp.eq.s32.totalorder %s8897_s11, 1  ;;  %p214_p3 = scmp.ne.s32.totalorder %s11793_s28, %s11789_s27 }
   0xf   : > { %s15062_s13 = smov (%p39_p0, %s37_s13), 0  ;;  %p215_p5 = scmp.eq.s32.totalorder %s8898_s12, 1 }
  0x10   : > { %14827 = sst [smem:[#allocation32_spill]] %s15062_s13  ;;  %p11914_p4 = por %p209_p2, %p208_p1 }
  0x11   : > { %s193_s16 = ssub.s32 %s11805_s9, %s15062_s13  ;;  %p8899_p6 = scmp.ge.s32.totalorder %s11809_s10, 1 }
  0x12   : > { %s14828_s15 = scalar_select %p11914_p4, 1, 0 }
  0x13   : > { %p196_p7 = scmp.eq.s32.totalorder %s193_s16, 0  ;;  %p11921_p8 = por %p215_p5, %p214_p3 }
  0x14   : > { %p222_p9 = scmp.lt.s32.totalorder %s11809_s10, 3  ;;  %p11933_p11 = scmp.eq.s32.totalorder %s8897_s11, 0 }
  0x15   : > { %s14829_s17 = scalar_select %p11921_p8, 1, 0 }
  0x16   : > { %s11927_s18 = scalar_select %p196_p7, %s11797_s29, %s198_s14  }
  0x17   : > { %14830 = sst [smem:[#allocation33_spill]] %s14829_s17  ;;  %p11929_p10 = pnand %p8899_p6, %p222_p9 }
  0x18   : > { %14831 = sst [smem:[#allocation34_spill]] %s11927_s18  ;;  %s11811_s21 = smov [#allocation8]  }
  0x19   : > { %s14832_s19 = scalar_select %p11929_p10, 1, 0 }
  0x1a   : > { %s14833_s20 = scalar_select %p11933_p11, 1, 0 }
  0x1b   : > { %p11007_p12 = pneg %p11929_p10  ;;  %s248_s22 = sshll.u32 %s11811_s21, 4  ;;  %s249_s22 = int_to_ptr.vmem [resolvable:$true] %s248_s22 }
  0x1c   : > { %s11812_s24 = smov [#allocation11]   ;;  %s14835_s2 = sld [smem:[#allocation80_spill]] }
  0x1d   : > { %p11941_p13 = pnand %p11933_p11, %p11007_p12  ;;  %s269_s25 = sshll.u32 %s11812_s24, 4  ;;  %s11945_s25 = int_to_ptr.vmem [resolvable:$true] %s269_s25 }
  0x1f   : > { %p11955_p1 = pneg %p11941_p13 }
  0x22   : > { %s11493_s12 = scalar_lea.hbm %s14835_s2, 16 }
  0x23   : > { %p11494_p0 = scmp.ne.s32.totalorder %s14835_s2, %s11493_s12  ;;  %p11500_p5 = scmp.lt.u32.totalorder %s11493_s12, %s14835_s2 }
  0x25   : > { %p11496_p2 = pnand %p11955_p1, %p11494_p0 }
  0x27   : > { %p11497_p3 = pneg %p11496_p2 }
  0x29   : > { %p11502_p6 = pnand %p11500_p5, %p11497_p3 }
  0x2b   : > { %11505 = shalt.err (!%p11502_p6)
}
  0x2c   : > { %s11506_s26 = scalar_lea.vmem %s249_s22, 16  ;;  %s11513_s11 = scalar_lea.vmem %s249_s22, 32 }
  0x2d   : > { %p11507_p7 = scmp.ne.s32.totalorder %s249_s22, %s11506_s26  ;;  %p11514_p8 = scmp.lt.s32.totalorder %s249_s22, %s249_s22 }
  0x2e   : > { %p11515_p4 = scmp.lt.s32.totalorder %s11513_s11, %s11506_s26 }
  0x2f   : > { %p11509_p9 = pnand %p11507_p7, %p11955_p1 }
  0x30   : > { %p11516_p11 = por %p11515_p4, %p11514_p8 }
  0x31   : > { %p11510_p12 = pneg %p11509_p9 }
  0x33   : > { %p11517_p10 = pnand %p11516_p11, %p11510_p12 }
  0x35   : > { %11520 = shalt.err (!%p11517_p10)
}
  0x36   : > { %11013 = dma.hbm_to_vmem [thread:$0]  (!%p11941_p13), %s14835_s2, 16, %s249_s22, [#allocation9]  }
  0x37   : > { %s11521_s24 = scalar_lea.hbm %s14742_s4, 9216 }
  0x38   : > { %p11522_p0 = scmp.ne.s32.totalorder %s14742_s4, %s11521_s24  ;;  %p11528_p8 = scmp.lt.u32.totalorder %s11521_s24, %s14742_s4 }
  0x3a   : > { %p11524_p2 = pnand %p11522_p0, %p11955_p1 }
  0x3c   : > { %p11525_p4 = pneg %p11524_p2 }
  0x3e   : > { %p11530_p10 = pnand %p11528_p8, %p11525_p4 }
  0x40   : > { %11533 = shalt.err (!%p11530_p10)
}
  0x41   : > { %s11534_s22 = scalar_lea.vmem %s11945_s25, 9216  ;;  %p11542_p6 = scmp.lt.s32.totalorder %s11945_s25, %s11945_s25 }
  0x42   : > { %p11535_p11 = scmp.ne.s32.totalorder %s11945_s25, %s11534_s22  ;;  %p11543_p7 = scmp.lt.s32.totalorder %s11534_s22, %s11534_s22 }
  0x44   : > { %p11537_p3 = pnand %p11535_p11, %p11955_p1  ;;  %p11544_p9 = por %p11543_p7, %p11542_p6 }
  0x46   : > { %p11538_p5 = pneg %p11537_p3 }
  0x48   : > { %p11545_p12 = pnand %p11544_p9, %p11538_p5 }
  0x4a   : > { %11548 = shalt.err (!%p11545_p12)
}
  0x4b   : > { %s11813_s9 = smov 64   ;;  %s11814_s18 = smov 4  }
  0x4c   : > { %11019 = dma.hbm_to_vmem [thread:$0]  (!%p11941_p13), %s14742_s4, 9216, %s11945_s25, [#allocation12], %s11813_s9, %s11813_s9, %s11814_s18  }
  0x4d   : > { %s11815_s13 = smov [#allocation14]   ;;  %s11549_s11 = scalar_lea.hbm %s14744_s6, 16 }
  0x4e   : > { %s294_s12 = sshll.u32 %s11815_s13, 4  ;;  %p11550_p0 = scmp.ne.s32.totalorder %s14744_s6, %s11549_s11  ;;  %s295_s12 = int_to_ptr.vmem [resolvable:$true] %s294_s12 }
  0x4f   : > { %p11556_p8 = scmp.lt.u32.totalorder %s11549_s11, %s14744_s6 }
  0x50   : > { %p11552_p2 = pnand %p11550_p0, %p11955_p1 }
  0x52   : > { %p11553_p4 = pneg %p11552_p2 }
  0x54   : > { %p11558_p10 = pnand %p11556_p8, %p11553_p4 }
  0x56   : > { %11561 = shalt.err (!%p11558_p10)
}
  0x57   : > { %s11562_s25 = scalar_lea.vmem %s295_s12, 16  ;;  %s11569_s14 = scalar_lea.vmem %s295_s12, 32 }
  0x58   : > { %p11563_p11 = scmp.ne.s32.totalorder %s295_s12, %s11562_s25  ;;  %p11570_p6 = scmp.lt.s32.totalorder %s295_s12, %s295_s12 }
  0x59   : > { %p11571_p7 = scmp.lt.s32.totalorder %s11569_s14, %s11562_s25 }
  0x5a   : > { %p11565_p3 = pnand %p11563_p11, %p11955_p1 }
  0x5b   : > { %p11572_p9 = por %p11571_p7, %p11570_p6 }
  0x5c   : > { %p11566_p5 = pneg %p11565_p3 }
  0x5e   : > { %p11573_p12 = pnand %p11572_p9, %p11566_p5 }
  0x60   : > { %11576 = shalt.err (!%p11573_p12)
}
  0x61   : > { %11025 = dma.hbm_to_vmem [thread:$0]  (!%p11941_p13), %s14744_s6, 16, %s295_s12, [#allocation15]  }
  0x62   : > { %s11816_s29 = smov [#allocation5]   ;;  %s11817_s13 = smov [#allocation10]  }
  0x63   : > { %s234_s17 = sshll.u32 %s11816_s29, 4  ;;  %s259_s24 = sshll.u32 %s11817_s13, 4  ;;  %s235_s17 = int_to_ptr.vmem [resolvable:$true] %s234_s17  ;;  %s12015_s24 = int_to_ptr.vmem [resolvable:$true] %s259_s24 }
  0x64   : > { %s11577_s22 = scalar_lea.hbm %s14739_s1, 9216 }
  0x65   : > { %p11578_p0 = scmp.ne.s32.totalorder %s14739_s1, %s11577_s22  ;;  %p11584_p8 = scmp.lt.u32.totalorder %s11577_s22, %s14739_s1 }
  0x67   : > { %p11580_p2 = pnand %p11578_p0, %p11955_p1 }
  0x69   : > { %p11581_p4 = pneg %p11580_p2 }
  0x6b   : > { %p11586_p10 = pnand %p11584_p8, %p11581_p4 }
  0x6d   : > { %11589 = shalt.err (!%p11586_p10)
}
  0x6e   : > { %s11590_s16 = scalar_lea.vmem %s235_s17, 9216  ;;  %p11598_p6 = scmp.lt.s32.totalorder %s235_s17, %s235_s17 }
  0x6f   : > { %p11591_p11 = scmp.ne.s32.totalorder %s235_s17, %s11590_s16  ;;  %p11599_p7 = scmp.lt.s32.totalorder %s11590_s16, %s11590_s16 }
  0x71   : > { %p11593_p3 = pnand %p11591_p11, %p11955_p1  ;;  %p11600_p9 = por %p11599_p7, %p11598_p6 }
  0x73   : > { %p11594_p5 = pneg %p11593_p3 }
  0x75   : > { %p11601_p12 = pnand %p11600_p9, %p11594_p5 }
  0x77   : > { %11604 = shalt.err (!%p11601_p12)
}
  0x78   : > { %11010 = dma.hbm_to_vmem [thread:$0]  (!%p11941_p13), %s14739_s1, 9216, %s235_s17, [#allocation6], %s11813_s9, %s11813_s9, %s11814_s18  }
  0x79   : > { %s11605_s22 = scalar_lea.hbm %s14741_s3, 16 }
  0x7a   : > { %p11606_p0 = scmp.ne.s32.totalorder %s14741_s3, %s11605_s22  ;;  %p11612_p8 = scmp.lt.u32.totalorder %s11605_s22, %s14741_s3 }
  0x7c   : > { %p11608_p2 = pnand %p11606_p0, %p11955_p1 }
  0x7e   : > { %p11609_p4 = pneg %p11608_p2 }
  0x80   : > { %p11614_p10 = pnand %p11612_p8, %p11609_p4 }
  0x82   : > { %11617 = shalt.err (!%p11614_p10)
}
  0x83   : > { %s11618_s9 = scalar_lea.vmem %s12015_s24, 16  ;;  %s11625_s18 = scalar_lea.vmem %s12015_s24, 32 }
  0x84   : > { %p11619_p11 = scmp.ne.s32.totalorder %s12015_s24, %s11618_s9  ;;  %p11626_p6 = scmp.lt.s32.totalorder %s12015_s24, %s12015_s24 }
  0x85   : > { %p11627_p7 = scmp.lt.s32.totalorder %s11625_s18, %s11618_s9 }
  0x86   : > { %p11621_p3 = pnand %p11619_p11, %p11955_p1 }
  0x87   : > { %p11628_p9 = por %p11627_p7, %p11626_p6 }
  0x88   : > { %p11622_p5 = pneg %p11621_p3 }
  0x8a   : > { %p11629_p12 = pnand %p11628_p9, %p11622_p5 }
  0x8c   : > { %11632 = shalt.err (!%p11629_p12)
}
  0x8d   : > { %11016 = dma.hbm_to_vmem [thread:$0]  (!%p11941_p13), %s14741_s3, 16, %s12015_s24, [#allocation9]  }
  0x8e   : > { %s11818_s29 = smov [#allocation13]   ;;  %s11819_s26 = smov [#allocation16]  }
  0x8f   : > { %s283_s13 = sshll.u32 %s11818_s29, 4  ;;  %s307_s11 = sshll.u32 %s11819_s26, 4  ;;  %s284_s13 = int_to_ptr.vmem [resolvable:$true] %s283_s13  ;;  %s12062_s11 = int_to_ptr.vmem [resolvable:$true] %s307_s11 }
  0x90   : > { %s11633_s14 = scalar_lea.hbm %s14743_s5, 16 }
  0x91   : > { %p11634_p0 = scmp.ne.s32.totalorder %s14743_s5, %s11633_s14  ;;  %p11640_p8 = scmp.lt.u32.totalorder %s11633_s14, %s14743_s5 }
  0x93   : > { %p11636_p2 = pnand %p11634_p0, %p11955_p1 }
  0x95   : > { %p11637_p4 = pneg %p11636_p2 }
  0x97   : > { %p11642_p10 = pnand %p11640_p8, %p11637_p4 }
  0x99   : > { %11645 = shalt.err (!%p11642_p10)
}
  0x9a   : > { %s11646_s18 = scalar_lea.vmem %s284_s13, 16  ;;  %s11653_s17 = scalar_lea.vmem %s284_s13, 32 }
  0x9b   : > { %p11647_p11 = scmp.ne.s32.totalorder %s284_s13, %s11646_s18  ;;  %p11654_p6 = scmp.lt.s32.totalorder %s284_s13, %s284_s13 }
  0x9c   : > { %p11655_p7 = scmp.lt.s32.totalorder %s11653_s17, %s11646_s18 }
  0x9d   : > { %p11649_p3 = pnand %p11647_p11, %p11955_p1 }
  0x9e   : > { %p11656_p9 = por %p11655_p7, %p11654_p6 }
  0x9f   : > { %p11650_p5 = pneg %p11649_p3 }
  0xa1   : > { %p11657_p12 = pnand %p11656_p9, %p11650_p5 }
  0xa3   : > { %11660 = shalt.err (!%p11657_p12)
}
  0xa4   : > { %11022 = dma.hbm_to_vmem [thread:$0]  (!%p11941_p13), %s14743_s5, 16, %s284_s13, [#allocation12]  }
  0xa5   : > { %s11661_s25 = scalar_lea.hbm %s14745_s7, 6912 }
  0xa6   : > { %p11662_p0 = scmp.ne.s32.totalorder %s14745_s7, %s11661_s25  ;;  %p11668_p8 = scmp.lt.u32.totalorder %s11661_s25, %s14745_s7 }
  0xa8   : > { %p11664_p2 = pnand %p11662_p0, %p11955_p1 }
  0xaa   : > { %p11665_p4 = pneg %p11664_p2 }
  0xac   : > { %p11670_p10 = pnand %p11668_p8, %p11665_p4 }
  0xae   : > { %11673 = shalt.err (!%p11670_p10)
}
  0xaf   : > { %s11674_s13 = scalar_lea.vmem %s12062_s11, 6912  ;;  %p11682_p6 = scmp.lt.s32.totalorder %s12062_s11, %s12062_s11 }
  0xb0   : > { %p11675_p11 = scmp.ne.s32.totalorder %s12062_s11, %s11674_s13  ;;  %p11683_p7 = scmp.lt.s32.totalorder %s11674_s13, %s11674_s13 }
  0xb2   : > { %p11677_p3 = pnand %p11675_p11, %p11955_p1  ;;  %p11684_p9 = por %p11683_p7, %p11682_p6 }
  0xb4   : > { %p11678_p5 = pneg %p11677_p3 }
  0xb6   : > { %p11685_p12 = pnand %p11684_p9, %p11678_p5 }
  0xb8   : > { %11688 = shalt.err (!%p11685_p12)
}
  0xb9   : > { %s11820_s24 = smov 128   ;;  %s11821_s18 = smov 8  }
  0xba   : > { %11028 = dma.hbm_to_vmem [thread:$0]  (!%p11941_p13), %s14745_s7, 6912, %s12062_s11, [#allocation15], %s11820_s24, %s11820_s24, %s11821_s18  }
  0xbb   : > { %p14837_p0 = scmp.ne.s32.totalorder %s14832_s19, 0 }
  0xbd   : > { %323 = sbr.rel (%p14837_p0) target bundleno = 2493 (0x9bd), region = 48 }
  0xc4   : > { %p14838_p1 = scmp.ne.s32.totalorder %s14833_s20, 0 }
  0xc6   : > { %11766 = dma.done.wait (%p14838_p1), [#allocation6], 9216  }
  0xc7   : > { %11768 = vsyncadd (%p14838_p1), [#allocation6], 4294958080 }
  0xc8   : > { %11770 = dma.done.wait (%p14838_p1), [#allocation9], 32  }
  0xc9   : > { %11772 = vsyncadd (%p14838_p1), [#allocation9], 4294967264 }
  0xca   : > { %11774 = dma.done.wait (%p14838_p1), [#allocation12], 9232  }
  0xcb   : > { %11776 = vsyncadd (%p14838_p1), [#allocation12], 4294958064 }
  0xcc   : > { %11778 = dma.done.wait (%p14838_p1), [#allocation15], 6928  }
  0xcd   : > { %11780 = vsyncadd (%p14838_p1), [#allocation15], 4294960368  ;;  %s371_s19 = sand.u32 1, %s11793_s28   ;;  %s9348_s23 = smul.u32 4032, %s11801_s30 }
  0xce   : > { %s8915_s21 = sshll.u32 %s371_s19, 7  ;;  %s11822_s22 = smov [#allocation2]  }
  0xcf   : > { %s382_s26 = scalar_lea.hbm %s14738_s0, %s9348_s23  ;;  %s390_s25 = sshll.u32 %s11822_s22, 4  ;;  %s391_s25 = int_to_ptr.vmem [resolvable:$true] %s390_s25 }
  0xd0   : > { %s11689_s14 = scalar_lea.hbm %s382_s26, 4032  ;;  %s11691_s20 = scalar_lea.hbm %s14738_s0, 8064 }
  0xd1   : > { %p11690_p13 = scmp.ne.s32.totalorder %s382_s26, %s11689_s14  ;;  %p11692_p2 = scmp.lt.u32.totalorder %s382_s26, %s14738_s0 }
  0xd2   : > { %p11693_p4 = scmp.lt.u32.totalorder %s11691_s20, %s11689_s14  ;;  %p11695_p10 = scmp.lt.u32.totalorder %s11689_s14, %s382_s26 }
  0xd4   : > { %p11694_p8 = por %p11693_p4, %p11692_p2 }
  0xd6   : > { %p11696_p11 = por %p11695_p10, %p11694_p8 }
  0xd8   : > { %p11697_p3 = pnand %p11696_p11, %p11690_p13 }
  0xda   : > { %11700 = shalt.err (!%p11697_p3)  }
  0xdb   : > { %s11701_s24 = scalar_lea.vmem %s391_s25, 4032  ;;  %s11705_s18 = scalar_lea.vmem %s391_s25, 8064 }
  0xdc   : > { %p11702_p5 = scmp.ne.s32.totalorder %s391_s25, %s11701_s24  ;;  %p11706_p6 = scmp.lt.s32.totalorder %s391_s25, %s391_s25 }
  0xdd   : > { %p11707_p7 = scmp.lt.s32.totalorder %s11705_s18, %s11701_s24 }
  0xdf   : > { %p11708_p9 = por %p11707_p7, %p11706_p6 }
  0xe1   : > { %p11709_p12 = pnand %p11708_p9, %p11702_p5 }
  0xe3   : > { %11712 = shalt.err (!%p11709_p12)  }
  0xe4   : > { %393 = dma.hbm_to_vmem [thread:$0]  %s382_s26, 4032, %s391_s25, [#allocation4] }
  0xe5   : > { %s12136_s17 = scalar_lea.vmem [#allocation17], %s8915_s21 }
  0xe6   : > { %11781 = dma.done.wait [#allocation4], 4032 }
  0xe7   : > { %11782 = vsyncadd [#allocation4], 4294963264  ;;  %v14797_v0 = vmov 0.0   ;;  %vm11824_vm0 = vmmov 0   ;;  %v14755_v1 = vmov 0   ;;  %v11115_v2 = vld [vmem:[#allocation5 + $0x140] sm:$0xff]  }
  0xe8   : > { %9895 = vmatprep.subr.bf16.mxu0 %v14797_v0  ;;  %9911 = vmatprep.mubr.msk.bf16.mxu0 %vm11824_vm0, %v14797_v0  ;;  %4900 = vst [vmem:[#allocation3 + $0xd8] sm:$0xf] %v14755_v1  ;;  %v11116_v3 = vld [vmem:[#allocation5 + $0x148] sm:$0xff]   ;;  %v11117_v4 = vld [vmem:[#allocation5 + $0x150] sm:$0xff]   ;;  %v11118_v5 = vld [vmem:[#allocation5 + $0x158] sm:$0xff]   ;;  %vm914_vm1 = vcmask 1046528  }
  0xe9   : > { %1638 = vmatprep.subr.bf16.mxu1 %v14755_v1  ;;  %11113 = vset.pattern.permute.xlu0 %v14755_v1  ;;  %v11119_v6 = vld [vmem:[#allocation5 + $0x160] sm:$0xff]   ;;  %v11120_v7 = vld [vmem:[#allocation5 + $0x168] sm:$0xff]   ;;  %v446_v8 = vld [vmem:[#allocation2 + $0x10] sm:$0xf]  ;;  %vm663_vm2 = vsmask.f32 7424 }
  0xea   : > { %11114 = vset.pattern.permute.xlu1 %v14755_v1  ;;  %9896 = vmatpush3.bf16.msra.mxu0 %v11115_v2  ;;  %v447_v9 = vld [vmem:[#allocation2 + $0x14] sm:$0xf]  ;;  %v448_v10 = vld [vmem:[#allocation2 + $0x18] sm:$0xf]  ;;  %v1049_v11 = vld [vmem:[#allocation2 + $0xc] sm:$0xe] }
  0xeb   : > { %9897 = vmatprep.subr.bf16.mxu0 %v14797_v0  ;;  %v11121_v12 = vld [vmem:[#allocation5 + $0x170] sm:$0xff]   ;;  %v12150_v13 = vcombine.low %v447_v9, %v448_v10  ;;  %v8975_v14 = vcombine.low %v1049_v11, %v446_v8  ;;  %v11122_v15 = vld [vmem:[#allocation5 + $0x178] sm:$0xff]   ;;  %v449_v18 = vld [vmem:[#allocation2 + $0x1c] sm:$0xf]  ;;  %s9437_s16 = sshll.u32 %s11801_s30, 11  ;;  %s8740_s23 = sshll.u32 %s12136_s17, 4  ;;  %s14687_s23 = int_to_ptr.vmem [resolvable:$true] %s8740_s23 }
  0xec   : > { %v450_v19 = vld [vmem:[#allocation2 + $0x20] sm:$0xf]  ;;  %v11126_v21 = vld [vmem:[#allocation5] sm:$0xff]   ;;  %v451_v25 = vld [vmem:[#allocation2 + $0x24] sm:$0xf]  ;;  %s14685_s29 = scalar_lea.hbm %s14746_s8, %s9437_s16  ;;  %s14692_s26 = scalar_lea.sflag [#allocation7], %s371_s19 }
  0xed   : > { %v1363_v16 = vrot.slane %v8975_v14, 1  ;;  %v1364_v17 = vrot.slane %v12150_v13, 1  ;;  %v12156_v22 = vcombine.low %v449_v18, %v450_v19  ;;  %v11128_v24 = vld [vmem:[#allocation5 + $0x8] sm:$0xff]   ;;  %v452_v26 = vld [vmem:[#allocation2 + $0x28] sm:$0xf]  ;;  %v11134_v33 = vld [vmem:[#allocation5 + $0x18] sm:$0xff]  }
  0xee   : > { %9898 = vmatpush3.bf16.msra.mxu0 %v11116_v3  ;;  %v11131_v27 = vld [vmem:[#allocation5 + $0x10] sm:$0xff]   ;;  %v12164_v29 = vcombine.low %v451_v25, %v452_v26  ;;  %v453_v30 = vld [vmem:[#allocation2 + $0x2c] sm:$0xf]  ;;  %v454_v32 = vld [vmem:[#allocation2 + $0x30] sm:$0xf]  ;;  %s11713_s22 = scalar_lea.vmem %s14687_s23, 2048 }
  0xef   : > { %9899 = vmatprep.subr.bf16.mxu0 %v14797_v0  ;;  %v1365_v20 = vsel %vm914_vm1, %v1363_v16, %v1364_v17  ;;  %v1366_v23 = vrot.slane %v12156_v22, 1  ;;  %v11136_v34 = vld [vmem:[#allocation5 + $0x20] sm:$0xff]   ;;  %v12172_v36 = vcombine.low %v453_v30, %v454_v32  ;;  %v11139_v40 = vld [vmem:[#allocation5 + $0x28] sm:$0xff]   ;;  %v11142_v41 = vld [vmem:[#allocation5 + $0x30] sm:$0xff]   ;;  %p11714_p0 = scmp.ne.s32.totalorder %s14687_s23, %s11713_s22  ;;  %p15052_p1 = scmp.ne.s32.totalorder %s14828_s15, 0 }
  0xf0   : > { %v1368_v31 = vrot.slane %v12164_v29, 1  ;;  %v455_v37 = vld [vmem:[#allocation2 + $0x34] sm:$0xf]  ;;  %v456_v39 = vld [vmem:[#allocation2 + $0x38] sm:$0xf]  ;;  %v11145_v47 = vld [vmem:[#allocation5 + $0x38] sm:$0xff]  }
  0xf1   : > { %v1367_v28 = vsel %vm914_vm1, %v1364_v17, %v1366_v23  ;;  %14839 = vst [vmem:[#allocation35_spill] sm:$0xff] %v12172_v36  ;;  %v1370_v38 = vrot.slane %v12172_v36, 1  ;;  %v12180_v43 = vcombine.low %v455_v37, %v456_v39  ;;  %v12183_v44 = vld [vmem:[#allocation2 + $0x3c] sm:$0xf]  ;;  %v12188_v46 = vld [vmem:[#allocation2 + $0x40] sm:$0xf]  ;;  %p11715_p13 = pnand %p11714_p0, %p15052_p1 }
  0xf2   : > { %9900 = vmatpush3.bf16.msra.mxu0 %v11117_v4  ;;  %v1369_v35 = vsel %vm914_vm1, %v1366_v23, %v1368_v31  ;;  %v11147_v48 = vld [vmem:[#allocation5 + $0x40] sm:$0xff]   ;;  %v12194_v50 = vcombine.low %v12183_v44, %v12188_v46  ;;  %v12197_v51 = vld [vmem:[#allocation2 + $0x44] sm:$0xf]  ;;  %v12202_v53 = vld [vmem:[#allocation2 + $0x48] sm:$0xf]  ;;  %s11826_s30 = smov [#allocation17]  }
  0xf3   : > { %9901 = vmatprep.subr.bf16.mxu0 %v14797_v0  ;;  %v1371_v42 = vsel %vm914_vm1, %v1368_v31, %v1370_v38  ;;  %14840 = vst [vmem:[#allocation36_spill] sm:$0xff] %v12180_v43  ;;  %v1372_v45 = vrot.slane %v12180_v43, 1  ;;  %v11150_v54 = vld [vmem:[#allocation5 + $0x48] sm:$0xff]   ;;  %v11153_v55 = vld [vmem:[#allocation5 + $0x50] sm:$0xff]   ;;  %v12208_v57 = vcombine.low %v12197_v51, %v12202_v53  ;;  %v12211_v58 = vld [vmem:[#allocation2 + $0x4c] sm:$0xf]  ;;  %p11716_p2 = pneg %p11715_p13 }
  0xf4   : > { %14841 = vst [vmem:[#allocation37_spill] sm:$0xff] %v12194_v50  ;;  %v1374_v52 = vrot.slane %v12194_v50, 1  ;;  %v12216_v60 = vld [vmem:[#allocation2 + $0x50] sm:$0xf]  ;;  %v11158_v62 = vld [vmem:[#allocation5 + $0x60] sm:$0xff]   ;;  %v11163_v10 = vld [vmem:[#allocation5 + $0x70] sm:$0xff]  }
  0xf5   : > { %v1373_v49 = vsel %vm914_vm1, %v1370_v38, %v1372_v45  ;;  %14842 = vst [vmem:[#allocation38_spill] sm:$0xff] %v12208_v57  ;;  %v1376_v59 = vrot.slane %v12208_v57, 1  ;;  %v11155_v61 = vld [vmem:[#allocation5 + $0x58] sm:$0xff]   ;;  %v12222_v2 = vcombine.low %v12211_v58, %v12216_v60  ;;  %v12225_v3 = vld [vmem:[#allocation2 + $0x54] sm:$0xf]  ;;  %s11717_s25 = sshll.u32 %s11826_s30, 4  ;;  %s11718_s25 = int_to_ptr.vmem [resolvable:$false] %s11717_s25 }
  0xf6   : > { %9902 = vmatpush3.bf16.msra.mxu0 %v11118_v5  ;;  %v1375_v56 = vsel %vm914_vm1, %v1372_v45, %v1374_v52  ;;  %v12230_v5 = vld [vmem:[#allocation2 + $0x58] sm:$0xf]  ;;  %v12239_v9 = vld [vmem:[#allocation2 + $0x5c] sm:$0xf]  ;;  %v12252_v16 = vld [vmem:[#allocation2 + $0x64] sm:$0xf]  ;;  %p11720_p4 = scmp.lt.s32.totalorder %s14687_s23, %s11718_s25 }
  0xf7   : > { %9903 = vmatprep.subr.bf16.mxu0 %v14797_v0  ;;  %v1377_v63 = vsel %vm914_vm1, %v1374_v52, %v1376_v59  ;;  %14843 = vst [vmem:[#allocation39_spill] sm:$0xff] %v12222_v2  ;;  %v1378_v4 = vrot.slane %v12222_v2, 1  ;;  %v12236_v8 = vcombine.low %v12225_v3, %v12230_v5  ;;  %v12254_v17 = vld [vmem:[#allocation2 + $0x68] sm:$0xf]  ;;  %v11166_v23 = vld [vmem:[#allocation5 + $0x78] sm:$0xff]   ;;  %s11719_s14 = scalar_lea.vmem %s11718_s25, 4096 }
  0xf8   : > { %v12269_v25 = vld [vmem:[#allocation2 + $0x70] sm:$0xf]  ;;  %v12278_v30 = vld [vmem:[#allocation2 + $0x74] sm:$0xf]  ;;  %v12282_v31 = vld [vmem:[#allocation2 + $0x78] sm:$0xf]  ;;  %p11721_p8 = scmp.lt.s32.totalorder %s11719_s14, %s11713_s22 }
  0xf9   : > { %14844 = vst [vmem:[#allocation40_spill] sm:$0xff] %v12236_v8  ;;  %v1380_v11 = vrot.slane %v12236_v8, 1  ;;  %v11449_v2 = vld [vmem:[#allocation2 + $0x14] sm:$0xf]  ;;  %v11451_v43 = vld [vmem:[#allocation2 + $0x1c] sm:$0xf] }
  0xfa   : > { %9904 = vmatpush3.bf16.msra.mxu0 %v11119_v6  ;;  %v11161_v6 = vld [vmem:[#allocation5 + $0x68] sm:$0xff]   ;;  %p11722_p10 = por %p11721_p8, %p11720_p4 }
  0xfb   : > { %9905 = vmatprep.subr.bf16.mxu0 %v14797_v0  ;;  %v1381_v14 = vsel %vm914_vm1, %v1378_v4, %v1380_v11 }
  0xfc   : > { %p11723_p11 = pnand %p11722_p10, %p11716_p2 }
  0xfe   : > { %9906 = vmatpush3.bf16.msra.mxu0 %v11120_v7  ;;  %v1379_v7 = vsel %vm914_vm1, %v1376_v59, %v1378_v4  ;;  %v12327_v59 = vld [vmem:[#allocation2 + $0x98] sm:$0xf] }
  0xff   : > { %9907 = vmatprep.subr.bf16.mxu0 %v14797_v0 }
 0x102   : > { %9908 = vmatpush3.bf16.msra.mxu0 %v11121_v12  ;;  %v12244_v12 = vld [vmem:[#allocation2 + $0x60] sm:$0xf] }
 0x103   : > { %9909 = vmatprep.subr.bf16.mxu0 %v14797_v0 }
 0x106   : > { %9910 = vmatpush3.bf16.msra.mxu0 %v11122_v15  ;;  %v12250_v15 = vcombine.low %v12239_v9, %v12244_v12 }
 0x107   : > { %2280 = vmatprep.subr.bf16.mxu0 %v14755_v1 }
 0x108   : > { %14845 = vst [vmem:[#allocation41_spill] sm:$0xff] %v12250_v15  ;;  %v1382_v18 = vrot.slane %v12250_v15, 1 }
 0x109   : > { %9912 = vmatmul.mubr.bf16.vlgmr.msra.gmra.mrb[0].mxu0 %v1365_v20  ;;  %v12262_v20 = vcombine.low %v12252_v16, %v12254_v17 }
 0x10a   : > { %2281 = vmatpush1.bf16.msra.mxu0 %v11126_v21  ;;  %9915 = vmatprep.mubr.msk.bf16.mxu0 %vm11824_vm0, %v14797_v0  ;;  %v1383_v19 = vsel %vm914_vm1, %v1380_v11, %v1382_v18  ;;  %v12264_v21 = vld [vmem:[#allocation2 + $0x6c] sm:$0xf] }
 0x10b   : > { %2282 = vmatprep.subr.bf16.mxu0 %v14755_v1  ;;  %14846 = vst [vmem:[#allocation42_spill] sm:$0xff] %v12262_v20  ;;  %v12274_v26 = vcombine.low %v12264_v21, %v12269_v25 }
 0x10d   : > { %14847 = vst [vmem:[#allocation43_spill] sm:$0xff] %v12274_v26 }
 0x10e   : > { %2283 = vmatpush1.bf16.msra.mxu0 %v11128_v24  ;;  %v1384_v24 = vrot.slane %v12262_v20, 1  ;;  %v11167_v20 = vld [vmem:[#allocation2 + $0xe4] ss:$0 sps:$4 sm:$0x11]  }
 0x10f   : > { %2284 = vmatprep.subr.bf16.mxu0 %v14755_v1 }
 0x111   : > { %9916 = vmatmul.mubr.bf16.gmra.mrb[4].mxu0 %v1367_v28  ;;  %v1386_v28 = vrot.slane %v12274_v26, 1  ;;  %v445_v26 = vld [vmem:[#allocation2 + $0xc] sm:$0xf] }
 0x112   : > { %9919 = vmatprep.mubr.msk.bf16.mxu0 %vm11824_vm0, %v14797_v0  ;;  %2285 = vmatpush1.bf16.msra.mxu0 %v11131_v27  ;;  %v1385_v27 = vsel %vm914_vm1, %v1382_v18, %v1384_v24  ;;  %v12352_v18 = vld [vmem:[#allocation2 + $0xa4] sm:$0xf] }
 0x113   : > { %2286 = vmatprep.subr.bf16.mxu0 %v14755_v1  ;;  %v1387_v32 = vsel %vm914_vm1, %v1384_v24, %v1386_v28 }
 0x116   : > { %2287 = vmatpush1.bf16.msra.mxu0 %v11134_v33  ;;  %v12287_v33 = vcombine.low %v12278_v30, %v12282_v31 }
 0x117   : > { %2288 = vmatprep.subr.bf16.mxu0 %v14755_v1 }
 0x118   : > { %14848 = vst [vmem:[#allocation44_spill] sm:$0xff] %v12287_v33  ;;  %v1388_v37 = vrot.slane %v12287_v33, 1  ;;  %v444_v33 = vld [vmem:[#allocation2 + $0x8] sm:$0xf] }
 0x119   : > { %9920 = vmatmul.mubr.bf16.gmra.mrb[8].mxu0 %v1369_v35  ;;  %v12291_v35 = vld [vmem:[#allocation2 + $0x80] sm:$0xf] }
 0x11a   : > { %9923 = vmatprep.mubr.msk.bf16.mxu0 %vm11824_vm0, %v14797_v0  ;;  %2289 = vmatpush1.bf16.msra.mxu0 %v11136_v34  ;;  %v12289_v34 = vld [vmem:[#allocation2 + $0x7c] sm:$0xf]  ;;  %v1389_v39 = vsel %vm914_vm1, %v1386_v28, %v1388_v37  ;;  %v12364_v28 = vld [vmem:[#allocation2 + $0xac] sm:$0xf] }
 0x11b   : > { %2290 = vmatprep.subr.bf16.mxu0 %v14755_v1  ;;  %v12298_v38 = vcombine.low %v12289_v34, %v12291_v35 }
 0x11d   : > { %14849 = vst [vmem:[#allocation45_spill] sm:$0xff] %v12298_v38 }
 0x11e   : > { %2291 = vmatpush1.bf16.msra.mxu0 %v11139_v40  ;;  %v12301_v40 = vld [vmem:[#allocation2 + $0x84] sm:$0xf] }
 0x11f   : > { %2292 = vmatprep.subr.bf16.mxu0 %v14755_v1 }
 0x121   : > { %9924 = vmatmul.mubr.bf16.gmra.mrb[12].mxu0 %v1371_v42  ;;  %v1390_v42 = vrot.slane %v12298_v38, 1 }
 0x122   : > { %9927 = vmatprep.mubr.msk.bf16.mxu0 %vm11824_vm0, %v14797_v0  ;;  %2293 = vmatpush1.bf16.msra.mxu0 %v11142_v41  ;;  %v12303_v41 = vld [vmem:[#allocation2 + $0x88] sm:$0xf] }
 0x123   : > { %2294 = vmatprep.subr.bf16.mxu0 %v14755_v1  ;;  %v12310_v45 = vcombine.low %v12301_v40, %v12303_v41 }
 0x125   : > { %14850 = vst [vmem:[#allocation46_spill] sm:$0xff] %v12310_v45  ;;  %v1392_v52 = vrot.slane %v12310_v45, 1 }
 0x126   : > { %2295 = vmatpush1.bf16.msra.mxu0 %v11145_v47  ;;  %v1391_v47 = vsel %vm914_vm1, %v1388_v37, %v1390_v42 }
 0x127   : > { %2296 = vmatprep.subr.bf16.mxu0 %v14755_v1 }
 0x129   : > { %9928 = vmatmul.mubr.bf16.gmra.mrb[16].mxu0 %v1373_v49  ;;  %v12315_v49 = vld [vmem:[#allocation2 + $0x90] sm:$0xf] }
 0x12a   : > { %9931 = vmatprep.mubr.msk.bf16.mxu0 %vm11824_vm0, %v14797_v0  ;;  %2297 = vmatpush1.bf16.msra.mxu0 %v11147_v48  ;;  %v12313_v48 = vld [vmem:[#allocation2 + $0x8c] sm:$0xf] }
 0x12b   : > { %2298 = vmatprep.subr.bf16.mxu0 %v14755_v1 }
 0x12e   : > { %2299 = vmatpush1.bf16.msra.mxu0 %v11150_v54  ;;  %v12322_v54 = vcombine.low %v12313_v48, %v12315_v49 }
 0x12f   : > { %2300 = vmatprep.subr.bf16.mxu0 %v14755_v1 }
 0x130   : > { %14851 = vst [vmem:[#allocation47_spill] sm:$0xff] %v12322_v54 }
 0x131   : > { %9932 = vmatmul.mubr.bf16.gmra.mrb[20].mxu0 %v1375_v56  ;;  %v12325_v56 = vld [vmem:[#allocation2 + $0x94] sm:$0xf] }
 0x132   : > { %9935 = vmatprep.mubr.msk.bf16.mxu0 %vm11824_vm0, %v14797_v0  ;;  %2301 = vmatpush1.bf16.msra.mxu0 %v11153_v55  ;;  %v1393_v55 = vsel %vm914_vm1, %v1390_v42, %v1392_v52 }
 0x133   : > { %2302 = vmatprep.subr.bf16.mxu0 %v14755_v1 }
 0x136   : > { %2303 = vmatpush1.bf16.msra.mxu0 %v11155_v61  ;;  %v1394_v61 = vrot.slane %v12322_v54, 1  ;;  %v12433_v54 = vld [vmem:[#allocation2 + $0x4] sm:$0xf] }
 0x137   : > { %2304 = vmatprep.subr.bf16.mxu0 %v14755_v1 }
 0x139   : > { %9936 = vmatmul.mubr.bf16.gmra.mrb[24].mxu0 %v1377_v63  ;;  %v1395_v63 = vsel %vm914_vm1, %v1392_v52, %v1394_v61  ;;  %v12378_v52 = vld [vmem:[#allocation2 + $0xb8] sm:$0xf] }
 0x13a   : > { %9939 = vmatprep.mubr.msk.bf16.mxu0 %vm11824_vm0, %v14797_v0  ;;  %2305 = vmatpush1.bf16.msra.mxu0 %v11158_v62  ;;  %v12334_v62 = vcombine.low %v12325_v56, %v12327_v59 }
 0x13b   : > { %2306 = vmatprep.subr.bf16.mxu0 %v14755_v1 }
 0x13c   : > { %14852 = vst [vmem:[#allocation48_spill] sm:$0xff] %v12334_v62  ;;  %v1396_v4 = vrot.slane %v12334_v62, 1 }
 0x13e   : > { %2307 = vmatpush1.bf16.msra.mxu0 %v11161_v6  ;;  %v12340_v6 = vld [vmem:[#allocation2 + $0x9c] sm:$0xf] }
 0x13f   : > { %2308 = vmatprep.subr.bf16.mxu0 %v14755_v1 }
 0x141   : > { %9940 = vmatmul.mubr.bf16.gmra.mrb[28].mxu0 %v1379_v7  ;;  %v12342_v7 = vld [vmem:[#allocation2 + $0xa0] sm:$0xf] }
 0x142   : > { %9943 = vmatprep.mubr.msk.bf16.mxu0 %vm11824_vm0, %v14797_v0  ;;  %2309 = vmatpush1.bf16.msra.mxu0 %v11163_v10  ;;  %v1397_v10 = vsel %vm914_vm1, %v1394_v61, %v1396_v4  ;;  %v12347_v11 = vcombine.low %v12340_v6, %v12342_v7 }
 0x143   : > { %2310 = vmatprep.subr.bf16.mxu0 %v14755_v1 }
 0x144   : > { %14853 = vst [vmem:[#allocation49_spill] sm:$0xff] %v12347_v11 }
 0x146   : > { %2311 = vmatpush1.bf16.msra.mxu0 %v11166_v23 }
 0x147   : > { %10019 = vmatprep.subr.bf16.mxu0 %v14797_v0 }
 0x149   : > { %9944 = vmatmul.mubr.bf16.gmra.mrb[32].mxu0 %v1381_v14  ;;  %v1398_v14 = vrot.slane %v12347_v11, 1  ;;  %v1045_v11 = vld [vmem:[#allocation2 + $0xd8] sm:$0xf] }
 0x14a   : > { %9947 = vmatprep.mubr.msk.bf16.mxu0 %vm11824_vm0, %v14797_v0 }
 0x14b   : > { %v1399_v23 = vsel %vm914_vm1, %v1396_v4, %v1398_v14  ;;  %v12388_v4 = vld [vmem:[#allocation2 + $0xbc] sm:$0xf] }
 0x151   : > { %9948 = vmatmul.mubr.bf16.gmra.mrb[36].mxu0 %v1383_v19  ;;  %v12354_v19 = vld [vmem:[#allocation2 + $0xa8] sm:$0xf] }
 0x152   : > { %9951 = vmatprep.mubr.msk.bf16.mxu0 %vm11824_vm0, %v14797_v0  ;;  %v12359_v24 = vcombine.low %v12352_v18, %v12354_v19 }
 0x154   : > { %14854 = vst [vmem:[#allocation50_spill] sm:$0xff] %v12359_v24 }
 0x159   : > { %9952 = vmatmul.mubr.bf16.gmra.mrb[40].mxu0 %v1385_v27  ;;  %v1400_v27 = vrot.slane %v12359_v24, 1 }
 0x15a   : > { %9955 = vmatprep.mubr.msk.bf16.mxu0 %vm11824_vm0, %v14797_v0 }
 0x15b   : > { %v1401_v37 = vsel %vm914_vm1, %v1398_v14, %v1400_v27 }
 0x161   : > { %9956 = vmatmul.mubr.bf16.gmra.mrb[44].mxu0 %v1387_v32  ;;  %v12366_v32 = vld [vmem:[#allocation2 + $0xb0] sm:$0xf] }
 0x162   : > { %9959 = vmatprep.mubr.msk.bf16.mxu0 %vm11824_vm0, %v14797_v0 }
 0x169   : > { %9960 = vmatmul.mubr.bf16.gmra.mrb[48].mxu0 %v1389_v39  ;;  %v12371_v39 = vcombine.low %v12364_v28, %v12366_v32 }
 0x16a   : > { %9963 = vmatprep.mubr.msk.bf16.mxu0 %vm11824_vm0, %v14797_v0 }
 0x16b   : > { %14855 = vst [vmem:[#allocation51_spill] sm:$0xff] %v12371_v39  ;;  %v1402_v42 = vrot.slane %v12371_v39, 1  ;;  %v12414_v39 = vld [vmem:[#allocation2 + $0xd0] sm:$0xf] }
 0x171   : > { %9964 = vmatmul.mubr.bf16.gmra.mrb[52].mxu0 %v1391_v47  ;;  %v12376_v47 = vld [vmem:[#allocation2 + $0xb4] sm:$0xf] }
 0x172   : > { %9967 = vmatprep.mubr.msk.bf16.mxu0 %vm11824_vm0, %v14797_v0  ;;  %v12383_v61 = vcombine.low %v12376_v47, %v12378_v52 }
 0x174   : > { %14856 = vst [vmem:[#allocation52_spill] sm:$0xff] %v12383_v61 }
 0x179   : > { %9968 = vmatmul.mubr.bf16.gmra.mrb[56].mxu0 %v1393_v55  ;;  %v1403_v55 = vsel %vm914_vm1, %v1400_v27, %v1402_v42 }
 0x17a   : > { %9971 = vmatprep.mubr.msk.bf16.mxu0 %vm11824_vm0, %v14797_v0 }
 0x181   : > { %9972 = vmatmul.mubr.bf16.gmra.mrb[60].mxu0 %v1395_v63  ;;  %v1404_v63 = vrot.slane %v12383_v61, 1 }
 0x182   : > { %9975 = vmatprep.mubr.msk.bf16.mxu0 %vm11824_vm0, %v14797_v0 }
 0x183   : > { %v1405_v14 = vsel %vm914_vm1, %v1402_v42, %v1404_v63 }
 0x189   : > { %9976 = vmatmul.mubr.bf16.gmra.mrb[64].mxu0 %v1397_v10  ;;  %v12390_v10 = vld [vmem:[#allocation2 + $0xc0] sm:$0xf] }
 0x18a   : > { %9979 = vmatprep.mubr.msk.bf16.mxu0 %vm11824_vm0, %v14797_v0 }
 0x191   : > { %9980 = vmatmul.mubr.bf16.gmra.mrb[68].mxu0 %v1399_v23  ;;  %v12395_v23 = vcombine.low %v12388_v4, %v12390_v10 }
 0x192   : > { %9983 = vmatprep.mubr.msk.bf16.mxu0 %vm11824_vm0, %v14797_v0 }
 0x193   : > { %14857 = vst [vmem:[#allocation53_spill] sm:$0xff] %v12395_v23  ;;  %v1406_v27 = vrot.slane %v12395_v23, 1 }
 0x195   : > { %v1407_v1 = vsel %vm914_vm1, %v1404_v63, %v1406_v27  ;;  %v12424_v63 = vld [vmem:[#allocation2 + $0xd4] sm:$0xf] }
 0x196   : > { %v12428_v62 = vcombine.low %v12424_v63, %v1045_v11 }
 0x198   : > { %14860 = vst [vmem:[#allocation56_spill] sm:$0xff] %v12428_v62 }
 0x199   : > { %9984 = vmatmul.mubr.bf16.gmra.mrb[72].mxu0 %v1401_v37  ;;  %v12400_v37 = vld [vmem:[#allocation2 + $0xc4] sm:$0xf] }
 0x19a   : > { %9987 = vmatprep.mubr.msk.bf16.mxu0 %vm11824_vm0, %v14797_v0 }
 0x1a1   : > { %9988 = vmatmul.mubr.bf16.gmra.mrb[76].mxu0 %v1403_v55  ;;  %v12402_v55 = vld [vmem:[#allocation2 + $0xc8] sm:$0xf] }
 0x1a2   : > { %9991 = vmatprep.mubr.msk.bf16.mxu0 %vm11824_vm0, %v14797_v0  ;;  %v12407_v61 = vcombine.low %v12400_v37, %v12402_v55 }
 0x1a4   : > { %14858 = vst [vmem:[#allocation54_spill] sm:$0xff] %v12407_v61  ;;  %v1408_v42 = vrot.slane %v12407_v61, 1 }
 0x1a6   : > { %v1409_v23 = vsel %vm914_vm1, %v1406_v27, %v1408_v42  ;;  %v1412_v27 = vrot.slane %v12428_v62, 1 }
 0x1a9   : > { %9992 = vmatmul.mubr.bf16.gmra.mrb[80].mxu0 %v1405_v14  ;;  %v12412_v14 = vld [vmem:[#allocation2 + $0xcc] sm:$0xf] }
 0x1aa   : > { %9995 = vmatprep.mubr.msk.bf16.mxu0 %vm11824_vm0, %v14797_v0  ;;  %v12419_v24 = vcombine.low %v12412_v14, %v12414_v39 }
 0x1ac   : > { %14859 = vst [vmem:[#allocation55_spill] sm:$0xff] %v12419_v24 }
 0x1b1   : > { %9996 = vmatmul.mubr.bf16.gmra.mrb[84].mxu0 %v1407_v1  ;;  %v1410_v1 = vrot.slane %v12419_v24, 1  ;;  %v11165_v24 = vld [vmem:[#allocation2 + $0xdc] sm:$0xff]  }
 0x1b2   : > { %9999 = vmatprep.mubr.msk.bf16.mxu0 %vm11824_vm0, %v14797_v0  ;;  %v1414_v11 = vrot.slane %v11165_v24, 1 }
 0x1b3   : > { %v1411_v61 = vsel %vm914_vm1, %v1408_v42, %v1410_v1  ;;  %v1413_v45 = vsel %vm914_vm1, %v1410_v1, %v1412_v27 }
 0x1b4   : > { %v1415_v62 = vsel %vm914_vm1, %v1412_v27, %v1414_v11 }
 0x1b9   : > { %10000 = vmatmul.mubr.bf16.gmra.mrb[88].mxu0 %v1409_v23  ;;  %v442_v23 = vld [vmem:[#allocation2] sm:$0xf] }
 0x1ba   : > { %10003 = vmatprep.mubr.msk.bf16.mxu0 %vm11824_vm0, %v14797_v0  ;;  %v8918_v38 = vcombine.low %v442_v23, %v12433_v54  ;;  %v1416_v23 = vrot.slane %v11167_v20, 1  ;;  %v11450_v20 = vld [vmem:[#allocation2 + $0x18] sm:$0xf] }
 0x1bb   : > { %v12451_v36 = vcombine.low %v11450_v20, %v11451_v43  ;;  %v11178_v43 = vld [vmem:[#allocation5 + $0x90] sm:$0xff]  }
 0x1bc   : > { %v667_v42 = vshll.u32 %v8918_v38, 16  ;;  %v665_v15 = vshrl.u32 %v8918_v38, 16 }
 0x1be   : > { %v669_v8 = vrot.slane %v667_v42, 1 }
 0x1c0   : > { %v670_v24 = vor.u32 %v669_v8, %v665_v15 }
 0x1c1   : > { %10004 = vmatmul.mubr.bf16.gmra.mrb[92].mxu0 %v1411_v61  ;;  %v12439_v61 = vcombine.low %v444_v33, %v445_v26  ;;  %v1417_v33 = vsel %vm914_vm1, %v1414_v11, %v1416_v23  ;;  %v688_v11 = vshll.u32 %v12451_v36, 16 }
 0x1c2   : > { %10007 = vmatprep.mubr.msk.bf16.mxu0 %vm11824_vm0, %v14797_v0 }
 0x1c3   : > { %v672_v1 = vshll.u32 %v12439_v61, 16  ;;  %v676_v42 = vshrl.u32 %v12439_v61, 16 }
 0x1c5   : > { %v674_v26 = vrot.slane %v672_v1, 1  ;;  %v11173_v1 = vld [vmem:[#allocation5 + $0x88] sm:$0xff]  }
 0x1c7   : > { %v675_v27 = vsel %vm663_vm2, %v670_v24, %v674_v26  ;;  %v11452_v24 = vld [vmem:[#allocation2 + $0x20] sm:$0xf] }
 0x1c9   : > { %10008 = vmatmul.mubr.bf16.gmra.mrb[96].mxu0 %v1413_v45  ;;  %v11448_v45 = vld [vmem:[#allocation2 + $0x10] sm:$0xf] }
 0x1ca   : > { %10011 = vmatprep.mubr.msk.bf16.mxu0 %vm11824_vm0, %v14797_v0  ;;  %v12445_v57 = vcombine.low %v11448_v45, %v11449_v2  ;;  %v11170_v2 = vld [vmem:[#allocation5 + $0x80] sm:$0xff]   ;;  %v690_v45 = vrot.slane %v688_v11, 1 }
 0x1cb   : > { %v11186_v11 = vld [vmem:[#allocation5 + $0xa0] sm:$0xff]  }
 0x1cc   : > { %v680_v50 = vshll.u32 %v12445_v57, 16  ;;  %v684_v15 = vshrl.u32 %v12445_v57, 16 }
 0x1d1   : > { %10012 = vmatmul.mubr.bf16.gmra.mrb[100].mxu0 %v1415_v62  ;;  %v678_v62 = vor.u32 %v676_v42, %v674_v26  ;;  %v11453_v26 = vld [vmem:[#allocation2 + $0x24] sm:$0xf]  ;;  %v692_v42 = vshrl.u32 %v12451_v36, 16 }
 0x1d2   : > { %10015 = vmatprep.mubr.msk.bf16.mxu0 %vm11824_vm0, %v14797_v0  ;;  %v682_v0 = vrot.slane %v680_v50, 1  ;;  %v12456_v50 = vcombine.low %v11452_v24, %v11453_v26 }
 0x1d4   : > { %v683_v8 = vsel %vm663_vm2, %v678_v62, %v682_v0  ;;  %v686_v23 = vor.u32 %v684_v15, %v682_v0  ;;  %v696_v62 = vshll.u32 %v12456_v50, 16  ;;  %v11182_v0 = vld [vmem:[#allocation5 + $0x98] sm:$0xff]  }
 0x1d6   : > { %v698_v20 = vrot.slane %v696_v62, 1 }
 0x1d9   : > { %10016 = vmatmul.mubr.bf16.gmra.mrb[104].mxu0 %v1417_v33  ;;  %v14861_v33 = vmov 0.0  }
 0x1da   : > { %2312 = vmatprep.mubr.bf16.mxu0 %v675_v27  ;;  %v691_v27 = vsel %vm663_vm2, %v686_v23, %v690_v45  ;;  %v700_v23 = vshrl.u32 %v12456_v50, 16 }
 0x1dc   : > { %v702_v26 = vor.u32 %v700_v23, %v698_v20 }
 0x1e1   : > { %2313 = vmatmul.mubr.bf16.vlgmr.msra.gmra.mrb[0].mxu0 %v8918_v38  ;;  %v694_v38 = vor.u32 %v692_v42, %v690_v45  ;;  %v11191_v45 = vld [vmem:[#allocation5 + $0xa8] sm:$0xff]   ;;  %v11457_v42 = vld [vmem:[#allocation2 + $0x34] sm:$0xf] }
 0x1e2   : > { %10020 = vmatpush3.bf16.msra.mxu0 %v11170_v2  ;;  %2320 = vmatprep.mubr.bf16.mxu0 %v683_v8  ;;  %v11454_v2 = vld [vmem:[#allocation2 + $0x28] sm:$0xf]  ;;  %v11455_v8 = vld [vmem:[#allocation2 + $0x2c] sm:$0xf] }
 0x1e3   : > { %10021 = vmatprep.subr.bf16.mxu0 %v14861_v33  ;;  %v12464_v15 = vcombine.low %v11454_v2, %v11455_v8 }
 0x1e5   : > { %v704_v24 = vshll.u32 %v12464_v15, 16 }
 0x1e6   : > { %10022 = vmatpush3.bf16.msra.mxu0 %v11173_v1  ;;  %v699_v1 = vsel %vm663_vm2, %v694_v38, %v698_v20  ;;  %v708_v38 = vshrl.u32 %v12464_v15, 16 }
 0x1e7   : > { %10023 = vmatprep.subr.bf16.mxu0 %v14861_v33 }
 0x1e9   : > { %2321 = vmatmul.mubr.bf16.gmra.mrb[4].mxu0 %v12439_v61 }
 0x1ea   : > { %2328 = vmatprep.mubr.bf16.mxu0 %v691_v27  ;;  %10024 = vmatpush3.bf16.msra.mxu0 %v11178_v43  ;;  %v706_v43 = vrot.slane %v704_v24, 1  ;;  %v11456_v27 = vld [vmem:[#allocation2 + $0x30] sm:$0xf] }
 0x1eb   : > { %10025 = vmatprep.subr.bf16.mxu0 %v14861_v33  ;;  %v12472_v62 = vcombine.low %v11456_v27, %v11457_v42 }
 0x1ec   : > { %v710_v20 = vor.u32 %v708_v38, %v706_v43 }
 0x1ed   : > { %v712_v2 = vshll.u32 %v12472_v62, 16  ;;  %v716_v24 = vshrl.u32 %v12472_v62, 16 }
 0x1ee   : > { %10026 = vmatpush3.bf16.msra.mxu0 %v11182_v0  ;;  %v707_v0 = vsel %vm663_vm2, %v702_v26, %v706_v43  ;;  %v11195_v26 = vld [vmem:[#allocation5 + $0xb0] sm:$0xff]   ;;  %v12489_v43 = vcombine.low %v12188_v46, %v12197_v51 }
 0x1ef   : > { %10027 = vmatprep.subr.bf16.mxu0 %v14861_v33  ;;  %v714_v8 = vrot.slane %v712_v2, 1 }
 0x1f0   : > { %v728_v38 = vshll.u32 %v12489_v43, 16  ;;  %v732_v51 = vshrl.u32 %v12489_v43, 16 }
 0x1f1   : > { %2329 = vmatmul.mubr.bf16.gmra.mrb[8].mxu0 %v12445_v57  ;;  %v715_v23 = vsel %vm663_vm2, %v710_v20, %v714_v8  ;;  %v718_v27 = vor.u32 %v716_v24, %v714_v8  ;;  %v12498_v8 = vcombine.low %v12202_v53, %v12211_v58 }
 0x1f2   : > { %2336 = vmatprep.mubr.bf16.mxu0 %v699_v1  ;;  %10028 = vmatpush3.bf16.msra.mxu0 %v11186_v11  ;;  %v11458_v11 = vld [vmem:[#allocation2 + $0x38] sm:$0xf]  ;;  %v730_v20 = vrot.slane %v728_v38, 1  ;;  %v14862_v38 = vmov 0  }
 0x1f3   : > { %10029 = vmatprep.subr.bf16.mxu0 %v14861_v33  ;;  %v12481_v1 = vcombine.low %v11458_v11, %v12183_v44  ;;  %v736_v11 = vshll.u32 %v12498_v8, 16  ;;  %v740_v53 = vshrl.u32 %v12498_v8, 16 }
 0x1f5   : > { %v738_v24 = vrot.slane %v736_v11, 1 }
 0x1f6   : > { %10030 = vmatpush3.bf16.msra.mxu0 %v11191_v45  ;;  %v720_v45 = vshll.u32 %v12481_v1, 16 }
 0x1f7   : > { %10031 = vmatprep.subr.bf16.mxu0 %v14861_v33 }
 0x1f8   : > { %v722_v42 = vrot.slane %v720_v45, 1  ;;  %v12506_v45 = vcombine.low %v12216_v60, %v12225_v3 }
 0x1f9   : > { %2337 = vmatmul.mubr.bf16.gmra.mrb[12].mxu0 %v12451_v36 }
 0x1fa   : > { %2344 = vmatprep.mubr.bf16.mxu0 %v707_v0  ;;  %10032 = vmatpush3.bf16.msra.mxu0 %v11195_v26  ;;  %v723_v44 = vsel %vm663_vm2, %v718_v27, %v722_v42  ;;  %v724_v0 = vshrl.u32 %v12481_v1, 16  ;;  %v744_v58 = vshll.u32 %v12506_v45, 16  ;;  %v11199_v27 = vld [vmem:[#allocation5 + $0xb8] sm:$0xff]   ;;  %v748_v3 = vshrl.u32 %v12506_v45, 16 }
 0x1fb   : > { %10033 = vmatprep.subr.bf16.mxu0 %v14861_v33 }
 0x1fc   : > { %v726_v2 = vor.u32 %v724_v0, %v722_v42  ;;  %v742_v42 = vor.u32 %v740_v53, %v738_v24  ;;  %v12514_v0 = vcombine.low %v12230_v5, %v12239_v9 }
 0x1fe   : > { %v731_v46 = vsel %vm663_vm2, %v726_v2, %v730_v20  ;;  %10034 = vmatpush3.bf16.msra.mxu0 %v11199_v27  ;;  %v752_v2 = vshll.u32 %v12514_v0, 16  ;;  %v756_v9 = vshrl.u32 %v12514_v0, 16 }
 0x1ff   : > { %3524 = vmatprep.subr.bf16.mxu0 %v14862_v38 }
 0x201   : > { %2345 = vmatmul.mubr.bf16.gmra.mrb[16].mxu0 %v12456_v50 }
 0x202   : > { %2352 = vmatprep.mubr.bf16.mxu0 %v715_v23  ;;  %v734_v23 = vor.u32 %v732_v51, %v730_v20  ;;  %v12523_v51 = vcombine.low %v12244_v12, %v12252_v16 }
 0x204   : > { %v739_v26 = vsel %vm663_vm2, %v734_v23, %v738_v24  ;;  %v760_v11 = vshll.u32 %v12523_v51, 16  ;;  %v764_v12 = vshrl.u32 %v12523_v51, 16 }
 0x206   : > { %v762_v24 = vrot.slane %v760_v11, 1 }
 0x209   : > { %2353 = vmatmul.mubr.bf16.gmra.mrb[20].mxu0 %v12464_v15 }
 0x20a   : > { %2360 = vmatprep.mubr.bf16.mxu0 %v723_v44  ;;  %v746_v44 = vrot.slane %v744_v58, 1  ;;  %v766_v58 = vor.u32 %v764_v12, %v762_v24 }
 0x20c   : > { %v747_v60 = vsel %vm663_vm2, %v742_v42, %v746_v44  ;;  %v750_v20 = vor.u32 %v748_v3, %v746_v44  ;;  %v12539_v42 = vcombine.low %v12269_v25, %v12278_v30 }
 0x20e   : > { %v780_v25 = vshrl.u32 %v12539_v42, 16 }
 0x211   : > { %2361 = vmatmul.mubr.bf16.gmra.mrb[24].mxu0 %v12472_v62 }
 0x212   : > { %2368 = vmatprep.mubr.bf16.mxu0 %v731_v46  ;;  %v754_v46 = vrot.slane %v752_v2, 1  ;;  %v12547_v2 = vcombine.low %v12282_v31, %v12289_v34 }
 0x214   : > { %v755_v5 = vsel %vm663_vm2, %v750_v20, %v754_v46  ;;  %v758_v23 = vor.u32 %v756_v9, %v754_v46  ;;  %v784_v30 = vshll.u32 %v12547_v2, 16  ;;  %v12555_v9 = vcombine.low %v12291_v35, %v12301_v40 }
 0x215   : > { %v788_v31 = vshrl.u32 %v12547_v2, 16 }
 0x216   : > { %v763_v53 = vsel %vm663_vm2, %v758_v23, %v762_v24  ;;  %v792_v34 = vshll.u32 %v12555_v9, 16  ;;  %v796_v35 = vshrl.u32 %v12555_v9, 16 }
 0x218   : > { %v794_v24 = vrot.slane %v792_v34, 1 }
 0x219   : > { %2369 = vmatmul.mubr.bf16.gmra.mrb[28].mxu0 %v12481_v1 }
 0x21a   : > { %2376 = vmatprep.mubr.bf16.mxu0 %v739_v26  ;;  %v12531_v26 = vcombine.low %v12254_v17, %v12264_v21  ;;  %v776_v21 = vshll.u32 %v12539_v42, 16 }
 0x21c   : > { %v768_v16 = vshll.u32 %v12531_v26, 16  ;;  %v772_v17 = vshrl.u32 %v12531_v26, 16  ;;  %v778_v3 = vrot.slane %v776_v21, 1 }
 0x21e   : > { %v770_v27 = vrot.slane %v768_v16, 1  ;;  %v782_v46 = vor.u32 %v780_v25, %v778_v3  ;;  %v798_v16 = vor.u32 %v796_v35, %v794_v24 }
 0x220   : > { %v771_v44 = vsel %vm663_vm2, %v766_v58, %v770_v27 }
 0x221   : > { %2377 = vmatmul.mubr.bf16.gmra.mrb[32].mxu0 %v12489_v43 }
 0x222   : > { %2384 = vmatprep.mubr.bf16.mxu0 %v747_v60  ;;  %v774_v60 = vor.u32 %v772_v17, %v770_v27  ;;  %v12571_v27 = vcombine.low %v12315_v49, %v12325_v56 }
 0x224   : > { %v779_v20 = vsel %vm663_vm2, %v774_v60, %v778_v3  ;;  %v12579_v60 = vcombine.low %v12327_v59, %v12340_v6  ;;  %v812_v49 = vshrl.u32 %v12571_v27, 16 }
 0x226   : > { %v816_v56 = vshll.u32 %v12579_v60, 16  ;;  %v820_v59 = vshrl.u32 %v12579_v60, 16 }
 0x228   : > { %v818_v25 = vrot.slane %v816_v56, 1  ;;  %v12627_v56 = vcombine.low %v12402_v55, %v12412_v14 }
 0x229   : > { %2385 = vmatmul.mubr.bf16.gmra.mrb[36].mxu0 %v12498_v8 }
 0x22a   : > { %2392 = vmatprep.mubr.bf16.mxu0 %v755_v5  ;;  %v786_v5 = vrot.slane %v784_v30, 1  ;;  %v12587_v30 = vcombine.low %v12342_v7, %v12352_v18  ;;  %v868_v55 = vshrl.u32 %v12627_v56, 16 }
 0x22c   : > { %v787_v11 = vsel %vm663_vm2, %v782_v46, %v786_v5  ;;  %v790_v23 = vor.u32 %v788_v31, %v786_v5  ;;  %v824_v6 = vshll.u32 %v12587_v30, 16  ;;  %v822_v5 = vor.u32 %v820_v59, %v818_v25 }
 0x22d   : > { %v12595_v31 = vcombine.low %v12354_v19, %v12364_v28  ;;  %v828_v7 = vshrl.u32 %v12587_v30, 16  ;;  %v12635_v59 = vcombine.low %v12414_v39, %v12424_v63 }
 0x22e   : > { %v795_v12 = vsel %vm663_vm2, %v790_v23, %v794_v24 }
 0x22f   : > { %v832_v18 = vshll.u32 %v12595_v31, 16  ;;  %v836_v19 = vshrl.u32 %v12595_v31, 16  ;;  %v872_v14 = vshll.u32 %v12635_v59, 16 }
 0x231   : > { %2393 = vmatmul.mubr.bf16.gmra.mrb[40].mxu0 %v12506_v45  ;;  %v834_v24 = vrot.slane %v832_v18, 1  ;;  %v876_v18 = vshrl.u32 %v12635_v59, 16 }
 0x232   : > { %2400 = vmatprep.mubr.bf16.mxu0 %v763_v53  ;;  %v12563_v53 = vcombine.low %v12303_v41, %v12313_v48  ;;  %v808_v48 = vshll.u32 %v12571_v27, 16 }
 0x234   : > { %v800_v40 = vshll.u32 %v12563_v53, 16  ;;  %v804_v41 = vshrl.u32 %v12563_v53, 16  ;;  %v810_v21 = vrot.slane %v808_v48, 1 }
 0x236   : > { %v802_v58 = vrot.slane %v800_v40, 1  ;;  %v838_v40 = vor.u32 %v836_v19, %v834_v24 }
 0x238   : > { %v806_v17 = vor.u32 %v804_v41, %v802_v58 }
 0x239   : > { %2401 = vmatmul.mubr.bf16.gmra.mrb[44].mxu0 %v12514_v0 }
 0x23a   : > { %2408 = vmatprep.mubr.bf16.mxu0 %v771_v44  ;;  %v803_v44 = vsel %vm663_vm2, %v798_v16, %v802_v58  ;;  %v811_v3 = vsel %vm663_vm2, %v806_v17, %v810_v21  ;;  %v12611_v58 = vcombine.low %v12378_v52, %v12388_v4  ;;  %v12619_v17 = vcombine.low %v12390_v10, %v12400_v37 }
 0x23b   : > { %v864_v37 = vshll.u32 %v12627_v56, 16 }
 0x23c   : > { %v852_v52 = vshrl.u32 %v12611_v58, 16  ;;  %v856_v4 = vshll.u32 %v12619_v17, 16  ;;  %v860_v10 = vshrl.u32 %v12619_v17, 16 }
 0x241   : > { %2409 = vmatmul.mubr.bf16.gmra.mrb[48].mxu0 %v12523_v51 }
 0x242   : > { %2416 = vmatprep.mubr.bf16.mxu0 %v779_v20  ;;  %v814_v20 = vor.u32 %v812_v49, %v810_v21  ;;  %v858_v49 = vrot.slane %v856_v4, 1  ;;  %v11209_v4 = vld [vmem:[#allocation5 + $0x1a8] sm:$0xff]  }
 0x244   : > { %v819_v46 = vsel %vm663_vm2, %v814_v20, %v818_v25  ;;  %v862_v25 = vor.u32 %v860_v10, %v858_v49  ;;  %v11212_v10 = vld [vmem:[#allocation5 + $0x1c0] sm:$0xff]  }
 0x249   : > { %2417 = vmatmul.mubr.bf16.gmra.mrb[52].mxu0 %v12531_v26 }
 0x24a   : > { %2424 = vmatprep.mubr.bf16.mxu0 %v787_v11  ;;  %v826_v11 = vrot.slane %v824_v6, 1 }
 0x24c   : > { %v827_v34 = vsel %vm663_vm2, %v822_v5, %v826_v11  ;;  %v830_v23 = vor.u32 %v828_v7, %v826_v11  ;;  %v874_v11 = vrot.slane %v872_v14, 1  ;;  %v11216_v14 = vld [vmem:[#allocation5 + $0x1e0] sm:$0xff]  }
 0x24e   : > { %v835_v35 = vsel %vm663_vm2, %v830_v23, %v834_v24  ;;  %v878_v63 = vor.u32 %v876_v18, %v874_v11  ;;  %v932_v18 = vrot.slane %v12498_v8, 1  ;;  %v936_v8 = vrot.slane %v12514_v0, 1 }
 0x251   : > { %2425 = vmatmul.mubr.bf16.gmra.mrb[56].mxu0 %v12539_v42 }
 0x252   : > { %2432 = vmatprep.mubr.bf16.mxu0 %v795_v12  ;;  %v12603_v12 = vcombine.low %v12366_v32, %v12376_v47  ;;  %v848_v47 = vshll.u32 %v12611_v58, 16 }
 0x254   : > { %v840_v28 = vshll.u32 %v12603_v12, 16  ;;  %v844_v32 = vshrl.u32 %v12603_v12, 16  ;;  %v850_v48 = vrot.slane %v848_v47, 1  ;;  %v11205_v47 = vld [vmem:[#allocation5 + $0x188] sm:$0xff]  }
 0x256   : > { %v842_v16 = vrot.slane %v840_v28, 1 }
 0x258   : > { %v846_v41 = vor.u32 %v844_v32, %v842_v16  ;;  %v918_v32 = vrot.slane %v12445_v57, 1 }
 0x259   : > { %2433 = vmatmul.mubr.bf16.gmra.mrb[60].mxu0 %v12547_v2 }
 0x25a   : > { %2440 = vmatprep.mubr.bf16.mxu0 %v803_v44  ;;  %v843_v44 = vsel %vm663_vm2, %v838_v40, %v842_v16  ;;  %v851_v21 = vsel %vm663_vm2, %v846_v41, %v850_v48  ;;  %v916_v40 = vrot.slane %v12439_v61, 1  ;;  %v11206_v41 = vld [vmem:[#allocation5 + $0x190] sm:$0xff]   ;;  %v920_v61 = vrot.slane %v12451_v36, 1 }
 0x25c   : > { %v921_v57 = vsel %vm914_vm1, %v918_v32, %v920_v61 }
 0x261   : > { %2441 = vmatmul.mubr.bf16.gmra.mrb[64].mxu0 %v12555_v9 }
 0x262   : > { %2448 = vmatprep.mubr.bf16.mxu0 %v811_v3  ;;  %v854_v3 = vor.u32 %v852_v52, %v850_v48  ;;  %v11207_v48 = vld [vmem:[#allocation5 + $0x198] sm:$0xff]   ;;  %v922_v52 = vrot.slane %v12456_v50, 1 }
 0x264   : > { %v859_v20 = vsel %vm663_vm2, %v854_v3, %v858_v49  ;;  %v923_v36 = vsel %vm914_vm1, %v920_v61, %v922_v52  ;;  %v11210_v3 = vld [vmem:[#allocation5 + $0x1b0] sm:$0xff]   ;;  %v924_v49 = vrot.slane %v12464_v15, 1 }
 0x266   : > { %v925_v50 = vsel %vm914_vm1, %v922_v52, %v924_v49  ;;  %v2778_v52 = vld [vmem:[#allocation2 + $0x18] sm:$0xf] }
 0x269   : > { %2449 = vmatmul.mubr.bf16.gmra.mrb[68].mxu0 %v12563_v53 }
 0x26a   : > { %2456 = vmatprep.mubr.bf16.mxu0 %v819_v46  ;;  %v866_v46 = vrot.slane %v864_v37, 1  ;;  %v926_v37 = vrot.slane %v12472_v62, 1 }
 0x26c   : > { %v867_v6 = vsel %vm663_vm2, %v862_v25, %v866_v46  ;;  %v870_v5 = vor.u32 %v868_v55, %v866_v46  ;;  %v11213_v25 = vld [vmem:[#allocation5 + $0x1c8] sm:$0xff]   ;;  %v927_v15 = vsel %vm914_vm1, %v924_v49, %v926_v37  ;;  %v11214_v46 = vld [vmem:[#allocation5 + $0x1d0] sm:$0xff]   ;;  %v11215_v55 = vld [vmem:[#allocation5 + $0x1d8] sm:$0xff]  }
 0x26e   : > { %v875_v7 = vsel %vm663_vm2, %v870_v5, %v874_v11  ;;  %v930_v5 = vrot.slane %v12489_v43, 1  ;;  %v11217_v11 = vld [vmem:[#allocation5 + $0x1e8] sm:$0xff]  }
 0x270   : > { %v933_v43 = vsel %vm914_vm1, %v930_v5, %v932_v18 }
 0x271   : > { %2457 = vmatmul.mubr.bf16.gmra.mrb[72].mxu0 %v12571_v27 }
 0x272   : > { %2464 = vmatprep.mubr.bf16.mxu0 %v827_v34  ;;  %v12641_v34 = vld [vmem:[#allocation2 + $0xd8] ss:$0 sps:$4 sm:$0x11]  }
 0x273   : > { %v880_v39 = vshll.u32 %v12641_v34, 16 }
 0x275   : > { %v882_v23 = vrot.slane %v880_v39, 1  ;;  %v934_v39 = vrot.slane %v12506_v45, 1  ;;  %v938_v45 = vrot.slane %v12523_v51, 1  ;;  %v944_v51 = vrot.slane %v12547_v2, 1 }
 0x276   : > { %v950_v2 = vrot.slane %v12571_v27, 1  ;;  %v956_v27 = vrot.slane %v12595_v31, 1 }
 0x277   : > { %v883_v24 = vsel %vm663_vm2, %v878_v63, %v882_v23  ;;  %v935_v63 = vsel %vm914_vm1, %v932_v18, %v934_v39  ;;  %v11219_v23 = vld [vmem:[#allocation5 + $0x1f8] sm:$0xff]  }
 0x279   : > { %2465 = vmatmul.mubr.bf16.gmra.mrb[76].mxu0 %v12579_v60 }
 0x27a   : > { %2472 = vmatprep.mubr.bf16.mxu0 %v835_v35  ;;  %v497_v35 = vld [vmem:[#allocation2] sm:$0xe] }
 0x27b   : > { %v8946_v19 = vcombine.low %v497_v35, %v12433_v54  ;;  %v919_v54 = vsel %vm914_vm1, %v916_v40, %v918_v32  ;;  %v939_v35 = vsel %vm914_vm1, %v936_v8, %v938_v45 }
 0x27d   : > { %v915_v28 = vrot.slane %v8946_v19, 1  ;;  %v940_v19 = vrot.slane %v12531_v26, 1  ;;  %v946_v26 = vrot.slane %v12555_v9, 1  ;;  %v952_v9 = vrot.slane %v12579_v60, 1 }
 0x27e   : > { %v958_v60 = vrot.slane %v12603_v12, 1 }
 0x27f   : > { %v917_v16 = vsel %vm914_vm1, %v915_v28, %v916_v40  ;;  %v941_v0 = vsel %vm914_vm1, %v938_v45, %v940_v19  ;;  %v942_v28 = vrot.slane %v12539_v42, 1  ;;  %v948_v42 = vrot.slane %v12563_v53, 1 }
 0x280   : > { %v954_v53 = vrot.slane %v12587_v30, 1 }
 0x281   : > { %2473 = vmatmul.mubr.bf16.gmra.mrb[80].mxu0 %v12587_v30  ;;  %v943_v40 = vsel %vm914_vm1, %v940_v19, %v942_v28  ;;  %v949_v32 = vsel %vm914_vm1, %v946_v26, %v948_v42  ;;  %v960_v30 = vrot.slane %v12611_v58, 1  ;;  %v11235_v19 = vld [vmem:[#allocation5 + $0x218] sm:$0xff]  }
 0x282   : > { %2480 = vmatprep.mubr.bf16.mxu0 %v843_v44  ;;  %v11204_v44 = vld [vmem:[#allocation5 + $0x180] sm:$0xff]   ;;  %v957_v61 = vsel %vm914_vm1, %v954_v53, %v956_v27 }
 0x289   : > { %2481 = vmatmul.mubr.bf16.gmra.mrb[84].mxu0 %v12595_v31  ;;  %v962_v31 = vrot.slane %v12619_v17, 1 }
 0x28a   : > { %2488 = vmatprep.mubr.bf16.mxu0 %v851_v21  ;;  %v11208_v21 = vld [vmem:[#allocation5 + $0x1a0] sm:$0xff]  }
 0x291   : > { %2489 = vmatmul.mubr.bf16.gmra.mrb[88].mxu0 %v12603_v12  ;;  %v964_v12 = vrot.slane %v12627_v56, 1 }
 0x292   : > { %2496 = vmatprep.mubr.bf16.mxu0 %v859_v20  ;;  %v11211_v20 = vld [vmem:[#allocation5 + $0x1b8] sm:$0xff]  }
 0x299   : > { %2497 = vmatmul.mubr.bf16.gmra.mrb[92].mxu0 %v12611_v58  ;;  %v965_v58 = vsel %vm914_vm1, %v962_v31, %v964_v12 }
 0x29a   : > { %2504 = vmatprep.mubr.bf16.mxu0 %v867_v6  ;;  %v928_v6 = vrot.slane %v12481_v1, 1 }
 0x29c   : > { %v929_v62 = vsel %vm914_vm1, %v926_v37, %v928_v6  ;;  %v931_v1 = vsel %vm914_vm1, %v928_v6, %v930_v5 }
 0x2a1   : > { %2505 = vmatmul.mubr.bf16.gmra.mrb[96].mxu0 %v12619_v17  ;;  %v11221_v17 = vld [vmem:[#allocation2 + $0x20] sm:$0xff]  }
 0x2a2   : > { %2512 = vmatprep.mubr.bf16.mxu0 %v875_v7  ;;  %v11218_v7 = vld [vmem:[#allocation5 + $0x1f0] sm:$0xff]   ;;  %v3007_v37 = vshll.u32 %v11221_v17, 16 }
 0x2a9   : > { %2513 = vmatmul.mubr.bf16.gmra.mrb[100].mxu0 %v12627_v56  ;;  %v968_v56 = vrot.slane %v12641_v34, 1  ;;  %v11226_v34 = vld [vmem:[#allocation5 + $0x208] sm:$0xff]  }
 0x2aa   : > { %2520 = vmatprep.mubr.bf16.mxu0 %v883_v24  ;;  %v937_v24 = vsel %vm914_vm1, %v934_v39, %v936_v8  ;;  %v11231_v8 = vld [vmem:[#allocation5 + $0x210] sm:$0xff]  }
 0x2b1   : > { %2521 = vmatmul.mubr.bf16.gmra.mrb[104].mxu0 %v12635_v59 }
 0x2b2   : > { %10035 = vmatprep.mubr.msk.bf16.mxu0 %vm11824_vm0, %v14861_v33 }
 0x2b9   : > { %10036 = vmatmul.mubr.bf16.vlgmr.msra.gmra.mrb[0].mxu0 %v917_v16  ;;  %v945_v16 = vsel %vm914_vm1, %v942_v28, %v944_v51 }
 0x2ba   : > { %3525 = vmatpush1.bf16.msra.mxu0 %v11204_v44  ;;  %10039 = vmatprep.mubr.msk.bf16.mxu0 %vm11824_vm0, %v14861_v33  ;;  %v947_v44 = vsel %vm914_vm1, %v944_v51, %v946_v26  ;;  %v11239_v51 = vld [vmem:[#allocation5 + $0x220] sm:$0xff]  }
 0x2bb   : > { %3526 = vmatprep.subr.bf16.mxu0 %v14862_v38 }
 0x2be   : > { %3527 = vmatpush1.bf16.msra.mxu0 %v11205_v47  ;;  %v951_v47 = vsel %vm914_vm1, %v948_v42, %v950_v2  ;;  %v11246_v42 = vld [vmem:[#allocation5 + $0xc0] sm:$0xff]  }
 0x2bf   : > { %3528 = vmatprep.subr.bf16.mxu0 %v14862_v38  ;;  %1639 = vmatpush1.bf16.msra.mxu1 %v11246_v42  ;;  %v4258_v42 = vld [vmem:[#allocation16 + $0x30] sm:$0xff] }
 0x2c0   : > { %1640 = vmatprep.subr.bf16.mxu1 %v14862_v38  ;;  %4338 = vperm.xlu0 %11113, %v4258_v42   ;;  %v14863_v42 = vld [vmem:[#allocation35_spill] sm:$0xff] }
 0x2c1   : > { %10040 = vmatmul.mubr.bf16.gmra.mrb[4].mxu0 %v919_v54  ;;  %v953_v54 = vsel %vm914_vm1, %v950_v2, %v952_v9 }
 0x2c2   : > { %10043 = vmatprep.mubr.msk.bf16.mxu0 %vm11824_vm0, %v14861_v33  ;;  %3529 = vmatpush1.bf16.msra.mxu0 %v11206_v41  ;;  %v955_v41 = vsel %vm914_vm1, %v952_v9, %v954_v53  ;;  %v11228_v9 = vld [vmem:[#allocation2 + $0x48] sm:$0xff]  }
 0x2c3   : > { %3530 = vmatprep.subr.bf16.mxu0 %v14862_v38 }
 0x2c6   : > { %3531 = vmatpush1.bf16.msra.mxu0 %v11207_v48  ;;  %v959_v48 = vsel %vm914_vm1, %v956_v27, %v958_v60  ;;  %v11248_v27 = vld [vmem:[#allocation5 + $0xc8] sm:$0xff]  }
 0x2c7   : > { %3532 = vmatprep.subr.bf16.mxu0 %v14862_v38  ;;  %1641 = vmatpush1.bf16.msra.mxu1 %v11248_v27 }
 0x2c8   : > { %1642 = vmatprep.subr.bf16.mxu1 %v14862_v38 }
 0x2c9   : > { %10044 = vmatmul.mubr.bf16.gmra.mrb[8].mxu0 %v921_v57  ;;  %v961_v57 = vsel %vm914_vm1, %v958_v60, %v960_v30 }
 0x2ca   : > { %10047 = vmatprep.mubr.msk.bf16.mxu0 %vm11824_vm0, %v14861_v33  ;;  %3533 = vmatpush1.bf16.msra.mxu0 %v11208_v21  ;;  %v963_v21 = vsel %vm914_vm1, %v960_v30, %v962_v31  ;;  %v11249_v30 = vld [vmem:[#allocation5 + $0xd0] sm:$0xff]   ;;  %v3051_v31 = vshrl.u32 %v11228_v9, 16 }
 0x2cb   : > { %3534 = vmatprep.subr.bf16.mxu0 %v14862_v38  ;;  %1643 = vmatpush1.bf16.msra.mxu1 %v11249_v30 }
 0x2cc   : > { %1644 = vmatprep.subr.bf16.mxu1 %v14862_v38 }
 0x2ce   : > { %3535 = vmatpush1.bf16.msra.mxu0 %v11209_v4  ;;  %v2779_v4 = vld [vmem:[#allocation2 + $0x1c] sm:$0xf] }
 0x2cf   : > { %3536 = vmatprep.subr.bf16.mxu0 %v14862_v38 }
 0x2d1   : > { %10048 = vmatmul.mubr.bf16.gmra.mrb[12].mxu0 %v923_v36  ;;  %v9024_v36 = vcombine.low %v2778_v52, %v2779_v4  ;;  %v11252_v52 = vld [vmem:[#allocation5 + $0x230] sm:$0xff]  }
 0x2d2   : > { %10051 = vmatprep.mubr.msk.bf16.mxu0 %vm11824_vm0, %v14861_v33  ;;  %3537 = vmatpush1.bf16.msra.mxu0 %v11210_v3  ;;  %v966_v3 = vrot.slane %v12635_v59, 1 }
 0x2d3   : > { %3538 = vmatprep.subr.bf16.mxu0 %v14862_v38  ;;  %v3002_v49 = vshll.u32 %v9024_v36, 16 }
 0x2d4   : > { %v969_v6 = vsel %vm914_vm1, %v966_v3, %v968_v56  ;;  %v11232_v56 = vld [vmem:[#allocation2 + $0x60] sm:$0xff]  }
 0x2d6   : > { %3539 = vmatpush1.bf16.msra.mxu0 %v11211_v20  ;;  %v967_v20 = vsel %vm914_vm1, %v964_v12, %v966_v3  ;;  %v11251_v12 = vld [vmem:[#allocation5 + $0xd8] sm:$0xff]   ;;  %v11253_v3 = vld [vmem:[#allocation5 + $0xe0] sm:$0xff]  }
 0x2d7   : > { %3540 = vmatprep.subr.bf16.mxu0 %v14862_v38  ;;  %1645 = vmatpush1.bf16.msra.mxu1 %v11251_v12  ;;  %v11271_v12 = vld [vmem:[#allocation5 + $0x138] sm:$0xff]  }
 0x2d8   : > { %1646 = vmatprep.subr.bf16.mxu1 %v14862_v38 }
 0x2d9   : > { %10052 = vmatmul.mubr.bf16.gmra.mrb[16].mxu0 %v925_v50  ;;  %v3000_v50 = vshrl.u32 %v9024_v36, 16 }
 0x2da   : > { %10055 = vmatprep.mubr.msk.bf16.mxu0 %vm11824_vm0, %v14861_v33  ;;  %3541 = vmatpush1.bf16.msra.mxu0 %v11212_v10  ;;  %v3004_v10 = vrot.slane %v3002_v49, 1 }
 0x2db   : > { %3542 = vmatprep.subr.bf16.mxu0 %v14862_v38  ;;  %1647 = vmatpush1.bf16.msra.mxu1 %v11253_v3 }
 0x2dc   : > { %1648 = vmatprep.subr.bf16.mxu1 %v14862_v38 }
 0x2de   : > { %3543 = vmatpush1.bf16.msra.mxu0 %v11213_v25  ;;  %v3005_v25 = vor.u32 %v3004_v10, %v3000_v50  ;;  %v11255_v50 = vld [vmem:[#allocation5 + $0xe8] sm:$0xff]  }
 0x2df   : > { %3544 = vmatprep.subr.bf16.mxu0 %v14862_v38  ;;  %1649 = vmatpush1.bf16.msra.mxu1 %v11255_v50  ;;  %v4262_v50 = vld [vmem:[#allocation16 + $0x50] sm:$0xff] }
 0x2e0   : > { %1650 = vmatprep.subr.bf16.mxu1 %v14862_v38 }
 0x2e1   : > { %10056 = vmatmul.mubr.bf16.gmra.mrb[20].mxu0 %v927_v15  ;;  %v3009_v15 = vrot.slane %v3007_v37, 1 }
 0x2e2   : > { %10059 = vmatprep.mubr.msk.bf16.mxu0 %vm11824_vm0, %v14861_v33  ;;  %3545 = vmatpush1.bf16.msra.mxu0 %v11214_v46  ;;  %v11223_v46 = vld [vmem:[#allocation2 + $0x28] sm:$0xff]  }
 0x2e3   : > { %3546 = vmatprep.subr.bf16.mxu0 %v14862_v38  ;;  %v3010_v59 = vsel %vm663_vm2, %v3005_v25, %v3009_v15  ;;  %v3019_v18 = vshrl.u32 %v11223_v46, 16  ;;  %v11256_v25 = vld [vmem:[#allocation5 + $0xf0] sm:$0xff]  }
 0x2e4   : > { %1651 = vmatpush1.bf16.msra.mxu1 %v11256_v25  ;;  %v1125_v25 = vshrl.u32 %v12150_v13, 16 }
 0x2e5   : > { %1652 = vmatprep.subr.bf16.mxu1 %v14862_v38 }
 0x2e6   : > { %3547 = vmatpush1.bf16.msra.mxu0 %v11215_v55  ;;  %v3011_v55 = vshrl.u32 %v11221_v17, 16 }
 0x2e7   : > { %3548 = vmatprep.subr.bf16.mxu0 %v14862_v38 }
 0x2e9   : > { %10060 = vmatmul.mubr.bf16.gmra.mrb[24].mxu0 %v929_v62  ;;  %v3015_v62 = vshll.u32 %v11223_v46, 16 }
 0x2ea   : > { %10063 = vmatprep.mubr.msk.bf16.mxu0 %vm11824_vm0, %v14861_v33  ;;  %3549 = vmatpush1.bf16.msra.mxu0 %v11216_v14  ;;  %v3013_v14 = vor.u32 %v3011_v55, %v3009_v15 }
 0x2eb   : > { %3550 = vmatprep.subr.bf16.mxu0 %v14862_v38  ;;  %v3017_v5 = vrot.slane %v3015_v62, 1 }
 0x2ed   : > { %v3021_v39 = vor.u32 %v3019_v18, %v3017_v5  ;;  %v11261_v18 = vld [vmem:[#allocation5 + $0x108] sm:$0xff]  }
 0x2ee   : > { %3551 = vmatpush1.bf16.msra.mxu0 %v11217_v11  ;;  %v11224_v11 = vld [vmem:[#allocation2 + $0x30] sm:$0xff]  }
 0x2ef   : > { %3552 = vmatprep.subr.bf16.mxu0 %v14862_v38  ;;  %v3027_v45 = vshrl.u32 %v11224_v11, 16 }
 0x2f1   : > { %10064 = vmatmul.mubr.bf16.gmra.mrb[28].mxu0 %v931_v1  ;;  %v11222_v1 = vld [vmem:[#allocation5 + $0x200] sm:$0xff]  }
 0x2f2   : > { %10067 = vmatprep.mubr.msk.bf16.mxu0 %vm11824_vm0, %v14861_v33  ;;  %3553 = vmatpush1.bf16.msra.mxu0 %v11218_v7  ;;  %v3018_v7 = vsel %vm663_vm2, %v3013_v14, %v3017_v5  ;;  %v11233_v14 = vld [vmem:[#allocation2 + $0x68] sm:$0xff]   ;;  %v11259_v5 = vld [vmem:[#allocation5 + $0x100] sm:$0xff]  }
 0x2f3   : > { %3554 = vmatprep.subr.bf16.mxu0 %v14862_v38 }
 0x2f6   : > { %3555 = vmatpush1.bf16.msra.mxu0 %v11219_v23  ;;  %v11225_v23 = vld [vmem:[#allocation2 + $0x38] sm:$0xff]  }
 0x2f7   : > { %10143 = vmatprep.subr.bf16.mxu0 %v14861_v33  ;;  %v3035_v26 = vshrl.u32 %v11225_v23, 16 }
 0x2f9   : > { %10068 = vmatmul.mubr.bf16.gmra.mrb[32].mxu0 %v933_v43  ;;  %v3023_v43 = vshll.u32 %v11224_v11, 16 }
 0x2fa   : > { %10071 = vmatprep.mubr.msk.bf16.mxu0 %vm11824_vm0, %v14861_v33 }
 0x301   : > { %10072 = vmatmul.mubr.bf16.gmra.mrb[36].mxu0 %v935_v63  ;;  %v3025_v63 = vrot.slane %v3023_v43, 1  ;;  %v11262_v43 = vld [vmem:[#allocation5 + $0x238] sm:$0xff]  }
 0x302   : > { %10075 = vmatprep.mubr.msk.bf16.mxu0 %vm11824_vm0, %v14861_v33 }
 0x309   : > { %10076 = vmatmul.mubr.bf16.gmra.mrb[40].mxu0 %v937_v24  ;;  %v3026_v24 = vsel %vm663_vm2, %v3021_v39, %v3025_v63 }
 0x30a   : > { %10079 = vmatprep.mubr.msk.bf16.mxu0 %vm11824_vm0, %v14861_v33 }
 0x311   : > { %10080 = vmatmul.mubr.bf16.gmra.mrb[44].mxu0 %v939_v35  ;;  %v3031_v35 = vshll.u32 %v11225_v23, 16 }
 0x312   : > { %10083 = vmatprep.mubr.msk.bf16.mxu0 %vm11824_vm0, %v14861_v33 }
 0x313   : > { %v3033_v28 = vrot.slane %v3031_v35, 1  ;;  %v11265_v35 = vld [vmem:[#allocation5 + $0x118] sm:$0xff]  }
 0x315   : > { %v3037_v2 = vor.u32 %v3035_v26, %v3033_v28 }
 0x319   : > { %10084 = vmatmul.mubr.bf16.gmra.mrb[48].mxu0 %v941_v0  ;;  %v3029_v0 = vor.u32 %v3027_v45, %v3025_v63  ;;  %v12800_v63 = vld [vmem:[#allocation2 + $0x70] sm:$0xff]  }
 0x31a   : > { %10087 = vmatprep.mubr.msk.bf16.mxu0 %vm11824_vm0, %v14861_v33  ;;  %v3087_v45 = vshll.u32 %v12800_v63, 16 }
 0x321   : > { %10088 = vmatmul.mubr.bf16.gmra.mrb[52].mxu0 %v943_v40  ;;  %v11227_v40 = vld [vmem:[#allocation2 + $0x40] sm:$0xff]  }
 0x322   : > { %10091 = vmatprep.mubr.msk.bf16.mxu0 %vm11824_vm0, %v14861_v33  ;;  %v3043_v53 = vshrl.u32 %v11227_v40, 16 }
 0x329   : > { %10092 = vmatmul.mubr.bf16.gmra.mrb[56].mxu0 %v945_v16  ;;  %v3034_v16 = vsel %vm663_vm2, %v3029_v0, %v3033_v28  ;;  %v3089_v0 = vrot.slane %v3087_v45, 1  ;;  %v12807_v28 = vld [vmem:[#allocation2 + $0x78] sm:$0xff]  }
 0x32a   : > { %10095 = vmatprep.mubr.msk.bf16.mxu0 %vm11824_vm0, %v14861_v33  ;;  %v3095_v26 = vshll.u32 %v12807_v28, 16 }
 0x331   : > { %10096 = vmatmul.mubr.bf16.gmra.mrb[60].mxu0 %v947_v44  ;;  %v3039_v44 = vshll.u32 %v11227_v40, 16 }
 0x332   : > { %10099 = vmatprep.mubr.msk.bf16.mxu0 %vm11824_vm0, %v14861_v33 }
 0x339   : > { %10100 = vmatmul.mubr.bf16.gmra.mrb[64].mxu0 %v949_v32  ;;  %v11244_v32 = vld [vmem:[#allocation5 + $0x228] sm:$0xff]  }
 0x33a   : > { %10103 = vmatprep.mubr.msk.bf16.mxu0 %vm11824_vm0, %v14861_v33 }
 0x341   : > { %10104 = vmatmul.mubr.bf16.gmra.mrb[68].mxu0 %v951_v47  ;;  %v3041_v47 = vrot.slane %v3039_v44, 1  ;;  %v11268_v44 = vld [vmem:[#allocation5 + $0x128] sm:$0xff]  }
 0x342   : > { %10107 = vmatprep.mubr.msk.bf16.mxu0 %vm11824_vm0, %v14861_v33 }
 0x349   : > { %10108 = vmatmul.mubr.bf16.gmra.mrb[72].mxu0 %v953_v54  ;;  %v3042_v54 = vsel %vm663_vm2, %v3037_v2, %v3041_v47  ;;  %v3097_v2 = vrot.slane %v3095_v26, 1 }
 0x34a   : > { %10111 = vmatprep.mubr.msk.bf16.mxu0 %vm11824_vm0, %v14861_v33 }
 0x351   : > { %10112 = vmatmul.mubr.bf16.gmra.mrb[76].mxu0 %v955_v41  ;;  %v3047_v41 = vshll.u32 %v11228_v9, 16 }
 0x352   : > { %10115 = vmatprep.mubr.msk.bf16.mxu0 %vm11824_vm0, %v14861_v33 }
 0x353   : > { %v3049_v60 = vrot.slane %v3047_v41, 1 }
 0x355   : > { %v3053_v4 = vor.u32 %v3051_v31, %v3049_v60  ;;  %v1121_v31 = vshll.u32 %v12150_v13, 16 }
 0x359   : > { %10116 = vmatmul.mubr.bf16.gmra.mrb[80].mxu0 %v957_v61  ;;  %v3045_v61 = vor.u32 %v3043_v53, %v3041_v47  ;;  %v12814_v47 = vld [vmem:[#allocation2 + $0x80] sm:$0xff]   ;;  %v11460_v53 = vld [vmem:[#allocation2 + $0xc] sm:$0xf] }
 0x35a   : > { %10119 = vmatprep.mubr.msk.bf16.mxu0 %vm11824_vm0, %v14861_v33 }
 0x361   : > { %10120 = vmatmul.mubr.bf16.gmra.mrb[84].mxu0 %v959_v48  ;;  %v11229_v48 = vld [vmem:[#allocation2 + $0x50] sm:$0xff]  }
 0x362   : > { %10123 = vmatprep.mubr.msk.bf16.mxu0 %vm11824_vm0, %v14861_v33  ;;  %v3059_v49 = vshrl.u32 %v11229_v48, 16 }
 0x369   : > { %10124 = vmatmul.mubr.bf16.gmra.mrb[88].mxu0 %v961_v57  ;;  %v3050_v57 = vsel %vm663_vm2, %v3045_v61, %v3049_v60  ;;  %v3099_v60 = vshrl.u32 %v12807_v28, 16 }
 0x36a   : > { %10127 = vmatprep.mubr.msk.bf16.mxu0 %vm11824_vm0, %v14861_v33 }
 0x371   : > { %10128 = vmatmul.mubr.bf16.gmra.mrb[92].mxu0 %v963_v21  ;;  %v3055_v21 = vshll.u32 %v11229_v48, 16 }
 0x372   : > { %10131 = vmatprep.mubr.msk.bf16.mxu0 %vm11824_vm0, %v14861_v33 }
 0x379   : > { %10132 = vmatmul.mubr.bf16.gmra.mrb[96].mxu0 %v965_v58  ;;  %v3057_v58 = vrot.slane %v3055_v21, 1  ;;  %v4260_v21 = vld [vmem:[#allocation16 + $0x40] sm:$0xff] }
 0x37a   : > { %10135 = vmatprep.mubr.msk.bf16.mxu0 %vm11824_vm0, %v14861_v33  ;;  %4348 = vperm.xlu1 %11114, %v4260_v21   ;;  %v14864_v21 = vld [vmem:[#allocation36_spill] sm:$0xff] }
 0x37b   : > { %v3061_v10 = vor.u32 %v3059_v49, %v3057_v58  ;;  %v4261_v49 = vld [vmem:[#allocation16 + $0x48] sm:$0xff] }
 0x37e   : > { %4353 = vperm.xlu1 %11114, %v4261_v49   ;;  %v12862_v49 = vld [vmem:[#allocation2 + $0xa8] sm:$0xff]  }
 0x381   : > { %10136 = vmatmul.mubr.bf16.gmra.mrb[100].mxu0 %v967_v20 }
 0x382   : > { %10139 = vmatprep.mubr.msk.bf16.mxu0 %vm11824_vm0, %v14861_v33 }
 0x389   : > { %10140 = vmatmul.mubr.bf16.gmra.mrb[104].mxu0 %v969_v6  ;;  %v3071_v6 = vshll.u32 %v11232_v56, 16 }
 0x38a   : > { %3556 = vmatprep.mubr.bf16.mxu0 %v3010_v59  ;;  %v11258_v59 = vld [vmem:[#allocation5 + $0xf8] sm:$0xff]  }
 0x38b   : > { %v3073_v62 = vrot.slane %v3071_v6, 1  ;;  %1653 = vmatpush1.bf16.msra.mxu1 %v11258_v59  ;;  %v4264_v6 = vld [vmem:[#allocation16 + $0x60] sm:$0xff] }
 0x38c   : > { %1654 = vmatprep.subr.bf16.mxu1 %v14862_v38 }
 0x38f   : > { %1655 = vmatpush1.bf16.msra.mxu1 %v11259_v5  ;;  %v12832_v5 = vld [vmem:[#allocation2 + $0x90] sm:$0xff]  }
 0x390   : > { %1656 = vmatprep.subr.bf16.mxu1 %v14862_v38 }
 0x391   : > { %3557 = vmatmul.mubr.bf16.vlgmr.msra.gmra.mrb[0].mxu0 %v9024_v36  ;;  %v11230_v36 = vld [vmem:[#allocation2 + $0x58] sm:$0xff]  }
 0x392   : > { %10144 = vmatpush3.bf16.msra.mxu0 %v11222_v1  ;;  %3564 = vmatprep.mubr.bf16.mxu0 %v3018_v7  ;;  %v3063_v20 = vshll.u32 %v11230_v36, 16  ;;  %v3075_v1 = vshrl.u32 %v11232_v56, 16  ;;  %v3079_v7 = vshll.u32 %v11233_v14, 16 }
 0x393   : > { %10145 = vmatprep.subr.bf16.mxu0 %v14861_v33  ;;  %1657 = vmatpush1.bf16.msra.mxu1 %v11261_v18 }
 0x394   : > { %v3065_v37 = vrot.slane %v3063_v20, 1  ;;  %v3081_v39 = vrot.slane %v3079_v7, 1  ;;  %1658 = vmatprep.subr.bf16.mxu1 %v14862_v38  ;;  %v4266_v7 = vld [vmem:[#allocation16 + $0x70] sm:$0xff] }
 0x396   : > { %10146 = vmatpush3.bf16.msra.mxu0 %v11226_v34  ;;  %v3066_v15 = vsel %vm663_vm2, %v3061_v10, %v3065_v37  ;;  %v3077_v34 = vor.u32 %v3075_v1, %v3073_v62 }
 0x397   : > { %10147 = vmatprep.subr.bf16.mxu0 %v14861_v33 }
 0x399   : > { %3565 = vmatmul.mubr.bf16.gmra.mrb[4].mxu0 %v11221_v17  ;;  %v3058_v17 = vsel %vm663_vm2, %v3053_v4, %v3057_v58  ;;  %v1123_v58 = vrot.slane %v1121_v31, 1  ;;  %v1149_v31 = vshrl.u32 %v14863_v42, 16 }
 0x39a   : > { %3572 = vmatprep.mubr.bf16.mxu0 %v3026_v24  ;;  %10148 = vmatpush3.bf16.msra.mxu0 %v11231_v8  ;;  %v3082_v8 = vsel %vm663_vm2, %v3077_v34, %v3081_v39  ;;  %v3083_v24 = vshrl.u32 %v11233_v14, 16  ;;  %v3119_v34 = vshll.u32 %v12832_v5, 16 }
 0x39b   : > { %10149 = vmatprep.subr.bf16.mxu0 %v14861_v33  ;;  %v1127_v59 = vor.u32 %v1125_v25, %v1123_v58  ;;  %v1157_v25 = vshrl.u32 %v14864_v21, 16 }
 0x39e   : > { %10150 = vmatpush3.bf16.msra.mxu0 %v11235_v19  ;;  %v3085_v19 = vor.u32 %v3083_v24, %v3081_v39  ;;  %v1133_v39 = vshrl.u32 %v12156_v22, 16 }
 0x39f   : > { %10151 = vmatprep.subr.bf16.mxu0 %v14861_v33 }
 0x3a1   : > { %3573 = vmatmul.mubr.bf16.gmra.mrb[8].mxu0 %v11223_v46  ;;  %v3067_v46 = vshrl.u32 %v11230_v36, 16 }
 0x3a2   : > { %3580 = vmatprep.mubr.bf16.mxu0 %v3034_v16  ;;  %10152 = vmatpush3.bf16.msra.mxu0 %v11239_v51  ;;  %v3090_v51 = vsel %vm663_vm2, %v3085_v19, %v3089_v0  ;;  %v3091_v16 = vshrl.u32 %v12800_v63, 16  ;;  %v12842_v19 = vld [vmem:[#allocation2 + $0x98] sm:$0xff]  }
 0x3a3   : > { %10153 = vmatprep.subr.bf16.mxu0 %v14861_v33  ;;  %v3069_v55 = vor.u32 %v3067_v46, %v3065_v37  ;;  %v3107_v37 = vshrl.u32 %v12814_v47, 16  ;;  %v4263_v46 = vld [vmem:[#allocation16 + $0x58] sm:$0xff]  ;;  %v3127_v26 = vshll.u32 %v12842_v19, 16 }
 0x3a4   : > { %4363 = vperm.xlu1 %11114, %v4263_v46  }
 0x3a6   : > { %10154 = vmatpush3.bf16.msra.mxu0 %v11244_v32  ;;  %v3093_v32 = vor.u32 %v3091_v16, %v3089_v0  ;;  %v4269_v0 = vld [vmem:[#allocation16 + $0x88] sm:$0xff]  ;;  %v3123_v16 = vshrl.u32 %v12832_v5, 16 }
 0x3a7   : > { %10155 = vmatprep.subr.bf16.mxu0 %v14861_v33 }
 0x3a8   : > { %v3098_v61 = vsel %vm663_vm2, %v3093_v32, %v3097_v2  ;;  %v1145_v32 = vshll.u32 %v14863_v42, 16 }
 0x3a9   : > { %3581 = vmatmul.mubr.bf16.gmra.mrb[12].mxu0 %v11224_v11  ;;  %v3074_v11 = vsel %vm663_vm2, %v3069_v55, %v3073_v62 }
 0x3aa   : > { %3588 = vmatprep.mubr.bf16.mxu0 %v3042_v54  ;;  %10156 = vmatpush3.bf16.msra.mxu0 %v11252_v52  ;;  %v11459_v54 = vld [vmem:[#allocation2 + $0x10] sm:$0xf]  ;;  %v4259_v52 = vld [vmem:[#allocation16 + $0x38] sm:$0xff] }
 0x3ab   : > { %10157 = vmatprep.subr.bf16.mxu0 %v14861_v33  ;;  %v8947_v41 = vcombine.low %v11460_v53, %v11459_v54  ;;  %4343 = vperm.xlu0 %11113, %v4259_v52   ;;  %v1147_v53 = vrot.slane %v1145_v32, 1  ;;  %v4275_v52 = vld [vmem:[#allocation16 + $0xb8] sm:$0xff] }
 0x3ad   : > { %v1116_v27 = vshll.u32 %v8947_v41, 16  ;;  %v1114_v30 = vshrl.u32 %v8947_v41, 16 }
 0x3ae   : > { %10158 = vmatpush3.bf16.msra.mxu0 %v11262_v43 }
 0x3af   : > { %5993 = vmatprep.subr.bf16.mxu0 %v14862_v38  ;;  %4358 = vperm.xlu0 %11113, %v4262_v50  }
 0x3b1   : > { %3589 = vmatmul.mubr.bf16.gmra.mrb[16].mxu0 %v11225_v23  ;;  %v11263_v23 = vld [vmem:[#allocation5 + $0x110] sm:$0xff]  }
 0x3b2   : > { %3596 = vmatprep.mubr.bf16.mxu0 %v3050_v57  ;;  %1659 = vmatpush1.bf16.msra.mxu1 %v11263_v23  ;;  %v1118_v57 = vrot.slane %v1116_v27, 1  ;;  %v4267_v23 = vld [vmem:[#allocation16 + $0x78] sm:$0xff]  ;;  %v12852_v27 = vld [vmem:[#allocation2 + $0xa0] sm:$0xff]  }
 0x3b3   : > { %1660 = vmatprep.subr.bf16.mxu1 %v14862_v38  ;;  %4368 = vperm.xlu0 %11113, %v4264_v6   ;;  %v4279_v6 = vld [vmem:[#allocation16 + $0xd8] sm:$0xff] }
 0x3b4   : > { %v1119_v4 = vor.u32 %v1118_v57, %v1114_v30  ;;  %v3131_v30 = vshrl.u32 %v12842_v19, 16  ;;  %v3135_v57 = vshll.u32 %v12852_v27, 16 }
 0x3b6   : > { %1661 = vmatpush1.bf16.msra.mxu1 %v11265_v35  ;;  %v1124_v20 = vsel %vm663_vm2, %v1119_v4, %v1123_v58  ;;  %v3121_v35 = vrot.slane %v3119_v34, 1  ;;  %v4276_v4 = vld [vmem:[#allocation16 + $0xc0] sm:$0xff]  ;;  %v1151_v58 = vor.u32 %v1149_v31, %v1147_v53  ;;  %v3147_v34 = vshrl.u32 %v12862_v49, 16 }
 0x3b7   : > { %1662 = vmatprep.subr.bf16.mxu1 %v14862_v38  ;;  %1670 = vmatprep.mubr.bf16.mxu1 %v1124_v20  ;;  %v4277_v20 = vld [vmem:[#allocation16 + $0xc8] sm:$0xff] }
 0x3b8   : > { %4378 = vperm.xlu0 %11113, %v4266_v7   ;;  %v4281_v7 = vld [vmem:[#allocation16 + $0xe8] sm:$0xff] }
 0x3b9   : > { %3597 = vmatmul.mubr.bf16.gmra.mrb[20].mxu0 %v11227_v40  ;;  %v11266_v40 = vld [vmem:[#allocation5 + $0x120] sm:$0xff]  }
 0x3ba   : > { %3604 = vmatprep.mubr.bf16.mxu0 %v3058_v17  ;;  %1663 = vmatpush1.bf16.msra.mxu1 %v11266_v40  ;;  %v12822_v17 = vld [vmem:[#allocation2 + $0x88] sm:$0xff]  }
 0x3bb   : > { %1664 = vmatprep.subr.bf16.mxu1 %v14862_v38  ;;  %v3115_v43 = vshrl.u32 %v12822_v17, 16 }
 0x3be   : > { %1665 = vmatpush1.bf16.msra.mxu1 %v11268_v44  ;;  %v1141_v44 = vshrl.u32 %v12164_v29, 16 }
 0x3bf   : > { %1666 = vmatprep.subr.bf16.mxu1 %v14862_v38 }
 0x3c1   : > { %3605 = vmatmul.mubr.bf16.gmra.mrb[24].mxu0 %v11228_v9  ;;  %v11269_v9 = vld [vmem:[#allocation5 + $0x130] sm:$0xff]  }
 0x3c2   : > { %3612 = vmatprep.mubr.bf16.mxu0 %v3066_v15  ;;  %1667 = vmatpush1.bf16.msra.mxu1 %v11269_v9  ;;  %v1129_v15 = vshll.u32 %v12156_v22, 16  ;;  %v4272_v9 = vld [vmem:[#allocation16 + $0xa0] sm:$0xff] }
 0x3c3   : > { %1668 = vmatprep.subr.bf16.mxu1 %v14862_v38 }
 0x3c4   : > { %v1131_v55 = vrot.slane %v1129_v15, 1  ;;  %v14865_v15 = vld [vmem:[#allocation37_spill] sm:$0xff] }
 0x3c5   : > { %v1161_v46 = vshll.u32 %v14865_v15, 16 }
 0x3c6   : > { %1669 = vmatpush1.bf16.msra.mxu1 %v11271_v12  ;;  %v1132_v1 = vsel %vm663_vm2, %v1127_v59, %v1131_v55  ;;  %v1135_v24 = vor.u32 %v1133_v39, %v1131_v55  ;;  %v1153_v12 = vshll.u32 %v14864_v21, 16  ;;  %v4280_v59 = vld [vmem:[#allocation16 + $0xe0] sm:$0xff] }
 0x3c7   : > { %10459 = vmatprep.subr.bf16.mxu1 %v14862_v38 }
 0x3c9   : > { %3613 = vmatmul.mubr.bf16.gmra.mrb[28].mxu0 %v11229_v48  ;;  %v3103_v48 = vshll.u32 %v12814_v47, 16  ;;  %1671 = vmatmul.mubr.bf16.vlgmr.msra.gmra.mrb[0].mxu1 %v8947_v41  ;;  %v3129_v41 = vrot.slane %v3127_v26, 1  ;;  %v4286_v26 = vld [vmem:[#allocation16 + $0x110] sm:$0xff] }
 0x3ca   : > { %3620 = vmatprep.mubr.bf16.mxu0 %v3074_v11  ;;  %v4265_v11 = vld [vmem:[#allocation16 + $0x68] sm:$0xff]  ;;  %1678 = vmatprep.mubr.bf16.mxu1 %v1132_v1  ;;  %v12872_v1 = vld [vmem:[#allocation2 + $0xb0] sm:$0xff]  }
 0x3cb   : > { %v3105_v3 = vrot.slane %v3103_v48, 1  ;;  %4373 = vperm.xlu1 %11114, %v4265_v11   ;;  %v4274_v48 = vld [vmem:[#allocation16 + $0xb0] sm:$0xff]  ;;  %v3151_v39 = vshll.u32 %v12872_v1, 16 }
 0x3cd   : > { %v3109_v62 = vor.u32 %v3107_v37, %v3105_v3  ;;  %v3139_v37 = vshrl.u32 %v12852_v27, 16 }
 0x3cf   : > { %4383 = vperm.xlu1 %11114, %v4267_v23   ;;  %v14866_v23 = vld [vmem:[#allocation38_spill] sm:$0xff] }
 0x3d0   : > { %v1173_v32 = vshrl.u32 %v14866_v23, 16 }
 0x3d1   : > { %3621 = vmatmul.mubr.bf16.gmra.mrb[32].mxu0 %v11230_v36  ;;  %v3101_v36 = vor.u32 %v3099_v60, %v3097_v2  ;;  %1679 = vmatmul.mubr.bf16.gmra.mrb[4].mxu1 %v12150_v13  ;;  %v4271_v2 = vld [vmem:[#allocation16 + $0x98] sm:$0xff] }
 0x3d2   : > { %3628 = vmatprep.mubr.bf16.mxu0 %v3082_v8  ;;  %v4268_v8 = vld [vmem:[#allocation16 + $0x80] sm:$0xff] }
 0x3d3   : > { %v3106_v10 = vsel %vm663_vm2, %v3101_v36, %v3105_v3  ;;  %4388 = vperm.xlu0 %11113, %v4268_v8   ;;  %4393 = vperm.xlu1 %11114, %v4269_v0   ;;  %v1155_v36 = vrot.slane %v1153_v12, 1  ;;  %v3137_v3 = vrot.slane %v3135_v57, 1  ;;  %v1169_v8 = vshll.u32 %v14866_v23, 16  ;;  %v4290_v57 = vld [vmem:[#allocation16 + $0x130] sm:$0xff] }
 0x3d5   : > { %v1156_v50 = vsel %vm663_vm2, %v1151_v58, %v1155_v36  ;;  %v1159_v55 = vor.u32 %v1157_v25, %v1155_v36  ;;  %v4291_v36 = vld [vmem:[#allocation16 + $0x138] sm:$0xff]  ;;  %v4294_v25 = vld [vmem:[#allocation16 + $0x150] sm:$0xff] }
 0x3d7   : > { %4403 = vperm.xlu1 %11114, %v4271_v2   ;;  %v14867_v2 = vld [vmem:[#allocation39_spill] sm:$0xff] }
 0x3d9   : > { %3629 = vmatmul.mubr.bf16.gmra.mrb[36].mxu0 %v11232_v56  ;;  %v3111_v56 = vshll.u32 %v12822_v17, 16 }
 0x3da   : > { %3636 = vmatprep.mubr.bf16.mxu0 %v3090_v51  ;;  %v4270_v51 = vld [vmem:[#allocation16 + $0x90] sm:$0xff] }
 0x3db   : > { %4398 = vperm.xlu0 %11113, %v4270_v51   ;;  %v12882_v51 = vld [vmem:[#allocation2 + $0xb8] sm:$0xff]  }
 0x3df   : > { %4408 = vperm.xlu0 %11113, %v4272_v9   ;;  %v1177_v9 = vshll.u32 %v14867_v2, 16 }
 0x3e1   : > { %3637 = vmatmul.mubr.bf16.gmra.mrb[40].mxu0 %v11233_v14  ;;  %v3113_v14 = vrot.slane %v3111_v56, 1  ;;  %v3143_v56 = vshll.u32 %v12862_v49, 16 }
 0x3e2   : > { %3644 = vmatprep.mubr.bf16.mxu0 %v3098_v61  ;;  %v4273_v61 = vld [vmem:[#allocation16 + $0xa8] sm:$0xff] }
 0x3e3   : > { %v3114_v18 = vsel %vm663_vm2, %v3109_v62, %v3113_v14  ;;  %v3117_v13 = vor.u32 %v3115_v43, %v3113_v14  ;;  %4413 = vperm.xlu1 %11114, %v4273_v61   ;;  %4418 = vperm.xlu0 %11113, %v4274_v48   ;;  %v1163_v62 = vrot.slane %v1161_v46, 1  ;;  %v3141_v14 = vor.u32 %v3139_v37, %v3137_v3  ;;  %v4282_v43 = vld [vmem:[#allocation16 + $0xf0] sm:$0xff]  ;;  %v12892_v48 = vld [vmem:[#allocation2 + $0xc0] sm:$0xff]  }
 0x3e4   : > { %v3145_v11 = vrot.slane %v3143_v56, 1  ;;  %v3167_v12 = vshll.u32 %v12892_v48, 16  ;;  %v4293_v37 = vld [vmem:[#allocation16 + $0x148] sm:$0xff]  ;;  %v3171_v46 = vshrl.u32 %v12892_v48, 16 }
 0x3e6   : > { %v3149_v0 = vor.u32 %v3147_v34, %v3145_v11 }
 0x3e7   : > { %4423 = vperm.xlu1 %11114, %v4275_v52   ;;  %4428 = vperm.xlu0 %11113, %v4276_v4   ;;  %v1181_v52 = vshrl.u32 %v14867_v2, 16  ;;  %v14868_v4 = vld [vmem:[#allocation40_spill] sm:$0xff] }
 0x3e8   : > { %v1185_v58 = vshll.u32 %v14868_v4, 16 }
 0x3e9   : > { %3645 = vmatmul.mubr.bf16.gmra.mrb[44].mxu0 %v12800_v63  ;;  %v1137_v63 = vshll.u32 %v12164_v29, 16 }
 0x3ea   : > { %3652 = vmatprep.mubr.bf16.mxu0 %v3106_v10  ;;  %v4278_v10 = vld [vmem:[#allocation16 + $0xd0] sm:$0xff] }
 0x3eb   : > { %v1139_v45 = vrot.slane %v1137_v63, 1  ;;  %4433 = vperm.xlu1 %11114, %v4277_v20   ;;  %4438 = vperm.xlu0 %11113, %v4278_v10   ;;  %v1165_v63 = vshrl.u32 %v14865_v15, 16  ;;  %v1187_v20 = vrot.slane %v1185_v58, 1  ;;  %v3169_v10 = vrot.slane %v3167_v12, 1  ;;  %v12938_v58 = vld [vmem:[#allocation2 + $0xe0] sm:$0xff]  }
 0x3ed   : > { %v1140_v40 = vsel %vm663_vm2, %v1135_v24, %v1139_v45  ;;  %v1143_v54 = vor.u32 %v1141_v44, %v1139_v45  ;;  %v4283_v24 = vld [vmem:[#allocation16 + $0xf8] sm:$0xff]  ;;  %v4284_v45 = vld [vmem:[#allocation16 + $0x100] sm:$0xff]  ;;  %v3155_v44 = vshrl.u32 %v12872_v1, 16 }
 0x3ee   : > { %1686 = vmatprep.mubr.bf16.mxu1 %v1140_v40  ;;  %v3153_v40 = vrot.slane %v3151_v39, 1  ;;  %v12914_v39 = vld [vmem:[#allocation2 + $0xd0] sm:$0xff]  }
 0x3ef   : > { %1687 = vmatmul.mubr.bf16.gmra.mrb[8].mxu1 %v12156_v22  ;;  %v3125_v22 = vor.u32 %v3123_v16, %v3121_v35  ;;  %v1148_v60 = vsel %vm663_vm2, %v1143_v54, %v1147_v53  ;;  %4443 = vperm.xlu1 %11114, %v4279_v6   ;;  %v4287_v54 = vld [vmem:[#allocation16 + $0x118] sm:$0xff]  ;;  %v4288_v53 = vld [vmem:[#allocation16 + $0x120] sm:$0xff] }
 0x3f0   : > { %1694 = vmatprep.mubr.bf16.mxu1 %v1148_v60  ;;  %4448 = vperm.xlu0 %11113, %v4280_v59   ;;  %v3157_v61 = vor.u32 %v3155_v44, %v3153_v40  ;;  %v1189_v59 = vshrl.u32 %v14868_v4, 16 }
 0x3f1   : > { %3653 = vmatmul.mubr.bf16.gmra.mrb[48].mxu0 %v12807_v28  ;;  %v3122_v28 = vsel %vm663_vm2, %v3117_v13, %v3121_v35  ;;  %v1167_v13 = vor.u32 %v1165_v63, %v1163_v62  ;;  %v1171_v35 = vrot.slane %v1169_v8, 1  ;;  %v4297_v63 = vld [vmem:[#allocation16 + $0x168] sm:$0xff]  ;;  %v4298_v8 = vld [vmem:[#allocation16 + $0x170] sm:$0xff] }
 0x3f2   : > { %3660 = vmatprep.mubr.bf16.mxu0 %v3114_v18  ;;  %v1164_v18 = vsel %vm663_vm2, %v1159_v55, %v1163_v62  ;;  %v14869_v55 = vld [vmem:[#allocation41_spill] sm:$0xff] }
 0x3f3   : > { %4453 = vperm.xlu1 %11114, %v4281_v7   ;;  %v1172_v16 = vsel %vm663_vm2, %v1167_v13, %v1171_v35  ;;  %v1193_v62 = vshll.u32 %v14869_v55, 16  ;;  %v4296_v7 = vld [vmem:[#allocation16 + $0x160] sm:$0xff]  ;;  %v3183_v13 = vshll.u32 %v12914_v39, 16 }
 0x3f4   : > { %4458 = vperm.xlu0 %11113, %v4282_v43  }
 0x3f5   : > { %v1195_v43 = vrot.slane %v1193_v62, 1 }
 0x3f7   : > { %1695 = vmatmul.mubr.bf16.gmra.mrb[12].mxu1 %v12164_v29  ;;  %v3133_v29 = vor.u32 %v3131_v30, %v3129_v41  ;;  %4463 = vperm.xlu1 %11114, %v4283_v24  }
 0x3f8   : > { %1702 = vmatprep.mubr.bf16.mxu1 %v1156_v50  ;;  %4468 = vperm.xlu0 %11113, %v4284_v45  }
 0x3f9   : > { %3661 = vmatmul.mubr.bf16.gmra.mrb[52].mxu0 %v12814_v47  ;;  %v3130_v47 = vsel %vm663_vm2, %v3125_v22, %v3129_v41  ;;  %v1175_v22 = vor.u32 %v1173_v32, %v1171_v35  ;;  %v1179_v41 = vrot.slane %v1177_v9, 1  ;;  %v1197_v35 = vshrl.u32 %v14869_v55, 16  ;;  %v12926_v32 = vld [vmem:[#allocation2 + $0xd8] sm:$0xff]  }
 0x3fa   : > { %3668 = vmatprep.mubr.bf16.mxu0 %v3122_v28  ;;  %v4285_v28 = vld [vmem:[#allocation16 + $0x108] sm:$0xff] }
 0x3fb   : > { %4473 = vperm.xlu1 %11114, %v4285_v28   ;;  %v1180_v30 = vsel %vm663_vm2, %v1175_v22, %v1179_v41  ;;  %v4299_v28 = vld [vmem:[#allocation16 + $0x178] sm:$0xff]  ;;  %v3187_v22 = vshrl.u32 %v12914_v39, 16 }
 0x3fc   : > { %4478 = vperm.xlu0 %11113, %v4286_v26   ;;  %v1199_v26 = vor.u32 %v1197_v35, %v1195_v43 }
 0x3ff   : > { %1703 = vmatmul.mubr.bf16.gmra.mrb[16].mxu1 %v14863_v42  ;;  %v3159_v42 = vshll.u32 %v12882_v51, 16  ;;  %4483 = vperm.xlu1 %11114, %v4287_v54   ;;  %v4302_v54 = vld [vmem:[#allocation16 + $0x190] sm:$0xff] }
 0x400   : > { %1710 = vmatprep.mubr.bf16.mxu1 %v1164_v18  ;;  %4488 = vperm.xlu0 %11113, %v4288_v53   ;;  %v1191_v18 = vor.u32 %v1189_v59, %v1187_v20 }
 0x401   : > { %3669 = vmatmul.mubr.bf16.gmra.mrb[56].mxu0 %v12822_v17  ;;  %v3138_v17 = vsel %vm663_vm2, %v3133_v29, %v3137_v3  ;;  %v3161_v60 = vrot.slane %v3159_v42, 1  ;;  %v4292_v29 = vld [vmem:[#allocation16 + $0x140] sm:$0xff]  ;;  %v1183_v3 = vor.u32 %v1181_v52, %v1179_v41  ;;  %v3185_v42 = vrot.slane %v3183_v13, 1 }
 0x402   : > { %3676 = vmatprep.mubr.bf16.mxu0 %v3130_v47  ;;  %v4289_v47 = vld [vmem:[#allocation16 + $0x128] sm:$0xff]  ;;  %v3191_v41 = vshll.u32 %v12926_v32, 16 }
 0x403   : > { %4493 = vperm.xlu1 %11114, %v4289_v47   ;;  %v3162_v31 = vsel %vm663_vm2, %v3157_v61, %v3161_v60  ;;  %v1188_v56 = vsel %vm663_vm2, %v1183_v3, %v1187_v20  ;;  %v3189_v52 = vor.u32 %v3187_v22, %v3185_v42  ;;  %v4256_v3 = vld [vmem:[#allocation16 + $0x20] sm:$0xff] }
 0x404   : > { %4498 = vperm.xlu0 %11113, %v4290_v57   ;;  %v4303_v57 = vld [vmem:[#allocation16 + $0x198] sm:$0xff] }
 0x407   : > { %1711 = vmatmul.mubr.bf16.gmra.mrb[20].mxu1 %v14864_v21  ;;  %v3163_v21 = vshrl.u32 %v12882_v51, 16  ;;  %4503 = vperm.xlu1 %11114, %v4291_v36   ;;  %v4255_v36 = vld [vmem:[#allocation16 + $0x18] sm:$0xff] }
 0x408   : > { %1718 = vmatprep.mubr.bf16.mxu1 %v1172_v16  ;;  %4508 = vperm.xlu0 %11113, %v4292_v29   ;;  %v4300_v16 = vld [vmem:[#allocation16 + $0x180] sm:$0xff] }
 0x409   : > { %3677 = vmatmul.mubr.bf16.gmra.mrb[60].mxu0 %v12832_v5  ;;  %v3146_v5 = vsel %vm663_vm2, %v3141_v14, %v3145_v11  ;;  %v3165_v50 = vor.u32 %v3163_v21, %v3161_v60  ;;  %v4295_v14 = vld [vmem:[#allocation16 + $0x158] sm:$0xff]  ;;  %v14871_v60 = vld [vmem:[#allocation43_spill] sm:$0xff] }
 0x40a   : > { %3684 = vmatprep.mubr.bf16.mxu0 %v3138_v17  ;;  %v12902_v17 = vld [vmem:[#allocation2 + $0xc8] sm:$0xff]   ;;  %v12912_v11 = vld [vmem:[#allocation11 + $0xc0] sm:$0xff]   ;;  %v1209_v47 = vshll.u32 %v14871_v60, 16 }
 0x40b   : > { %4513 = vperm.xlu1 %11114, %v4293_v37   ;;  %v3175_v6 = vshll.u32 %v12902_v17, 16  ;;  %10475 = vmatpush1.bf16.msra.mxu1 %v12912_v11  ;;  %v3179_v45 = vshrl.u32 %v12902_v17, 16  ;;  %v1213_v37 = vshrl.u32 %v14871_v60, 16 }
 0x40c   : > { %4518 = vperm.xlu0 %11113, %v4294_v25   ;;  %10460 = vmatprep.subr.bf16.mxu1 %v14862_v38  ;;  %v1211_v12 = vrot.slane %v1209_v47, 1 }
 0x40d   : > { %v3177_v34 = vrot.slane %v3175_v6, 1 }
 0x40e   : > { %v1215_v6 = vor.u32 %v1213_v37, %v1211_v12  ;;  %v4305_v37 = vld [vmem:[#allocation16 + $0x1a8] sm:$0xff] }
 0x40f   : > { %1719 = vmatmul.mubr.bf16.gmra.mrb[24].mxu1 %v14865_v15  ;;  %v3170_v15 = vsel %vm663_vm2, %v3165_v50, %v3169_v10  ;;  %4523 = vperm.xlu1 %11114, %v4295_v14   ;;  %v3181_v44 = vor.u32 %v3179_v45, %v3177_v34  ;;  %v3195_v50 = vshrl.u32 %v12926_v32, 16 }
 0x410   : > { %1726 = vmatprep.mubr.bf16.mxu1 %v1180_v30  ;;  %4528 = vperm.xlu0 %11113, %v4296_v7   ;;  %v12936_v30 = vld [vmem:[#allocation11 + $0xc8] sm:$0xff]   ;;  %v12952_v7 = vld [vmem:[#allocation2 + $0xe8] sm:$0xff]  }
 0x411   : > { %3685 = vmatmul.mubr.bf16.gmra.mrb[64].mxu0 %v12842_v19  ;;  %v3154_v19 = vsel %vm663_vm2, %v3149_v0, %v3153_v40  ;;  %v14870_v0 = vld [vmem:[#allocation42_spill] sm:$0xff]  ;;  %v3186_v53 = vsel %vm663_vm2, %v3181_v44, %v3185_v42  ;;  %10476 = vmatpush1.bf16.msra.mxu1 %v12936_v30 }
 0x412   : > { %3692 = vmatprep.mubr.bf16.mxu0 %v3146_v5  ;;  %v3173_v5 = vor.u32 %v3171_v46, %v3169_v10  ;;  %v1201_v40 = vshll.u32 %v14870_v0, 16  ;;  %v1205_v61 = vshrl.u32 %v14870_v0, 16  ;;  %10461 = vmatprep.subr.bf16.mxu1 %v14862_v38  ;;  %v3199_v10 = vshll.u32 %v12938_v58, 16  ;;  %v4252_v46 = vld [vmem:[#allocation16] sm:$0xff]  ;;  %v14874_v42 = vld [vmem:[#allocation46_spill] sm:$0xff] }
 0x413   : > { %4533 = vperm.xlu1 %11114, %v4297_v63   ;;  %v3207_v63 = vshll.u32 %v12952_v7, 16  ;;  %v1237_v47 = vshrl.u32 %v14874_v42, 16 }
 0x414   : > { %v3178_v24 = vsel %vm663_vm2, %v3173_v5, %v3177_v34  ;;  %4538 = vperm.xlu0 %11113, %v4298_v8   ;;  %v3201_v14 = vrot.slane %v3199_v10, 1  ;;  %v3203_v34 = vshrl.u32 %v12938_v58, 16  ;;  %v14873_v8 = vld [vmem:[#allocation45_spill] sm:$0xff] }
 0x415   : > { %v1229_v44 = vshrl.u32 %v14873_v8, 16  ;;  %v11278_v10 = vld [vmem:[#allocation11 + $0xe0] sm:$0xff]  }
 0x416   : > { %v3205_v35 = vor.u32 %v3203_v34, %v3201_v14  ;;  %v11463_v34 = vld [vmem:[#allocation2 + $0x28] sm:$0xff]  }
 0x417   : > { %1727 = vmatmul.mubr.bf16.gmra.mrb[28].mxu1 %v14866_v23  ;;  %v1196_v23 = vsel %vm663_vm2, %v1191_v18, %v1195_v43  ;;  %4543 = vperm.xlu1 %11114, %v4299_v28   ;;  %v4253_v18 = vld [vmem:[#allocation16 + $0x8] sm:$0xff] }
 0x418   : > { %1734 = vmatprep.mubr.bf16.mxu1 %v1188_v56  ;;  %4548 = vperm.xlu0 %11113, %v4300_v16   ;;  %v14872_v56 = vld [vmem:[#allocation44_spill] sm:$0xff] }
 0x419   : > { %3693 = vmatmul.mubr.bf16.gmra.mrb[68].mxu0 %v12852_v27  ;;  %v1217_v25 = vshll.u32 %v14872_v56, 16 }
 0x41a   : > { %3700 = vmatprep.mubr.bf16.mxu0 %v3154_v19  ;;  %v1203_v19 = vrot.slane %v1201_v40, 1  ;;  %v12964_v40 = vld [vmem:[#allocation2 + $0xf0] ss:$0 sps:$4 sm:$0x11]  }
 0x41b   : > { %v1219_v59 = vrot.slane %v1217_v25, 1 }
 0x41c   : > { %v1204_v9 = vsel %vm663_vm2, %v1199_v26, %v1203_v19  ;;  %4558 = vperm.xlu0 %11113, %v4302_v54   ;;  %v1207_v21 = vor.u32 %v1205_v61, %v1203_v19  ;;  %v3211_v26 = vshrl.u32 %v12952_v7, 16  ;;  %v3215_v19 = vshll.u32 %v12964_v40, 16 }
 0x41d   : > { %v1220_v43 = vsel %vm663_vm2, %v1215_v6, %v1219_v59 }
 0x41e   : > { %v1212_v29 = vsel %vm663_vm2, %v1207_v21, %v1211_v12 }
 0x41f   : > { %1735 = vmatmul.mubr.bf16.gmra.mrb[32].mxu1 %v14867_v2  ;;  %v4301_v2 = vld [vmem:[#allocation16 + $0x188] sm:$0xff] }
 0x420   : > { %1742 = vmatprep.mubr.bf16.mxu1 %v1196_v23  ;;  %4553 = vperm.xlu1 %11114, %v4301_v2   ;;  %v1221_v23 = vshrl.u32 %v14872_v56, 16  ;;  %v1233_v2 = vshll.u32 %v14874_v42, 16 }
 0x421   : > { %3701 = vmatmul.mubr.bf16.gmra.mrb[72].mxu0 %v12862_v49 }
 0x422   : > { %3708 = vmatprep.mubr.bf16.mxu0 %v3162_v31  ;;  %v4254_v31 = vld [vmem:[#allocation16 + $0x10] sm:$0xff]  ;;  %v1223_v45 = vor.u32 %v1221_v23, %v1219_v59 }
 0x423   : > { %4318 = vperm.xlu0 %11113, %v4254_v31  }
 0x424   : > { %4563 = vperm.xlu1 %11114, %v4303_v57   ;;  %v14875_v57 = vld [vmem:[#allocation47_spill] sm:$0xff] }
 0x425   : > { %v1241_v31 = vshll.u32 %v14875_v57, 16 }
 0x427   : > { %1743 = vmatmul.mubr.bf16.gmra.mrb[36].mxu1 %v14868_v4  ;;  %v3193_v4 = vrot.slane %v3191_v41, 1  ;;  %4328 = vperm.xlu0 %11113, %v4256_v3   ;;  %v3217_v41 = vrot.slane %v3215_v19, 1  ;;  %v1243_v12 = vrot.slane %v1241_v31, 1  ;;  %v1245_v3 = vshrl.u32 %v14875_v57, 16 }
 0x428   : > { %1750 = vmatprep.mubr.bf16.mxu1 %v1204_v9  ;;  %4323 = vperm.xlu1 %11114, %v4255_v36   ;;  %v12974_v9 = vld [vmem:[#allocation11 + $0xd8] sm:$0xff]   ;;  %v11461_v36 = vld [vmem:[#allocation2 + $0x1c] sm:$0xf] }
 0x429   : > { %3709 = vmatmul.mubr.bf16.gmra.mrb[76].mxu0 %v12872_v1  ;;  %v3194_v20 = vsel %vm663_vm2, %v3189_v52, %v3193_v4  ;;  %v3197_v62 = vor.u32 %v3195_v50, %v3193_v4  ;;  %v2833_v52 = vld [vmem:[#allocation2 + $0x18] sm:$0xe]  ;;  %v1247_v6 = vor.u32 %v1245_v3, %v1243_v12 }
 0x42a   : > { %3716 = vmatprep.mubr.bf16.mxu0 %v3170_v15  ;;  %v4257_v15 = vld [vmem:[#allocation16 + $0x28] sm:$0xff] }
 0x42b   : > { %4308 = vperm.xlu0 %11113, %v4252_v46   ;;  %v3202_v5 = vsel %vm663_vm2, %v3197_v62, %v3201_v14 }
 0x42c   : > { %4333 = vperm.xlu1 %11114, %v4257_v15   ;;  %v11462_v15 = vld [vmem:[#allocation2 + $0x20] sm:$0xff]  }
 0x42d   : > { %v3250_v46 = vrot.slane %v11462_v15, 1 }
 0x42f   : > { %1751 = vmatmul.mubr.bf16.gmra.mrb[40].mxu1 %v14869_v55  ;;  %v12950_v55 = vld [vmem:[#allocation11 + $0xd0] sm:$0xff]  }
 0x430   : > { %1758 = vmatprep.mubr.bf16.mxu1 %v1212_v29  ;;  %10477 = vmatpush1.bf16.msra.mxu1 %v12950_v55  ;;  %v9052_v29 = vcombine.low %v2833_v52, %v11461_v36 }
 0x431   : > { %3717 = vmatmul.mubr.bf16.gmra.mrb[80].mxu0 %v12882_v51  ;;  %10462 = vmatprep.subr.bf16.mxu1 %v14862_v38 }
 0x432   : > { %3724 = vmatprep.mubr.bf16.mxu0 %v3178_v24  ;;  %4313 = vperm.xlu1 %11114, %v4253_v18   ;;  %v1225_v24 = vshll.u32 %v14873_v8, 16  ;;  %v3249_v25 = vrot.slane %v9052_v29, 1 }
 0x434   : > { %v1227_v13 = vrot.slane %v1225_v24, 1  ;;  %10478 = vmatpush1.bf16.msra.mxu1 %v12974_v9  ;;  %v3251_v14 = vsel %vm914_vm1, %v3249_v25, %v3250_v46  ;;  %v11279_v24 = vld [vmem:[#allocation11 + $0xe8] sm:$0xff]  }
 0x435   : > { %10463 = vmatprep.subr.bf16.mxu1 %v14862_v38 }
 0x436   : > { %v1228_v28 = vsel %vm663_vm2, %v1223_v45, %v1227_v13  ;;  %v1231_v54 = vor.u32 %v1229_v44, %v1227_v13  ;;  %4573 = vperm.xlu1 %11114, %v4305_v37   ;;  %v11467_v37 = vld [vmem:[#allocation2 + $0x48] sm:$0xff]  }
 0x437   : > { %1759 = vmatmul.mubr.bf16.gmra.mrb[44].mxu1 %v14870_v0  ;;  %v3209_v0 = vrot.slane %v3207_v63, 1  ;;  %v3252_v63 = vrot.slane %v11463_v34, 1 }
 0x438   : > { %1766 = vmatprep.mubr.bf16.mxu1 %v1220_v43  ;;  %10479 = vmatpush1.bf16.msra.mxu1 %v11278_v10  ;;  %v14877_v43 = vld [vmem:[#allocation49_spill] sm:$0xff] }
 0x439   : > { %3725 = vmatmul.mubr.bf16.gmra.mrb[84].mxu0 %v12892_v48  ;;  %v3210_v16 = vsel %vm663_vm2, %v3205_v35, %v3209_v0  ;;  %v3213_v22 = vor.u32 %v3211_v26, %v3209_v0  ;;  %10464 = vmatprep.subr.bf16.mxu1 %v14862_v38  ;;  %v3253_v13 = vsel %vm914_vm1, %v3250_v46, %v3252_v63  ;;  %v1261_v35 = vshrl.u32 %v14877_v43, 16  ;;  %v14878_v0 = vld [vmem:[#allocation50_spill] sm:$0xff] }
 0x43a   : > { %3732 = vmatprep.mubr.bf16.mxu0 %v3186_v53  ;;  %v1235_v53 = vrot.slane %v1233_v2, 1  ;;  %v14879_v2 = vld [vmem:[#allocation51_spill] sm:$0xff] }
 0x43c   : > { %v1236_v61 = vsel %vm663_vm2, %v1231_v54, %v1235_v53  ;;  %v1239_v21 = vor.u32 %v1237_v47, %v1235_v53  ;;  %10480 = vmatpush1.bf16.msra.mxu1 %v11279_v24  ;;  %v1273_v54 = vshll.u32 %v14879_v2, 16  ;;  %v11280_v53 = vld [vmem:[#allocation11 + $0xf0] sm:$0xff]   ;;  %v1277_v47 = vshrl.u32 %v14879_v2, 16 }
 0x43d   : > { %10465 = vmatprep.subr.bf16.mxu1 %v14862_v38 }
 0x43e   : > { %v1244_v4 = vsel %vm663_vm2, %v1239_v21, %v1243_v12  ;;  %v11466_v21 = vld [vmem:[#allocation2 + $0x40] sm:$0xff]  }
 0x43f   : > { %1767 = vmatmul.mubr.bf16.gmra.mrb[48].mxu1 %v14871_v60  ;;  %v3218_v60 = vsel %vm663_vm2, %v3213_v22, %v3217_v41  ;;  %v3258_v12 = vrot.slane %v11466_v21, 1  ;;  %v13075_v21 = vpop.permute.xlu1 %4348 }
 0x440   : > { %1774 = vmatprep.mubr.bf16.mxu1 %v1228_v28  ;;  %v11464_v28 = vld [vmem:[#allocation2 + $0x30] sm:$0xff]   ;;  %10481 = vmatpush1.bf16.msra.mxu1 %v11280_v53 }
 0x441   : > { %3733 = vmatmul.mubr.bf16.gmra.mrb[88].mxu0 %v12902_v17  ;;  %10466 = vmatprep.subr.bf16.mxu1 %v14862_v38 }
 0x442   : > { %3740 = vmatprep.mubr.bf16.mxu0 %v3194_v20  ;;  %v14876_v20 = vld [vmem:[#allocation48_spill] sm:$0xff] }
 0x443   : > { %v1249_v50 = vshll.u32 %v14876_v20, 16  ;;  %v1253_v18 = vshrl.u32 %v14876_v20, 16 }
 0x445   : > { %v1251_v59 = vrot.slane %v1249_v50, 1 }
 0x447   : > { %1775 = vmatmul.mubr.bf16.gmra.mrb[52].mxu1 %v14872_v56  ;;  %v4304_v56 = vld [vmem:[#allocation16 + $0x1a0] sm:$0xff]  ;;  %v1252_v62 = vsel %vm663_vm2, %v1247_v6, %v1251_v59  ;;  %v1255_v23 = vor.u32 %v1253_v18, %v1251_v59  ;;  %v11468_v18 = vld [vmem:[#allocation2 + $0x50] sm:$0xff]  }
 0x448   : > { %1782 = vmatprep.mubr.bf16.mxu1 %v1236_v61  ;;  %4568 = vperm.xlu0 %11113, %v4304_v56   ;;  %v1275_v61 = vrot.slane %v1273_v54, 1  ;;  %v3260_v56 = vrot.slane %v11467_v37, 1 }
 0x449   : > { %3741 = vmatmul.mubr.bf16.gmra.mrb[92].mxu0 %v12914_v39 }
 0x44a   : > { %3748 = vmatprep.mubr.bf16.mxu0 %v3202_v5  ;;  %v1257_v5 = vshll.u32 %v14877_v43, 16  ;;  %v1279_v52 = vor.u32 %v1277_v47, %v1275_v61  ;;  %v3261_v6 = vsel %vm914_vm1, %v3258_v12, %v3260_v56  ;;  %v11472_v47 = vld [vmem:[#allocation2 + $0x68] sm:$0xff]  }
 0x44f   : > { %1783 = vmatmul.mubr.bf16.gmra.mrb[56].mxu1 %v14873_v8  ;;  %v1259_v8 = vrot.slane %v1257_v5, 1 }
 0x450   : > { %1790 = vmatprep.mubr.bf16.mxu1 %v1244_v4 }
 0x451   : > { %3749 = vmatmul.mubr.bf16.gmra.mrb[96].mxu0 %v12926_v32  ;;  %v1260_v45 = vsel %vm663_vm2, %v1255_v23, %v1259_v8  ;;  %v1263_v26 = vor.u32 %v1261_v35, %v1259_v8  ;;  %v11469_v35 = vld [vmem:[#allocation2 + $0x58] sm:$0xff]  }
 0x452   : > { %3756 = vmatprep.mubr.bf16.mxu0 %v3210_v16  ;;  %v3254_v16 = vrot.slane %v11464_v28, 1 }
 0x454   : > { %v3255_v44 = vsel %vm914_vm1, %v3252_v63, %v3254_v16  ;;  %v11282_v63 = vld [vmem:[#allocation11 + $0x100] sm:$0xff]  }
 0x457   : > { %1791 = vmatmul.mubr.bf16.gmra.mrb[60].mxu1 %v14874_v42  ;;  %v1269_v42 = vshrl.u32 %v14878_v0, 16 }
 0x458   : > { %1798 = vmatprep.mubr.bf16.mxu1 %v1252_v62  ;;  %v14882_v62 = vld [vmem:[#allocation54_spill] sm:$0xff] }
 0x459   : > { %3757 = vmatmul.mubr.bf16.gmra.mrb[100].mxu0 %v12938_v58 }
 0x45a   : > { %3764 = vmatprep.mubr.bf16.mxu0 %v3218_v60 }
 0x45f   : > { %1799 = vmatmul.mubr.bf16.gmra.mrb[64].mxu1 %v14875_v57  ;;  %v14880_v57 = vld [vmem:[#allocation52_spill] sm:$0xff] }
 0x460   : > { %1806 = vmatprep.mubr.bf16.mxu1 %v1260_v45  ;;  %v1281_v31 = vshll.u32 %v14880_v57, 16  ;;  %v1285_v3 = vshrl.u32 %v14880_v57, 16  ;;  %v14883_v45 = vld [vmem:[#allocation55_spill] sm:$0xff] }
 0x461   : > { %3765 = vmatmul.mubr.bf16.gmra.mrb[104].mxu0 %v12952_v7 }
 0x462   : > { %10159 = vmatprep.mubr.msk.bf16.mxu0 %vm11824_vm0, %v14861_v33  ;;  %v1283_v4 = vrot.slane %v1281_v31, 1  ;;  %v13073_v31 = vpop.permute.xlu0 %4338 }
 0x464   : > { %v1284_v36 = vsel %vm663_vm2, %v1279_v52, %v1283_v4  ;;  %v1287_v25 = vor.u32 %v1285_v3, %v1283_v4  ;;  %v13082_v3 = vpop.permute.xlu1 %4353 }
 0x467   : > { %1807 = vmatmul.mubr.bf16.gmra.mrb[68].mxu1 %v14876_v20  ;;  %v14881_v20 = vld [vmem:[#allocation53_spill] sm:$0xff] }
 0x468   : > { %v1289_v50 = vshll.u32 %v14881_v20, 16  ;;  %v1293_v59 = vshrl.u32 %v14881_v20, 16 }
 0x469   : > { %10160 = vmatmul.mubr.bf16.vlgmr.msra.gmra.mrb[0].mxu0 %v3251_v14  ;;  %v1297_v14 = vshll.u32 %v14882_v62, 16 }
 0x46a   : > { %10163 = vmatprep.mubr.msk.bf16.mxu0 %vm11824_vm0, %v14861_v33  ;;  %5994 = vmatpush1.bf16.msra.mxu0 %v12912_v11  ;;  %v1265_v11 = vshll.u32 %v14878_v0, 16  ;;  %v1291_v15 = vrot.slane %v1289_v50, 1 }
 0x46b   : > { %5995 = vmatprep.subr.bf16.mxu0 %v14862_v38  ;;  %v1299_v34 = vrot.slane %v1297_v14, 1  ;;  %v13092_v14 = vpop.permute.xlu1 %4363 }
 0x46c   : > { %v1267_v19 = vrot.slane %v1265_v11, 1  ;;  %v1292_v46 = vsel %vm663_vm2, %v1287_v25, %v1291_v15  ;;  %v1295_v5 = vor.u32 %v1293_v59, %v1291_v15 }
 0x46e   : > { %5996 = vmatpush1.bf16.msra.mxu0 %v12936_v30  ;;  %v1268_v30 = vsel %vm663_vm2, %v1263_v26, %v1267_v19  ;;  %v1271_v41 = vor.u32 %v1269_v42, %v1267_v19  ;;  %v1300_v23 = vsel %vm663_vm2, %v1295_v5, %v1299_v34  ;;  %v1309_v19 = vshrl.u32 %v14883_v45, 16  ;;  %v11283_v42 = vld [vmem:[#allocation11 + $0x108] sm:$0xff]  }
 0x46f   : > { %5997 = vmatprep.subr.bf16.mxu0 %v14862_v38  ;;  %1814 = vmatprep.mubr.bf16.mxu1 %v1268_v30  ;;  %v14884_v30 = vld [vmem:[#allocation56_spill] sm:$0xff] }
 0x470   : > { %1815 = vmatmul.mubr.bf16.gmra.mrb[72].mxu1 %v14877_v43  ;;  %v3262_v43 = vrot.slane %v11468_v18, 1 }
 0x471   : > { %10164 = vmatmul.mubr.bf16.gmra.mrb[4].mxu0 %v3253_v13  ;;  %v1305_v13 = vshll.u32 %v14883_v45, 16 }
 0x472   : > { %10167 = vmatprep.mubr.msk.bf16.mxu0 %vm11824_vm0, %v14861_v33  ;;  %5998 = vmatpush1.bf16.msra.mxu0 %v12950_v55  ;;  %v11465_v55 = vld [vmem:[#allocation2 + $0x38] sm:$0xff]   ;;  %v3263_v8 = vsel %vm914_vm1, %v3260_v56, %v3262_v43  ;;  %v11474_v56 = vld [vmem:[#allocation2 + $0x70] sm:$0xff]  }
 0x473   : > { %5999 = vmatprep.subr.bf16.mxu0 %v14862_v38  ;;  %v3256_v22 = vrot.slane %v11465_v55, 1  ;;  %v1307_v28 = vrot.slane %v1305_v13, 1  ;;  %v3270_v25 = vrot.slane %v11474_v56, 1  ;;  %v11285_v13 = vld [vmem:[#allocation11 + $0x118] sm:$0xff]  }
 0x475   : > { %v3257_v60 = vsel %vm914_vm1, %v3254_v16, %v3256_v22  ;;  %v3259_v29 = vsel %vm914_vm1, %v3256_v22, %v3258_v12 }
 0x476   : > { %6000 = vmatpush1.bf16.msra.mxu0 %v12974_v9  ;;  %v1276_v9 = vsel %vm663_vm2, %v1271_v41, %v1275_v61  ;;  %v1317_v61 = vshrl.u32 %v14884_v30, 16 }
 0x477   : > { %6001 = vmatprep.subr.bf16.mxu0 %v14862_v38  ;;  %1822 = vmatprep.mubr.bf16.mxu1 %v1276_v9  ;;  %v11471_v9 = vld [vmem:[#allocation2 + $0xdc] sm:$0xff]  }
 0x478   : > { %1823 = vmatmul.mubr.bf16.gmra.mrb[76].mxu1 %v14878_v0  ;;  %v3264_v0 = vrot.slane %v11469_v35, 1  ;;  %v1325_v50 = vshrl.u32 %v11471_v9, 16 }
 0x479   : > { %10168 = vmatmul.mubr.bf16.gmra.mrb[8].mxu0 %v3255_v44  ;;  %1830 = vmatprep.mubr.bf16.mxu1 %v1284_v36  ;;  %v1313_v44 = vshll.u32 %v14884_v30, 16 }
 0x47a   : > { %10171 = vmatprep.mubr.msk.bf16.mxu0 %vm11824_vm0, %v14861_v33  ;;  %6002 = vmatpush1.bf16.msra.mxu0 %v11278_v10  ;;  %v11281_v10 = vld [vmem:[#allocation11 + $0xf8] sm:$0xff]   ;;  %v3265_v26 = vsel %vm914_vm1, %v3262_v43, %v3264_v0  ;;  %v11475_v43 = vld [vmem:[#allocation2 + $0x78] sm:$0xff]  }
 0x47b   : > { %6003 = vmatprep.subr.bf16.mxu0 %v14862_v38  ;;  %10482 = vmatpush1.bf16.msra.mxu1 %v11281_v10  ;;  %v1315_v55 = vrot.slane %v1313_v44, 1  ;;  %v3272_v5 = vrot.slane %v11475_v43, 1  ;;  %v11286_v43 = vld [vmem:[#allocation11 + $0x120] sm:$0xff]  }
 0x47c   : > { %10467 = vmatprep.subr.bf16.mxu1 %v14862_v38 }
 0x47d   : > { %v1319_v12 = vor.u32 %v1317_v61, %v1315_v55 }
 0x47e   : > { %6004 = vmatpush1.bf16.msra.mxu0 %v11279_v24  ;;  %v1301_v24 = vshrl.u32 %v14882_v62, 16 }
 0x47f   : > { %6005 = vmatprep.subr.bf16.mxu0 %v14862_v38  ;;  %10483 = vmatpush1.bf16.msra.mxu1 %v11282_v63 }
 0x480   : > { %1831 = vmatmul.mubr.bf16.gmra.mrb[80].mxu1 %v14879_v2  ;;  %10468 = vmatprep.subr.bf16.mxu1 %v14862_v38  ;;  %v1303_v11 = vor.u32 %v1301_v24, %v1299_v34  ;;  %v11470_v2 = vld [vmem:[#allocation2 + $0x60] sm:$0xff]   ;;  %v13102_v24 = vpop.permute.xlu1 %4373 }
 0x481   : > { %10172 = vmatmul.mubr.bf16.gmra.mrb[12].mxu0 %v3257_v60  ;;  %1838 = vmatprep.mubr.bf16.mxu1 %v1292_v46  ;;  %v3266_v54 = vrot.slane %v11470_v2, 1  ;;  %v1321_v60 = vshll.u32 %v11471_v9, 16 }
 0x482   : > { %10175 = vmatprep.mubr.msk.bf16.mxu0 %vm11824_vm0, %v14861_v33  ;;  %6006 = vmatpush1.bf16.msra.mxu0 %v11280_v53  ;;  %v1308_v16 = vsel %vm663_vm2, %v1303_v11, %v1307_v28  ;;  %v1311_v53 = vor.u32 %v1309_v19, %v1307_v28 }
 0x483   : > { %6007 = vmatprep.subr.bf16.mxu0 %v14862_v38  ;;  %10484 = vmatpush1.bf16.msra.mxu1 %v11283_v42  ;;  %v3267_v41 = vsel %vm914_vm1, %v3264_v0, %v3266_v54  ;;  %v1323_v52 = vrot.slane %v1321_v60, 1  ;;  %v11476_v0 = vld [vmem:[#allocation2 + $0x80] sm:$0xff]  }
 0x484   : > { %v1316_v22 = vsel %vm663_vm2, %v1311_v53, %v1315_v55  ;;  %10469 = vmatprep.subr.bf16.mxu1 %v14862_v38  ;;  %v3274_v11 = vrot.slane %v11476_v0, 1  ;;  %v11477_v53 = vld [vmem:[#allocation2 + $0x88] sm:$0xff]  }
 0x485   : > { %v1324_v4 = vsel %vm663_vm2, %v1319_v12, %v1323_v52  ;;  %v1327_v15 = vor.u32 %v1325_v50, %v1323_v52  ;;  %v3276_v55 = vrot.slane %v11477_v53, 1  ;;  %v11478_v12 = vld [vmem:[#allocation2 + $0x90] sm:$0xff]   ;;  %v11287_v53 = vld [vmem:[#allocation11 + $0x128] sm:$0xff]  }
 0x486   : > { %6008 = vmatpush1.bf16.msra.mxu0 %v11281_v10  ;;  %v11473_v10 = vld [vmem:[#allocation2 + $0xe4] ss:$0 sps:$4 sm:$0x11]   ;;  %v3275_v44 = vsel %vm914_vm1, %v3272_v5, %v3274_v11  ;;  %v3278_v52 = vrot.slane %v11478_v12, 1  ;;  %v11288_v12 = vld [vmem:[#allocation11 + $0x130] sm:$0xff]  }
 0x487   : > { %6009 = vmatprep.subr.bf16.mxu0 %v14862_v38  ;;  %v1329_v37 = vshll.u32 %v11473_v10, 16 }
 0x488   : > { %1839 = vmatmul.mubr.bf16.gmra.mrb[84].mxu1 %v14880_v57  ;;  %v3268_v57 = vrot.slane %v11472_v47, 1 }
 0x489   : > { %10176 = vmatmul.mubr.bf16.gmra.mrb[16].mxu0 %v3259_v29  ;;  %1846 = vmatprep.mubr.bf16.mxu1 %v1300_v23  ;;  %v13080_v29 = vpop.permute.xlu0 %4343  ;;  %v1331_v46 = vrot.slane %v1329_v37, 1  ;;  %v3279_v37 = vsel %vm914_vm1, %v3276_v55, %v3278_v52 }
 0x48a   : > { %10179 = vmatprep.mubr.msk.bf16.mxu0 %vm11824_vm0, %v14861_v33  ;;  %6010 = vmatpush1.bf16.msra.mxu0 %v11282_v63  ;;  %v3269_v36 = vsel %vm914_vm1, %v3266_v54, %v3268_v57  ;;  %v3271_v59 = vsel %vm914_vm1, %v3268_v57, %v3270_v25 }
 0x48b   : > { %6011 = vmatprep.subr.bf16.mxu0 %v14862_v38 }
 0x48e   : > { %6012 = vmatpush1.bf16.msra.mxu0 %v11283_v42 }
 0x48f   : > { %6013 = vmatprep.subr.bf16.mxu0 %v14862_v38 }
 0x490   : > { %1847 = vmatmul.mubr.bf16.gmra.mrb[88].mxu1 %v14881_v20  ;;  %v11284_v20 = vld [vmem:[#allocation11 + $0x110] sm:$0xff]  }
 0x491   : > { %10180 = vmatmul.mubr.bf16.gmra.mrb[20].mxu0 %v3261_v6  ;;  %1854 = vmatprep.mubr.bf16.mxu1 %v1308_v16  ;;  %v1332_v6 = vsel %vm663_vm2, %v1327_v15, %v1331_v46 }
 0x492   : > { %10183 = vmatprep.mubr.msk.bf16.mxu0 %vm11824_vm0, %v14861_v33  ;;  %10485 = vmatpush1.bf16.msra.mxu1 %v11284_v20 }
 0x493   : > { %6014 = vmatpush1.bf16.msra.mxu0 %v11284_v20  ;;  %10470 = vmatprep.subr.bf16.mxu1 %v14862_v38 }
 0x494   : > { %6015 = vmatprep.subr.bf16.mxu0 %v14862_v38 }
 0x496   : > { %10486 = vmatpush1.bf16.msra.mxu1 %v11285_v13 }
 0x497   : > { %6016 = vmatpush1.bf16.msra.mxu0 %v11285_v13  ;;  %10471 = vmatprep.subr.bf16.mxu1 %v14862_v38 }
 0x498   : > { %1855 = vmatmul.mubr.bf16.gmra.mrb[92].mxu1 %v14882_v62  ;;  %v13090_v62 = vpop.permute.xlu0 %4358  ;;  %6017 = vmatprep.subr.bf16.mxu0 %v14862_v38 }
 0x499   : > { %10184 = vmatmul.mubr.bf16.gmra.mrb[24].mxu0 %v3263_v8  ;;  %1862 = vmatprep.mubr.bf16.mxu1 %v1316_v22 }
 0x49a   : > { %10187 = vmatprep.mubr.msk.bf16.mxu0 %vm11824_vm0, %v14861_v33  ;;  %10487 = vmatpush1.bf16.msra.mxu1 %v11286_v43 }
 0x49b   : > { %6018 = vmatpush1.bf16.msra.mxu0 %v11286_v43  ;;  %10472 = vmatprep.subr.bf16.mxu1 %v14862_v38  ;;  %v3286_v43 = vrot.slane %v12872_v1, 1  ;;  %v3288_v1 = vrot.slane %v12882_v51, 1 }
 0x49c   : > { %v13094_v18 = vpop.f32.mrb[0].mxu1  ;;  %v13100_v23 = vpop.permute.xlu0 %4368  ;;  %6019 = vmatprep.subr.bf16.mxu0 %v14862_v38 }
 0x49d   : > { %v1674_v34 = vpop.f32.mrb[1].mxu1 }
 0x49e   : > { %v13098_v63 = vpop.f32.mrb[2].mxu1  ;;  %10488 = vmatpush1.bf16.msra.mxu1 %v11287_v53 }
 0x49f   : > { %v1677_v8 = vpop.f32.mrb[3].mxu1  ;;  %6020 = vmatpush1.bf16.msra.mxu0 %v11287_v53  ;;  %10473 = vmatprep.subr.bf16.mxu1 %v14862_v38 }
 0x4a0   : > { %1863 = vmatmul.mubr.bf16.gmra.mrb[96].mxu1 %v14883_v45  ;;  %v3273_v45 = vsel %vm914_vm1, %v3270_v25, %v3272_v5  ;;  %v13109_v28 = vpop.permute.xlu0 %4378  ;;  %v11479_v25 = vld [vmem:[#allocation2 + $0x98] sm:$0xff]   ;;  %6021 = vmatprep.subr.bf16.mxu0 %v14862_v38 }
 0x4a1   : > { %10188 = vmatmul.mubr.bf16.gmra.mrb[28].mxu0 %v3265_v26  ;;  %1870 = vmatprep.mubr.bf16.mxu1 %v1324_v4  ;;  %v13111_v26 = vpop.permute.xlu1 %4383  ;;  %v3280_v15 = vrot.slane %v11479_v25, 1 }
 0x4a2   : > { %10191 = vmatprep.mubr.msk.bf16.mxu0 %vm11824_vm0, %v14861_v33  ;;  %10489 = vmatpush1.bf16.msra.mxu1 %v11288_v12 }
 0x4a3   : > { %v3281_v8 = vsel %vm914_vm1, %v3278_v52, %v3280_v15  ;;  %6022 = vmatpush1.bf16.msra.mxu0 %v11288_v12  ;;  %10474 = vmatprep.subr.bf16.mxu1 %v14862_v38 }
 0x4a4   : > { %v13105_v35 = vpop.f32.mrb[4].mxu1  ;;  %v13118_v42 = vpop.permute.xlu0 %4388  ;;  %6023 = vmatprep.subr.bf16.mxu0 %v14862_v38 }
 0x4a5   : > { %v1682_v16 = vpop.f32.mrb[5].mxu1  ;;  %v13120_v2 = vpop.permute.xlu1 %4393 }
 0x4a6   : > { %v13113_v19 = vpop.f32.mrb[6].mxu1 }
 0x4a8   : > { %1871 = vmatmul.mubr.bf16.gmra.mrb[100].mxu1 %v14884_v30  ;;  %v1685_v30 = vpop.f32.mrb[7].mxu1  ;;  %v13129_v60 = vpop.permute.xlu0 %4398 }
 0x4a9   : > { %10192 = vmatmul.mubr.bf16.gmra.mrb[32].mxu0 %v3267_v41  ;;  %1878 = vmatprep.mubr.bf16.mxu1 %v1332_v6  ;;  %v13131_v47 = vpop.permute.xlu1 %4403 }
 0x4aa   : > { %10195 = vmatprep.mubr.msk.bf16.mxu0 %vm11824_vm0, %v14861_v33 }
 0x4ac   : > { %v13139_v20 = vpop.permute.xlu0 %4408 }
 0x4ad   : > { %v13141_v10 = vpop.permute.xlu1 %4413 }
 0x4b0   : > { %1879 = vmatmul.mubr.bf16.gmra.mrb[104].mxu1 %v11471_v9  ;;  %v3277_v9 = vsel %vm914_vm1, %v3274_v11, %v3276_v55  ;;  %v13148_v46 = vpop.permute.xlu0 %4418  ;;  %v3282_v11 = vrot.slane %v12852_v27, 1  ;;  %v3284_v27 = vrot.slane %v12862_v49, 1 }
 0x4b1   : > { %10196 = vmatmul.mubr.bf16.gmra.mrb[36].mxu0 %v3269_v36  ;;  %14885 = vst [vmem:[#allocation35_spill] sm:$0xff] %v13148_v46 }
 0x4b2   : > { %10199 = vmatprep.mubr.msk.bf16.mxu0 %vm11824_vm0, %v14861_v33  ;;  %v3283_v55 = vsel %vm914_vm1, %v3280_v15, %v3282_v11  ;;  %v3285_v15 = vsel %vm914_vm1, %v3282_v11, %v3284_v27  ;;  %v3287_v11 = vsel %vm914_vm1, %v3284_v27, %v3286_v43 }
 0x4b9   : > { %10200 = vmatmul.mubr.bf16.gmra.mrb[40].mxu0 %v3271_v59  ;;  %v13150_v59 = vpop.permute.xlu1 %4423 }
 0x4ba   : > { %10203 = vmatprep.mubr.msk.bf16.mxu0 %vm11824_vm0, %v14861_v33  ;;  %14886 = vst [vmem:[#allocation36_spill] sm:$0xff] %v13150_v59 }
 0x4bd   : > { %v13159_v13 = vpop.permute.xlu1 %4433 }
 0x4be   : > { %14888 = vst [vmem:[#allocation38_spill] sm:$0xff] %v13159_v13 }
 0x4c1   : > { %10204 = vmatmul.mubr.bf16.gmra.mrb[44].mxu0 %v3273_v45  ;;  %v13157_v45 = vpop.permute.xlu0 %4428 }
 0x4c2   : > { %10207 = vmatprep.mubr.msk.bf16.mxu0 %vm11824_vm0, %v14861_v33  ;;  %v13122_v54 = vpop.f32.mrb[8].mxu1  ;;  %14887 = vst [vmem:[#allocation37_spill] sm:$0xff] %v13157_v45  ;;  %v13319_v45 = vld [vmem:[#allocation10] ss:$0 sm:$0xff] }
 0x4c3   : > { %v1690_v22 = vpop.f32.mrb[9].mxu1 }
 0x4c4   : > { %v13126_v41 = vpop.f32.mrb[10].mxu1 }
 0x4c5   : > { %v1693_v61 = vpop.f32.mrb[11].mxu1  ;;  %v13169_v22 = vpop.permute.xlu0 %4438 }
 0x4c6   : > { %14889 = vst [vmem:[#allocation39_spill] sm:$0xff] %v13169_v22  ;;  %v13171_v61 = vpop.permute.xlu1 %4443 }
 0x4c7   : > { %14890 = vst [vmem:[#allocation40_spill] sm:$0xff] %v13171_v61 }
 0x4c9   : > { %10208 = vmatmul.mubr.bf16.gmra.mrb[48].mxu0 %v3275_v44 }
 0x4ca   : > { %10211 = vmatprep.mubr.msk.bf16.mxu0 %vm11824_vm0, %v14861_v33  ;;  %v13133_v57 = vpop.f32.mrb[12].mxu1  ;;  %v13184_v25 = vpop.permute.xlu1 %4453 }
 0x4cb   : > { %v1698_v4 = vpop.f32.mrb[13].mxu1  ;;  %14892 = vst [vmem:[#allocation42_spill] sm:$0xff] %v13184_v25 }
 0x4cc   : > { %v13137_v36 = vpop.f32.mrb[14].mxu1 }
 0x4cd   : > { %v1701_v50 = vpop.f32.mrb[15].mxu1 }
 0x4ce   : > { %v13182_v50 = vpop.permute.xlu0 %4448 }
 0x4cf   : > { %14891 = vst [vmem:[#allocation41_spill] sm:$0xff] %v13182_v50 }
 0x4d1   : > { %10212 = vmatmul.mubr.bf16.gmra.mrb[52].mxu0 %v3277_v9 }
 0x4d2   : > { %10215 = vmatprep.mubr.msk.bf16.mxu0 %vm11824_vm0, %v14861_v33  ;;  %v13144_v56 = vpop.f32.mrb[16].mxu1 }
 0x4d3   : > { %v1706_v6 = vpop.f32.mrb[17].mxu1 }
 0x4d4   : > { %v13152_v5 = vpop.f32.mrb[18].mxu1  ;;  %v11289_v6 = vld [vmem:[#allocation11 + $0x138] sm:$0xff]  }
 0x4d5   : > { %v1709_v34 = vpop.f32.mrb[19].mxu1  ;;  %6024 = vmatpush1.bf16.msra.mxu0 %v11289_v6  ;;  %10490 = vmatpush1.bf16.msra.mxu1 %v11289_v6 }
 0x4d6   : > { %v13194_v34 = vpop.permute.xlu0 %4458 }
 0x4d7   : > { %14893 = vst [vmem:[#allocation43_spill] sm:$0xff] %v13194_v34 }
 0x4d9   : > { %10216 = vmatmul.mubr.bf16.gmra.mrb[56].mxu0 %v3279_v37 }
 0x4da   : > { %10219 = vmatprep.mubr.msk.bf16.mxu0 %vm11824_vm0, %v14861_v33  ;;  %v13161_v0 = vpop.f32.mrb[20].mxu1 }
 0x4db   : > { %v1714_v16 = vpop.f32.mrb[21].mxu1 }
 0x4dc   : > { %v13166_v30 = vpop.f32.mrb[22].mxu1  ;;  %v13196_v16 = vpop.permute.xlu1 %4463 }
 0x4dd   : > { %v1717_v44 = vpop.f32.mrb[23].mxu1  ;;  %14894 = vst [vmem:[#allocation44_spill] sm:$0xff] %v13196_v16 }
 0x4e0   : > { %v13203_v12 = vpop.permute.xlu1 %4473 }
 0x4e1   : > { %10220 = vmatmul.mubr.bf16.gmra.mrb[60].mxu0 %v3281_v8  ;;  %14896 = vst [vmem:[#allocation46_spill] sm:$0xff] %v13203_v12 }
 0x4e2   : > { %10223 = vmatprep.mubr.msk.bf16.mxu0 %vm11824_vm0, %v14861_v33  ;;  %v13175_v9 = vpop.f32.mrb[24].mxu1 }
 0x4e3   : > { %v1722_v52 = vpop.f32.mrb[25].mxu1 }
 0x4e4   : > { %v13180_v4 = vpop.f32.mrb[26].mxu1  ;;  %v13215_v27 = vpop.permute.xlu1 %4483 }
 0x4e5   : > { %v1725_v37 = vpop.f32.mrb[27].mxu1  ;;  %14898 = vst [vmem:[#allocation48_spill] sm:$0xff] %v13215_v27 }
 0x4e9   : > { %10224 = vmatmul.mubr.bf16.gmra.mrb[64].mxu0 %v3283_v55  ;;  %v13201_v55 = vpop.permute.xlu0 %4468 }
 0x4ea   : > { %10227 = vmatprep.mubr.msk.bf16.mxu0 %vm11824_vm0, %v14861_v33  ;;  %v13189_v49 = vpop.f32.mrb[28].mxu1  ;;  %14895 = vst [vmem:[#allocation45_spill] sm:$0xff] %v13201_v55 }
 0x4eb   : > { %v1730_v8 = vpop.f32.mrb[29].mxu1 }
 0x4ec   : > { %v13198_v44 = vpop.f32.mrb[30].mxu1  ;;  %v3289_v8 = vsel %vm914_vm1, %v3286_v43, %v3288_v1 }
 0x4ed   : > { %v1733_v53 = vpop.f32.mrb[31].mxu1 }
 0x4ee   : > { %v13213_v53 = vpop.permute.xlu0 %4478 }
 0x4ef   : > { %14897 = vst [vmem:[#allocation47_spill] sm:$0xff] %v13213_v53 }
 0x4f1   : > { %10228 = vmatmul.mubr.bf16.gmra.mrb[68].mxu0 %v3285_v15 }
 0x4f2   : > { %10231 = vmatprep.mubr.msk.bf16.mxu0 %vm11824_vm0, %v14861_v33  ;;  %v13208_v52 = vpop.f32.mrb[32].mxu1  ;;  %v13222_v55 = vpop.permute.xlu0 %4488 }
 0x4f3   : > { %v1738_v37 = vpop.f32.mrb[33].mxu1  ;;  %14899 = vst [vmem:[#allocation49_spill] sm:$0xff] %v13222_v55  ;;  %v13238_v55 = vld [vmem:[#allocation11 + $0x140] sm:$0xff]  }
 0x4f4   : > { %v13210_v15 = vpop.f32.mrb[34].mxu1  ;;  %10267 = vmatprep.subr.bf16.mxu1 %v13238_v55 }
 0x4f5   : > { %v1741_v6 = vpop.f32.mrb[35].mxu1 }
 0x4f6   : > { %v13226_v6 = vpop.permute.xlu1 %4493  ;;  %v13232_v27 = vpop.permute.xlu0 %4498 }
 0x4f7   : > { %14900 = vst [vmem:[#allocation50_spill] sm:$0xff] %v13226_v6  ;;  %14901 = vst [vmem:[#allocation51_spill] sm:$0xff] %v13232_v27 }
 0x4f9   : > { %10232 = vmatmul.mubr.bf16.gmra.mrb[72].mxu0 %v3287_v11  ;;  %v3290_v11 = vrot.slane %v12892_v48, 1 }
 0x4fa   : > { %10235 = vmatprep.mubr.msk.bf16.mxu0 %vm11824_vm0, %v14861_v33  ;;  %v13220_v12 = vpop.f32.mrb[36].mxu1 }
 0x4fb   : > { %v1746_v51 = vpop.f32.mrb[37].mxu1  ;;  %v3291_v53 = vsel %vm914_vm1, %v3288_v1, %v3290_v11 }
 0x4fc   : > { %v13224_v37 = vpop.f32.mrb[38].mxu1  ;;  %v13236_v51 = vpop.permute.xlu1 %4503 }
 0x4fd   : > { %v1749_v43 = vpop.f32.mrb[39].mxu1  ;;  %14902 = vst [vmem:[#allocation52_spill] sm:$0xff] %v13236_v51  ;;  %v3294_v51 = vrot.slane %v12914_v39, 1 }
 0x4fe   : > { %v13244_v43 = vpop.permute.xlu0 %4508 }
 0x4ff   : > { %14903 = vst [vmem:[#allocation53_spill] sm:$0xff] %v13244_v43 }
 0x501   : > { %10236 = vmatmul.mubr.bf16.gmra.mrb[76].mxu0 %v3289_v8  ;;  %v3292_v8 = vrot.slane %v12902_v17, 1  ;;  %v13246_v17 = vpop.permute.xlu1 %4513 }
 0x502   : > { %10239 = vmatprep.mubr.msk.bf16.mxu0 %vm11824_vm0, %v14861_v33  ;;  %v13234_v48 = vpop.f32.mrb[40].mxu1  ;;  %14904 = vst [vmem:[#allocation54_spill] sm:$0xff] %v13246_v17  ;;  %v13256_v50 = vpop.permute.xlu0 %4518 }
 0x503   : > { %v1754_v16 = vpop.f32.mrb[41].mxu1  ;;  %14906 = vst [vmem:[#allocation56_spill] sm:$0xff] %v13256_v50 }
 0x504   : > { %v13240_v34 = vpop.f32.mrb[42].mxu1 }
 0x505   : > { %v1757_v1 = vpop.f32.mrb[43].mxu1 }
 0x506   : > { %v3295_v1 = vsel %vm914_vm1, %v3292_v8, %v3294_v51  ;;  %v13265_v43 = vpop.permute.xlu0 %4528 }
 0x507   : > { %14909 = vst [vmem:[#allocation59_spill] sm:$0xff] %v13265_v43 }
 0x509   : > { %10240 = vmatmul.mubr.bf16.gmra.mrb[80].mxu0 %v3291_v53  ;;  %v3293_v53 = vsel %vm914_vm1, %v3290_v11, %v3292_v8  ;;  %v13258_v11 = vpop.permute.xlu1 %4523 }
 0x50a   : > { %10243 = vmatprep.mubr.msk.bf16.mxu0 %vm11824_vm0, %v14861_v33  ;;  %v13251_v27 = vpop.f32.mrb[44].mxu1  ;;  %14907 = vst [vmem:[#allocation57_spill] sm:$0xff] %v13258_v11  ;;  %v13275_v11 = vpop.permute.xlu0 %4538 }
 0x50b   : > { %v1762_v16 = vpop.f32.mrb[45].mxu1  ;;  %14912 = vst [vmem:[#allocation62_spill] sm:$0xff] %v13275_v11 }
 0x50c   : > { %v13253_v6 = vpop.f32.mrb[46].mxu1 }
 0x50d   : > { %14905 = vst [vmem:[#allocation55_spill] sm:$0xff] %v13253_v6  ;;  %v1765_v25 = vpop.f32.mrb[47].mxu1 }
 0x50e   : > { %v13269_v25 = vpop.permute.xlu1 %4533 }
 0x50f   : > { %14911 = vst [vmem:[#allocation61_spill] sm:$0xff] %v13269_v25  ;;  %v13284_v25 = vpop.permute.xlu0 %4548 }
 0x510   : > { %14916 = vst [vmem:[#allocation66_spill] sm:$0xff] %v13284_v25 }
 0x511   : > { %10244 = vmatmul.mubr.bf16.gmra.mrb[84].mxu0 %v3293_v53  ;;  %v3296_v53 = vrot.slane %v12926_v32, 1 }
 0x512   : > { %10247 = vmatprep.mubr.msk.bf16.mxu0 %vm11824_vm0, %v14861_v33  ;;  %v13263_v17 = vpop.f32.mrb[48].mxu1 }
 0x513   : > { %14908 = vst [vmem:[#allocation58_spill] sm:$0xff] %v13263_v17  ;;  %v1770_v39 = vpop.f32.mrb[49].mxu1  ;;  %v3297_v50 = vsel %vm914_vm1, %v3294_v51, %v3296_v53 }
 0x514   : > { %v13267_v16 = vpop.f32.mrb[50].mxu1  ;;  %v13279_v39 = vpop.permute.xlu1 %4543 }
 0x515   : > { %14910 = vst [vmem:[#allocation60_spill] sm:$0xff] %v13267_v16  ;;  %v1773_v8 = vpop.f32.mrb[51].mxu1  ;;  %14914 = vst [vmem:[#allocation64_spill] sm:$0xff] %v13279_v39 }
 0x519   : > { %10248 = vmatmul.mubr.bf16.gmra.mrb[88].mxu0 %v3295_v1  ;;  %v3298_v1 = vrot.slane %v12938_v58, 1  ;;  %v3300_v58 = vrot.slane %v12952_v7, 1 }
 0x51a   : > { %10251 = vmatprep.mubr.msk.bf16.mxu0 %vm11824_vm0, %v14861_v33  ;;  %v13277_v32 = vpop.f32.mrb[52].mxu1 }
 0x51b   : > { %14913 = vst [vmem:[#allocation63_spill] sm:$0xff] %v13277_v32  ;;  %v1778_v43 = vpop.f32.mrb[53].mxu1  ;;  %v3299_v8 = vsel %vm914_vm1, %v3296_v53, %v3298_v1 }
 0x51c   : > { %v13281_v61 = vpop.f32.mrb[54].mxu1 }
 0x51d   : > { %14915 = vst [vmem:[#allocation65_spill] sm:$0xff] %v13281_v61  ;;  %v1781_v22 = vpop.f32.mrb[55].mxu1  ;;  %v13296_v61 = vpop.permute.xlu0 %4558 }
 0x51e   : > { %v3301_v22 = vsel %vm914_vm1, %v3298_v1, %v3300_v58  ;;  %14920 = vst [vmem:[#allocation70_spill] sm:$0xff] %v13296_v61 }
 0x521   : > { %10252 = vmatmul.mubr.bf16.gmra.mrb[92].mxu0 %v3297_v50  ;;  %v13286_v50 = vpop.permute.xlu1 %4553  ;;  %v4319_v25 = vpop.permute.xlu0 %4318 }
 0x522   : > { %10255 = vmatprep.mubr.msk.bf16.mxu0 %vm11824_vm0, %v14861_v33  ;;  %14917 = vst [vmem:[#allocation67_spill] sm:$0xff] %v13286_v50  ;;  %v13291_v51 = vpop.f32.mrb[56].mxu1 }
 0x523   : > { %14918 = vst [vmem:[#allocation68_spill] sm:$0xff] %v13291_v51  ;;  %v1786_v11 = vpop.f32.mrb[57].mxu1 }
 0x524   : > { %v13293_v39 = vpop.f32.mrb[58].mxu1 }
 0x525   : > { %14919 = vst [vmem:[#allocation69_spill] sm:$0xff] %v13293_v39  ;;  %v1789_v43 = vpop.f32.mrb[59].mxu1  ;;  %v13298_v53 = vpop.permute.xlu1 %4563 }
 0x526   : > { %14921 = vst [vmem:[#allocation71_spill] sm:$0xff] %v13298_v53  ;;  %v13308_v61 = vpop.permute.xlu0 %4328 }
 0x529   : > { %10256 = vmatmul.mubr.bf16.gmra.mrb[96].mxu0 %v3299_v8  ;;  %v3302_v8 = vrot.slane %v12964_v40, 1  ;;  %v4324_v39 = vpop.permute.xlu1 %4323  ;;  %v13314_v40 = vld [vmem:[#allocation8] ss:$0 sm:$0xff] }
 0x52a   : > { %10259 = vmatprep.mubr.msk.bf16.mxu0 %vm11824_vm0, %v14861_v33  ;;  %v13303_v50 = vpop.f32.mrb[60].mxu1  ;;  %v4309_v32 = vpop.permute.xlu0 %4308 }
 0x52b   : > { %14922 = vst [vmem:[#allocation72_spill] sm:$0xff] %v13303_v50  ;;  %v1794_v7 = vpop.f32.mrb[61].mxu1  ;;  %v3303_v1 = vsel %vm914_vm1, %v3300_v58, %v3302_v8 }
 0x52c   : > { %v13305_v11 = vpop.f32.mrb[62].mxu1 }
 0x52d   : > { %14923 = vst [vmem:[#allocation73_spill] sm:$0xff] %v13305_v11  ;;  %v1797_v43 = vpop.f32.mrb[63].mxu1 }
 0x531   : > { %10260 = vmatmul.mubr.bf16.gmra.mrb[100].mxu0 %v3301_v22  ;;  %v13312_v22 = vpop.permute.xlu1 %4333 }
 0x532   : > { %10263 = vmatprep.mubr.msk.bf16.mxu0 %vm11824_vm0, %v14861_v33  ;;  %v13310_v53 = vpop.f32.mrb[64].mxu1 }
 0x533   : > { %14924 = vst [vmem:[#allocation74_spill] sm:$0xff] %v13310_v53  ;;  %v1802_v33 = vpop.f32.mrb[65].mxu1 }
 0x534   : > { %v13316_v50 = vpop.f32.mrb[66].mxu1 }
 0x535   : > { %14925 = vst [vmem:[#allocation75_spill] sm:$0xff] %v13316_v50  ;;  %v1805_v13 = vpop.f32.mrb[67].mxu1  ;;  %v4314_v16 = vpop.permute.xlu1 %4313 }
 0x539   : > { %10264 = vmatmul.mubr.bf16.gmra.mrb[104].mxu0 %v3303_v1 }
 0x53a   : > { %v13325_v38 = vpop.f32.mrb[68].mxu1 }
 0x53b   : > { %14926 = vst [vmem:[#allocation76_spill] sm:$0xff] %v13325_v38  ;;  %v1810_v13 = vpop.f32.mrb[69].mxu1 }
 0x53c   : > { %v3807_v51 = vpop.f32.mrb[0].mxu0 }
 0x53d   : > { %v10491_v7 = vadd.f32 %v3807_v51, %v13094_v18  ;;  %v10161_v11 = vpop.f32.mrb[1].mxu0 }
 0x53e   : > { %v3810_v43 = vpop.f32.mrb[2].mxu0  ;;  %v13328_v11 = vpop.f32.mrb[70].mxu1 }
 0x53f   : > { %v4083_v58 = vmul.f32 %v10491_v7, %v13314_v40  ;;  %v10492_v8 = vadd.f32 %v3810_v43, %v13098_v63  ;;  %v10162_v1 = vpop.f32.mrb[3].mxu0  ;;  %14927 = vst [vmem:[#allocation77_spill] sm:$0xff] %v13328_v11  ;;  %v1813_v43 = vpop.f32.mrb[71].mxu1 }
 0x541   : > { %v4084_v53 = vmul.f32 %v10492_v8, %v13314_v40  ;;  %v4144_v33 = vadd.f32 %v13319_v45, %v4083_v58 }
 0x543   : > { %v4198_v50 = vmax.f32 %v4144_v33, 0.0  ;;  %v4145_v18 = vadd.f32 %v13319_v45, %v4084_v53  ;;  %v13335_v6 = vpop.f32.mrb[72].mxu1 }
 0x544   : > { %v3815_v51 = vpop.f32.mrb[4].mxu0 }
 0x545   : > { %v10493_v7 = vadd.f32 %v3815_v51, %v13105_v35  ;;  %v10165_v59 = vpop.f32.mrb[5].mxu0  ;;  %v4199_v63 = vmax.f32 %v4145_v18, 0.0  ;;  %v4576_v8 = vmul.f32 %v4309_v32, %v4198_v50 }
 0x546   : > { %v3818_v1 = vpop.f32.mrb[6].mxu0  ;;  %v1818_v59 = vpop.f32.mrb[73].mxu1 }
 0x547   : > { %v4085_v58 = vmul.f32 %v10493_v7, %v13314_v40  ;;  %v4577_v46 = vmul.f32 %v4314_v16, %v4199_v63  ;;  %v10494_v38 = vadd.f32 %v3818_v1, %v13113_v19  ;;  %v10166_v33 = vpop.f32.mrb[7].mxu0  ;;  %v13338_v32 = vpop.f32.mrb[74].mxu1 }
 0x548   : > { %v1821_v51 = vpop.f32.mrb[75].mxu1 }
 0x549   : > { %v4146_v17 = vadd.f32 %v13319_v45, %v4085_v58  ;;  %v9441_v53 = vpack.c.bf16 %v4577_v46, %v4576_v8  ;;  %v4086_v13 = vmul.f32 %v10494_v38, %v13314_v40 }
 0x54b   : > { %v4200_v11 = vmax.f32 %v4146_v17, 0.0  ;;  %9442 = vst [vmem:[#allocation3] sm:$0xff] %v9441_v53   ;;  %v4147_v35 = vadd.f32 %v13319_v45, %v4086_v13  ;;  %v13345_v33 = vpop.f32.mrb[76].mxu1 }
 0x54c   : > { %v3823_v18 = vpop.f32.mrb[8].mxu0  ;;  %v1826_v13 = vpop.f32.mrb[77].mxu1 }
 0x54d   : > { %v4201_v50 = vmax.f32 %v4147_v35, 0.0  ;;  %v10495_v16 = vadd.f32 %v3823_v18, %v13122_v54  ;;  %v10169_v19 = vpop.f32.mrb[9].mxu0  ;;  %v4578_v63 = vmul.f32 %v4319_v25, %v4200_v11  ;;  %v13348_v25 = vpop.f32.mrb[78].mxu1 }
 0x54e   : > { %v3826_v7 = vpop.f32.mrb[10].mxu0  ;;  %v1829_v59 = vpop.f32.mrb[79].mxu1 }
 0x54f   : > { %v4579_v46 = vmul.f32 %v4324_v39, %v4201_v50  ;;  %v4087_v38 = vmul.f32 %v10495_v16, %v13314_v40  ;;  %v10496_v43 = vadd.f32 %v3826_v7, %v13126_v41  ;;  %v10170_v17 = vpop.f32.mrb[11].mxu0 }
 0x551   : > { %v9446_v1 = vpack.c.bf16 %v4579_v46, %v4578_v63  ;;  %v4148_v8 = vadd.f32 %v13319_v45, %v4087_v38  ;;  %v4088_v58 = vmul.f32 %v10496_v43, %v13314_v40 }
 0x553   : > { %9653 = vst [vmem:[#allocation3 + $0x8] sm:$0xff] %v9446_v1   ;;  %v4202_v53 = vmax.f32 %v4148_v8, 0.0  ;;  %v4149_v54 = vadd.f32 %v13319_v45, %v4088_v58  ;;  %v13357_v43 = vpop.f32.mrb[80].mxu1 }
 0x554   : > { %v3831_v35 = vpop.f32.mrb[12].mxu0  ;;  %v1834_v1 = vpop.f32.mrb[81].mxu1 }
 0x555   : > { %v4203_v39 = vmax.f32 %v4149_v54, 0.0  ;;  %v10497_v11 = vadd.f32 %v3831_v35, %v13133_v57  ;;  %v10173_v41 = vpop.f32.mrb[13].mxu0  ;;  %v4580_v50 = vmul.f32 %v13308_v61, %v4202_v53  ;;  %v13360_v8 = vpop.f32.mrb[82].mxu1 }
 0x556   : > { %v3834_v18 = vpop.f32.mrb[14].mxu0  ;;  %v1837_v53 = vpop.f32.mrb[83].mxu1 }
 0x557   : > { %v4581_v16 = vmul.f32 %v13312_v22, %v4203_v39  ;;  %v4089_v19 = vmul.f32 %v10497_v11, %v13314_v40  ;;  %v10498_v51 = vadd.f32 %v3834_v18, %v13137_v36  ;;  %v10174_v7 = vpop.f32.mrb[15].mxu0 }
 0x559   : > { %v9451_v63 = vpack.c.bf16 %v4581_v16, %v4580_v50  ;;  %v4150_v46 = vadd.f32 %v13319_v45, %v4089_v19  ;;  %v4090_v38 = vmul.f32 %v10498_v51, %v13314_v40 }
 0x55a   : > { %v4904_v16 = vld [vmem:[#allocation3 + $0xc] sm:$0xf] }
 0x55b   : > { %9654 = vst [vmem:[#allocation3 + $0x10] sm:$0xff] %v9451_v63   ;;  %v4204_v57 = vmax.f32 %v4150_v46, 0.0  ;;  %v4151_v17 = vadd.f32 %v13319_v45, %v4090_v38  ;;  %v13369_v51 = vpop.f32.mrb[84].mxu1 }
 0x55c   : > { %v3839_v61 = vpop.f32.mrb[16].mxu0  ;;  %v1842_v63 = vpop.f32.mrb[85].mxu1 }
 0x55d   : > { %v4205_v22 = vmax.f32 %v4151_v17, 0.0  ;;  %v10499_v58 = vadd.f32 %v3839_v61, %v13144_v56  ;;  %v10177_v36 = vpop.f32.mrb[17].mxu0  ;;  %v4582_v13 = vmul.f32 %v13073_v31, %v4204_v57  ;;  %v13372_v38 = vpop.f32.mrb[86].mxu1 }
 0x55e   : > { %v3842_v54 = vpop.f32.mrb[18].mxu0  ;;  %v1845_v61 = vpop.f32.mrb[87].mxu1 }
 0x55f   : > { %v4583_v35 = vmul.f32 %v13080_v29, %v4205_v22  ;;  %v4091_v39 = vmul.f32 %v10499_v58, %v13314_v40  ;;  %v10500_v11 = vadd.f32 %v3842_v54, %v13152_v5  ;;  %v10178_v41 = vpop.f32.mrb[19].mxu0 }
 0x561   : > { %v9456_v59 = vpack.c.bf16 %v4583_v35, %v4582_v13  ;;  %v4152_v18 = vadd.f32 %v13319_v45, %v4091_v39  ;;  %v4092_v50 = vmul.f32 %v10500_v11, %v13314_v40 }
 0x562   : > { %v4905_v19 = vld [vmem:[#allocation3 + $0x10] sm:$0xf]  ;;  %v4906_v56 = vld [vmem:[#allocation3 + $0x14] sm:$0xf] }
 0x563   : > { %9655 = vst [vmem:[#allocation3 + $0x18] sm:$0xff] %v9456_v59   ;;  %v4206_v7 = vmax.f32 %v4152_v18, 0.0  ;;  %v4153_v31 = vadd.f32 %v13319_v45, %v4092_v50  ;;  %v9159_v29 = vcombine.low %v4904_v16, %v4905_v19  ;;  %v13374_v5 = vcombine.low %v4905_v19, %v4906_v56 }
 0x564   : > { %v3847_v46 = vpop.f32.mrb[20].mxu0 }
 0x565   : > { %v4207_v57 = vmax.f32 %v4153_v31, 0.0  ;;  %v10501_v17 = vadd.f32 %v3847_v46, %v13161_v0  ;;  %v10181_v1 = vpop.f32.mrb[21].mxu0  ;;  %v5507_v58 = vshll.u32 %v9159_v29, 16  ;;  %v4584_v36 = vmul.f32 %v13075_v21, %v4206_v7  ;;  %v5446_v0 = vld [vmem:[#allocation3 + $0xc] sm:$0xe]  ;;  %v13383_v31 = vpop.f32.mrb[88].mxu1 }
 0x566   : > { %v3850_v22 = vpop.f32.mrb[22].mxu0  ;;  %v5505_v59 = vshrl.u32 %v9159_v29, 16  ;;  %v9184_v21 = vcombine.low %v5446_v0, %v4905_v19 }
 0x567   : > { %v4585_v53 = vmul.f32 %v13082_v3, %v4207_v57  ;;  %v4093_v54 = vmul.f32 %v10501_v17, %v13314_v40  ;;  %v10502_v13 = vadd.f32 %v3850_v22, %v13166_v30  ;;  %v10182_v35 = vpop.f32.mrb[23].mxu0  ;;  %v5509_v50 = vrot.slane %v5507_v58, 1  ;;  %v1850_v30 = vpop.f32.mrb[89].mxu1 }
 0x568   : > { %v13390_v17 = vpop.f32.mrb[90].mxu1 }
 0x569   : > { %v9461_v39 = vpack.c.bf16 %v4585_v53, %v4584_v36  ;;  %v4154_v11 = vadd.f32 %v13319_v45, %v4093_v54  ;;  %v4094_v41 = vmul.f32 %v10502_v13, %v13314_v40  ;;  %v1853_v36 = vpop.f32.mrb[91].mxu1  ;;  %v5510_v54 = vor.u32 %v5509_v50, %v5505_v59 }
 0x56a   : > { %v4907_v18 = vld [vmem:[#allocation3 + $0x18] sm:$0xf]  ;;  %v4908_v16 = vld [vmem:[#allocation3 + $0x1c] sm:$0xf]  ;;  %v5727_v13 = vrot.slane %v9184_v21, 1 }
 0x56b   : > { %9656 = vst [vmem:[#allocation3 + $0x20] sm:$0xff] %v9461_v39   ;;  %v4208_v3 = vmax.f32 %v4154_v11, 0.0  ;;  %v4155_v7 = vadd.f32 %v13319_v45, %v4094_v41  ;;  %v13386_v63 = vcombine.low %v4906_v56, %v4907_v18  ;;  %v13388_v46 = vcombine.low %v4907_v18, %v4908_v16 }
 0x56c   : > { %v3855_v57 = vpop.f32.mrb[24].mxu0 }
 0x56d   : > { %v4209_v1 = vmax.f32 %v4155_v7, 0.0  ;;  %v10503_v61 = vadd.f32 %v3855_v57, %v13175_v9  ;;  %v10185_v22 = vpop.f32.mrb[25].mxu0  ;;  %v5512_v58 = vshll.u32 %v13386_v63, 16  ;;  %v4586_v19 = vmul.f32 %v13090_v62, %v4208_v3 }
 0x56e   : > { %v3858_v53 = vpop.f32.mrb[26].mxu0  ;;  %v5728_v56 = vrot.slane %v13386_v63, 1  ;;  %v5516_v22 = vshrl.u32 %v13386_v63, 16 }
 0x56f   : > { %v4587_v35 = vmul.f32 %v13092_v14, %v4209_v1  ;;  %v4095_v39 = vmul.f32 %v10503_v61, %v13314_v40  ;;  %v10504_v11 = vadd.f32 %v3858_v53, %v13180_v4  ;;  %v10186_v41 = vpop.f32.mrb[27].mxu0  ;;  %v5514_v0 = vrot.slane %v5512_v58, 1  ;;  %v13405_v14 = vpop.f32.mrb[92].mxu1 }
 0x570   : > { %v13400_v9 = vsel %vm914_vm1, %v5727_v13, %v5728_v56  ;;  %v1858_v57 = vpop.f32.mrb[93].mxu1 }
 0x571   : > { %v9466_v18 = vpack.c.bf16 %v4587_v35, %v4586_v19  ;;  %v4156_v7 = vadd.f32 %v13319_v45, %v4095_v39  ;;  %v4096_v62 = vmul.f32 %v10504_v11, %v13314_v40  ;;  %v5515_v59 = vsel %vm663_vm2, %v5510_v54, %v5514_v0  ;;  %v13413_v58 = vpop.f32.mrb[94].mxu1 }
 0x572   : > { %6025 = vmatprep.mubr.bf16.mxu0 %v5515_v59  ;;  %v4909_v50 = vld [vmem:[#allocation3 + $0x20] sm:$0xf]  ;;  %v4910_v21 = vld [vmem:[#allocation3 + $0x24] sm:$0xf]  ;;  %v1861_v13 = vpop.f32.mrb[95].mxu1 }
 0x573   : > { %9657 = vst [vmem:[#allocation3 + $0x28] sm:$0xff] %v9466_v18   ;;  %v4210_v3 = vmax.f32 %v4156_v7, 0.0  ;;  %v4157_v4 = vadd.f32 %v13319_v45, %v4096_v62  ;;  %6026 = vmatmul.mubr.bf16.vlgmr.msra.gmra.mrb[108].mxu0 %v9159_v29  ;;  %v13408_v30 = vcombine.low %v4908_v16, %v4909_v50  ;;  %v13410_v1 = vcombine.low %v4909_v50, %v4910_v21 }
 0x574   : > { %v3863_v61 = vpop.f32.mrb[28].mxu0  ;;  %v5518_v16 = vor.u32 %v5516_v22, %v5514_v0 }
 0x575   : > { %v4211_v36 = vmax.f32 %v4157_v4, 0.0  ;;  %v10505_v19 = vadd.f32 %v3863_v61, %v13189_v49  ;;  %v10189_v53 = vpop.f32.mrb[29].mxu0  ;;  %v5520_v54 = vshll.u32 %v13408_v30, 16  ;;  %v4588_v35 = vmul.f32 %v13100_v23, %v4210_v3 }
 0x576   : > { %v3866_v29 = vpop.f32.mrb[30].mxu0  ;;  %v5730_v39 = vrot.slane %v13408_v30, 1 }
 0x577   : > { %v4589_v11 = vmul.f32 %v13102_v24, %v4211_v36  ;;  %v4097_v41 = vmul.f32 %v10505_v19, %v13314_v40  ;;  %v10506_v18 = vadd.f32 %v3866_v29, %v13198_v44  ;;  %v10190_v7 = vpop.f32.mrb[31].mxu0  ;;  %v5522_v62 = vrot.slane %v5520_v54, 1  ;;  %v13428_v24 = vpop.f32.mrb[96].mxu1 }
 0x578   : > { %v13423_v49 = vsel %vm914_vm1, %v5728_v56, %v5730_v39  ;;  %v1866_v61 = vpop.f32.mrb[97].mxu1  ;;  %v5524_v19 = vshrl.u32 %v13408_v30, 16 }
 0x579   : > { %v9471_v59 = vpack.c.bf16 %v4589_v11, %v4588_v35  ;;  %v4158_v50 = vadd.f32 %v13319_v45, %v4097_v41  ;;  %v4098_v23 = vmul.f32 %v10506_v18, %v13314_v40  ;;  %v5523_v0 = vsel %vm663_vm2, %v5518_v16, %v5522_v62  ;;  %v13437_v53 = vpop.f32.mrb[98].mxu1 }
 0x57a   : > { %6033 = vmatprep.mubr.bf16.mxu0 %v5523_v0  ;;  %v4911_v3 = vld [vmem:[#allocation3 + $0x28] sm:$0xf]  ;;  %v4912_v4 = vld [vmem:[#allocation3 + $0x2c] sm:$0xf]  ;;  %v1869_v16 = vpop.f32.mrb[99].mxu1 }
 0x57b   : > { %9658 = vst [vmem:[#allocation3 + $0x30] sm:$0xff] %v9471_v59   ;;  %v4212_v57 = vmax.f32 %v4158_v50, 0.0  ;;  %v4159_v44 = vadd.f32 %v13319_v45, %v4098_v23  ;;  %6034 = vmatmul.mubr.bf16.gmra.mrb[112].mxu0 %v13386_v63  ;;  %v13432_v56 = vcombine.low %v4910_v21, %v4911_v3  ;;  %v13434_v22 = vcombine.low %v4911_v3, %v4912_v4 }
 0x57c   : > { %v3871_v36 = vpop.f32.mrb[32].mxu0  ;;  %v5526_v21 = vor.u32 %v5524_v19, %v5522_v62 }
 0x57d   : > { %v4213_v54 = vmax.f32 %v4159_v44, 0.0  ;;  %v10507_v13 = vadd.f32 %v3871_v36, %v13208_v52  ;;  %v10193_v35 = vpop.f32.mrb[33].mxu0  ;;  %v5528_v29 = vshll.u32 %v13432_v56, 16  ;;  %v4590_v11 = vmul.f32 %v13109_v28, %v4212_v57  ;;  %v11297_v57 = vld [vmem:[#allocation11 + $0x148] sm:$0xff]  }
 0x57e   : > { %v3874_v63 = vpop.f32.mrb[34].mxu0  ;;  %v5732_v41 = vrot.slane %v13432_v56, 1  ;;  %v11301_v35 = vld [vmem:[#allocation11 + $0x150] sm:$0xff]  }
 0x57f   : > { %v4591_v18 = vmul.f32 %v13111_v26, %v4213_v54  ;;  %v4099_v7 = vmul.f32 %v10507_v13, %v13314_v40  ;;  %v10508_v59 = vadd.f32 %v3874_v63, %v13210_v15  ;;  %v10194_v50 = vpop.f32.mrb[35].mxu0  ;;  %v5530_v23 = vrot.slane %v5528_v29, 1 }
 0x580   : > { %v13447_v52 = vsel %vm914_vm1, %v5730_v39, %v5732_v41  ;;  %v13456_v39 = vpop.f32.mrb[100].mxu1  ;;  %v5532_v13 = vshrl.u32 %v13432_v56, 16 }
 0x581   : > { %v9476_v0 = vpack.c.bf16 %v4591_v18, %v4590_v11  ;;  %v4160_v3 = vadd.f32 %v13319_v45, %v4099_v7  ;;  %v4100_v28 = vmul.f32 %v10508_v59, %v13314_v40  ;;  %v5531_v62 = vsel %vm663_vm2, %v5526_v21, %v5530_v23  ;;  %v1874_v29 = vpop.f32.mrb[101].mxu1 }
 0x582   : > { %6041 = vmatprep.mubr.bf16.mxu1 %v5531_v62  ;;  %v4913_v44 = vld [vmem:[#allocation3 + $0x30] sm:$0xf]  ;;  %v4914_v26 = vld [vmem:[#allocation3 + $0x34] sm:$0xf]  ;;  %v5534_v7 = vor.u32 %v5532_v13, %v5530_v23 }
 0x583   : > { %9659 = vst [vmem:[#allocation3 + $0x38] sm:$0xff] %v9476_v0   ;;  %v4214_v61 = vmax.f32 %v4160_v3, 0.0  ;;  %v4161_v15 = vadd.f32 %v13319_v45, %v4100_v28  ;;  %6042 = vmatmul.mubr.bf16.vlgmr.msra.gmra.mrb[108].mxu1 %v13408_v30  ;;  %v13454_v36 = vcombine.low %v4912_v4, %v4913_v44  ;;  %v13458_v19 = vcombine.low %v4913_v44, %v4914_v26  ;;  %v13464_v30 = vpop.f32.mrb[102].mxu1 }
 0x584   : > { %v3879_v54 = vpop.f32.mrb[36].mxu0  ;;  %10268 = vmatpush3.bf16.msra.mxu1 %v13238_v55  ;;  %v1877_v59 = vpop.f32.mrb[103].mxu1 }
 0x585   : > { %v4215_v16 = vmax.f32 %v4161_v15, 0.0  ;;  %v10509_v11 = vadd.f32 %v3879_v54, %v13220_v12  ;;  %v10197_v63 = vpop.f32.mrb[37].mxu0  ;;  %v5536_v21 = vshll.u32 %v13454_v36, 16  ;;  %10269 = vmatprep.subr.bf16.mxu1 %v11297_v57  ;;  %v4592_v4 = vmul.f32 %v13118_v42, %v4214_v61  ;;  %v11305_v15 = vld [vmem:[#allocation11 + $0x158] sm:$0xff]  }
 0x586   : > { %v3882_v18 = vpop.f32.mrb[38].mxu0  ;;  %v5734_v55 = vrot.slane %v13454_v36, 1 }
 0x587   : > { %v4593_v50 = vmul.f32 %v13120_v2, %v4215_v16  ;;  %v4101_v0 = vmul.f32 %v10509_v11, %v13314_v40  ;;  %v10510_v3 = vadd.f32 %v3882_v18, %v13224_v37  ;;  %v10198_v12 = vpop.f32.mrb[39].mxu0  ;;  %v5538_v28 = vrot.slane %v5536_v21, 1  ;;  %v11309_v18 = vld [vmem:[#allocation11 + $0x160] sm:$0xff]  }
 0x588   : > { %10270 = vmatpush3.bf16.msra.mxu1 %v11297_v57  ;;  %v13472_v62 = vsel %vm914_vm1, %v5732_v41, %v5734_v55  ;;  %v5540_v16 = vshrl.u32 %v13454_v36, 16 }
 0x589   : > { %v9481_v44 = vpack.c.bf16 %v4593_v50, %v4592_v4  ;;  %v4162_v42 = vadd.f32 %v13319_v45, %v4101_v0  ;;  %v4102_v23 = vmul.f32 %v10510_v3, %v13314_v40  ;;  %v5539_v61 = vsel %vm663_vm2, %v5534_v7, %v5538_v28  ;;  %10271 = vmatprep.subr.bf16.mxu1 %v11301_v35  ;;  %v13486_v7 = vpop.f32.mrb[104].mxu1 }
 0x58a   : > { %6049 = vmatprep.mubr.bf16.mxu1 %v5539_v61  ;;  %v4915_v2 = vld [vmem:[#allocation3 + $0x38] sm:$0xf]  ;;  %v4916_v54 = vld [vmem:[#allocation3 + $0x3c] sm:$0xf]  ;;  %v5542_v59 = vor.u32 %v5540_v16, %v5538_v28  ;;  %v1882_v50 = vpop.f32.mrb[105].mxu1 }
 0x58b   : > { %9660 = vst [vmem:[#allocation3 + $0x40] sm:$0xff] %v9481_v44   ;;  %v4216_v37 = vmax.f32 %v4162_v42, 0.0  ;;  %v4163_v13 = vadd.f32 %v13319_v45, %v4102_v23  ;;  %6050 = vmatmul.mubr.bf16.gmra.mrb[112].mxu1 %v13432_v56  ;;  %v13479_v41 = vcombine.low %v4914_v26, %v4915_v2  ;;  %v13481_v57 = vcombine.low %v4915_v2, %v4916_v54  ;;  %v13493_v42 = vpop.f32.mrb[106].mxu1 }
 0x58c   : > { %v3887_v29 = vpop.f32.mrb[40].mxu0  ;;  %10272 = vmatpush3.bf16.msra.mxu1 %v11301_v35 }
 0x58d   : > { %14928 = vst [vmem:[#allocation78_spill] sm:$0xff] %v13481_v57  ;;  %v4217_v11 = vmax.f32 %v4163_v13, 0.0  ;;  %v10511_v63 = vadd.f32 %v3887_v29, %v13234_v48  ;;  %v10201_v21 = vpop.f32.mrb[41].mxu0  ;;  %v5544_v4 = vshll.u32 %v13479_v41, 16  ;;  %10273 = vmatprep.subr.bf16.mxu1 %v11305_v15  ;;  %v4594_v56 = vmul.f32 %v13129_v60, %v4216_v37  ;;  %v1885_v60 = vpop.f32.mrb[107].mxu1  ;;  %v11312_v37 = vld [vmem:[#allocation11 + $0x168] sm:$0xff]  }
 0x58e   : > { %v3890_v26 = vpop.f32.mrb[42].mxu0  ;;  %v5736_v0 = vrot.slane %v13479_v41, 1 }
 0x58f   : > { %v4595_v3 = vmul.f32 %v13131_v47, %v4217_v11  ;;  %v4103_v35 = vmul.f32 %v10511_v63, %v13314_v40  ;;  %v10512_v48 = vadd.f32 %v3890_v26, %v13240_v34  ;;  %v10202_v12 = vpop.f32.mrb[43].mxu0  ;;  %v5546_v44 = vrot.slane %v5544_v4, 1 }
 0x590   : > { %10274 = vmatpush3.bf16.msra.mxu1 %v11305_v15  ;;  %v13496_v23 = vsel %vm914_vm1, %v5734_v55, %v5736_v0  ;;  %v5548_v63 = vshrl.u32 %v13479_v41, 16  ;;  %v14930_v12 = vld [vmem:[#allocation55_spill] sm:$0xff] }
 0x591   : > { %v9486_v61 = vpack.c.bf16 %v4595_v3, %v4594_v56  ;;  %v4164_v28 = vadd.f32 %v13319_v45, %v4103_v35  ;;  %v4104_v2 = vmul.f32 %v10512_v48, %v13314_v40  ;;  %v5547_v47 = vsel %vm663_vm2, %v5542_v59, %v5546_v44  ;;  %10275 = vmatprep.subr.bf16.mxu1 %v11309_v18  ;;  %v11316_v59 = vld [vmem:[#allocation11 + $0x170] sm:$0xff]  }
 0x592   : > { %6057 = vmatprep.mubr.bf16.mxu1 %v5547_v47  ;;  %v4917_v34 = vld [vmem:[#allocation3 + $0x40] sm:$0xf]  ;;  %v4918_v13 = vld [vmem:[#allocation3 + $0x44] sm:$0xf] }
 0x593   : > { %9661 = vst [vmem:[#allocation3 + $0x48] sm:$0xff] %v9486_v61   ;;  %v4218_v29 = vmax.f32 %v4164_v28, 0.0  ;;  %v4165_v15 = vadd.f32 %v13319_v45, %v4104_v2  ;;  %6058 = vmatmul.mubr.bf16.gmra.mrb[116].mxu1 %v13454_v36  ;;  %v13503_v55 = vcombine.low %v4916_v54, %v4917_v34  ;;  %v13505_v16 = vcombine.low %v4917_v34, %v4918_v13 }
 0x594   : > { %v3895_v11 = vpop.f32.mrb[44].mxu0  ;;  %10276 = vmatpush3.bf16.msra.mxu1 %v11309_v18  ;;  %v5550_v36 = vor.u32 %v5548_v63, %v5546_v44 }
 0x595   : > { %14929 = vst [vmem:[#allocation79_spill] sm:$0xff] %v13505_v16  ;;  %v4219_v21 = vmax.f32 %v4165_v15, 0.0  ;;  %v10513_v4 = vadd.f32 %v3895_v11, %v13251_v27  ;;  %v10205_v56 = vpop.f32.mrb[45].mxu0  ;;  %v5552_v26 = vshll.u32 %v13503_v55, 16  ;;  %10277 = vmatprep.subr.bf16.mxu1 %v11312_v37  ;;  %v4596_v50 = vmul.f32 %v13139_v20, %v4218_v29 }
 0x596   : > { %v3898_v3 = vpop.f32.mrb[46].mxu0  ;;  %v5738_v54 = vrot.slane %v13503_v55, 1  ;;  %v5556_v63 = vshrl.u32 %v13503_v55, 16 }
 0x597   : > { %v4597_v35 = vmul.f32 %v13141_v10, %v4219_v21  ;;  %v4105_v48 = vmul.f32 %v10513_v4, %v13314_v40  ;;  %v10514_v18 = vadd.f32 %v3898_v3, %v14930_v12  ;;  %v10206_v60 = vpop.f32.mrb[47].mxu0  ;;  %v5554_v61 = vrot.slane %v5552_v26, 1  ;;  %v14932_v4 = vld [vmem:[#allocation58_spill] sm:$0xff]  ;;  %v14933_v3 = vld [vmem:[#allocation35_spill] sm:$0xff] }
 0x598   : > { %10278 = vmatpush3.bf16.msra.mxu1 %v11312_v37  ;;  %v13516_v27 = vsel %vm914_vm1, %v5736_v0, %v5738_v54  ;;  %v11320_v0 = vld [vmem:[#allocation11 + $0x178] sm:$0xff]  }
 0x599   : > { %v9491_v28 = vpack.c.bf16 %v4597_v35, %v4596_v50  ;;  %v4166_v2 = vadd.f32 %v13319_v45, %v4105_v48  ;;  %v4106_v20 = vmul.f32 %v10514_v18, %v13314_v40  ;;  %v5555_v44 = vsel %vm663_vm2, %v5550_v36, %v5554_v61  ;;  %10279 = vmatprep.subr.bf16.mxu1 %v11316_v59  ;;  %v14935_v60 = vld [vmem:[#allocation60_spill] sm:$0xff] }
 0x59a   : > { %6065 = vmatprep.mubr.bf16.mxu1 %v5555_v44  ;;  %v4919_v10 = vld [vmem:[#allocation3 + $0x48] sm:$0xf]  ;;  %v4920_v47 = vld [vmem:[#allocation3 + $0x4c] sm:$0xf]  ;;  %v5558_v48 = vor.u32 %v5556_v63, %v5554_v61 }
 0x59b   : > { %9662 = vst [vmem:[#allocation3 + $0x50] sm:$0xff] %v9491_v28   ;;  %v4220_v34 = vmax.f32 %v4166_v2, 0.0  ;;  %v4167_v29 = vadd.f32 %v13319_v45, %v4106_v20  ;;  %6066 = vmatmul.mubr.bf16.gmra.mrb[120].mxu1 %v13479_v41  ;;  %v9166_v37 = vcombine.low %v4918_v13, %v4919_v10  ;;  %v13523_v15 = vcombine.low %v4919_v10, %v4920_v47  ;;  %v14934_v41 = vld [vmem:[#allocation36_spill] sm:$0xff] }
 0x59c   : > { %v3903_v11 = vpop.f32.mrb[48].mxu0  ;;  %10280 = vmatpush3.bf16.msra.mxu1 %v11316_v59 }
 0x59d   : > { %14931 = vst [vmem:[#allocation55_spill] sm:$0xff] %v13523_v15  ;;  %v4221_v21 = vmax.f32 %v4167_v29, 0.0  ;;  %v10515_v56 = vadd.f32 %v3903_v11, %v14932_v4  ;;  %v10209_v26 = vpop.f32.mrb[49].mxu0  ;;  %v5560_v50 = vshll.u32 %v9166_v37, 16  ;;  %10281 = vmatprep.subr.bf16.mxu1 %v11320_v0  ;;  %v4598_v36 = vmul.f32 %v14933_v3, %v4220_v34  ;;  %v14938_v3 = vld [vmem:[#allocation63_spill] sm:$0xff] }
 0x59e   : > { %v3906_v35 = vpop.f32.mrb[50].mxu0  ;;  %v5740_v12 = vrot.slane %v9166_v37, 1  ;;  %v14936_v29 = vmov 0   ;;  %v5564_v26 = vshrl.u32 %v9166_v37, 16 }
 0x59f   : > { %v4599_v13 = vmul.f32 %v14934_v41, %v4221_v21  ;;  %v4107_v18 = vmul.f32 %v10515_v56, %v13314_v40  ;;  %v10516_v28 = vadd.f32 %v3906_v35, %v14935_v60  ;;  %v10210_v2 = vpop.f32.mrb[51].mxu0  ;;  %v5562_v20 = vrot.slane %v5560_v50, 1  ;;  %v14939_v41 = vld [vmem:[#allocation37_spill] sm:$0xff] }
 0x5a0   : > { %10282 = vmatpush3.bf16.msra.mxu1 %v11320_v0  ;;  %v13532_v59 = vsel %vm914_vm1, %v5738_v54, %v5740_v12  ;;  %v14940_v2 = vld [vmem:[#allocation38_spill] sm:$0xff] }
 0x5a1   : > { %v9496_v44 = vpack.c.bf16 %v4599_v13, %v4598_v36  ;;  %v4168_v10 = vadd.f32 %v13319_v45, %v4107_v18  ;;  %v4108_v34 = vmul.f32 %v10516_v28, %v13314_v40  ;;  %v5563_v61 = vsel %vm663_vm2, %v5558_v48, %v5562_v20  ;;  %6587 = vmatprep.subr.bf16.mxu1 %v14936_v29 }
 0x5a2   : > { %6073 = vmatprep.mubr.bf16.mxu1 %v5563_v61  ;;  %v4921_v11 = vld [vmem:[#allocation3 + $0x50] sm:$0xf]  ;;  %v4922_v63 = vld [vmem:[#allocation3 + $0x54] sm:$0xf]  ;;  %v5566_v60 = vor.u32 %v5564_v26, %v5562_v20 }
 0x5a3   : > { %9663 = vst [vmem:[#allocation3 + $0x58] sm:$0xff] %v9496_v44   ;;  %v4222_v21 = vmax.f32 %v4168_v10, 0.0  ;;  %v4169_v4 = vadd.f32 %v13319_v45, %v4108_v34  ;;  %6074 = vmatmul.mubr.bf16.gmra.mrb[124].mxu1 %v13503_v55  ;;  %v9167_v54 = vcombine.low %v4920_v47, %v4921_v11  ;;  %v13540_v0 = vcombine.low %v4921_v11, %v4922_v63  ;;  %v14941_v55 = vld [vmem:[#allocation65_spill] sm:$0xff] }
 0x5a4   : > { %v3911_v56 = vpop.f32.mrb[52].mxu0 }
 0x5a5   : > { %14937 = vst [vmem:[#allocation58_spill] sm:$0xff] %v13540_v0  ;;  %v4223_v50 = vmax.f32 %v4169_v4, 0.0  ;;  %v10517_v36 = vadd.f32 %v3911_v56, %v14938_v3  ;;  %v10213_v35 = vpop.f32.mrb[53].mxu0  ;;  %v5568_v48 = vshll.u32 %v9167_v54, 16  ;;  %v4600_v13 = vmul.f32 %v14939_v41, %v4222_v21 }
 0x5a6   : > { %v3914_v18 = vpop.f32.mrb[54].mxu0  ;;  %v5742_v28 = vrot.slane %v9167_v54, 1  ;;  %v5572_v41 = vshrl.u32 %v9167_v54, 16 }
 0x5a7   : > { %v4601_v44 = vmul.f32 %v14940_v2, %v4223_v50  ;;  %v4109_v10 = vmul.f32 %v10517_v36, %v13314_v40  ;;  %v10518_v47 = vadd.f32 %v3914_v18, %v14941_v55  ;;  %v10214_v34 = vpop.f32.mrb[55].mxu0  ;;  %v5570_v61 = vrot.slane %v5568_v48, 1  ;;  %v14943_v18 = vld [vmem:[#allocation68_spill] sm:$0xff]  ;;  %v14944_v55 = vld [vmem:[#allocation39_spill] sm:$0xff] }
 0x5a8   : > { %v13548_v11 = vsel %vm914_vm1, %v5740_v12, %v5742_v28 }
 0x5a9   : > { %v9501_v4 = vpack.c.bf16 %v4601_v44, %v4600_v13  ;;  %v4170_v56 = vadd.f32 %v13319_v45, %v4109_v10  ;;  %v4110_v3 = vmul.f32 %v10518_v47, %v13314_v40  ;;  %v5571_v21 = vsel %vm663_vm2, %v5566_v60, %v5570_v61 }
 0x5aa   : > { %6081 = vmatprep.mubr.bf16.mxu1 %v5571_v21  ;;  %v4923_v20 = vld [vmem:[#allocation3 + $0x58] sm:$0xf]  ;;  %v4924_v26 = vld [vmem:[#allocation3 + $0x5c] sm:$0xf]  ;;  %v5574_v34 = vor.u32 %v5572_v41, %v5570_v61 }
 0x5ab   : > { %9664 = vst [vmem:[#allocation3 + $0x60] sm:$0xff] %v9501_v4   ;;  %v4224_v50 = vmax.f32 %v4170_v56, 0.0  ;;  %v4171_v36 = vadd.f32 %v13319_v45, %v4110_v3  ;;  %6082 = vmatmul.mubr.bf16.gmra.mrb[128].mxu1 %v9166_v37  ;;  %v9168_v35 = vcombine.low %v4922_v63, %v4923_v20  ;;  %v13554_v48 = vcombine.low %v4923_v20, %v4924_v26  ;;  %v14945_v4 = vld [vmem:[#allocation40_spill] sm:$0xff]  ;;  %v14946_v37 = vld [vmem:[#allocation69_spill] sm:$0xff] }
 0x5ac   : > { %v3919_v12 = vpop.f32.mrb[56].mxu0 }
 0x5ad   : > { %14942 = vst [vmem:[#allocation35_spill] sm:$0xff] %v13554_v48  ;;  %v4225_v13 = vmax.f32 %v4171_v36, 0.0  ;;  %v10519_v2 = vadd.f32 %v3919_v12, %v14943_v18  ;;  %v10217_v44 = vpop.f32.mrb[57].mxu0  ;;  %v5576_v10 = vshll.u32 %v9168_v35, 16  ;;  %v4602_v60 = vmul.f32 %v14944_v55, %v4224_v50 }
 0x5ae   : > { %v3922_v47 = vpop.f32.mrb[58].mxu0  ;;  %v5744_v21 = vrot.slane %v9168_v35, 1  ;;  %v5580_v55 = vshrl.u32 %v9168_v35, 16 }
 0x5af   : > { %v4603_v56 = vmul.f32 %v14945_v4, %v4225_v13  ;;  %v4111_v3 = vmul.f32 %v10519_v2, %v13314_v40  ;;  %v10520_v63 = vadd.f32 %v3922_v47, %v14946_v37  ;;  %v10218_v20 = vpop.f32.mrb[59].mxu0  ;;  %v5578_v48 = vrot.slane %v5576_v10, 1  ;;  %v14948_v47 = vld [vmem:[#allocation72_spill] sm:$0xff]  ;;  %v14949_v37 = vld [vmem:[#allocation41_spill] sm:$0xff] }
 0x5b0   : > { %v13562_v0 = vsel %vm914_vm1, %v5742_v28, %v5744_v21 }
 0x5b1   : > { %v9506_v36 = vpack.c.bf16 %v4603_v56, %v4602_v60  ;;  %v4172_v12 = vadd.f32 %v13319_v45, %v4111_v3  ;;  %v4112_v18 = vmul.f32 %v10520_v63, %v13314_v40  ;;  %v5579_v50 = vsel %vm663_vm2, %v5574_v34, %v5578_v48 }
 0x5b2   : > { %6089 = vmatprep.mubr.bf16.mxu1 %v5579_v50  ;;  %v4925_v61 = vld [vmem:[#allocation3 + $0x60] sm:$0xf]  ;;  %v4926_v41 = vld [vmem:[#allocation3 + $0x64] sm:$0xf]  ;;  %v5582_v20 = vor.u32 %v5580_v55, %v5578_v48 }
 0x5b3   : > { %9665 = vst [vmem:[#allocation3 + $0x68] sm:$0xff] %v9506_v36   ;;  %v4226_v13 = vmax.f32 %v4172_v12, 0.0  ;;  %v4173_v2 = vadd.f32 %v13319_v45, %v4112_v18  ;;  %6090 = vmatmul.mubr.bf16.gmra.mrb[132].mxu1 %v9167_v54  ;;  %v9169_v44 = vcombine.low %v4924_v26, %v4925_v61  ;;  %v13568_v10 = vcombine.low %v4925_v61, %v4926_v41  ;;  %v14950_v36 = vld [vmem:[#allocation42_spill] sm:$0xff]  ;;  %v14951_v54 = vld [vmem:[#allocation73_spill] sm:$0xff] }
 0x5b4   : > { %v3927_v28 = vpop.f32.mrb[60].mxu0 }
 0x5b5   : > { %14947 = vst [vmem:[#allocation36_spill] sm:$0xff] %v13568_v10  ;;  %v4227_v60 = vmax.f32 %v4173_v2, 0.0  ;;  %v10521_v4 = vadd.f32 %v3927_v28, %v14948_v47  ;;  %v10221_v56 = vpop.f32.mrb[61].mxu0  ;;  %v5584_v3 = vshll.u32 %v9169_v44, 16  ;;  %v4604_v34 = vmul.f32 %v14949_v37, %v4226_v13 }
 0x5b6   : > { %v3930_v63 = vpop.f32.mrb[62].mxu0  ;;  %v5746_v50 = vrot.slane %v9169_v44, 1  ;;  %v5588_v37 = vshrl.u32 %v9169_v44, 16 }
 0x5b7   : > { %v4605_v12 = vmul.f32 %v14950_v36, %v4227_v60  ;;  %v4113_v18 = vmul.f32 %v10521_v4, %v13314_v40  ;;  %v10522_v26 = vadd.f32 %v3930_v63, %v14951_v54  ;;  %v10222_v61 = vpop.f32.mrb[63].mxu0  ;;  %v5586_v10 = vrot.slane %v5584_v3, 1  ;;  %v14953_v63 = vld [vmem:[#allocation74_spill] sm:$0xff] }
 0x5b8   : > { %v13576_v15 = vsel %vm914_vm1, %v5744_v21, %v5746_v50 }
 0x5b9   : > { %v9511_v2 = vpack.c.bf16 %v4605_v12, %v4604_v34  ;;  %v4174_v28 = vadd.f32 %v13319_v45, %v4113_v18  ;;  %v4114_v47 = vmul.f32 %v10522_v26, %v13314_v40  ;;  %v5587_v13 = vsel %vm663_vm2, %v5582_v20, %v5586_v10  ;;  %v14954_v18 = vld [vmem:[#allocation43_spill] sm:$0xff] }
 0x5ba   : > { %6097 = vmatprep.mubr.bf16.mxu1 %v5587_v13  ;;  %v4927_v48 = vld [vmem:[#allocation3 + $0x68] sm:$0xf]  ;;  %v4928_v55 = vld [vmem:[#allocation3 + $0x6c] sm:$0xf]  ;;  %v5590_v26 = vor.u32 %v5588_v37, %v5586_v10  ;;  %v13587_v13 = vld [vmem:[#allocation8] ss:$0 sm:$0xff] }
 0x5bb   : > { %9666 = vst [vmem:[#allocation3 + $0x70] sm:$0xff] %v9511_v2   ;;  %v4228_v60 = vmax.f32 %v4174_v28, 0.0  ;;  %v4175_v4 = vadd.f32 %v13319_v45, %v4114_v47  ;;  %6098 = vmatmul.mubr.bf16.gmra.mrb[136].mxu1 %v9168_v35  ;;  %v9170_v56 = vcombine.low %v4926_v41, %v4927_v48  ;;  %v13582_v3 = vcombine.low %v4927_v48, %v4928_v55  ;;  %v14955_v2 = vld [vmem:[#allocation44_spill] sm:$0xff]  ;;  %v14956_v35 = vld [vmem:[#allocation75_spill] sm:$0xff] }
 0x5bc   : > { %v3935_v21 = vpop.f32.mrb[64].mxu0 }
 0x5bd   : > { %14952 = vst [vmem:[#allocation60_spill] sm:$0xff] %v13582_v3  ;;  %v4229_v34 = vmax.f32 %v4175_v4, 0.0  ;;  %v10523_v36 = vadd.f32 %v3935_v21, %v14953_v63  ;;  %v10225_v12 = vpop.f32.mrb[65].mxu0  ;;  %v5592_v40 = vshll.u32 %v9170_v56, 16  ;;  %v4606_v20 = vmul.f32 %v14954_v18, %v4228_v60  ;;  %v13594_v63 = vld [vmem:[#allocation10] ss:$0 sm:$0xff] }
 0x5be   : > { %v3938_v54 = vpop.f32.mrb[66].mxu0  ;;  %v5748_v61 = vrot.slane %v9170_v56, 1 }
 0x5bf   : > { %v4607_v28 = vmul.f32 %v14955_v2, %v4229_v34  ;;  %v4115_v45 = vmul.f32 %v13587_v13, %v10523_v36  ;;  %v10524_v41 = vadd.f32 %v3938_v54, %v14956_v35  ;;  %v10226_v47 = vpop.f32.mrb[67].mxu0  ;;  %v5594_v48 = vrot.slane %v5592_v40, 1 }
 0x5c0   : > { %v13592_v4 = vsel %vm914_vm1, %v5746_v50, %v5748_v61  ;;  %v5596_v54 = vshrl.u32 %v9170_v56, 16  ;;  %v14959_v47 = vld [vmem:[#allocation45_spill] sm:$0xff] }
 0x5c1   : > { %v9516_v21 = vpack.c.bf16 %v4607_v28, %v4606_v20  ;;  %v4176_v60 = vadd.f32 %v13594_v63, %v4115_v45  ;;  %v4116_v10 = vmul.f32 %v13587_v13, %v10524_v41  ;;  %v5595_v37 = vsel %vm663_vm2, %v5590_v26, %v5594_v48  ;;  %v14958_v28 = vld [vmem:[#allocation76_spill] sm:$0xff] }
 0x5c2   : > { %6105 = vmatprep.mubr.bf16.mxu1 %v5595_v37  ;;  %v4929_v34 = vld [vmem:[#allocation3 + $0x70] sm:$0xf]  ;;  %v4930_v12 = vld [vmem:[#allocation3 + $0x74] sm:$0xf]  ;;  %v5598_v3 = vor.u32 %v5596_v54, %v5594_v48 }
 0x5c3   : > { %9667 = vst [vmem:[#allocation3 + $0x78] sm:$0xff] %v9516_v21   ;;  %v4230_v36 = vmax.f32 %v4176_v60, 0.0  ;;  %v4177_v18 = vadd.f32 %v13594_v63, %v4116_v10  ;;  %6106 = vmatmul.mubr.bf16.gmra.mrb[140].mxu1 %v9169_v44  ;;  %v9171_v40 = vcombine.low %v4928_v55, %v4929_v34  ;;  %v13600_v50 = vcombine.low %v4929_v34, %v4930_v12  ;;  %v14960_v21 = vld [vmem:[#allocation46_spill] sm:$0xff]  ;;  %v14961_v44 = vld [vmem:[#allocation77_spill] sm:$0xff] }
 0x5c4   : > { %v3943_v20 = vpop.f32.mrb[68].mxu0 }
 0x5c5   : > { %14957 = vst [vmem:[#allocation63_spill] sm:$0xff] %v13600_v50  ;;  %v4231_v2 = vmax.f32 %v4177_v18, 0.0  ;;  %v10525_v45 = vadd.f32 %v3943_v20, %v14958_v28  ;;  %v10229_v35 = vpop.f32.mrb[69].mxu0  ;;  %v5600_v41 = vshll.u32 %v9171_v40, 16  ;;  %v4608_v26 = vmul.f32 %v14959_v47, %v4230_v36 }
 0x5c6   : > { %v3946_v37 = vpop.f32.mrb[70].mxu0  ;;  %v5750_v16 = vrot.slane %v9171_v40, 1  ;;  %v5604_v47 = vshrl.u32 %v9171_v40, 16 }
 0x5c7   : > { %v4609_v60 = vmul.f32 %v14960_v21, %v4231_v2  ;;  %v4117_v10 = vmul.f32 %v13587_v13, %v10525_v45  ;;  %v10526_v55 = vadd.f32 %v3946_v37, %v14961_v44  ;;  %v10230_v34 = vpop.f32.mrb[71].mxu0  ;;  %v5602_v50 = vrot.slane %v5600_v41, 1 }
 0x5c8   : > { %v13608_v57 = vsel %vm914_vm1, %v5748_v61, %v5750_v16 }
 0x5c9   : > { %v9521_v18 = vpack.c.bf16 %v4609_v60, %v4608_v26  ;;  %v4178_v20 = vadd.f32 %v13594_v63, %v4117_v10  ;;  %v4118_v28 = vmul.f32 %v13587_v13, %v10526_v55  ;;  %v5603_v36 = vsel %vm663_vm2, %v5598_v3, %v5602_v50  ;;  %v14962_v10 = vld [vmem:[#allocation47_spill] sm:$0xff] }
 0x5ca   : > { %6113 = vmatprep.mubr.bf16.mxu1 %v5603_v36  ;;  %v4931_v48 = vld [vmem:[#allocation3 + $0x78] sm:$0xf]  ;;  %v4932_v54 = vld [vmem:[#allocation3 + $0x7c] sm:$0xf]  ;;  %v5606_v55 = vor.u32 %v5604_v47, %v5602_v50 }
 0x5cb   : > { %9668 = vst [vmem:[#allocation3 + $0x80] sm:$0xff] %v9521_v18   ;;  %v4232_v2 = vmax.f32 %v4178_v20, 0.0  ;;  %v4179_v45 = vadd.f32 %v13594_v63, %v4118_v28  ;;  %6114 = vmatmul.mubr.bf16.gmra.mrb[144].mxu1 %v9170_v56  ;;  %v9172_v35 = vcombine.low %v4930_v12, %v4931_v48  ;;  %v13614_v41 = vcombine.low %v4931_v48, %v4932_v54  ;;  %v14963_v18 = vld [vmem:[#allocation48_spill] sm:$0xff] }
 0x5cc   : > { %v3951_v61 = vpop.f32.mrb[72].mxu0 }
 0x5cd   : > { %v4233_v26 = vmax.f32 %v4179_v45, 0.0  ;;  %v10527_v37 = vadd.f32 %v3951_v61, %v13335_v6  ;;  %v10233_v21 = vpop.f32.mrb[73].mxu0  ;;  %v5608_v60 = vshll.u32 %v9172_v35, 16  ;;  %v4610_v3 = vmul.f32 %v14962_v10, %v4232_v2 }
 0x5ce   : > { %v3954_v44 = vpop.f32.mrb[74].mxu0  ;;  %v5752_v34 = vrot.slane %v9172_v35, 1 }
 0x5cf   : > { %v4611_v20 = vmul.f32 %v14963_v18, %v4233_v26  ;;  %v4119_v28 = vmul.f32 %v13587_v13, %v10527_v37  ;;  %v10528_v56 = vadd.f32 %v3954_v44, %v13338_v32  ;;  %v10234_v12 = vpop.f32.mrb[75].mxu0  ;;  %v5610_v36 = vrot.slane %v5608_v60, 1 }
 0x5d0   : > { %v13622_v48 = vsel %vm914_vm1, %v5750_v16, %v5752_v34  ;;  %v5612_v60 = vshrl.u32 %v9172_v35, 16 }
 0x5d1   : > { %v9526_v45 = vpack.c.bf16 %v4611_v20, %v4610_v3  ;;  %v4180_v6 = vadd.f32 %v13594_v63, %v4119_v28  ;;  %v4120_v61 = vmul.f32 %v13587_v13, %v10528_v56  ;;  %v5611_v2 = vsel %vm663_vm2, %v5606_v55, %v5610_v36  ;;  %v14964_v20 = vld [vmem:[#allocation49_spill] sm:$0xff] }
 0x5d2   : > { %6121 = vmatprep.mubr.bf16.mxu1 %v5611_v2  ;;  %v4933_v50 = vld [vmem:[#allocation3 + $0x80] sm:$0xf]  ;;  %v4934_v47 = vld [vmem:[#allocation3 + $0x84] sm:$0xf]  ;;  %v5614_v56 = vor.u32 %v5612_v60, %v5610_v36 }
 0x5d3   : > { %9669 = vst [vmem:[#allocation3 + $0x88] sm:$0xff] %v9526_v45   ;;  %v4234_v26 = vmax.f32 %v4180_v6, 0.0  ;;  %v4181_v37 = vadd.f32 %v13594_v63, %v4120_v61  ;;  %6122 = vmatmul.mubr.bf16.gmra.mrb[148].mxu1 %v9171_v40  ;;  %v9173_v32 = vcombine.low %v4932_v54, %v4933_v50  ;;  %v13628_v21 = vcombine.low %v4933_v50, %v4934_v47  ;;  %v14965_v45 = vld [vmem:[#allocation50_spill] sm:$0xff] }
 0x5d4   : > { %v3959_v16 = vpop.f32.mrb[76].mxu0 }
 0x5d5   : > { %v4235_v10 = vmax.f32 %v4181_v37, 0.0  ;;  %v10529_v3 = vadd.f32 %v3959_v16, %v13345_v33  ;;  %v10237_v44 = vpop.f32.mrb[77].mxu0  ;;  %v5616_v18 = vshll.u32 %v9173_v32, 16  ;;  %v4612_v55 = vmul.f32 %v14964_v20, %v4234_v26 }
 0x5d6   : > { %v3962_v28 = vpop.f32.mrb[78].mxu0  ;;  %v5754_v12 = vrot.slane %v9173_v32, 1 }
 0x5d7   : > { %v4613_v6 = vmul.f32 %v14965_v45, %v4235_v10  ;;  %v4121_v61 = vmul.f32 %v13587_v13, %v10529_v3  ;;  %v10530_v40 = vadd.f32 %v3962_v28, %v13348_v25  ;;  %v10238_v54 = vpop.f32.mrb[79].mxu0  ;;  %v5618_v2 = vrot.slane %v5616_v18, 1 }
 0x5d8   : > { %v13636_v50 = vsel %vm914_vm1, %v5752_v34, %v5754_v12  ;;  %v5620_v18 = vshrl.u32 %v9173_v32, 16 }
 0x5d9   : > { %v9531_v37 = vpack.c.bf16 %v4613_v6, %v4612_v55  ;;  %v4182_v33 = vadd.f32 %v13594_v63, %v4121_v61  ;;  %v4122_v16 = vmul.f32 %v13587_v13, %v10530_v40  ;;  %v5619_v26 = vsel %vm663_vm2, %v5614_v56, %v5618_v2  ;;  %v14966_v6 = vld [vmem:[#allocation51_spill] sm:$0xff] }
 0x5da   : > { %6129 = vmatprep.mubr.bf16.mxu1 %v5619_v26  ;;  %v4935_v36 = vld [vmem:[#allocation3 + $0x88] sm:$0xf]  ;;  %v4936_v60 = vld [vmem:[#allocation3 + $0x8c] sm:$0xf]  ;;  %v5622_v40 = vor.u32 %v5620_v18, %v5618_v2 }
 0x5db   : > { %9670 = vst [vmem:[#allocation3 + $0x90] sm:$0xff] %v9531_v37   ;;  %v4236_v10 = vmax.f32 %v4182_v33, 0.0  ;;  %v4183_v3 = vadd.f32 %v13594_v63, %v4122_v16  ;;  %6130 = vmatmul.mubr.bf16.gmra.mrb[152].mxu1 %v9172_v35  ;;  %v9174_v25 = vcombine.low %v4934_v47, %v4935_v36  ;;  %v13642_v44 = vcombine.low %v4935_v36, %v4936_v60  ;;  %v14967_v37 = vld [vmem:[#allocation52_spill] sm:$0xff] }
 0x5dc   : > { %v3967_v34 = vpop.f32.mrb[80].mxu0 }
 0x5dd   : > { %v4237_v20 = vmax.f32 %v4183_v3, 0.0  ;;  %v10531_v55 = vadd.f32 %v3967_v34, %v13357_v43  ;;  %v10241_v28 = vpop.f32.mrb[81].mxu0  ;;  %v5624_v45 = vshll.u32 %v9174_v25, 16  ;;  %v4614_v56 = vmul.f32 %v14966_v6, %v4236_v10 }
 0x5de   : > { %v3970_v61 = vpop.f32.mrb[82].mxu0  ;;  %v5756_v54 = vrot.slane %v9174_v25, 1 }
 0x5df   : > { %v4615_v33 = vmul.f32 %v14967_v37, %v4237_v20  ;;  %v4123_v16 = vmul.f32 %v13587_v13, %v10531_v55  ;;  %v10532_v35 = vadd.f32 %v3970_v61, %v13360_v8  ;;  %v10242_v47 = vpop.f32.mrb[83].mxu0  ;;  %v5626_v26 = vrot.slane %v5624_v45, 1 }
 0x5e0   : > { %v13650_v36 = vsel %vm914_vm1, %v5754_v12, %v5756_v54  ;;  %v5628_v45 = vshrl.u32 %v9174_v25, 16 }
 0x5e1   : > { %v9536_v3 = vpack.c.bf16 %v4615_v33, %v4614_v56  ;;  %v4184_v43 = vadd.f32 %v13594_v63, %v4123_v16  ;;  %v4124_v34 = vmul.f32 %v13587_v13, %v10532_v35  ;;  %v5627_v10 = vsel %vm663_vm2, %v5622_v40, %v5626_v26  ;;  %v14968_v33 = vld [vmem:[#allocation53_spill] sm:$0xff] }
 0x5e2   : > { %6137 = vmatprep.mubr.bf16.mxu1 %v5627_v10  ;;  %v4937_v2 = vld [vmem:[#allocation3 + $0x90] sm:$0xf]  ;;  %v4938_v18 = vld [vmem:[#allocation3 + $0x94] sm:$0xf]  ;;  %v5630_v35 = vor.u32 %v5628_v45, %v5626_v26 }
 0x5e3   : > { %9671 = vst [vmem:[#allocation3 + $0x98] sm:$0xff] %v9536_v3   ;;  %v4238_v20 = vmax.f32 %v4184_v43, 0.0  ;;  %v4185_v55 = vadd.f32 %v13594_v63, %v4124_v34  ;;  %6138 = vmatmul.mubr.bf16.gmra.mrb[156].mxu1 %v9173_v32  ;;  %v9175_v8 = vcombine.low %v4936_v60, %v4937_v2  ;;  %v13656_v28 = vcombine.low %v4937_v2, %v4938_v18  ;;  %v14969_v3 = vld [vmem:[#allocation54_spill] sm:$0xff] }
 0x5e4   : > { %v3975_v12 = vpop.f32.mrb[84].mxu0 }
 0x5e5   : > { %v4239_v6 = vmax.f32 %v4185_v55, 0.0  ;;  %v10533_v56 = vadd.f32 %v3975_v12, %v13369_v51  ;;  %v10245_v61 = vpop.f32.mrb[85].mxu0  ;;  %v5632_v37 = vshll.u32 %v9175_v8, 16  ;;  %v4616_v40 = vmul.f32 %v14968_v33, %v4238_v20 }
 0x5e6   : > { %v3978_v16 = vpop.f32.mrb[86].mxu0  ;;  %v5758_v47 = vrot.slane %v9175_v8, 1 }
 0x5e7   : > { %v4617_v43 = vmul.f32 %v14969_v3, %v4239_v6  ;;  %v4125_v34 = vmul.f32 %v13587_v13, %v10533_v56  ;;  %v10534_v32 = vadd.f32 %v3978_v16, %v13372_v38  ;;  %v10246_v60 = vpop.f32.mrb[87].mxu0  ;;  %v5634_v10 = vrot.slane %v5632_v37, 1 }
 0x5e8   : > { %v13664_v2 = vsel %vm914_vm1, %v5756_v54, %v5758_v47  ;;  %v5636_v37 = vshrl.u32 %v9175_v8, 16 }
 0x5e9   : > { %v9541_v55 = vpack.c.bf16 %v4617_v43, %v4616_v40  ;;  %v4186_v51 = vadd.f32 %v13594_v63, %v4125_v34  ;;  %v4126_v12 = vmul.f32 %v13587_v13, %v10534_v32  ;;  %v5635_v20 = vsel %vm663_vm2, %v5630_v35, %v5634_v10  ;;  %v14970_v43 = vld [vmem:[#allocation56_spill] sm:$0xff] }
 0x5ea   : > { %6145 = vmatprep.mubr.bf16.mxu1 %v5635_v20  ;;  %v4939_v26 = vld [vmem:[#allocation3 + $0x98] sm:$0xf]  ;;  %v4940_v45 = vld [vmem:[#allocation3 + $0x9c] sm:$0xf]  ;;  %v5638_v32 = vor.u32 %v5636_v37, %v5634_v10 }
 0x5eb   : > { %9672 = vst [vmem:[#allocation3 + $0xa0] sm:$0xff] %v9541_v55   ;;  %v4240_v6 = vmax.f32 %v4186_v51, 0.0  ;;  %v4187_v56 = vadd.f32 %v13594_v63, %v4126_v12  ;;  %6146 = vmatmul.mubr.bf16.gmra.mrb[160].mxu1 %v9174_v25  ;;  %v9176_v38 = vcombine.low %v4938_v18, %v4939_v26  ;;  %v13670_v61 = vcombine.low %v4939_v26, %v4940_v45  ;;  %v14971_v55 = vld [vmem:[#allocation57_spill] sm:$0xff] }
 0x5ec   : > { %v3983_v54 = vpop.f32.mrb[88].mxu0 }
 0x5ed   : > { %v4241_v33 = vmax.f32 %v4187_v56, 0.0  ;;  %v10535_v40 = vadd.f32 %v3983_v54, %v13383_v31  ;;  %v10249_v16 = vpop.f32.mrb[89].mxu0  ;;  %v5640_v3 = vshll.u32 %v9176_v38, 16  ;;  %v4618_v35 = vmul.f32 %v14970_v43, %v4240_v6 }
 0x5ee   : > { %v3986_v34 = vpop.f32.mrb[90].mxu0  ;;  %v5760_v60 = vrot.slane %v9176_v38, 1 }
 0x5ef   : > { %v4619_v51 = vmul.f32 %v14971_v55, %v4241_v33  ;;  %v4127_v12 = vmul.f32 %v13587_v13, %v10535_v40  ;;  %v10536_v25 = vadd.f32 %v3986_v34, %v13390_v17  ;;  %v10250_v18 = vpop.f32.mrb[91].mxu0  ;;  %v5642_v20 = vrot.slane %v5640_v3, 1 }
 0x5f0   : > { %v13678_v26 = vsel %vm914_vm1, %v5758_v47, %v5760_v60  ;;  %v5644_v3 = vshrl.u32 %v9176_v38, 16 }
 0x5f1   : > { %v9546_v56 = vpack.c.bf16 %v4619_v51, %v4618_v35  ;;  %v4188_v31 = vadd.f32 %v13594_v63, %v4127_v12  ;;  %v4128_v54 = vmul.f32 %v13587_v13, %v10536_v25  ;;  %v5643_v6 = vsel %vm663_vm2, %v5638_v32, %v5642_v20  ;;  %v14972_v51 = vld [vmem:[#allocation59_spill] sm:$0xff] }
 0x5f2   : > { %6153 = vmatprep.mubr.bf16.mxu1 %v5643_v6  ;;  %v4941_v10 = vld [vmem:[#allocation3 + $0xa0] sm:$0xf]  ;;  %v4942_v37 = vld [vmem:[#allocation3 + $0xa4] sm:$0xf]  ;;  %v5646_v25 = vor.u32 %v5644_v3, %v5642_v20 }
 0x5f3   : > { %9673 = vst [vmem:[#allocation3 + $0xa8] sm:$0xff] %v9546_v56   ;;  %v4242_v33 = vmax.f32 %v4188_v31, 0.0  ;;  %v4189_v40 = vadd.f32 %v13594_v63, %v4128_v54  ;;  %6154 = vmatmul.mubr.bf16.gmra.mrb[164].mxu1 %v9175_v8  ;;  %v9177_v17 = vcombine.low %v4940_v45, %v4941_v10  ;;  %v13684_v16 = vcombine.low %v4941_v10, %v4942_v37  ;;  %v14973_v56 = vld [vmem:[#allocation61_spill] sm:$0xff] }
 0x5f4   : > { %v3991_v47 = vpop.f32.mrb[92].mxu0 }
 0x5f5   : > { %v4243_v43 = vmax.f32 %v4189_v40, 0.0  ;;  %v10537_v35 = vadd.f32 %v3991_v47, %v13405_v14  ;;  %v10253_v34 = vpop.f32.mrb[93].mxu0  ;;  %v5648_v55 = vshll.u32 %v9177_v17, 16  ;;  %v4620_v32 = vmul.f32 %v14972_v51, %v4242_v33 }
 0x5f6   : > { %v3994_v12 = vpop.f32.mrb[94].mxu0  ;;  %v5762_v18 = vrot.slane %v9177_v17, 1 }
 0x5f7   : > { %v4621_v31 = vmul.f32 %v14973_v56, %v4243_v43  ;;  %v4129_v54 = vmul.f32 %v13587_v13, %v10537_v35  ;;  %v10538_v8 = vadd.f32 %v3994_v12, %v13413_v58  ;;  %v10254_v45 = vpop.f32.mrb[95].mxu0  ;;  %v5650_v6 = vrot.slane %v5648_v55, 1 }
 0x5f8   : > { %v13692_v10 = vsel %vm914_vm1, %v5760_v60, %v5762_v18  ;;  %v5652_v55 = vshrl.u32 %v9177_v17, 16 }
 0x5f9   : > { %v9551_v40 = vpack.c.bf16 %v4621_v31, %v4620_v32  ;;  %v4190_v14 = vadd.f32 %v13594_v63, %v4129_v54  ;;  %v4130_v47 = vmul.f32 %v13587_v13, %v10538_v8  ;;  %v5651_v33 = vsel %vm663_vm2, %v5646_v25, %v5650_v6  ;;  %v14974_v31 = vld [vmem:[#allocation62_spill] sm:$0xff] }
 0x5fa   : > { %6161 = vmatprep.mubr.bf16.mxu1 %v5651_v33  ;;  %v4943_v20 = vld [vmem:[#allocation3 + $0xa8] sm:$0xf]  ;;  %v4944_v3 = vld [vmem:[#allocation3 + $0xac] sm:$0xf]  ;;  %v5654_v8 = vor.u32 %v5652_v55, %v5650_v6 }
 0x5fb   : > { %9674 = vst [vmem:[#allocation3 + $0xb0] sm:$0xff] %v9551_v40   ;;  %v4244_v43 = vmax.f32 %v4190_v14, 0.0  ;;  %v4191_v35 = vadd.f32 %v13594_v63, %v4130_v47  ;;  %6162 = vmatmul.mubr.bf16.gmra.mrb[168].mxu1 %v9176_v38  ;;  %v9178_v58 = vcombine.low %v4942_v37, %v4943_v20  ;;  %v13698_v34 = vcombine.low %v4943_v20, %v4944_v3  ;;  %v14975_v40 = vld [vmem:[#allocation64_spill] sm:$0xff] }
 0x5fc   : > { %v3999_v60 = vpop.f32.mrb[96].mxu0 }
 0x5fd   : > { %v4245_v51 = vmax.f32 %v4191_v35, 0.0  ;;  %v10539_v32 = vadd.f32 %v3999_v60, %v13428_v24  ;;  %v10257_v12 = vpop.f32.mrb[97].mxu0  ;;  %v5656_v56 = vshll.u32 %v9178_v58, 16  ;;  %v4622_v25 = vmul.f32 %v14974_v31, %v4244_v43 }
 0x5fe   : > { %v4002_v54 = vpop.f32.mrb[98].mxu0  ;;  %v5764_v45 = vrot.slane %v9178_v58, 1 }
 0x5ff   : > { %v4623_v14 = vmul.f32 %v14975_v40, %v4245_v51  ;;  %v4131_v47 = vmul.f32 %v13587_v13, %v10539_v32  ;;  %v10540_v38 = vadd.f32 %v4002_v54, %v13437_v53  ;;  %v10258_v37 = vpop.f32.mrb[99].mxu0  ;;  %v5658_v33 = vrot.slane %v5656_v56, 1 }
 0x600   : > { %v13706_v20 = vsel %vm914_vm1, %v5762_v18, %v5764_v45  ;;  %v5660_v56 = vshrl.u32 %v9178_v58, 16 }
 0x601   : > { %v9556_v35 = vpack.c.bf16 %v4623_v14, %v4622_v25  ;;  %v4192_v24 = vadd.f32 %v13594_v63, %v4131_v47  ;;  %v4132_v60 = vmul.f32 %v13587_v13, %v10540_v38  ;;  %v5659_v43 = vsel %vm663_vm2, %v5654_v8, %v5658_v33  ;;  %v14976_v14 = vld [vmem:[#allocation66_spill] sm:$0xff] }
 0x602   : > { %6169 = vmatprep.mubr.bf16.mxu1 %v5659_v43  ;;  %v4945_v6 = vld [vmem:[#allocation3 + $0xb0] sm:$0xf]  ;;  %v4946_v55 = vld [vmem:[#allocation3 + $0xb4] sm:$0xf]  ;;  %v5662_v38 = vor.u32 %v5660_v56, %v5658_v33 }
 0x603   : > { %9675 = vst [vmem:[#allocation3 + $0xb8] sm:$0xff] %v9556_v35   ;;  %v4246_v51 = vmax.f32 %v4192_v24, 0.0  ;;  %v4193_v32 = vadd.f32 %v13594_v63, %v4132_v60  ;;  %6170 = vmatmul.mubr.bf16.gmra.mrb[172].mxu1 %v9177_v17  ;;  %v9179_v53 = vcombine.low %v4944_v3, %v4945_v6  ;;  %v13712_v12 = vcombine.low %v4945_v6, %v4946_v55  ;;  %v14977_v35 = vld [vmem:[#allocation67_spill] sm:$0xff] }
 0x604   : > { %v4007_v18 = vpop.f32.mrb[100].mxu0 }
 0x605   : > { %v4247_v31 = vmax.f32 %v4193_v32, 0.0  ;;  %v10541_v25 = vadd.f32 %v4007_v18, %v13456_v39  ;;  %v10261_v54 = vpop.f32.mrb[101].mxu0  ;;  %v5664_v40 = vshll.u32 %v9179_v53, 16  ;;  %v4624_v8 = vmul.f32 %v14976_v14, %v4246_v51 }
 0x606   : > { %v4010_v47 = vpop.f32.mrb[102].mxu0  ;;  %v5766_v37 = vrot.slane %v9179_v53, 1 }
 0x607   : > { %v4625_v24 = vmul.f32 %v14977_v35, %v4247_v31  ;;  %v4133_v60 = vmul.f32 %v13587_v13, %v10541_v25  ;;  %v10542_v17 = vadd.f32 %v4010_v47, %v13464_v30  ;;  %v10262_v3 = vpop.f32.mrb[103].mxu0  ;;  %v5666_v43 = vrot.slane %v5664_v40, 1 }
 0x608   : > { %v13720_v6 = vsel %vm914_vm1, %v5764_v45, %v5766_v37  ;;  %v5668_v40 = vshrl.u32 %v9179_v53, 16 }
 0x609   : > { %v9561_v32 = vpack.c.bf16 %v4625_v24, %v4624_v8  ;;  %v4194_v39 = vadd.f32 %v13594_v63, %v4133_v60  ;;  %v4134_v18 = vmul.f32 %v13587_v13, %v10542_v17  ;;  %v5667_v51 = vsel %vm663_vm2, %v5662_v38, %v5666_v43  ;;  %v14978_v24 = vld [vmem:[#allocation70_spill] sm:$0xff] }
 0x60a   : > { %6177 = vmatprep.mubr.bf16.mxu1 %v5667_v51  ;;  %v4947_v33 = vld [vmem:[#allocation3 + $0xb8] sm:$0xf]  ;;  %v4948_v56 = vld [vmem:[#allocation3 + $0xbc] sm:$0xf]  ;;  %v5670_v17 = vor.u32 %v5668_v40, %v5666_v43 }
 0x60b   : > { %9676 = vst [vmem:[#allocation3 + $0xc0] sm:$0xff] %v9561_v32   ;;  %v4248_v31 = vmax.f32 %v4194_v39, 0.0  ;;  %v4195_v25 = vadd.f32 %v13594_v63, %v4134_v18  ;;  %6178 = vmatmul.mubr.bf16.gmra.mrb[176].mxu1 %v9178_v58  ;;  %v9180_v30 = vcombine.low %v4946_v55, %v4947_v33  ;;  %v13726_v54 = vcombine.low %v4947_v33, %v4948_v56  ;;  %v14979_v32 = vld [vmem:[#allocation71_spill] sm:$0xff] }
 0x60c   : > { %v4015_v45 = vpop.f32.mrb[104].mxu0 }
 0x60d   : > { %v4249_v14 = vmax.f32 %v4195_v25, 0.0  ;;  %v10543_v8 = vadd.f32 %v4015_v45, %v13486_v7  ;;  %v10265_v47 = vpop.f32.mrb[105].mxu0  ;;  %v5672_v35 = vshll.u32 %v9180_v30, 16  ;;  %v4626_v38 = vmul.f32 %v14978_v24, %v4248_v31  ;;  %v4569_v24 = vpop.permute.xlu0 %4568 }
 0x60e   : > { %v4018_v60 = vpop.f32.mrb[106].mxu0  ;;  %v5768_v3 = vrot.slane %v9180_v30, 1  ;;  %v5676_v47 = vshrl.u32 %v9180_v30, 16 }
 0x60f   : > { %v4627_v39 = vmul.f32 %v14979_v32, %v4249_v14  ;;  %v4135_v18 = vmul.f32 %v13587_v13, %v10543_v8  ;;  %v10544_v58 = vadd.f32 %v4018_v60, %v13493_v42  ;;  %v10266_v55 = vpop.f32.mrb[107].mxu0  ;;  %v5674_v51 = vrot.slane %v5672_v35, 1 }
 0x610   : > { %v13734_v33 = vsel %vm914_vm1, %v5766_v37, %v5768_v3  ;;  %v4574_v37 = vpop.permute.xlu1 %4573 }
 0x611   : > { %v9566_v25 = vpack.c.bf16 %v4627_v39, %v4626_v38  ;;  %v4196_v7 = vadd.f32 %v13594_v63, %v4135_v18  ;;  %v4136_v45 = vmul.f32 %v13587_v13, %v10544_v58  ;;  %v5675_v31 = vsel %vm663_vm2, %v5670_v17, %v5674_v51 }
 0x612   : > { %6185 = vmatprep.mubr.bf16.mxu1 %v5675_v31  ;;  %v5442_v43 = vld [vmem:[#allocation3 + $0xc0] sm:$0xf]  ;;  %v5678_v39 = vor.u32 %v5676_v47, %v5674_v51 }
 0x613   : > { %9677 = vst [vmem:[#allocation3 + $0xc8] sm:$0xff] %v9566_v25   ;;  %v4250_v40 = vmax.f32 %v4196_v7, 0.0  ;;  %v4197_v14 = vadd.f32 %v13594_v63, %v4136_v45  ;;  %6186 = vmatmul.mubr.bf16.gmra.mrb[180].mxu1 %v9179_v53  ;;  %v9181_v42 = vcombine.low %v4948_v56, %v5442_v43 }
 0x615   : > { %v4251_v8 = vmax.f32 %v4197_v14, 0.0  ;;  %v5680_v35 = vshll.u32 %v9181_v42, 16  ;;  %v5770_v38 = vrot.slane %v9181_v42, 1  ;;  %v4628_v60 = vmul.f32 %v4569_v24, %v4250_v40  ;;  %v11429_v24 = vld [vmem:[#allocation3 + $0xa0] sm:$0xff]  }
 0x616   : > { %v5684_v56 = vshrl.u32 %v9181_v42, 16 }
 0x617   : > { %v4629_v32 = vmul.f32 %v4574_v37, %v4251_v8  ;;  %v5682_v13 = vrot.slane %v5680_v35, 1  ;;  %v13741_v17 = vsel %vm914_vm1, %v5768_v3, %v5770_v38  ;;  %v13752_v35 = vld [vmem:[#allocation3 + $0x90] sm:$0xff]   ;;  %v11426_v37 = vld [vmem:[#allocation3 + $0x98] sm:$0xff]  }
 0x618   : > { %14980 = vst [vmem:[#allocation37_spill] sm:$0xff] %v13752_v35 }
 0x619   : > { %v9571_v18 = vpack.c.bf16 %v4629_v32, %v4628_v60  ;;  %v5683_v58 = vsel %vm663_vm2, %v5678_v39, %v5682_v13  ;;  %v5686_v31 = vor.u32 %v5684_v56, %v5682_v13  ;;  %v14812_v60 = vrot.slane %v13752_v35, 1  ;;  %v11431_v39 = vld [vmem:[#allocation3 + $0xa8] sm:$0xff]   ;;  %v11433_v56 = vld [vmem:[#allocation3 + $0xb0] sm:$0xff]  }
 0x61a   : > { %6193 = vmatprep.mubr.bf16.mxu1 %v5683_v58  ;;  %v11321_v63 = vld [vmem:[#allocation3 + $0xc4] sm:$0xff]   ;;  %v11322_v53 = vld [vmem:[#allocation3 + $0xcc] ss:$0 sps:$4 sm:$0x11]   ;;  %v7658_v32 = vrot.slane %v11429_v24, 1 }
 0x61b   : > { %9678 = vst [vmem:[#allocation3 + $0xd0] sm:$0xff] %v9571_v18   ;;  %6194 = vmatmul.mubr.bf16.gmra.mrb[184].mxu1 %v9180_v30  ;;  %v5688_v55 = vshll.u32 %v11321_v63, 16  ;;  %v5772_v25 = vrot.slane %v11321_v63, 1  ;;  %v5696_v7 = vshll.u32 %v11322_v53, 16  ;;  %v5774_v45 = vrot.slane %v11322_v53, 1  ;;  %v11324_v58 = vld [vmem:[#allocation11] sm:$0xff]  }
 0x61c   : > { %v5692_v51 = vshrl.u32 %v11321_v63, 16  ;;  %v7660_v18 = vrot.slane %v11431_v39, 1 }
 0x61d   : > { %v5690_v43 = vrot.slane %v5688_v55, 1  ;;  %v13745_v40 = vsel %vm914_vm1, %v5770_v38, %v5772_v25  ;;  %v13748_v3 = vsel %vm914_vm1, %v5772_v25, %v5774_v45  ;;  %v5698_v47 = vrot.slane %v5696_v7, 1  ;;  %v11326_v55 = vld [vmem:[#allocation11 + $0x10] sm:$0xff]   ;;  %v11436_v7 = vld [vmem:[#allocation3 + $0xb8] sm:$0xff]   ;;  %v11328_v45 = vld [vmem:[#allocation11 + $0x20] sm:$0xff]  }
 0x61e   : > { %v7656_v38 = vrot.slane %v11426_v37, 1  ;;  %v13765_v53 = vsel %vm914_vm1, %v7658_v32, %v7660_v18  ;;  %v11331_v37 = vld [vmem:[#allocation11 + $0x38] sm:$0xff]  }
 0x61f   : > { %v5691_v14 = vsel %vm663_vm2, %v5686_v31, %v5690_v43  ;;  %v5694_v8 = vor.u32 %v5692_v51, %v5690_v43  ;;  %14983 = vst [vmem:[#allocation68_spill] sm:$0xff] %v13765_v53  ;;  %v11438_v43 = vld [vmem:[#allocation3 + $0xc0] sm:$0xff]  }
 0x620   : > { %6201 = vmatprep.mubr.bf16.mxu1 %v5691_v14  ;;  %v13759_v13 = vsel %vm914_vm1, %v14812_v60, %v7656_v38  ;;  %v7666_v14 = vrot.slane %v11438_v43, 1 }
 0x621   : > { %v5699_v30 = vsel %vm663_vm2, %v5694_v8, %v5698_v47  ;;  %14981 = vst [vmem:[#allocation38_spill] sm:$0xff] %v13759_v13  ;;  %v11330_v47 = vld [vmem:[#allocation11 + $0x30] sm:$0xff]  }
 0x623   : > { %6202 = vmatmul.mubr.bf16.gmra.mrb[188].mxu1 %v9181_v42  ;;  %v13762_v42 = vsel %vm914_vm1, %v7656_v38, %v7658_v32 }
 0x624   : > { %6209 = vmatprep.mubr.bf16.mxu1 %v5699_v30  ;;  %14982 = vst [vmem:[#allocation65_spill] sm:$0xff] %v13762_v42 }
 0x62b   : > { %6210 = vmatmul.mubr.bf16.gmra.mrb[192].mxu1 %v11321_v63  ;;  %v7662_v63 = vrot.slane %v11433_v56, 1  ;;  %v11445_v56 = vld [vmem:[#allocation3 + $0xd8] ss:$0 sps:$4 sm:$0x11]  }
 0x62c   : > { %10283 = vmatprep.mubr.bf16.mxu1 %v13400_v9  ;;  %v11325_v9 = vld [vmem:[#allocation11 + $0x8] sm:$0xff]  }
 0x62d   : > { %v13772_v25 = vsel %vm914_vm1, %v7660_v18, %v7662_v63  ;;  %v11332_v18 = vld [vmem:[#allocation11 + $0x40] sm:$0xff]  }
 0x62e   : > { %14984 = vst [vmem:[#allocation39_spill] sm:$0xff] %v13772_v25 }
 0x633   : > { %10284 = vmatmul.mubr.bf16.vlgmr.msra.gmra.mrb[196].mxu1 %v13423_v49  ;;  %v11327_v49 = vld [vmem:[#allocation11 + $0x18] sm:$0xff]  }
 0x634   : > { %10287 = vmatprep.mubr.bf16.mxu1 %v13447_v52  ;;  %6588 = vmatpush1.bf16.msra.mxu1 %v11324_v58  ;;  %v7664_v52 = vrot.slane %v11436_v7, 1 }
 0x635   : > { %6589 = vmatprep.subr.bf16.mxu1 %v14936_v29 }
 0x636   : > { %v13779_v31 = vsel %vm914_vm1, %v7662_v63, %v7664_v52  ;;  %v7672_v63 = vrot.slane %v11445_v56, 1 }
 0x637   : > { %14985 = vst [vmem:[#allocation40_spill] sm:$0xff] %v13779_v31 }
 0x638   : > { %6590 = vmatpush1.bf16.msra.mxu1 %v11325_v9  ;;  %v11333_v9 = vld [vmem:[#allocation11 + $0x48] sm:$0xff]  }
 0x639   : > { %6591 = vmatprep.subr.bf16.mxu1 %v14936_v29 }
 0x63b   : > { %10288 = vmatmul.mubr.bf16.gmra.mrb[200].mxu1 %v13472_v62  ;;  %v11329_v62 = vld [vmem:[#allocation11 + $0x28] sm:$0xff]  }
 0x63c   : > { %10291 = vmatprep.mubr.bf16.mxu1 %v13496_v23  ;;  %6592 = vmatpush1.bf16.msra.mxu1 %v11326_v55 }
 0x63d   : > { %6593 = vmatprep.subr.bf16.mxu1 %v14936_v29 }
 0x640   : > { %6594 = vmatpush1.bf16.msra.mxu1 %v11327_v49 }
 0x641   : > { %6595 = vmatprep.subr.bf16.mxu1 %v14936_v29 }
 0x643   : > { %10292 = vmatmul.mubr.bf16.gmra.mrb[204].mxu1 %v13516_v27  ;;  %v13790_v27 = vsel %vm914_vm1, %v7664_v52, %v7666_v14 }
 0x644   : > { %10295 = vmatprep.mubr.bf16.mxu1 %v13532_v59  ;;  %6596 = vmatpush1.bf16.msra.mxu1 %v11328_v45  ;;  %14986 = vst [vmem:[#allocation69_spill] sm:$0xff] %v13790_v27  ;;  %v11440_v59 = vld [vmem:[#allocation3 + $0xc8] sm:$0xff]   ;;  %v11334_v45 = vld [vmem:[#allocation11 + $0x50] sm:$0xff]  }
 0x645   : > { %6597 = vmatprep.subr.bf16.mxu1 %v14936_v29  ;;  %v7668_v32 = vrot.slane %v11440_v59, 1 }
 0x646   : > { %v13784_v23 = vpop.f32.mrb[108].mxu0 }
 0x647   : > { %v6029_v51 = vpop.f32.mrb[109].mxu0 }
 0x648   : > { %v13786_v8 = vpop.f32.mrb[110].mxu0  ;;  %6598 = vmatpush1.bf16.msra.mxu1 %v11329_v62  ;;  %v11335_v62 = vld [vmem:[#allocation11 + $0x58] sm:$0xff]  }
 0x649   : > { %v6032_v30 = vpop.f32.mrb[111].mxu0  ;;  %6599 = vmatprep.subr.bf16.mxu1 %v14936_v29 }
 0x64a   : > { %v11336_v30 = vld [vmem:[#allocation11 + $0x60] sm:$0xff]  }
 0x64b   : > { %10296 = vmatmul.mubr.bf16.gmra.mrb[208].mxu1 %v13548_v11  ;;  %v13799_v11 = vsel %vm914_vm1, %v7666_v14, %v7668_v32 }
 0x64c   : > { %10299 = vmatprep.mubr.bf16.mxu1 %v13562_v0  ;;  %6600 = vmatpush1.bf16.msra.mxu1 %v11330_v47  ;;  %14987 = vst [vmem:[#allocation72_spill] sm:$0xff] %v13799_v11  ;;  %v11443_v0 = vld [vmem:[#allocation3 + $0xd0] sm:$0xff]  }
 0x64d   : > { %6601 = vmatprep.subr.bf16.mxu1 %v14936_v29  ;;  %v7670_v49 = vrot.slane %v11443_v0, 1 }
 0x64e   : > { %v6035_v24 = vpop.f32.mrb[112].mxu0 }
 0x64f   : > { %v6037_v38 = vpop.f32.mrb[113].mxu0 }
 0x650   : > { %v13795_v39 = vpop.f32.mrb[114].mxu0  ;;  %6602 = vmatpush1.bf16.msra.mxu1 %v11331_v37  ;;  %v11338_v38 = vld [vmem:[#allocation11 + $0x70] sm:$0xff]  }
 0x651   : > { %v6040_v58 = vpop.f32.mrb[115].mxu0  ;;  %6603 = vmatprep.subr.bf16.mxu1 %v14936_v29 }
 0x653   : > { %10300 = vmatmul.mubr.bf16.gmra.mrb[212].mxu1 %v13576_v15  ;;  %v13808_v15 = vsel %vm914_vm1, %v7668_v32, %v7670_v49 }
 0x654   : > { %10303 = vmatprep.mubr.bf16.mxu1 %v13592_v4  ;;  %6604 = vmatpush1.bf16.msra.mxu1 %v11332_v18  ;;  %14988 = vst [vmem:[#allocation41_spill] sm:$0xff] %v13808_v15  ;;  %v13811_v4 = vsel %vm914_vm1, %v7670_v49, %v7672_v63  ;;  %v13838_v49 = vld [vmem:[#allocation3 + $0x4] sm:$0xf] }
 0x655   : > { %6605 = vmatprep.subr.bf16.mxu1 %v14936_v29  ;;  %14989 = vst [vmem:[#allocation42_spill] sm:$0xff] %v13811_v4 }
 0x656   : > { %v13804_v55 = vpop.f32.mrb[108].mxu1 }
 0x657   : > { %v6045_v7 = vpop.f32.mrb[109].mxu1 }
 0x658   : > { %v6046_v52 = vpop.f32.mrb[110].mxu1  ;;  %6606 = vmatpush1.bf16.msra.mxu1 %v11333_v9  ;;  %v4901_v7 = vld [vmem:[#allocation3] sm:$0xf] }
 0x659   : > { %v6048_v43 = vpop.f32.mrb[111].mxu1  ;;  %6607 = vmatprep.subr.bf16.mxu1 %v14936_v29  ;;  %v4903_v52 = vld [vmem:[#allocation3 + $0x8] sm:$0xf] }
 0x65b   : > { %10304 = vmatmul.mubr.bf16.gmra.mrb[216].mxu1 %v13608_v57  ;;  %v11337_v57 = vld [vmem:[#allocation11 + $0x68] sm:$0xff]  }
 0x65c   : > { %10307 = vmatprep.mubr.bf16.mxu1 %v13622_v48  ;;  %6608 = vmatpush1.bf16.msra.mxu1 %v11334_v45  ;;  %v9133_v45 = vcombine.low %v4901_v7, %v13838_v49 }
 0x65d   : > { %6609 = vmatprep.subr.bf16.mxu1 %v14936_v29 }
 0x65e   : > { %v13816_v51 = vpop.f32.mrb[112].mxu1 }
 0x65f   : > { %v6053_v14 = vpop.f32.mrb[113].mxu1 }
 0x660   : > { %v13818_v47 = vpop.f32.mrb[114].mxu1  ;;  %6610 = vmatpush1.bf16.msra.mxu1 %v11335_v62  ;;  %v11482_v62 = vld [vmem:[#allocation3 + $0xc] sm:$0xf] }
 0x661   : > { %v6056_v59 = vpop.f32.mrb[115].mxu1  ;;  %6611 = vmatprep.subr.bf16.mxu1 %v14936_v29 }
 0x662   : > { %v5101_v59 = vshll.u32 %v9133_v45, 16 }
 0x663   : > { %10308 = vmatmul.mubr.bf16.gmra.mrb[220].mxu1 %v13636_v50  ;;  %v11341_v50 = vld [vmem:[#allocation11 + $0x78] sm:$0xff]  }
 0x664   : > { %10311 = vmatprep.mubr.bf16.mxu1 %v13650_v36  ;;  %6612 = vmatpush1.bf16.msra.mxu1 %v11336_v30  ;;  %v11342_v36 = vld [vmem:[#allocation11 + $0x80] sm:$0xff]  }
 0x665   : > { %6613 = vmatprep.subr.bf16.mxu1 %v14936_v29 }
 0x666   : > { %v6059_v48 = vpop.f32.mrb[116].mxu1 }
 0x667   : > { %v6061_v37 = vpop.f32.mrb[117].mxu1 }
 0x668   : > { %v13824_v24 = vpop.f32.mrb[118].mxu1  ;;  %6614 = vmatpush1.bf16.msra.mxu1 %v11337_v57  ;;  %v5099_v37 = vshrl.u32 %v9133_v45, 16 }
 0x669   : > { %v6064_v32 = vpop.f32.mrb[119].mxu1  ;;  %6615 = vmatprep.subr.bf16.mxu1 %v14936_v29 }
 0x66b   : > { %10312 = vmatmul.mubr.bf16.gmra.mrb[224].mxu1 %v13664_v2 }
 0x66c   : > { %10315 = vmatprep.mubr.bf16.mxu1 %v13678_v26  ;;  %6616 = vmatpush1.bf16.msra.mxu1 %v11338_v38 }
 0x66d   : > { %6617 = vmatprep.subr.bf16.mxu1 %v14936_v29 }
 0x66e   : > { %v13830_v18 = vpop.f32.mrb[120].mxu1 }
 0x66f   : > { %v6069_v58 = vpop.f32.mrb[121].mxu1 }
 0x670   : > { %v6070_v56 = vpop.f32.mrb[122].mxu1  ;;  %6618 = vmatpush1.bf16.msra.mxu1 %v11341_v50 }
 0x671   : > { %v6072_v0 = vpop.f32.mrb[123].mxu1  ;;  %10331 = vmatprep.subr.bf16.mxu1 %v11342_v36 }
 0x672   : > { %v5114_v0 = vshll.u32 %v13374_v5, 16 }
 0x673   : > { %10316 = vmatmul.mubr.bf16.gmra.mrb[228].mxu1 %v13692_v10 }
 0x674   : > { %10319 = vmatprep.mubr.bf16.mxu1 %v13706_v20  ;;  %v13843_v20 = vcombine.low %v4903_v52, %v11482_v62 }
 0x676   : > { %v13834_v9 = vpop.f32.mrb[124].mxu1  ;;  %v5106_v57 = vshll.u32 %v13843_v20, 16 }
 0x677   : > { %v6077_v2 = vpop.f32.mrb[125].mxu1 }
 0x678   : > { %v13836_v26 = vpop.f32.mrb[126].mxu1  ;;  %v5108_v38 = vrot.slane %v5106_v57, 1 }
 0x679   : > { %v6080_v63 = vpop.f32.mrb[127].mxu1 }
 0x67a   : > { %v5116_v63 = vrot.slane %v5114_v0, 1 }
 0x67b   : > { %10320 = vmatmul.mubr.bf16.gmra.mrb[232].mxu1 %v13720_v6  ;;  %v5103_v6 = vrot.slane %v5101_v59, 1 }
 0x67c   : > { %10323 = vmatprep.mubr.bf16.mxu1 %v13734_v33 }
 0x67d   : > { %v5104_v58 = vor.u32 %v5103_v6, %v5099_v37  ;;  %v5118_v6 = vshrl.u32 %v13374_v5, 16 }
 0x67e   : > { %v6083_v43 = vpop.f32.mrb[128].mxu1 }
 0x67f   : > { %v6085_v10 = vpop.f32.mrb[129].mxu1  ;;  %v5109_v56 = vsel %vm663_vm2, %v5104_v58, %v5108_v38  ;;  %v11358_v58 = vld [vmem:[#allocation11 + $0xa0] sm:$0xff]  }
 0x680   : > { %v13845_v14 = vpop.f32.mrb[130].mxu1  ;;  %v11346_v10 = vld [vmem:[#allocation11 + $0x88] sm:$0xff]  }
 0x681   : > { %v6088_v30 = vpop.f32.mrb[131].mxu1 }
 0x682   : > { %v11350_v30 = vld [vmem:[#allocation11 + $0x90] sm:$0xff]  }
 0x683   : > { %10324 = vmatmul.mubr.bf16.gmra.mrb[236].mxu1 %v13741_v17 }
 0x684   : > { %10327 = vmatprep.mubr.bf16.mxu1 %v13745_v40  ;;  %v5110_v40 = vshrl.u32 %v13843_v20, 16 }
 0x686   : > { %v13850_v33 = vpop.f32.mrb[132].mxu1  ;;  %v5112_v43 = vor.u32 %v5110_v40, %v5108_v38  ;;  %v5120_v38 = vor.u32 %v5118_v6, %v5116_v63  ;;  %v5134_v6 = vshrl.u32 %v13410_v1, 16 }
 0x687   : > { %v6093_v48 = vpop.f32.mrb[133].mxu1 }
 0x688   : > { %v6094_v32 = vpop.f32.mrb[134].mxu1  ;;  %v5117_v62 = vsel %vm663_vm2, %v5112_v43, %v5116_v63 }
 0x689   : > { %v6096_v50 = vpop.f32.mrb[135].mxu1 }
 0x68b   : > { %10328 = vmatmul.mubr.bf16.gmra.mrb[240].mxu1 %v13748_v3  ;;  %v5122_v3 = vshll.u32 %v13388_v46, 16 }
 0x68c   : > { %6619 = vmatprep.mubr.bf16.mxu1 %v5109_v56 }
 0x68d   : > { %v5124_v48 = vrot.slane %v5122_v3, 1  ;;  %v5138_v3 = vshll.u32 %v13434_v22, 16 }
 0x68e   : > { %v13855_v17 = vpop.f32.mrb[136].mxu1 }
 0x68f   : > { %v6101_v2 = vpop.f32.mrb[137].mxu1  ;;  %v5125_v50 = vsel %vm663_vm2, %v5120_v38, %v5124_v48 }
 0x690   : > { %v13858_v7 = vpop.f32.mrb[138].mxu1  ;;  %v5126_v2 = vshrl.u32 %v13388_v46, 16 }
 0x691   : > { %v6104_v52 = vpop.f32.mrb[139].mxu1 }
 0x692   : > { %v5128_v43 = vor.u32 %v5126_v2, %v5124_v48  ;;  %v5142_v2 = vshrl.u32 %v13434_v22, 16 }
 0x693   : > { %6620 = vmatmul.mubr.bf16.vlgmr.msra.gmra.mrb[244].mxu1 %v9133_v45  ;;  %v11354_v45 = vld [vmem:[#allocation11 + $0x98] sm:$0xff]  }
 0x694   : > { %6627 = vmatprep.mubr.bf16.mxu1 %v5117_v62  ;;  %10332 = vmatpush3.bf16.msra.mxu1 %v11342_v36  ;;  %v5130_v36 = vshll.u32 %v13410_v1, 16 }
 0x695   : > { %10333 = vmatprep.subr.bf16.mxu1 %v11346_v10 }
 0x696   : > { %v6107_v59 = vpop.f32.mrb[140].mxu1  ;;  %v5132_v40 = vrot.slane %v5130_v36, 1  ;;  %v5146_v36 = vshll.u32 %v13458_v19, 16 }
 0x697   : > { %v6109_v57 = vpop.f32.mrb[141].mxu1 }
 0x698   : > { %v13863_v37 = vpop.f32.mrb[142].mxu1  ;;  %10334 = vmatpush3.bf16.msra.mxu1 %v11346_v10  ;;  %v11362_v10 = vld [vmem:[#allocation11 + $0xa8] sm:$0xff]   ;;  %v5133_v62 = vsel %vm663_vm2, %v5128_v43, %v5132_v40 }
 0x699   : > { %v6112_v32 = vpop.f32.mrb[143].mxu1  ;;  %10335 = vmatprep.subr.bf16.mxu1 %v11350_v30 }
 0x69a   : > { %v5140_v32 = vrot.slane %v5138_v3, 1 }
 0x69b   : > { %6628 = vmatmul.mubr.bf16.gmra.mrb[248].mxu1 %v13843_v20 }
 0x69c   : > { %6635 = vmatprep.mubr.bf16.mxu1 %v5125_v50  ;;  %10336 = vmatpush3.bf16.msra.mxu1 %v11350_v30  ;;  %v11366_v30 = vld [vmem:[#allocation11 + $0xb0] sm:$0xff]  }
 0x69d   : > { %10337 = vmatprep.subr.bf16.mxu1 %v11354_v45 }
 0x69e   : > { %v13868_v56 = vpop.f32.mrb[144].mxu1 }
 0x69f   : > { %v6117_v0 = vpop.f32.mrb[145].mxu1 }
 0x6a0   : > { %v6118_v52 = vpop.f32.mrb[146].mxu1  ;;  %10338 = vmatpush3.bf16.msra.mxu1 %v11354_v45  ;;  %v5136_v45 = vor.u32 %v5134_v6, %v5132_v40 }
 0x6a1   : > { %v6120_v63 = vpop.f32.mrb[147].mxu1  ;;  %10339 = vmatprep.subr.bf16.mxu1 %v11358_v58  ;;  %v5148_v52 = vrot.slane %v5146_v36, 1 }
 0x6a2   : > { %v5141_v50 = vsel %vm663_vm2, %v5136_v45, %v5140_v32 }
 0x6a3   : > { %6636 = vmatmul.mubr.bf16.gmra.mrb[252].mxu1 %v13374_v5 }
 0x6a4   : > { %6643 = vmatprep.mubr.bf16.mxu1 %v5133_v62  ;;  %10340 = vmatpush3.bf16.msra.mxu1 %v11358_v58  ;;  %v14990_v62 = vld [vmem:[#allocation78_spill] sm:$0xff] }
 0x6a5   : > { %10341 = vmatprep.subr.bf16.mxu1 %v11362_v10  ;;  %v5154_v3 = vshll.u32 %v14990_v62, 16 }
 0x6a6   : > { %v13874_v59 = vpop.f32.mrb[148].mxu1 }
 0x6a7   : > { %v6125_v57 = vpop.f32.mrb[149].mxu1 }
 0x6a8   : > { %v13877_v38 = vpop.f32.mrb[150].mxu1  ;;  %10342 = vmatpush3.bf16.msra.mxu1 %v11362_v10  ;;  %v5144_v10 = vor.u32 %v5142_v2, %v5140_v32  ;;  %v11370_v2 = vld [vmem:[#allocation11 + $0xb8] sm:$0xff]  }
 0x6a9   : > { %v6128_v48 = vpop.f32.mrb[151].mxu1  ;;  %10343 = vmatprep.subr.bf16.mxu1 %v11366_v30 }
 0x6aa   : > { %v5149_v40 = vsel %vm663_vm2, %v5144_v10, %v5148_v52  ;;  %v5156_v48 = vrot.slane %v5154_v3, 1 }
 0x6ab   : > { %6644 = vmatmul.mubr.bf16.gmra.mrb[0].mxu1 %v13388_v46 }
 0x6ac   : > { %6651 = vmatprep.mubr.bf16.mxu1 %v5141_v50  ;;  %10344 = vmatpush3.bf16.msra.mxu1 %v11366_v30  ;;  %v5150_v30 = vshrl.u32 %v13458_v19, 16 }
 0x6ad   : > { %10345 = vmatprep.subr.bf16.mxu1 %v11370_v2 }
 0x6ae   : > { %v6131_v58 = vpop.f32.mrb[152].mxu1  ;;  %v5152_v36 = vor.u32 %v5150_v30, %v5148_v52 }
 0x6af   : > { %v6133_v0 = vpop.f32.mrb[153].mxu1  ;;  %v14991_v58 = vld [vmem:[#allocation79_spill] sm:$0xff] }
 0x6b0   : > { %v13883_v63 = vpop.f32.mrb[154].mxu1  ;;  %v5157_v32 = vsel %vm663_vm2, %v5152_v36, %v5156_v48  ;;  %v5162_v0 = vshll.u32 %v14991_v58, 16  ;;  %10346 = vmatpush3.bf16.msra.mxu1 %v11370_v2  ;;  %v5166_v2 = vshrl.u32 %v14991_v58, 16 }
 0x6b1   : > { %v6136_v43 = vpop.f32.mrb[155].mxu1  ;;  %7891 = vmatprep.subr.bf16.mxu1 %v14936_v29 }
 0x6b3   : > { %6652 = vmatmul.mubr.bf16.gmra.mrb[4].mxu1 %v13410_v1 }
 0x6b4   : > { %6659 = vmatprep.mubr.bf16.mxu1 %v5149_v40  ;;  %v5158_v40 = vshrl.u32 %v14990_v62, 16 }
 0x6b6   : > { %v13888_v57 = vpop.f32.mrb[156].mxu1  ;;  %v5160_v30 = vor.u32 %v5158_v40, %v5156_v48  ;;  %v14993_v40 = vld [vmem:[#allocation58_spill] sm:$0xff] }
 0x6b7   : > { %v6141_v6 = vpop.f32.mrb[157].mxu1 }
 0x6b8   : > { %v6142_v45 = vpop.f32.mrb[158].mxu1  ;;  %v5164_v6 = vrot.slane %v5162_v0, 1 }
 0x6b9   : > { %v6144_v50 = vpop.f32.mrb[159].mxu1 }
 0x6ba   : > { %v5165_v45 = vsel %vm663_vm2, %v5160_v30, %v5164_v6  ;;  %v14992_v50 = vld [vmem:[#allocation55_spill] sm:$0xff]  ;;  %v5168_v15 = vor.u32 %v5166_v2, %v5164_v6 }
 0x6bb   : > { %6660 = vmatmul.mubr.bf16.gmra.mrb[8].mxu1 %v13434_v22  ;;  %v5170_v36 = vshll.u32 %v14992_v50, 16  ;;  %v14994_v2 = vld [vmem:[#allocation35_spill] sm:$0xff] }
 0x6bc   : > { %6667 = vmatprep.mubr.bf16.mxu1 %v5157_v32 }
 0x6be   : > { %v13894_v43 = vpop.f32.mrb[160].mxu1 }
 0x6bf   : > { %v6149_v10 = vpop.f32.mrb[161].mxu1 }
 0x6c0   : > { %v13898_v3 = vpop.f32.mrb[162].mxu1  ;;  %v5172_v10 = vrot.slane %v5170_v36, 1 }
 0x6c1   : > { %v6152_v52 = vpop.f32.mrb[163].mxu1 }
 0x6c2   : > { %v5173_v48 = vsel %vm663_vm2, %v5168_v15, %v5172_v10  ;;  %v5178_v52 = vshll.u32 %v14993_v40, 16 }
 0x6c3   : > { %6668 = vmatmul.mubr.bf16.gmra.mrb[12].mxu1 %v13458_v19 }
 0x6c4   : > { %6675 = vmatprep.mubr.bf16.mxu1 %v5165_v45  ;;  %v5174_v45 = vshrl.u32 %v14992_v50, 16 }
 0x6c6   : > { %v6155_v32 = vpop.f32.mrb[164].mxu1  ;;  %v5176_v36 = vor.u32 %v5174_v45, %v5172_v10  ;;  %v14995_v10 = vld [vmem:[#allocation36_spill] sm:$0xff] }
 0x6c7   : > { %v6157_v60 = vpop.f32.mrb[165].mxu1  ;;  %v5194_v45 = vshll.u32 %v14995_v10, 16 }
 0x6c8   : > { %v13904_v4 = vpop.f32.mrb[166].mxu1  ;;  %v5180_v60 = vrot.slane %v5178_v52, 1 }
 0x6c9   : > { %v6160_v0 = vpop.f32.mrb[167].mxu1  ;;  %v5196_v42 = vrot.slane %v5194_v45, 1 }
 0x6ca   : > { %v5181_v6 = vsel %vm663_vm2, %v5176_v36, %v5180_v60  ;;  %v5186_v0 = vshll.u32 %v14994_v2, 16 }
 0x6cb   : > { %6676 = vmatmul.mubr.bf16.gmra.mrb[16].mxu1 %v14990_v62 }
 0x6cc   : > { %6683 = vmatprep.mubr.bf16.mxu1 %v5173_v48  ;;  %v5182_v48 = vshrl.u32 %v14993_v40, 16  ;;  %v5188_v25 = vrot.slane %v5186_v0, 1 }
 0x6ce   : > { %v13909_v30 = vpop.f32.mrb[168].mxu1  ;;  %v5184_v52 = vor.u32 %v5182_v48, %v5180_v60  ;;  %v14996_v60 = vld [vmem:[#allocation60_spill] sm:$0xff] }
 0x6cf   : > { %v6165_v11 = vpop.f32.mrb[169].mxu1  ;;  %v5202_v48 = vshll.u32 %v14996_v60, 16 }
 0x6d0   : > { %v6166_v32 = vpop.f32.mrb[170].mxu1 }
 0x6d1   : > { %v6168_v27 = vpop.f32.mrb[171].mxu1 }
 0x6d2   : > { %v5189_v27 = vsel %vm663_vm2, %v5184_v52, %v5188_v25 }
 0x6d3   : > { %6684 = vmatmul.mubr.bf16.gmra.mrb[20].mxu1 %v14991_v58 }
 0x6d4   : > { %6691 = vmatprep.mubr.bf16.mxu1 %v5181_v6  ;;  %v5190_v6 = vshrl.u32 %v14994_v2, 16 }
 0x6d6   : > { %v13915_v15 = vpop.f32.mrb[172].mxu1  ;;  %v5192_v0 = vor.u32 %v5190_v6, %v5188_v25  ;;  %v14997_v25 = vld [vmem:[#allocation63_spill] sm:$0xff] }
 0x6d7   : > { %v6173_v31 = vpop.f32.mrb[173].mxu1  ;;  %v5210_v6 = vshll.u32 %v14997_v25, 16 }
 0x6d8   : > { %v13918_v11 = vpop.f32.mrb[174].mxu1 }
 0x6d9   : > { %v6176_v53 = vpop.f32.mrb[175].mxu1  ;;  %v5212_v58 = vrot.slane %v5210_v6, 1 }
 0x6da   : > { %v5197_v53 = vsel %vm663_vm2, %v5192_v0, %v5196_v42 }
 0x6db   : > { %6692 = vmatmul.mubr.bf16.gmra.mrb[24].mxu1 %v14992_v50 }
 0x6dc   : > { %6699 = vmatprep.mubr.bf16.mxu1 %v5189_v27  ;;  %v5198_v27 = vshrl.u32 %v14995_v10, 16 }
 0x6de   : > { %v6179_v32 = vpop.f32.mrb[176].mxu1  ;;  %v5200_v45 = vor.u32 %v5198_v27, %v5196_v42 }
 0x6df   : > { %v6181_v36 = vpop.f32.mrb[177].mxu1  ;;  %v5204_v32 = vrot.slane %v5202_v48, 1 }
 0x6e0   : > { %v13924_v31 = vpop.f32.mrb[178].mxu1 }
 0x6e1   : > { %v6184_v13 = vpop.f32.mrb[179].mxu1 }
 0x6e2   : > { %v5205_v13 = vsel %vm663_vm2, %v5200_v45, %v5204_v32  ;;  %v5214_v45 = vshrl.u32 %v14997_v25, 16 }
 0x6e3   : > { %6700 = vmatmul.mubr.bf16.gmra.mrb[28].mxu1 %v14993_v40 }
 0x6e4   : > { %6707 = vmatprep.mubr.bf16.mxu1 %v5197_v53  ;;  %v5206_v53 = vshrl.u32 %v14996_v60, 16  ;;  %v5216_v6 = vor.u32 %v5214_v45, %v5212_v58 }
 0x6e6   : > { %v13929_v52 = vpop.f32.mrb[180].mxu1  ;;  %v5208_v48 = vor.u32 %v5206_v53, %v5204_v32  ;;  %v5226_v32 = vshll.u32 %v13628_v21, 16 }
 0x6e7   : > { %v6189_v35 = vpop.f32.mrb[181].mxu1 }
 0x6e8   : > { %v6190_v36 = vpop.f32.mrb[182].mxu1  ;;  %v5213_v42 = vsel %vm663_vm2, %v5208_v48, %v5212_v58 }
 0x6e9   : > { %v6192_v50 = vpop.f32.mrb[183].mxu1 }
 0x6ea   : > { %v5218_v50 = vshll.u32 %v13614_v41, 16 }
 0x6eb   : > { %6708 = vmatmul.mubr.bf16.gmra.mrb[32].mxu1 %v14994_v2 }
 0x6ec   : > { %6715 = vmatprep.mubr.bf16.mxu1 %v5205_v13  ;;  %v5220_v13 = vrot.slane %v5218_v50, 1 }
 0x6ee   : > { %v13935_v0 = vpop.f32.mrb[184].mxu1 }
 0x6ef   : > { %v6197_v40 = vpop.f32.mrb[185].mxu1 }
 0x6f0   : > { %v13938_v35 = vpop.f32.mrb[186].mxu1 }
 0x6f1   : > { %v6200_v62 = vpop.f32.mrb[187].mxu1 }
 0x6f2   : > { %v5221_v62 = vsel %vm663_vm2, %v5216_v6, %v5220_v13 }
 0x6f3   : > { %6716 = vmatmul.mubr.bf16.gmra.mrb[36].mxu1 %v14995_v10 }
 0x6f4   : > { %6723 = vmatprep.mubr.bf16.mxu1 %v5213_v42  ;;  %v5222_v42 = vshrl.u32 %v13614_v41, 16 }
 0x6f6   : > { %v6203_v27 = vpop.f32.mrb[188].mxu1  ;;  %v5224_v50 = vor.u32 %v5222_v42, %v5220_v13 }
 0x6f7   : > { %v6205_v36 = vpop.f32.mrb[189].mxu1  ;;  %v5228_v27 = vrot.slane %v5226_v32, 1 }
 0x6f8   : > { %v13944_v40 = vpop.f32.mrb[190].mxu1 }
 0x6f9   : > { %14998 = vst [vmem:[#allocation73_spill] sm:$0xff] %v13944_v40  ;;  %v6208_v2 = vpop.f32.mrb[191].mxu1  ;;  %v5229_v58 = vsel %vm663_vm2, %v5224_v50, %v5228_v27  ;;  %v5242_v50 = vshll.u32 %v13656_v28, 16 }
 0x6fa   : > { %v5234_v2 = vshll.u32 %v13642_v44, 16 }
 0x6fb   : > { %6724 = vmatmul.mubr.bf16.gmra.mrb[40].mxu1 %v14996_v60 }
 0x6fc   : > { %6731 = vmatprep.mubr.bf16.mxu1 %v5221_v62  ;;  %v5230_v62 = vshrl.u32 %v13628_v21, 16  ;;  %v5236_v60 = vrot.slane %v5234_v2, 1 }
 0x6fe   : > { %v13949_v53 = vpop.f32.mrb[192].mxu1  ;;  %v5232_v13 = vor.u32 %v5230_v62, %v5228_v27 }
 0x6ff   : > { %v6213_v48 = vpop.f32.mrb[193].mxu1 }
 0x700   : > { %v6214_v36 = vpop.f32.mrb[194].mxu1 }
 0x701   : > { %v6216_v10 = vpop.f32.mrb[195].mxu1  ;;  %v5237_v36 = vsel %vm663_vm2, %v5232_v13, %v5236_v60 }
 0x703   : > { %6732 = vmatmul.mubr.bf16.gmra.mrb[44].mxu1 %v14997_v25 }
 0x704   : > { %6739 = vmatprep.mubr.bf16.mxu1 %v5229_v58 }
 0x706   : > { %v10285_v45 = vpop.f32.mrb[196].mxu1 }
 0x707   : > { %v6252_v6 = vpop.f32.mrb[197].mxu1 }
 0x708   : > { %v13957_v48 = vadd.f32 %v6252_v6, %v13784_v23  ;;  %v10286_v40 = vpop.f32.mrb[198].mxu1 }
 0x709   : > { %v13960_v32 = vadd.f32 %v10286_v40, %v13795_v39  ;;  %v6255_v10 = vpop.f32.mrb[199].mxu1  ;;  %v5238_v39 = vshrl.u32 %v13642_v44, 16  ;;  %v5244_v40 = vrot.slane %v5242_v50, 1 }
 0x70a   : > { %v13963_v42 = vadd.f32 %v6255_v10, %v13786_v8 }
 0x70b   : > { %6740 = vmatmul.mubr.bf16.gmra.mrb[48].mxu1 %v13614_v41  ;;  %v5240_v62 = vor.u32 %v5238_v39, %v5236_v60 }
 0x70c   : > { %6747 = vmatprep.mubr.bf16.mxu1 %v5237_v36 }
 0x70d   : > { %v5245_v10 = vsel %vm663_vm2, %v5240_v62, %v5244_v40 }
 0x70e   : > { %v10289_v58 = vpop.f32.mrb[200].mxu1 }
 0x70f   : > { %v13969_v23 = vadd.f32 %v10289_v58, %v13816_v51  ;;  %v6268_v2 = vpop.f32.mrb[201].mxu1  ;;  %v5250_v51 = vshll.u32 %v13670_v61, 16 }
 0x710   : > { %v13973_v27 = vadd.f32 %v6268_v2, %v13804_v55  ;;  %v10290_v8 = vpop.f32.mrb[202].mxu1  ;;  %v5246_v55 = vshrl.u32 %v13656_v28, 16 }
 0x711   : > { %v13976_v45 = vadd.f32 %v10290_v8, %v13818_v47  ;;  %v6271_v6 = vpop.f32.mrb[203].mxu1  ;;  %v5252_v58 = vrot.slane %v5250_v51, 1 }
 0x712   : > { %v5248_v8 = vor.u32 %v5246_v55, %v5244_v40  ;;  %v5258_v6 = vshll.u32 %v13684_v16, 16 }
 0x713   : > { %6748 = vmatmul.mubr.bf16.gmra.mrb[52].mxu1 %v13628_v21 }
 0x714   : > { %6755 = vmatprep.mubr.bf16.mxu1 %v5245_v10  ;;  %v5253_v39 = vsel %vm663_vm2, %v5248_v8, %v5252_v58  ;;  %v5254_v10 = vshrl.u32 %v13670_v61, 16  ;;  %v5266_v8 = vshll.u32 %v13698_v34, 16 }
 0x716   : > { %v10293_v13 = vpop.f32.mrb[204].mxu1  ;;  %v5256_v55 = vor.u32 %v5254_v10, %v5252_v58 }
 0x717   : > { %v13982_v36 = vadd.f32 %v10293_v13, %v13830_v18  ;;  %v6284_v50 = vpop.f32.mrb[205].mxu1  ;;  %v5260_v13 = vrot.slane %v5258_v6, 1 }
 0x718   : > { %v10294_v2 = vpop.f32.mrb[206].mxu1 }
 0x719   : > { %v6287_v47 = vpop.f32.mrb[207].mxu1 }
 0x71a   : > { %v13986_v60 = vadd.f32 %v6287_v47, %v13824_v24  ;;  %v5261_v47 = vsel %vm663_vm2, %v5256_v55, %v5260_v13  ;;  %v5274_v55 = vshll.u32 %v13712_v12, 16 }
 0x71b   : > { %6756 = vmatmul.mubr.bf16.gmra.mrb[56].mxu1 %v13642_v44 }
 0x71c   : > { %6763 = vmatprep.mubr.bf16.mxu1 %v5253_v39 }
 0x71e   : > { %v10297_v62 = vpop.f32.mrb[208].mxu1 }
 0x71f   : > { %v6300_v18 = vpop.f32.mrb[209].mxu1  ;;  %v5268_v62 = vrot.slane %v5266_v8, 1 }
 0x720   : > { %v13993_v51 = vadd.f32 %v6300_v18, %v13834_v9  ;;  %v10298_v50 = vpop.f32.mrb[210].mxu1  ;;  %v5262_v9 = vshrl.u32 %v13684_v16, 16 }
 0x721   : > { %v13996_v40 = vadd.f32 %v10298_v50, %v13845_v14  ;;  %v6303_v24 = vpop.f32.mrb[211].mxu1 }
 0x722   : > { %v13999_v2 = vadd.f32 %v6303_v24, %v13836_v26  ;;  %v5264_v10 = vor.u32 %v5262_v9, %v5260_v13 }
 0x723   : > { %6764 = vmatmul.mubr.bf16.gmra.mrb[60].mxu1 %v13656_v28 }
 0x724   : > { %6771 = vmatprep.mubr.bf16.mxu1 %v5261_v47  ;;  %v5269_v24 = vsel %vm663_vm2, %v5264_v10, %v5268_v62 }
 0x726   : > { %v10301_v39 = vpop.f32.mrb[212].mxu1 }
 0x727   : > { %v6316_v6 = vpop.f32.mrb[213].mxu1  ;;  %v14006_v14 = vadd.f32 %v10301_v39, %v13855_v17  ;;  %v5270_v17 = vshrl.u32 %v13698_v34, 16  ;;  %v5276_v39 = vrot.slane %v5274_v55, 1  ;;  %v5278_v55 = vshrl.u32 %v13712_v12, 16 }
 0x728   : > { %v10302_v18 = vpop.f32.mrb[214].mxu1  ;;  %v14009_v58 = vadd.f32 %v6316_v6, %v13850_v33 }
 0x729   : > { %v6319_v26 = vpop.f32.mrb[215].mxu1  ;;  %v14012_v50 = vadd.f32 %v10302_v18, %v13858_v7  ;;  %v5272_v9 = vor.u32 %v5270_v17, %v5268_v62  ;;  %v5280_v17 = vor.u32 %v5278_v55, %v5276_v39 }
 0x72a   : > { %v5282_v26 = vshll.u32 %v13726_v54, 16 }
 0x72b   : > { %6772 = vmatmul.mubr.bf16.gmra.mrb[64].mxu1 %v13670_v61  ;;  %v5277_v18 = vsel %vm663_vm2, %v5272_v9, %v5276_v39 }
 0x72c   : > { %6779 = vmatprep.mubr.bf16.mxu1 %v5269_v24 }
 0x72e   : > { %v10305_v47 = vpop.f32.mrb[216].mxu1 }
 0x72f   : > { %v6332_v8 = vpop.f32.mrb[217].mxu1  ;;  %v14019_v33 = vadd.f32 %v10305_v47, %v13868_v56  ;;  %v14028_v56 = vld [vmem:[#allocation3 + $0xc0] ss:$0 sps:$4 sm:$0x11]  }
 0x730   : > { %v10306_v6 = vpop.f32.mrb[218].mxu1  ;;  %v5284_v8 = vrot.slane %v5282_v26, 1 }
 0x731   : > { %v6335_v13 = vpop.f32.mrb[219].mxu1 }
 0x732   : > { %v14022_v7 = vadd.f32 %v6335_v13, %v13863_v37  ;;  %v5285_v9 = vsel %vm663_vm2, %v5280_v17, %v5284_v8  ;;  %v4950_v17 = vld [vmem:[#allocation3] sm:$0xe] }
 0x733   : > { %6780 = vmatmul.mubr.bf16.gmra.mrb[68].mxu1 %v13684_v16 }
 0x734   : > { %6787 = vmatprep.mubr.bf16.mxu1 %v5277_v18  ;;  %v5290_v18 = vshll.u32 %v14028_v56, 16 }
 0x736   : > { %v10309_v10 = vpop.f32.mrb[220].mxu1 }
 0x737   : > { %v6348_v24 = vpop.f32.mrb[221].mxu1 }
 0x738   : > { %v10310_v47 = vpop.f32.mrb[222].mxu1  ;;  %v14031_v62 = vadd.f32 %v6348_v24, %v13874_v59  ;;  %v5286_v59 = vshrl.u32 %v13726_v54, 16  ;;  %v5292_v24 = vrot.slane %v5290_v18, 1  ;;  %v9158_v18 = vcombine.low %v4950_v17, %v13838_v49 }
 0x739   : > { %v6351_v37 = vpop.f32.mrb[223].mxu1  ;;  %v14034_v6 = vadd.f32 %v10310_v47, %v13883_v63  ;;  %v5324_v49 = vrot.slane %v13374_v5, 1 }
 0x73a   : > { %v14037_v13 = vadd.f32 %v6351_v37, %v13877_v38  ;;  %v5288_v47 = vor.u32 %v5286_v59, %v5284_v8  ;;  %v5321_v59 = vrot.slane %v9158_v18, 1 }
 0x73b   : > { %14999 = vst [vmem:[#allocation74_spill] sm:$0xff] %v14034_v6  ;;  %6788 = vmatmul.mubr.bf16.gmra.mrb[72].mxu1 %v13698_v34 }
 0x73c   : > { %6795 = vmatprep.mubr.bf16.mxu1 %v5285_v9  ;;  %v5293_v9 = vsel %vm663_vm2, %v5288_v47, %v5292_v24 }
 0x73e   : > { %v10313_v26 = vpop.f32.mrb[224].mxu1 }
 0x73f   : > { %v6364_v10 = vpop.f32.mrb[225].mxu1  ;;  %v14044_v39 = vadd.f32 %v10313_v26, %v13894_v43  ;;  %v5322_v26 = vrot.slane %v13843_v20, 1  ;;  %v5326_v20 = vrot.slane %v13388_v46, 1  ;;  %v11375_v46 = vld [vmem:[#allocation11 + $0x188] sm:$0xff]  }
 0x740   : > { %v10314_v63 = vpop.f32.mrb[226].mxu1  ;;  %v14047_v55 = vadd.f32 %v6364_v10, %v13888_v57 }
 0x741   : > { %v6367_v38 = vpop.f32.mrb[227].mxu1  ;;  %v14050_v37 = vadd.f32 %v10314_v63, %v13898_v3  ;;  %v5323_v24 = vsel %vm914_vm1, %v5321_v59, %v5322_v26  ;;  %v5327_v5 = vsel %vm914_vm1, %v5324_v49, %v5326_v20 }
 0x743   : > { %6796 = vmatmul.mubr.bf16.gmra.mrb[76].mxu1 %v13712_v12 }
 0x744   : > { %6803 = vmatprep.mubr.bf16.mxu1 %v5293_v9  ;;  %v5325_v9 = vsel %vm914_vm1, %v5322_v26, %v5324_v49 }
 0x746   : > { %v10317_v6 = vpop.f32.mrb[228].mxu1 }
 0x747   : > { %v6380_v43 = vpop.f32.mrb[229].mxu1  ;;  %v14057_v57 = vadd.f32 %v10317_v6, %v13909_v30  ;;  %v11374_v30 = vld [vmem:[#allocation11 + $0x180] sm:$0xff]  }
 0x748   : > { %v10318_v10 = vpop.f32.mrb[230].mxu1 }
 0x749   : > { %v6383_v8 = vpop.f32.mrb[231].mxu1 }
 0x74a   : > { %v14060_v3 = vadd.f32 %v6383_v8, %v13904_v4 }
 0x74b   : > { %6804 = vmatmul.mubr.bf16.gmra.mrb[80].mxu1 %v13726_v54 }
 0x74c   : > { %10347 = vmatprep.mubr.bf16.mxu1 %v5323_v24 }
 0x74e   : > { %v10321_v63 = vpop.f32.mrb[232].mxu1 }
 0x74f   : > { %v6396_v38 = vpop.f32.mrb[233].mxu1  ;;  %v5332_v63 = vrot.slane %v13458_v19, 1 }
 0x750   : > { %v10322_v47 = vpop.f32.mrb[234].mxu1  ;;  %v14067_v6 = vadd.f32 %v6396_v38, %v13915_v15  ;;  %v5328_v15 = vrot.slane %v13410_v1, 1 }
 0x751   : > { %v6399_v17 = vpop.f32.mrb[235].mxu1  ;;  %v14070_v4 = vadd.f32 %v10322_v47, %v13924_v31  ;;  %v5330_v31 = vrot.slane %v13434_v22, 1  ;;  %v15000_v47 = vld [vmem:[#allocation78_spill] sm:$0xff] }
 0x752   : > { %v14074_v18 = vadd.f32 %v6399_v17, %v13918_v11  ;;  %v11376_v11 = vld [vmem:[#allocation11 + $0x190] sm:$0xff]   ;;  %v5329_v1 = vsel %vm914_vm1, %v5326_v20, %v5328_v15  ;;  %v11378_v20 = vld [vmem:[#allocation11 + $0x1a0] sm:$0xff]  }
 0x753   : > { %10348 = vmatmul.mubr.bf16.vlgmr.msra.gmra.mrb[84].mxu1 %v5325_v9  ;;  %v5331_v22 = vsel %vm914_vm1, %v5328_v15, %v5330_v31 }
 0x754   : > { %10351 = vmatprep.mubr.bf16.mxu1 %v5327_v5  ;;  %7892 = vmatpush1.bf16.msra.mxu1 %v11374_v30  ;;  %v5334_v30 = vrot.slane %v15000_v47, 1  ;;  %v5333_v5 = vsel %vm914_vm1, %v5330_v31, %v5332_v63 }
 0x755   : > { %7893 = vmatprep.subr.bf16.mxu1 %v14936_v29 }
 0x756   : > { %v10325_v43 = vpop.f32.mrb[236].mxu1  ;;  %v5335_v19 = vsel %vm914_vm1, %v5332_v63, %v5334_v30 }
 0x757   : > { %v6412_v10 = vpop.f32.mrb[237].mxu1  ;;  %v14081_v8 = vadd.f32 %v10325_v43, %v13935_v0  ;;  %v11377_v0 = vld [vmem:[#allocation11 + $0x198] sm:$0xff]   ;;  %v11379_v43 = vld [vmem:[#allocation11 + $0x1a8] sm:$0xff]  }
 0x758   : > { %v10326_v26 = vpop.f32.mrb[238].mxu1  ;;  %7894 = vmatpush1.bf16.msra.mxu1 %v11375_v46  ;;  %v14084_v59 = vadd.f32 %v6412_v10, %v13929_v52  ;;  %v15001_v46 = vld [vmem:[#allocation73_spill] sm:$0xff] }
 0x759   : > { %v6415_v24 = vpop.f32.mrb[239].mxu1  ;;  %7895 = vmatprep.subr.bf16.mxu1 %v14936_v29  ;;  %v14088_v49 = vadd.f32 %v10326_v26, %v13938_v35 }
 0x75a   : > { %v15003_v24 = vld [vmem:[#allocation55_spill] sm:$0xff] }
 0x75b   : > { %10352 = vmatmul.mubr.bf16.gmra.mrb[88].mxu1 %v5329_v1  ;;  %v5338_v1 = vrot.slane %v15003_v24, 1  ;;  %v15006_v24 = vld [vmem:[#allocation36_spill] sm:$0xff] }
 0x75c   : > { %10355 = vmatprep.mubr.bf16.mxu1 %v5331_v22  ;;  %7896 = vmatpush1.bf16.msra.mxu1 %v11376_v11 }
 0x75d   : > { %7897 = vmatprep.subr.bf16.mxu1 %v14936_v29 }
 0x75e   : > { %v10329_v52 = vpop.f32.mrb[240].mxu1 }
 0x75f   : > { %v6428_v38 = vpop.f32.mrb[241].mxu1  ;;  %v14096_v17 = vadd.f32 %v10329_v52, %v13949_v53  ;;  %v15002_v53 = vld [vmem:[#allocation79_spill] sm:$0xff] }
 0x760   : > { %v10330_v35 = vpop.f32.mrb[242].mxu1  ;;  %7898 = vmatpush1.bf16.msra.mxu1 %v11377_v0  ;;  %v5336_v10 = vrot.slane %v15002_v53, 1  ;;  %v11380_v0 = vld [vmem:[#allocation11 + $0x1b0] sm:$0xff]  }
 0x761   : > { %v6431_v9 = vpop.f32.mrb[243].mxu1  ;;  %7899 = vmatprep.subr.bf16.mxu1 %v14936_v29  ;;  %v11381_v35 = vld [vmem:[#allocation11 + $0x1b8] sm:$0xff]  }
 0x762   : > { %v14101_v15 = vadd.f32 %v6431_v9, %v15001_v46  ;;  %v5337_v38 = vsel %vm914_vm1, %v5334_v30, %v5336_v10  ;;  %v5339_v47 = vsel %vm914_vm1, %v5336_v10, %v5338_v1  ;;  %v15005_v46 = vld [vmem:[#allocation35_spill] sm:$0xff] }
 0x763   : > { %10356 = vmatmul.mubr.bf16.gmra.mrb[92].mxu1 %v5333_v5 }
 0x764   : > { %10359 = vmatprep.mubr.bf16.mxu1 %v5335_v19  ;;  %7900 = vmatpush1.bf16.msra.mxu1 %v11378_v20  ;;  %v5342_v19 = vrot.slane %v15005_v46, 1  ;;  %v5348_v46 = vrot.slane %v14997_v25, 1 }
 0x765   : > { %7901 = vmatprep.subr.bf16.mxu1 %v14936_v29 }
 0x766   : > { %v6621_v26 = vpop.f32.mrb[244].mxu1 }
 0x767   : > { %v6623_v11 = vpop.f32.mrb[245].mxu1  ;;  %v14108_v22 = vadd.f32 %v6621_v26, %v13957_v48  ;;  %v15004_v48 = vld [vmem:[#allocation58_spill] sm:$0xff] }
 0x768   : > { %v6624_v31 = vpop.f32.mrb[246].mxu1  ;;  %7902 = vmatpush1.bf16.msra.mxu1 %v11379_v43  ;;  %v5340_v20 = vrot.slane %v15004_v48, 1  ;;  %v11383_v11 = vld [vmem:[#allocation11 + $0x1c8] sm:$0xff]  }
 0x769   : > { %v6626_v52 = vpop.f32.mrb[247].mxu1  ;;  %7903 = vmatprep.subr.bf16.mxu1 %v14936_v29  ;;  %v14112_v63 = vadd.f32 %v6624_v31, %v13963_v42  ;;  %v11382_v42 = vld [vmem:[#allocation11 + $0x1c0] sm:$0xff]   ;;  %v5344_v31 = vrot.slane %v15006_v24, 1 }
 0x76a   : > { %v5341_v10 = vsel %vm914_vm1, %v5338_v1, %v5340_v20  ;;  %v5343_v26 = vsel %vm914_vm1, %v5340_v20, %v5342_v19  ;;  %v11384_v1 = vld [vmem:[#allocation11 + $0x1d0] sm:$0xff]  }
 0x76b   : > { %10360 = vmatmul.mubr.bf16.gmra.mrb[96].mxu1 %v5337_v38  ;;  %v15007_v38 = vld [vmem:[#allocation60_spill] sm:$0xff]  ;;  %v5345_v20 = vsel %vm914_vm1, %v5342_v19, %v5344_v31 }
 0x76c   : > { %10363 = vmatprep.mubr.bf16.mxu1 %v5339_v47  ;;  %7904 = vmatpush1.bf16.msra.mxu1 %v11380_v0  ;;  %v5346_v47 = vrot.slane %v15007_v38, 1  ;;  %v11386_v19 = vld [vmem:[#allocation11 + $0x1e0] sm:$0xff]  }
 0x76d   : > { %7905 = vmatprep.subr.bf16.mxu1 %v14936_v29 }
 0x76e   : > { %v6629_v9 = vpop.f32.mrb[248].mxu1  ;;  %v5349_v24 = vsel %vm914_vm1, %v5346_v47, %v5348_v46 }
 0x76f   : > { %v6631_v5 = vpop.f32.mrb[249].mxu1  ;;  %v5347_v9 = vsel %vm914_vm1, %v5344_v31, %v5346_v47 }
 0x770   : > { %v6632_v43 = vpop.f32.mrb[250].mxu1  ;;  %7906 = vmatpush1.bf16.msra.mxu1 %v11381_v35  ;;  %v11385_v5 = vld [vmem:[#allocation11 + $0x1d8] sm:$0xff]  }
 0x771   : > { %v6634_v53 = vpop.f32.mrb[251].mxu1  ;;  %7907 = vmatprep.subr.bf16.mxu1 %v14936_v29  ;;  %v14121_v30 = vadd.f32 %v6632_v43, %v13960_v32 }
 0x773   : > { %10364 = vmatmul.mubr.bf16.gmra.mrb[100].mxu1 %v5341_v10 }
 0x774   : > { %10367 = vmatprep.mubr.bf16.mxu1 %v5343_v26  ;;  %7908 = vmatpush1.bf16.msra.mxu1 %v11382_v42  ;;  %v5350_v42 = vrot.slane %v13614_v41, 1  ;;  %v11387_v41 = vld [vmem:[#allocation11 + $0x1e8] sm:$0xff]  }
 0x775   : > { %7909 = vmatprep.subr.bf16.mxu1 %v14936_v29 }
 0x776   : > { %v6637_v0 = vpop.f32.mrb[252].mxu1  ;;  %v5351_v25 = vsel %vm914_vm1, %v5348_v46, %v5350_v42  ;;  %v5358_v46 = vrot.slane %v13670_v61, 1  ;;  %v5362_v61 = vrot.slane %v13698_v34, 1  ;;  %v5364_v34 = vrot.slane %v13712_v12, 1 }
 0x777   : > { %v6639_v52 = vpop.f32.mrb[253].mxu1  ;;  %v14129_v35 = vadd.f32 %v6637_v0, %v13973_v27 }
 0x778   : > { %v6640_v32 = vpop.f32.mrb[254].mxu1  ;;  %7910 = vmatpush1.bf16.msra.mxu1 %v11383_v11  ;;  %v5354_v52 = vrot.slane %v13642_v44, 1  ;;  %v14156_v44 = vld [vmem:[#allocation11 + $0x200] sm:$0xff]  }
 0x779   : > { %v6642_v48 = vpop.f32.mrb[255].mxu1  ;;  %7911 = vmatprep.subr.bf16.mxu1 %v14936_v29 }
 0x77b   : > { %10368 = vmatmul.mubr.bf16.gmra.mrb[104].mxu1 %v5345_v20  ;;  %v5356_v20 = vrot.slane %v13656_v28, 1  ;;  %v5360_v28 = vrot.slane %v13684_v16, 1 }
 0x77c   : > { %10371 = vmatprep.mubr.bf16.mxu1 %v5347_v9  ;;  %7912 = vmatpush1.bf16.msra.mxu1 %v11384_v1 }
 0x77d   : > { %7913 = vmatprep.subr.bf16.mxu1 %v14936_v29  ;;  %v5363_v16 = vsel %vm914_vm1, %v5360_v28, %v5362_v61 }
 0x77e   : > { %v6645_v27 = vpop.f32.mrb[0].mxu1 }
 0x77f   : > { %v6647_v43 = vpop.f32.mrb[1].mxu1  ;;  %v14138_v53 = vadd.f32 %v6645_v27, %v13969_v23  ;;  %v5352_v23 = vrot.slane %v13628_v21, 1  ;;  %v11391_v21 = vld [vmem:[#allocation11 + $0x1f8] sm:$0xff]  }
 0x780   : > { %v6648_v10 = vpop.f32.mrb[2].mxu1  ;;  %7914 = vmatpush1.bf16.msra.mxu1 %v11385_v5 }
 0x781   : > { %v6650_v26 = vpop.f32.mrb[3].mxu1  ;;  %7915 = vmatprep.subr.bf16.mxu1 %v14936_v29  ;;  %v14142_v11 = vadd.f32 %v6648_v10, %v13976_v45  ;;  %v11388_v45 = vld [vmem:[#allocation11 + $0x1f0] sm:$0xff]   ;;  %v5353_v1 = vsel %vm914_vm1, %v5350_v42, %v5352_v23  ;;  %v5355_v48 = vsel %vm914_vm1, %v5352_v23, %v5354_v52  ;;  %v5357_v42 = vsel %vm914_vm1, %v5354_v52, %v5356_v20  ;;  %v7085_v23 = vld [vmem:[#allocation3 + $0x18] sm:$0xf] }
 0x783   : > { %10372 = vmatmul.mubr.bf16.gmra.mrb[108].mxu1 %v5349_v24 }
 0x784   : > { %10375 = vmatprep.mubr.bf16.mxu1 %v5351_v25  ;;  %7916 = vmatpush1.bf16.msra.mxu1 %v11386_v19 }
 0x785   : > { %7917 = vmatprep.subr.bf16.mxu1 %v14936_v29 }
 0x786   : > { %v6653_v31 = vpop.f32.mrb[4].mxu1 }
 0x787   : > { %v6655_v0 = vpop.f32.mrb[5].mxu1  ;;  %v14175_v31 = vld [vmem:[#allocation3 + $0x1c] sm:$0xf] }
 0x788   : > { %v6656_v38 = vpop.f32.mrb[6].mxu1  ;;  %7918 = vmatpush1.bf16.msra.mxu1 %v11387_v41  ;;  %v5361_v41 = vsel %vm914_vm1, %v5358_v46, %v5360_v28  ;;  %v9257_v0 = vcombine.low %v7085_v23, %v14175_v31 }
 0x789   : > { %v6658_v32 = vpop.f32.mrb[7].mxu1  ;;  %7919 = vmatprep.subr.bf16.mxu1 %v14936_v29  ;;  %v14151_v47 = vadd.f32 %v6656_v38, %v13986_v60  ;;  %v5366_v38 = vrot.slane %v13726_v54, 1 }
 0x78b   : > { %10376 = vmatmul.mubr.bf16.gmra.mrb[112].mxu1 %v5353_v1  ;;  %v7405_v1 = vshll.u32 %v9257_v0, 16 }
 0x78c   : > { %10379 = vmatprep.mubr.bf16.mxu1 %v5355_v48  ;;  %7920 = vmatpush1.bf16.msra.mxu1 %v11388_v45  ;;  %v14181_v45 = vld [vmem:[#allocation3 + $0x20] sm:$0xff]  }
 0x78d   : > { %7921 = vmatprep.subr.bf16.mxu1 %v14936_v29  ;;  %v5359_v29 = vsel %vm914_vm1, %v5356_v20, %v5358_v46  ;;  %v5367_v20 = vsel %vm914_vm1, %v5364_v34, %v5366_v38  ;;  %v7407_v12 = vrot.slane %v7405_v1, 1  ;;  %v11407_v1 = vld [vmem:[#allocation11 + $0x210] sm:$0xff]  }
 0x78e   : > { %v6661_v9 = vpop.f32.mrb[8].mxu1 }
 0x78f   : > { %v6663_v5 = vpop.f32.mrb[9].mxu1  ;;  %v14161_v60 = vadd.f32 %v6661_v9, %v13982_v36  ;;  %v7410_v9 = vshll.u32 %v14181_v45, 16 }
 0x790   : > { %v6664_v27 = vpop.f32.mrb[10].mxu1  ;;  %7922 = vmatpush1.bf16.msra.mxu1 %v11391_v21  ;;  %v5365_v21 = vsel %vm914_vm1, %v5362_v61, %v5364_v34  ;;  %v5368_v5 = vrot.slane %v14028_v56, 1 }
 0x791   : > { %v6666_v43 = vpop.f32.mrb[11].mxu1  ;;  %10395 = vmatprep.subr.bf16.mxu1 %v14156_v44 }
 0x792   : > { %v7403_v43 = vshrl.u32 %v9257_v0, 16 }
 0x793   : > { %10380 = vmatmul.mubr.bf16.gmra.mrb[116].mxu1 %v5357_v42  ;;  %v7412_v42 = vrot.slane %v7410_v9, 1 }
 0x794   : > { %10383 = vmatprep.mubr.bf16.mxu1 %v5359_v29 }
 0x796   : > { %v6669_v10 = vpop.f32.mrb[12].mxu1 }
 0x797   : > { %v6671_v19 = vpop.f32.mrb[13].mxu1  ;;  %v14169_v36 = vadd.f32 %v6669_v10, %v13993_v51  ;;  %v7408_v10 = vor.u32 %v7407_v12, %v7403_v43  ;;  %v14211_v12 = vld [vmem:[#allocation3 + $0x38] sm:$0xff]   ;;  %v11395_v43 = vld [vmem:[#allocation3 + $0x20] sm:$0xff]  }
 0x798   : > { %v6672_v26 = vpop.f32.mrb[14].mxu1  ;;  %v5369_v19 = vsel %vm914_vm1, %v5366_v38, %v5368_v5 }
 0x799   : > { %v6674_v24 = vpop.f32.mrb[15].mxu1  ;;  %v14172_v25 = vadd.f32 %v6672_v26, %v13999_v2  ;;  %v7413_v61 = vsel %vm663_vm2, %v7408_v10, %v7412_v42  ;;  %v11421_v10 = vld [vmem:[#allocation11 + $0x220] sm:$0xff]  }
 0x79b   : > { %10384 = vmatmul.mubr.bf16.gmra.mrb[120].mxu1 %v5361_v41  ;;  %v7414_v41 = vshrl.u32 %v14181_v45, 16 }
 0x79c   : > { %10387 = vmatprep.mubr.bf16.mxu1 %v5363_v16  ;;  %v14202_v16 = vld [vmem:[#allocation3 + $0x30] sm:$0xff]  }
 0x79d   : > { %v7416_v38 = vor.u32 %v7414_v41, %v7412_v42 }
 0x79e   : > { %v6677_v51 = vpop.f32.mrb[16].mxu1 }
 0x79f   : > { %v6679_v52 = vpop.f32.mrb[17].mxu1 }
 0x7a0   : > { %v6680_v2 = vpop.f32.mrb[18].mxu1  ;;  %v11392_v52 = vld [vmem:[#allocation3 + $0x18] sm:$0xff]  }
 0x7a1   : > { %v6682_v32 = vpop.f32.mrb[19].mxu1  ;;  %v14184_v48 = vadd.f32 %v6680_v2, %v13996_v40  ;;  %v14193_v40 = vld [vmem:[#allocation3 + $0x28] sm:$0xff]  }
 0x7a2   : > { %v7418_v26 = vshll.u32 %v14193_v40, 16  ;;  %v11400_v2 = vld [vmem:[#allocation11 + $0x208] sm:$0xff]   ;;  %v7422_v9 = vshrl.u32 %v14193_v40, 16 }
 0x7a3   : > { %10388 = vmatmul.mubr.bf16.gmra.mrb[124].mxu1 %v5365_v21 }
 0x7a4   : > { %10391 = vmatprep.mubr.bf16.mxu1 %v5367_v20  ;;  %v7420_v23 = vrot.slane %v7418_v26, 1  ;;  %v7430_v26 = vshrl.u32 %v14202_v16, 16 }
 0x7a6   : > { %v6685_v54 = vpop.f32.mrb[20].mxu1  ;;  %v7421_v32 = vsel %vm663_vm2, %v7416_v38, %v7420_v23  ;;  %v7424_v42 = vor.u32 %v7422_v9, %v7420_v23  ;;  %v14230_v9 = vld [vmem:[#allocation3 + $0x48] sm:$0xff]  }
 0x7a7   : > { %v14191_v46 = vadd.f32 %v6685_v54, %v14009_v58  ;;  %v6687_v27 = vpop.f32.mrb[21].mxu1 }
 0x7a8   : > { %v6688_v29 = vpop.f32.mrb[22].mxu1 }
 0x7a9   : > { %v6690_v28 = vpop.f32.mrb[23].mxu1  ;;  %v11414_v29 = vld [vmem:[#allocation11 + $0x218] sm:$0xff]  }
 0x7aa   : > { %v7434_v28 = vshll.u32 %v14211_v12, 16 }
 0x7ab   : > { %10392 = vmatmul.mubr.bf16.gmra.mrb[128].mxu1 %v5369_v19 }
 0x7ac   : > { %7923 = vmatprep.mubr.bf16.mxu1 %v7413_v61 }
 0x7ae   : > { %v6693_v56 = vpop.f32.mrb[24].mxu1 }
 0x7af   : > { %v14199_v58 = vadd.f32 %v6693_v56, %v14006_v14  ;;  %v6695_v24 = vpop.f32.mrb[25].mxu1  ;;  %v7426_v14 = vshll.u32 %v14202_v16, 16  ;;  %v7436_v56 = vrot.slane %v7434_v28, 1 }
 0x7b0   : > { %v6696_v0 = vpop.f32.mrb[26].mxu1  ;;  %v14222_v24 = vld [vmem:[#allocation3 + $0x40] sm:$0xff]  }
 0x7b1   : > { %v14205_v34 = vadd.f32 %v6696_v0, %v14012_v50  ;;  %v6698_v51 = vpop.f32.mrb[27].mxu1  ;;  %v7428_v50 = vrot.slane %v7426_v14, 1  ;;  %v11397_v0 = vld [vmem:[#allocation3 + $0x28] sm:$0xff]  }
 0x7b3   : > { %7924 = vmatmul.mubr.bf16.vlgmr.msra.gmra.mrb[132].mxu1 %v11392_v52  ;;  %v7432_v51 = vor.u32 %v7430_v26, %v7428_v50  ;;  %v11428_v52 = vld [vmem:[#allocation11 + $0x228] sm:$0xff]  }
 0x7b4   : > { %7931 = vmatprep.mubr.bf16.mxu1 %v7421_v32  ;;  %10396 = vmatpush3.bf16.msra.mxu1 %v14156_v44  ;;  %v7429_v44 = vsel %vm663_vm2, %v7424_v42, %v7428_v50  ;;  %v15008_v26 = vld [vmem:[#allocation74_spill] sm:$0xff] }
 0x7b5   : > { %10397 = vmatprep.subr.bf16.mxu1 %v11400_v2  ;;  %v7437_v38 = vsel %vm663_vm2, %v7432_v51, %v7436_v56 }
 0x7b6   : > { %v6701_v21 = vpop.f32.mrb[28].mxu1 }
 0x7b7   : > { %v6703_v20 = vpop.f32.mrb[29].mxu1  ;;  %v7438_v21 = vshrl.u32 %v14211_v12, 16 }
 0x7b8   : > { %v6704_v5 = vpop.f32.mrb[30].mxu1  ;;  %10398 = vmatpush3.bf16.msra.mxu1 %v11400_v2  ;;  %v7442_v2 = vshll.u32 %v14222_v24, 16 }
 0x7b9   : > { %v14214_v54 = vadd.f32 %v6704_v5, %v14022_v7  ;;  %v6706_v27 = vpop.f32.mrb[31].mxu1  ;;  %10399 = vmatprep.subr.bf16.mxu1 %v11407_v1  ;;  %v7440_v42 = vor.u32 %v7438_v21, %v7436_v56  ;;  %v14249_v21 = vld [vmem:[#allocation3 + $0x58] sm:$0xff]  }
 0x7ba   : > { %v7444_v20 = vrot.slane %v7442_v2, 1 }
 0x7bb   : > { %7932 = vmatmul.mubr.bf16.gmra.mrb[136].mxu1 %v11395_v43  ;;  %v11399_v43 = vld [vmem:[#allocation3 + $0x30] sm:$0xff]  }
 0x7bc   : > { %7939 = vmatprep.mubr.bf16.mxu1 %v7429_v44  ;;  %10400 = vmatpush3.bf16.msra.mxu1 %v11407_v1 }
 0x7bd   : > { %10401 = vmatprep.subr.bf16.mxu1 %v11414_v29 }
 0x7be   : > { %v6709_v19 = vpop.f32.mrb[32].mxu1 }
 0x7bf   : > { %v14219_v61 = vadd.f32 %v6709_v19, %v14019_v33  ;;  %v6711_v7 = vpop.f32.mrb[33].mxu1  ;;  %v11435_v33 = vld [vmem:[#allocation11 + $0x230] sm:$0xff]  }
 0x7c0   : > { %v6712_v41 = vpop.f32.mrb[34].mxu1  ;;  %10402 = vmatpush3.bf16.msra.mxu1 %v11414_v29  ;;  %v7445_v29 = vsel %vm663_vm2, %v7440_v42, %v7444_v20  ;;  %v14238_v7 = vld [vmem:[#allocation3 + $0x50] sm:$0xff]  }
 0x7c1   : > { %v6714_v23 = vpop.f32.mrb[35].mxu1  ;;  %10403 = vmatprep.subr.bf16.mxu1 %v11421_v10 }
 0x7c2   : > { %v11402_v23 = vld [vmem:[#allocation3 + $0x38] sm:$0xff]  }
 0x7c3   : > { %7940 = vmatmul.mubr.bf16.gmra.mrb[140].mxu1 %v11397_v0 }
 0x7c4   : > { %7947 = vmatprep.mubr.bf16.mxu1 %v7437_v38  ;;  %10404 = vmatpush3.bf16.msra.mxu1 %v11421_v10  ;;  %v7446_v10 = vshrl.u32 %v14222_v24, 16 }
 0x7c5   : > { %10405 = vmatprep.subr.bf16.mxu1 %v11428_v52 }
 0x7c6   : > { %v6717_v32 = vpop.f32.mrb[36].mxu1  ;;  %v7448_v0 = vor.u32 %v7446_v10, %v7444_v20  ;;  %v7462_v10 = vshrl.u32 %v14238_v7, 16 }
 0x7c7   : > { %v14227_v14 = vadd.f32 %v6717_v32, %v14031_v62  ;;  %v6719_v1 = vpop.f32.mrb[37].mxu1  ;;  %v7450_v62 = vshll.u32 %v14230_v9, 16  ;;  %v7454_v32 = vshrl.u32 %v14230_v9, 16 }
 0x7c8   : > { %v6720_v50 = vpop.f32.mrb[38].mxu1  ;;  %10406 = vmatpush3.bf16.msra.mxu1 %v11428_v52  ;;  %v7458_v52 = vshll.u32 %v14238_v7, 16 }
 0x7c9   : > { %v14233_v5 = vadd.f32 %v6720_v50, %v14037_v13  ;;  %v6722_v27 = vpop.f32.mrb[39].mxu1  ;;  %10407 = vmatprep.subr.bf16.mxu1 %v11435_v33  ;;  %v7452_v19 = vrot.slane %v7450_v62, 1  ;;  %v11442_v62 = vld [vmem:[#allocation11 + $0x238] sm:$0xff]  }
 0x7ca   : > { %v7460_v1 = vrot.slane %v7458_v52, 1 }
 0x7cb   : > { %7948 = vmatmul.mubr.bf16.gmra.mrb[144].mxu1 %v11399_v43  ;;  %v7453_v51 = vsel %vm663_vm2, %v7448_v0, %v7452_v19  ;;  %v11404_v43 = vld [vmem:[#allocation3 + $0x40] sm:$0xff]   ;;  %v7456_v20 = vor.u32 %v7454_v32, %v7452_v19  ;;  %v11406_v0 = vld [vmem:[#allocation3 + $0x48] sm:$0xff]   ;;  %v7470_v32 = vshrl.u32 %v14249_v21, 16 }
 0x7cc   : > { %7955 = vmatprep.mubr.bf16.mxu1 %v7445_v29  ;;  %10408 = vmatpush3.bf16.msra.mxu1 %v11435_v33  ;;  %v7466_v29 = vshll.u32 %v14249_v21, 16 }
 0x7cd   : > { %v7461_v42 = vsel %vm663_vm2, %v7456_v20, %v7460_v1  ;;  %10409 = vmatprep.subr.bf16.mxu1 %v11442_v62 }
 0x7ce   : > { %v6725_v44 = vpop.f32.mrb[40].mxu1 }
 0x7cf   : > { %v6727_v28 = vpop.f32.mrb[41].mxu1 }
 0x7d0   : > { %v6728_v13 = vpop.f32.mrb[42].mxu1  ;;  %10410 = vmatpush3.bf16.msra.mxu1 %v11442_v62 }
 0x7d1   : > { %v14241_v41 = vadd.f32 %v6728_v13, %v15008_v26  ;;  %v6730_v56 = vpop.f32.mrb[43].mxu1  ;;  %v7468_v13 = vrot.slane %v7466_v29, 1  ;;  %v14257_v26 = vld [vmem:[#allocation3 + $0x60] sm:$0xff]  }
 0x7d3   : > { %7956 = vmatmul.mubr.bf16.gmra.mrb[148].mxu1 %v11402_v23 }
 0x7d4   : > { %7963 = vmatprep.mubr.bf16.mxu1 %v7453_v51  ;;  %v7464_v51 = vor.u32 %v7462_v10, %v7460_v1  ;;  %v7472_v1 = vor.u32 %v7470_v32, %v7468_v13 }
 0x7d6   : > { %v6733_v38 = vpop.f32.mrb[44].mxu1  ;;  %v7469_v52 = vsel %vm663_vm2, %v7464_v51, %v7468_v13 }
 0x7d7   : > { %v14246_v2 = vadd.f32 %v6733_v38, %v14047_v55  ;;  %v6735_v33 = vpop.f32.mrb[45].mxu1  ;;  %v7474_v38 = vshll.u32 %v14257_v26, 16 }
 0x7d8   : > { %v6736_v50 = vpop.f32.mrb[46].mxu1 }
 0x7d9   : > { %v6738_v27 = vpop.f32.mrb[47].mxu1  ;;  %v7476_v50 = vrot.slane %v7474_v38, 1 }
 0x7da   : > { %v14265_v27 = vld [vmem:[#allocation3 + $0x68] sm:$0xff]  }
 0x7db   : > { %7964 = vmatmul.mubr.bf16.gmra.mrb[152].mxu1 %v11404_v43  ;;  %v7477_v29 = vsel %vm663_vm2, %v7472_v1, %v7476_v50  ;;  %v7482_v62 = vshll.u32 %v14265_v27, 16 }
 0x7dc   : > { %7971 = vmatprep.mubr.bf16.mxu1 %v7461_v42  ;;  %v11409_v42 = vld [vmem:[#allocation3 + $0x50] sm:$0xff]  }
 0x7de   : > { %v6741_v55 = vpop.f32.mrb[48].mxu1 }
 0x7df   : > { %v14254_v44 = vadd.f32 %v6741_v55, %v14044_v39  ;;  %v6743_v28 = vpop.f32.mrb[49].mxu1 }
 0x7e0   : > { %v6744_v19 = vpop.f32.mrb[50].mxu1 }
 0x7e1   : > { %v14260_v56 = vadd.f32 %v6744_v19, %v14050_v37  ;;  %v6746_v23 = vpop.f32.mrb[51].mxu1  ;;  %v7478_v19 = vshrl.u32 %v14257_v26, 16 }
 0x7e2   : > { %v7484_v23 = vrot.slane %v7482_v62, 1  ;;  %v11413_v62 = vld [vmem:[#allocation3 + $0x60] sm:$0xff]  }
 0x7e3   : > { %7972 = vmatmul.mubr.bf16.gmra.mrb[156].mxu1 %v11406_v0  ;;  %v14276_v0 = vld [vmem:[#allocation3 + $0x70] sm:$0xff]   ;;  %v7480_v13 = vor.u32 %v7478_v19, %v7476_v50 }
 0x7e4   : > { %7979 = vmatprep.mubr.bf16.mxu1 %v7469_v52  ;;  %v11411_v52 = vld [vmem:[#allocation3 + $0x58] sm:$0xff]  }
 0x7e5   : > { %v7485_v38 = vsel %vm663_vm2, %v7480_v13, %v7484_v23  ;;  %v14292_v13 = vld [vmem:[#allocation3 + $0x80] sm:$0xff]  }
 0x7e6   : > { %v6749_v39 = vpop.f32.mrb[52].mxu1  ;;  %15010 = vst [vmem:[#allocation44_spill] sm:$0xff] %v14292_v13 }
 0x7e7   : > { %v6751_v33 = vpop.f32.mrb[53].mxu1  ;;  %v7490_v39 = vshll.u32 %v14276_v0, 16 }
 0x7e8   : > { %v6752_v43 = vpop.f32.mrb[54].mxu1 }
 0x7e9   : > { %v14268_v37 = vadd.f32 %v6752_v43, %v14060_v3  ;;  %v6754_v20 = vpop.f32.mrb[55].mxu1  ;;  %v7486_v43 = vshrl.u32 %v14265_v27, 16 }
 0x7ea   : > { %v7492_v20 = vrot.slane %v7490_v39, 1 }
 0x7eb   : > { %7980 = vmatmul.mubr.bf16.gmra.mrb[160].mxu1 %v11409_v42  ;;  %v14284_v42 = vld [vmem:[#allocation3 + $0x78] sm:$0xff]  }
 0x7ec   : > { %7987 = vmatprep.mubr.bf16.mxu1 %v7477_v29  ;;  %15009 = vst [vmem:[#allocation43_spill] sm:$0xff] %v14284_v42  ;;  %v7498_v19 = vshll.u32 %v14284_v42, 16 }
 0x7ee   : > { %v6757_v55 = vpop.f32.mrb[56].mxu1 }
 0x7ef   : > { %v14273_v28 = vadd.f32 %v6757_v55, %v14057_v57  ;;  %v6759_v10 = vpop.f32.mrb[57].mxu1  ;;  %v7488_v55 = vor.u32 %v7486_v43, %v7484_v23  ;;  %v7506_v43 = vshll.u32 %v14292_v13, 16 }
 0x7f0   : > { %v6760_v3 = vpop.f32.mrb[58].mxu1 }
 0x7f1   : > { %v6762_v51 = vpop.f32.mrb[59].mxu1  ;;  %v7493_v10 = vsel %vm663_vm2, %v7488_v55, %v7492_v20  ;;  %v7502_v55 = vshrl.u32 %v14284_v42, 16 }
 0x7f2   : > { %v7494_v51 = vshrl.u32 %v14276_v0, 16 }
 0x7f3   : > { %7988 = vmatmul.mubr.bf16.gmra.mrb[164].mxu1 %v11411_v52  ;;  %v7500_v52 = vrot.slane %v7498_v19, 1  ;;  %v14303_v19 = vld [vmem:[#allocation3 + $0x88] sm:$0xff]  }
 0x7f4   : > { %7995 = vmatprep.mubr.bf16.mxu1 %v7485_v38  ;;  %v7496_v23 = vor.u32 %v7494_v51, %v7492_v20  ;;  %15011 = vst [vmem:[#allocation75_spill] sm:$0xff] %v14303_v19 }
 0x7f5   : > { %v7504_v20 = vor.u32 %v7502_v55, %v7500_v52 }
 0x7f6   : > { %v6765_v33 = vpop.f32.mrb[60].mxu1 }
 0x7f7   : > { %v14281_v57 = vadd.f32 %v6765_v33, %v14067_v6  ;;  %v6767_v32 = vpop.f32.mrb[61].mxu1  ;;  %v11416_v33 = vld [vmem:[#allocation3 + $0x68] sm:$0xff]  }
 0x7f8   : > { %v6768_v1 = vpop.f32.mrb[62].mxu1  ;;  %v7501_v32 = vsel %vm663_vm2, %v7496_v23, %v7500_v52  ;;  %v7510_v23 = vshrl.u32 %v14292_v13, 16  ;;  %v11420_v52 = vld [vmem:[#allocation3 + $0x78] sm:$0xff]  }
 0x7f9   : > { %v14287_v29 = vadd.f32 %v6768_v1, %v14074_v18  ;;  %v6770_v50 = vpop.f32.mrb[63].mxu1 }
 0x7fb   : > { %7996 = vmatmul.mubr.bf16.gmra.mrb[168].mxu1 %v11413_v62 }
 0x7fc   : > { %8003 = vmatprep.mubr.bf16.mxu1 %v7493_v10  ;;  %v7508_v10 = vrot.slane %v7506_v43, 1 }
 0x7fe   : > { %v6773_v6 = vpop.f32.mrb[64].mxu1  ;;  %v7509_v51 = vsel %vm663_vm2, %v7504_v20, %v7508_v10  ;;  %v7512_v55 = vor.u32 %v7510_v23, %v7508_v10  ;;  %v11484_v23 = vld [vmem:[#allocation3 + $0x98] sm:$0xff]  }
 0x7ff   : > { %v6775_v3 = vpop.f32.mrb[65].mxu1 }
 0x800   : > { %v6776_v38 = vpop.f32.mrb[66].mxu1  ;;  %v11418_v3 = vld [vmem:[#allocation3 + $0x70] sm:$0xff]  }
 0x801   : > { %v14295_v18 = vadd.f32 %v6776_v38, %v14070_v4  ;;  %v6778_v39 = vpop.f32.mrb[67].mxu1  ;;  %v7514_v38 = vshll.u32 %v14303_v19, 16 }
 0x803   : > { %8004 = vmatmul.mubr.bf16.gmra.mrb[172].mxu1 %v11416_v33 }
 0x804   : > { %8011 = vmatprep.mubr.bf16.mxu1 %v7501_v32  ;;  %v7516_v32 = vrot.slane %v7514_v38, 1 }
 0x806   : > { %v6781_v1 = vpop.f32.mrb[68].mxu1 }
 0x807   : > { %v14300_v50 = vadd.f32 %v6781_v1, %v14084_v59  ;;  %v6783_v62 = vpop.f32.mrb[69].mxu1 }
 0x808   : > { %v6784_v4 = vpop.f32.mrb[70].mxu1 }
 0x809   : > { %v6786_v6 = vpop.f32.mrb[71].mxu1  ;;  %v7517_v4 = vsel %vm663_vm2, %v7512_v55, %v7516_v32 }
 0x80a   : > { %v11483_v6 = vld [vmem:[#allocation3 + $0x90] sm:$0xff]  }
 0x80b   : > { %8012 = vmatmul.mubr.bf16.gmra.mrb[176].mxu1 %v11418_v3  ;;  %v7522_v3 = vshll.u32 %v11483_v6, 16 }
 0x80c   : > { %8019 = vmatprep.mubr.bf16.mxu1 %v7509_v51  ;;  %v7518_v51 = vshrl.u32 %v14303_v19, 16 }
 0x80e   : > { %v6789_v39 = vpop.f32.mrb[72].mxu1 }
 0x80f   : > { %v14308_v59 = vadd.f32 %v6789_v39, %v14081_v8  ;;  %v6791_v33 = vpop.f32.mrb[73].mxu1  ;;  %v7524_v39 = vrot.slane %v7522_v3, 1 }
 0x810   : > { %v6792_v43 = vpop.f32.mrb[74].mxu1 }
 0x811   : > { %v14312_v1 = vadd.f32 %v6792_v43, %v14088_v49  ;;  %v6794_v62 = vpop.f32.mrb[75].mxu1  ;;  %v11423_v43 = vld [vmem:[#allocation3 + $0x80] sm:$0xff]  }
 0x812   : > { %v7520_v62 = vor.u32 %v7518_v51, %v7516_v32  ;;  %v11485_v51 = vld [vmem:[#allocation3 + $0xa0] sm:$0xff]  }
 0x813   : > { %8020 = vmatmul.mubr.bf16.gmra.mrb[180].mxu1 %v11420_v52  ;;  %v7530_v52 = vshll.u32 %v11484_v23, 16 }
 0x814   : > { %8027 = vmatprep.mubr.bf16.mxu1 %v7517_v4  ;;  %v7525_v10 = vsel %vm663_vm2, %v7520_v62, %v7524_v39 }
 0x815   : > { %v7532_v3 = vrot.slane %v7530_v52, 1 }
 0x816   : > { %v6797_v20 = vpop.f32.mrb[76].mxu1 }
 0x817   : > { %v6799_v8 = vpop.f32.mrb[77].mxu1 }
 0x818   : > { %v6800_v33 = vpop.f32.mrb[78].mxu1  ;;  %v7526_v8 = vshrl.u32 %v11483_v6, 16 }
 0x819   : > { %v14317_v38 = vadd.f32 %v6800_v33, %v14101_v15  ;;  %v6802_v49 = vpop.f32.mrb[79].mxu1  ;;  %v11425_v15 = vld [vmem:[#allocation3 + $0x88] sm:$0xff]  }
 0x81a   : > { %v7528_v33 = vor.u32 %v7526_v8, %v7524_v39  ;;  %v7538_v49 = vshll.u32 %v11485_v51, 16  ;;  %v11486_v8 = vld [vmem:[#allocation3 + $0xa8] sm:$0xff]  }
 0x81b   : > { %8028 = vmatmul.mubr.bf16.gmra.mrb[184].mxu1 %v11423_v43 }
 0x81c   : > { %8035 = vmatprep.mubr.bf16.mxu1 %v7525_v10  ;;  %v7533_v32 = vsel %vm663_vm2, %v7528_v33, %v7532_v3  ;;  %v7534_v10 = vshrl.u32 %v11484_v23, 16  ;;  %v7540_v42 = vrot.slane %v7538_v49, 1 }
 0x81e   : > { %v6805_v55 = vpop.f32.mrb[80].mxu1  ;;  %v7536_v39 = vor.u32 %v7534_v10, %v7532_v3 }
 0x81f   : > { %v14321_v4 = vadd.f32 %v6805_v55, %v14096_v17  ;;  %v6807_v20 = vpop.f32.mrb[81].mxu1 }
 0x820   : > { %v6808_v19 = vpop.f32.mrb[82].mxu1  ;;  %v7541_v20 = vsel %vm663_vm2, %v7536_v39, %v7540_v42 }
 0x821   : > { %v6810_v13 = vpop.f32.mrb[83].mxu1  ;;  %v11427_v19 = vld [vmem:[#allocation3 + $0x90] sm:$0xff]  }
 0x823   : > { %8036 = vmatmul.mubr.bf16.gmra.mrb[188].mxu1 %v11425_v15  ;;  %v7546_v15 = vshll.u32 %v11486_v8, 16 }
 0x824   : > { %8043 = vmatprep.mubr.bf16.mxu1 %v7533_v32  ;;  %v7542_v32 = vshrl.u32 %v11485_v51, 16 }
 0x826   : > { %v10349_v43 = vpop.f32.mrb[84].mxu1  ;;  %v7544_v10 = vor.u32 %v7542_v32, %v7540_v42  ;;  %v11488_v32 = vld [vmem:[#allocation3 + $0xb8] sm:$0xff]  }
 0x827   : > { %v6846_v62 = vpop.f32.mrb[85].mxu1 }
 0x828   : > { %v14325_v17 = vadd.f32 %v6846_v62, %v14108_v22  ;;  %v10350_v55 = vpop.f32.mrb[86].mxu1  ;;  %v11430_v62 = vld [vmem:[#allocation3 + $0x98] sm:$0xff]  }
 0x829   : > { %v14328_v6 = vadd.f32 %v10350_v55, %v14121_v30  ;;  %v6849_v13 = vpop.f32.mrb[87].mxu1  ;;  %v7548_v30 = vrot.slane %v7546_v15, 1 }
 0x82a   : > { %v14331_v52 = vadd.f32 %v6849_v13, %v14112_v63  ;;  %v11487_v13 = vld [vmem:[#allocation3 + $0xb0] sm:$0xff]  }
 0x82b   : > { %8044 = vmatmul.mubr.bf16.gmra.mrb[192].mxu1 %v11427_v19  ;;  %v7549_v55 = vsel %vm663_vm2, %v7544_v10, %v7548_v30  ;;  %v7554_v19 = vshll.u32 %v11487_v13, 16 }
 0x82c   : > { %8051 = vmatprep.mubr.bf16.mxu1 %v7541_v20 }
 0x82d   : > { %v7556_v20 = vrot.slane %v7554_v19, 1 }
 0x82e   : > { %v10353_v23 = vpop.f32.mrb[88].mxu1 }
 0x82f   : > { %v14335_v22 = vadd.f32 %v10353_v23, %v14138_v53  ;;  %v6862_v33 = vpop.f32.mrb[89].mxu1 }
 0x830   : > { %v14338_v49 = vadd.f32 %v6862_v33, %v14129_v35  ;;  %v10354_v3 = vpop.f32.mrb[90].mxu1  ;;  %v7550_v35 = vshrl.u32 %v11486_v8, 16 }
 0x831   : > { %v14341_v63 = vadd.f32 %v10354_v3, %v14142_v11  ;;  %v6865_v43 = vpop.f32.mrb[91].mxu1  ;;  %v11432_v11 = vld [vmem:[#allocation3 + $0xa0] sm:$0xff]  }
 0x832   : > { %v7552_v33 = vor.u32 %v7550_v35, %v7548_v30  ;;  %v7562_v43 = vshll.u32 %v11488_v32, 16 }
 0x833   : > { %8052 = vmatmul.mubr.bf16.gmra.mrb[196].mxu1 %v11430_v62 }
 0x834   : > { %8059 = vmatprep.mubr.bf16.mxu1 %v7549_v55  ;;  %v7557_v42 = vsel %vm663_vm2, %v7552_v33, %v7556_v20  ;;  %v7564_v55 = vrot.slane %v7562_v43, 1 }
 0x836   : > { %v10357_v53 = vpop.f32.mrb[92].mxu1 }
 0x837   : > { %v14345_v51 = vadd.f32 %v10357_v53, %v14161_v60  ;;  %v6878_v39 = vpop.f32.mrb[93].mxu1  ;;  %v7558_v60 = vshrl.u32 %v11487_v13, 16 }
 0x838   : > { %v10358_v15 = vpop.f32.mrb[94].mxu1 }
 0x839   : > { %v6881_v23 = vpop.f32.mrb[95].mxu1  ;;  %v7560_v39 = vor.u32 %v7558_v60, %v7556_v20 }
 0x83a   : > { %v14348_v3 = vadd.f32 %v6881_v23, %v14151_v47  ;;  %v11434_v47 = vld [vmem:[#allocation3 + $0xa8] sm:$0xff]   ;;  %v11489_v23 = vld [vmem:[#allocation3 + $0xc0] sm:$0xff]  }
 0x83b   : > { %8060 = vmatmul.mubr.bf16.gmra.mrb[200].mxu1 %v11432_v11  ;;  %v7565_v15 = vsel %vm663_vm2, %v7560_v39, %v7564_v55  ;;  %v7570_v11 = vshll.u32 %v11489_v23, 16 }
 0x83c   : > { %8067 = vmatprep.mubr.bf16.mxu1 %v7557_v42  ;;  %v7566_v42 = vshrl.u32 %v11488_v32, 16 }
 0x83e   : > { %v10361_v62 = vpop.f32.mrb[96].mxu1  ;;  %v7568_v60 = vor.u32 %v7566_v42, %v7564_v55  ;;  %v11491_v42 = vld [vmem:[#allocation3 + $0xd0] sm:$0xff]  }
 0x83f   : > { %v6894_v10 = vpop.f32.mrb[97].mxu1 }
 0x840   : > { %v14352_v8 = vadd.f32 %v6894_v10, %v14169_v36  ;;  %v10362_v19 = vpop.f32.mrb[98].mxu1  ;;  %v11437_v10 = vld [vmem:[#allocation3 + $0xb0] sm:$0xff]  }
 0x841   : > { %v14355_v53 = vadd.f32 %v10362_v19, %v14184_v48  ;;  %v6897_v30 = vpop.f32.mrb[99].mxu1  ;;  %v7572_v48 = vrot.slane %v7570_v11, 1 }
 0x842   : > { %v14358_v35 = vadd.f32 %v6897_v30, %v14172_v25  ;;  %v11490_v30 = vld [vmem:[#allocation3 + $0xc8] sm:$0xff]  }
 0x843   : > { %8068 = vmatmul.mubr.bf16.gmra.mrb[204].mxu1 %v11434_v47  ;;  %v7573_v19 = vsel %vm663_vm2, %v7568_v60, %v7572_v48  ;;  %v7578_v47 = vshll.u32 %v11490_v30, 16 }
 0x844   : > { %8075 = vmatprep.mubr.bf16.mxu1 %v7565_v15 }
 0x845   : > { %v7580_v15 = vrot.slane %v7578_v47, 1 }
 0x846   : > { %v10365_v13 = vpop.f32.mrb[100].mxu1 }
 0x847   : > { %v14362_v36 = vadd.f32 %v10365_v13, %v14199_v58  ;;  %v6910_v33 = vpop.f32.mrb[101].mxu1 }
 0x848   : > { %v14365_v43 = vadd.f32 %v6910_v33, %v14191_v46  ;;  %v10366_v20 = vpop.f32.mrb[102].mxu1  ;;  %v7574_v46 = vshrl.u32 %v11489_v23, 16 }
 0x849   : > { %v14368_v25 = vadd.f32 %v10366_v20, %v14205_v34  ;;  %v6913_v62 = vpop.f32.mrb[103].mxu1  ;;  %v11439_v34 = vld [vmem:[#allocation3 + $0xb8] sm:$0xff]  }
 0x84a   : > { %v7576_v33 = vor.u32 %v7574_v46, %v7572_v48  ;;  %v7586_v62 = vshll.u32 %v11491_v42, 16 }
 0x84b   : > { %8076 = vmatmul.mubr.bf16.gmra.mrb[208].mxu1 %v11437_v10 }
 0x84c   : > { %8083 = vmatprep.mubr.bf16.mxu1 %v7573_v19  ;;  %v7581_v55 = vsel %vm663_vm2, %v7576_v33, %v7580_v15  ;;  %v7588_v19 = vrot.slane %v7586_v62, 1 }
 0x84e   : > { %v10369_v58 = vpop.f32.mrb[104].mxu1 }
 0x84f   : > { %v14372_v32 = vadd.f32 %v10369_v58, %v14219_v61  ;;  %v6926_v39 = vpop.f32.mrb[105].mxu1  ;;  %v7582_v61 = vshrl.u32 %v11490_v30, 16  ;;  %v7590_v30 = vshrl.u32 %v11491_v42, 16 }
 0x850   : > { %v10370_v11 = vpop.f32.mrb[106].mxu1 }
 0x851   : > { %v6929_v13 = vpop.f32.mrb[107].mxu1  ;;  %v7584_v39 = vor.u32 %v7582_v61, %v7580_v15  ;;  %v11444_v61 = vld [vmem:[#allocation3 + $0xc8] sm:$0xff]  }
 0x852   : > { %v14375_v20 = vadd.f32 %v6929_v13, %v14214_v54  ;;  %v11441_v54 = vld [vmem:[#allocation3 + $0xc0] sm:$0xff]   ;;  %v11492_v13 = vld [vmem:[#allocation3 + $0xd8] ss:$0 sps:$4 sm:$0x11]  }
 0x853   : > { %8084 = vmatmul.mubr.bf16.gmra.mrb[212].mxu1 %v11439_v34  ;;  %v7589_v11 = vsel %vm663_vm2, %v7584_v39, %v7588_v19  ;;  %v7594_v34 = vshll.u32 %v11492_v13, 16 }
 0x854   : > { %8091 = vmatprep.mubr.bf16.mxu1 %v7581_v55 }
 0x855   : > { %v7596_v62 = vrot.slane %v7594_v34, 1 }
 0x856   : > { %v10373_v10 = vpop.f32.mrb[108].mxu1 }
 0x857   : > { %v6942_v60 = vpop.f32.mrb[109].mxu1 }
 0x858   : > { %v14379_v23 = vadd.f32 %v6942_v60, %v14227_v14  ;;  %v10374_v47 = vpop.f32.mrb[110].mxu1 }
 0x859   : > { %v14382_v58 = vadd.f32 %v10374_v47, %v14241_v41  ;;  %v6945_v48 = vpop.f32.mrb[111].mxu1  ;;  %v7592_v41 = vor.u32 %v7590_v30, %v7588_v19  ;;  %v7134_v47 = vld [vmem:[#allocation3 + $0x18] sm:$0xe] }
 0x85a   : > { %v14385_v46 = vadd.f32 %v6945_v48, %v14233_v5 }
 0x85b   : > { %8092 = vmatmul.mubr.bf16.gmra.mrb[216].mxu1 %v11441_v54  ;;  %v7597_v42 = vsel %vm663_vm2, %v7592_v41, %v7596_v62 }
 0x85c   : > { %8099 = vmatprep.mubr.bf16.mxu1 %v7589_v11 }
 0x85e   : > { %v10377_v33 = vpop.f32.mrb[112].mxu1 }
 0x85f   : > { %v14389_v14 = vadd.f32 %v10377_v33, %v14254_v44  ;;  %v6958_v55 = vpop.f32.mrb[113].mxu1  ;;  %v9282_v44 = vcombine.low %v7134_v47, %v14175_v31  ;;  %v7628_v31 = vrot.slane %v14193_v40, 1 }
 0x860   : > { %v14392_v10 = vadd.f32 %v6958_v55, %v14246_v2  ;;  %v10378_v15 = vpop.f32.mrb[114].mxu1  ;;  %v7626_v2 = vrot.slane %v14181_v45, 1 }
 0x861   : > { %v14395_v5 = vadd.f32 %v10378_v15, %v14260_v56  ;;  %v6961_v60 = vpop.f32.mrb[115].mxu1  ;;  %v11446_v56 = vld [vmem:[#allocation3 + $0xd0] sm:$0xff]   ;;  %v7625_v13 = vrot.slane %v9282_v44, 1 }
 0x863   : > { %8100 = vmatmul.mubr.bf16.gmra.mrb[220].mxu1 %v11444_v61  ;;  %v7627_v30 = vsel %vm914_vm1, %v7625_v13, %v7626_v2  ;;  %v7632_v61 = vrot.slane %v14211_v12, 1 }
 0x864   : > { %8107 = vmatprep.mubr.bf16.mxu1 %v7597_v42 }
 0x866   : > { %v10381_v48 = vpop.f32.mrb[116].mxu1 }
 0x867   : > { %v14400_v19 = vadd.f32 %v10381_v48, %v14273_v28  ;;  %v6974_v54 = vpop.f32.mrb[117].mxu1  ;;  %v7630_v28 = vrot.slane %v14202_v16, 1 }
 0x868   : > { %v10382_v39 = vpop.f32.mrb[118].mxu1 }
 0x869   : > { %v6977_v11 = vpop.f32.mrb[119].mxu1  ;;  %v7631_v40 = vsel %vm914_vm1, %v7628_v31, %v7630_v28  ;;  %v7633_v54 = vsel %vm914_vm1, %v7630_v28, %v7632_v61 }
 0x86a   : > { %v14404_v34 = vadd.f32 %v6977_v11, %v14268_v37  ;;  %v7629_v37 = vsel %vm914_vm1, %v7626_v2, %v7628_v31 }
 0x86b   : > { %8108 = vmatmul.mubr.bf16.gmra.mrb[224].mxu1 %v11446_v56 }
 0x86c   : > { %10411 = vmatprep.mubr.bf16.mxu1 %v7627_v30 }
 0x86e   : > { %v10385_v33 = vpop.f32.mrb[120].mxu1 }
 0x86f   : > { %v6990_v55 = vpop.f32.mrb[121].mxu1  ;;  %v7642_v33 = vrot.slane %v14257_v26, 1 }
 0x870   : > { %v14410_v41 = vadd.f32 %v6990_v55, %v14281_v57  ;;  %v10386_v45 = vpop.f32.mrb[122].mxu1 }
 0x871   : > { %v14413_v62 = vadd.f32 %v10386_v45, %v14295_v18  ;;  %v6993_v15 = vpop.f32.mrb[123].mxu1  ;;  %v7634_v18 = vrot.slane %v14222_v24, 1  ;;  %v7644_v45 = vrot.slane %v14265_v27, 1 }
 0x872   : > { %15012 = vst [vmem:[#allocation76_spill] sm:$0xff] %v14410_v41  ;;  %v14417_v60 = vadd.f32 %v6993_v15, %v14287_v29 }
 0x873   : > { %15013 = vst [vmem:[#allocation45_spill] sm:$0xff] %v14413_v62  ;;  %10412 = vmatmul.mubr.bf16.vlgmr.msra.gmra.mrb[228].mxu1 %v7629_v37  ;;  %v7635_v12 = vsel %vm914_vm1, %v7632_v61, %v7634_v18  ;;  %v7645_v26 = vsel %vm914_vm1, %v7642_v33, %v7644_v45 }
 0x874   : > { %15014 = vst [vmem:[#allocation46_spill] sm:$0xff] %v14417_v60  ;;  %10415 = vmatprep.mubr.bf16.mxu1 %v7631_v40 }
 0x876   : > { %v10389_v16 = vpop.f32.mrb[124].mxu1 }
 0x877   : > { %v14422_v57 = vadd.f32 %v10389_v16, %v14308_v59  ;;  %v7006_v47 = vpop.f32.mrb[125].mxu1  ;;  %v7636_v59 = vrot.slane %v14230_v9, 1  ;;  %v7640_v9 = vrot.slane %v14249_v21, 1  ;;  %v7646_v21 = vrot.slane %v14276_v0, 1 }
 0x878   : > { %v14426_v42 = vadd.f32 %v7006_v47, %v14300_v50  ;;  %v10390_v44 = vpop.f32.mrb[126].mxu1  ;;  %v7638_v50 = vrot.slane %v14238_v7, 1  ;;  %v15020_v47 = vld [vmem:[#allocation43_spill] sm:$0xff] }
 0x879   : > { %15015 = vst [vmem:[#allocation77_spill] sm:$0xff] %v14422_v57  ;;  %v14429_v29 = vadd.f32 %v10390_v44, %v14312_v1  ;;  %v7009_v48 = vpop.f32.mrb[127].mxu1  ;;  %v7637_v1 = vsel %vm914_vm1, %v7634_v18, %v7636_v59  ;;  %v7647_v16 = vsel %vm914_vm1, %v7644_v45, %v7646_v21  ;;  %v7648_v18 = vrot.slane %v15020_v47, 1 }
 0x87a   : > { %15016 = vst [vmem:[#allocation47_spill] sm:$0xff] %v14426_v42  ;;  %v7639_v30 = vsel %vm914_vm1, %v7636_v59, %v7638_v50  ;;  %v7641_v28 = vsel %vm914_vm1, %v7638_v50, %v7640_v9 }
 0x87b   : > { %15017 = vst [vmem:[#allocation48_spill] sm:$0xff] %v14429_v29  ;;  %10416 = vmatmul.mubr.bf16.gmra.mrb[232].mxu1 %v7633_v54  ;;  %v15021_v54 = vld [vmem:[#allocation44_spill] sm:$0xff]  ;;  %v7649_v0 = vsel %vm914_vm1, %v7646_v21, %v7648_v18  ;;  %v15026_v21 = vld [vmem:[#allocation65_spill] sm:$0xff] }
 0x87c   : > { %10419 = vmatprep.mubr.bf16.mxu1 %v7635_v12  ;;  %v7650_v27 = vrot.slane %v15021_v54, 1 }
 0x87e   : > { %v10393_v2 = vpop.f32.mrb[128].mxu1 }
 0x87f   : > { %v14435_v39 = vadd.f32 %v10393_v2, %v14321_v4  ;;  %v7022_v24 = vpop.f32.mrb[129].mxu1  ;;  %v7651_v2 = vsel %vm914_vm1, %v7648_v18, %v7650_v27  ;;  %v15027_v18 = vld [vmem:[#allocation68_spill] sm:$0xff] }
 0x880   : > { %v10394_v11 = vpop.f32.mrb[130].mxu1  ;;  %v15022_v24 = vld [vmem:[#allocation75_spill] sm:$0xff] }
 0x881   : > { %15018 = vst [vmem:[#allocation49_spill] sm:$0xff] %v14435_v39  ;;  %v7025_v56 = vpop.f32.mrb[131].mxu1  ;;  %v7652_v50 = vrot.slane %v15022_v24, 1 }
 0x882   : > { %v14440_v13 = vadd.f32 %v7025_v56, %v14317_v38  ;;  %v7643_v38 = vsel %vm914_vm1, %v7640_v9, %v7642_v33 }
 0x883   : > { %10420 = vmatmul.mubr.bf16.gmra.mrb[236].mxu1 %v7637_v1  ;;  %v7653_v9 = vsel %vm914_vm1, %v7650_v27, %v7652_v50 }
 0x884   : > { %15019 = vst [vmem:[#allocation50_spill] sm:$0xff] %v14440_v13  ;;  %10423 = vmatprep.mubr.bf16.mxu1 %v7639_v30 }
 0x886   : > { %v14444_v31 = vpop.f32.mrb[132].mxu1 }
 0x887   : > { %v7927_v4 = vpop.f32.mrb[133].mxu1 }
 0x888   : > { %v14447_v55 = vpop.f32.mrb[134].mxu1  ;;  %v15023_v4 = vld [vmem:[#allocation37_spill] sm:$0xff] }
 0x889   : > { %v7930_v7 = vpop.f32.mrb[135].mxu1  ;;  %v15024_v33 = vrot.slane %v15023_v4, 1  ;;  %v15032_v4 = vld [vmem:[#allocation41_spill] sm:$0xff] }
 0x88b   : > { %10424 = vmatmul.mubr.bf16.gmra.mrb[240].mxu1 %v7641_v28  ;;  %v7655_v7 = vsel %vm914_vm1, %v7652_v50, %v15024_v33 }
 0x88c   : > { %10427 = vmatprep.mubr.bf16.mxu1 %v7643_v38 }
 0x88e   : > { %v7933_v15 = vpop.f32.mrb[136].mxu1 }
 0x88f   : > { %v7935_v37 = vpop.f32.mrb[137].mxu1 }
 0x890   : > { %v14453_v40 = vpop.f32.mrb[138].mxu1  ;;  %v15025_v37 = vld [vmem:[#allocation38_spill] sm:$0xff] }
 0x891   : > { %v7938_v61 = vpop.f32.mrb[139].mxu1 }
 0x893   : > { %10428 = vmatmul.mubr.bf16.gmra.mrb[244].mxu1 %v7645_v26 }
 0x894   : > { %10431 = vmatprep.mubr.bf16.mxu1 %v7647_v16 }
 0x896   : > { %v14458_v44 = vpop.f32.mrb[140].mxu1 }
 0x897   : > { %v7943_v48 = vpop.f32.mrb[141].mxu1 }
 0x898   : > { %v7944_v12 = vpop.f32.mrb[142].mxu1  ;;  %v15028_v48 = vld [vmem:[#allocation39_spill] sm:$0xff] }
 0x899   : > { %v7946_v59 = vpop.f32.mrb[143].mxu1 }
 0x89b   : > { %10432 = vmatmul.mubr.bf16.gmra.mrb[248].mxu1 %v7649_v0  ;;  %v15029_v0 = vld [vmem:[#allocation40_spill] sm:$0xff] }
 0x89c   : > { %10435 = vmatprep.mubr.bf16.mxu1 %v7651_v2  ;;  %v15030_v2 = vld [vmem:[#allocation69_spill] sm:$0xff] }
 0x89e   : > { %v14464_v11 = vpop.f32.mrb[144].mxu1 }
 0x89f   : > { %v7951_v56 = vpop.f32.mrb[145].mxu1 }
 0x8a0   : > { %v14466_v1 = vpop.f32.mrb[146].mxu1 }
 0x8a1   : > { %v7954_v30 = vpop.f32.mrb[147].mxu1 }
 0x8a3   : > { %10436 = vmatmul.mubr.bf16.gmra.mrb[252].mxu1 %v7653_v9  ;;  %v15031_v9 = vld [vmem:[#allocation72_spill] sm:$0xff] }
 0x8a4   : > { %10439 = vmatprep.mubr.bf16.mxu1 %v7655_v7 }
 0x8a6   : > { %v7957_v28 = vpop.f32.mrb[148].mxu1 }
 0x8a7   : > { %v7959_v38 = vpop.f32.mrb[149].mxu1 }
 0x8a8   : > { %v14472_v45 = vpop.f32.mrb[150].mxu1 }
 0x8a9   : > { %v7962_v15 = vpop.f32.mrb[151].mxu1 }
 0x8aa   : > { %v15033_v15 = vld [vmem:[#allocation42_spill] sm:$0xff] }
 0x8ab   : > { %10440 = vmatmul.mubr.bf16.gmra.mrb[0].mxu1 %v15025_v37 }
 0x8ac   : > { %10443 = vmatprep.mubr.bf16.mxu1 %v15026_v21 }
 0x8ae   : > { %v14476_v61 = vpop.f32.mrb[152].mxu1 }
 0x8af   : > { %v7967_v26 = vpop.f32.mrb[153].mxu1 }
 0x8b0   : > { %v7968_v16 = vpop.f32.mrb[154].mxu1 }
 0x8b1   : > { %v7970_v47 = vpop.f32.mrb[155].mxu1 }
 0x8b3   : > { %10444 = vmatmul.mubr.bf16.gmra.mrb[4].mxu1 %v15027_v18 }
 0x8b4   : > { %10447 = vmatprep.mubr.bf16.mxu1 %v15028_v48 }
 0x8b6   : > { %v14480_v54 = vpop.f32.mrb[156].mxu1 }
 0x8b7   : > { %v7975_v27 = vpop.f32.mrb[157].mxu1 }
 0x8b8   : > { %v14482_v12 = vpop.f32.mrb[158].mxu1 }
 0x8b9   : > { %v7978_v59 = vpop.f32.mrb[159].mxu1 }
 0x8bb   : > { %10448 = vmatmul.mubr.bf16.gmra.mrb[8].mxu1 %v15029_v0 }
 0x8bc   : > { %10451 = vmatprep.mubr.bf16.mxu1 %v15030_v2 }
 0x8be   : > { %v7981_v24 = vpop.f32.mrb[160].mxu1 }
 0x8bf   : > { %v7983_v50 = vpop.f32.mrb[161].mxu1 }
 0x8c0   : > { %v14486_v56 = vpop.f32.mrb[162].mxu1 }
 0x8c1   : > { %v7986_v30 = vpop.f32.mrb[163].mxu1 }
 0x8c3   : > { %10452 = vmatmul.mubr.bf16.gmra.mrb[12].mxu1 %v15031_v9 }
 0x8c4   : > { %10455 = vmatprep.mubr.bf16.mxu1 %v15032_v4 }
 0x8c6   : > { %v14490_v33 = vpop.f32.mrb[164].mxu1 }
 0x8c7   : > { %v7991_v7 = vpop.f32.mrb[165].mxu1 }
 0x8c8   : > { %v7992_v28 = vpop.f32.mrb[166].mxu1 }
 0x8c9   : > { %v7994_v38 = vpop.f32.mrb[167].mxu1 }
 0x8cb   : > { %10456 = vmatmul.mubr.bf16.gmra.mrb[16].mxu1 %v15033_v15 }
 0x8ce   : > { %v14493_v37 = vpop.f32.mrb[168].mxu1 }
 0x8cf   : > { %v7999_v21 = vpop.f32.mrb[169].mxu1 }
 0x8d0   : > { %v14495_v26 = vpop.f32.mrb[170].mxu1 }
 0x8d1   : > { %v8002_v16 = vpop.f32.mrb[171].mxu1 }
 0x8d6   : > { %v8005_v47 = vpop.f32.mrb[172].mxu1 }
 0x8d7   : > { %v8007_v18 = vpop.f32.mrb[173].mxu1 }
 0x8d8   : > { %v14497_v48 = vpop.f32.mrb[174].mxu1 }
 0x8d9   : > { %v8010_v27 = vpop.f32.mrb[175].mxu1 }
 0x8de   : > { %v14499_v59 = vpop.f32.mrb[176].mxu1 }
 0x8df   : > { %v8015_v0 = vpop.f32.mrb[177].mxu1 }
 0x8e0   : > { %v8016_v2 = vpop.f32.mrb[178].mxu1 }
 0x8e1   : > { %v8018_v24 = vpop.f32.mrb[179].mxu1 }
 0x8e6   : > { %v14501_v50 = vpop.f32.mrb[180].mxu1 }
 0x8e7   : > { %v8023_v30 = vpop.f32.mrb[181].mxu1 }
 0x8e8   : > { %v14503_v9 = vpop.f32.mrb[182].mxu1 }
 0x8e9   : > { %v8026_v4 = vpop.f32.mrb[183].mxu1 }
 0x8ee   : > { %v8029_v7 = vpop.f32.mrb[184].mxu1 }
 0x8ef   : > { %v8031_v28 = vpop.f32.mrb[185].mxu1 }
 0x8f0   : > { %v14505_v38 = vpop.f32.mrb[186].mxu1 }
 0x8f1   : > { %v8034_v15 = vpop.f32.mrb[187].mxu1 }
 0x8f6   : > { %v14507_v21 = vpop.f32.mrb[188].mxu1 }
 0x8f7   : > { %v8039_v16 = vpop.f32.mrb[189].mxu1 }
 0x8f8   : > { %v8040_v47 = vpop.f32.mrb[190].mxu1 }
 0x8f9   : > { %v8042_v18 = vpop.f32.mrb[191].mxu1 }
 0x8fe   : > { %v14509_v27 = vpop.f32.mrb[192].mxu1 }
 0x8ff   : > { %v8047_v0 = vpop.f32.mrb[193].mxu1 }
 0x900   : > { %v14511_v2 = vpop.f32.mrb[194].mxu1 }
 0x901   : > { %v8050_v24 = vpop.f32.mrb[195].mxu1 }
 0x906   : > { %v8053_v30 = vpop.f32.mrb[196].mxu1 }
 0x907   : > { %v8055_v13 = vpop.f32.mrb[197].mxu1 }
 0x908   : > { %v14513_v39 = vpop.f32.mrb[198].mxu1 }
 0x909   : > { %v8058_v4 = vpop.f32.mrb[199].mxu1 }
 0x90e   : > { %v14515_v7 = vpop.f32.mrb[200].mxu1 }
 0x90f   : > { %v8063_v28 = vpop.f32.mrb[201].mxu1 }
 0x910   : > { %v8064_v15 = vpop.f32.mrb[202].mxu1 }
 0x911   : > { %v8066_v29 = vpop.f32.mrb[203].mxu1 }
 0x916   : > { %v14517_v42 = vpop.f32.mrb[204].mxu1 }
 0x917   : > { %15034 = vst [vmem:[#allocation51_spill] sm:$0xff] %v14517_v42  ;;  %v8071_v16 = vpop.f32.mrb[205].mxu1 }
 0x918   : > { %v14519_v47 = vpop.f32.mrb[206].mxu1 }
 0x919   : > { %15035 = vst [vmem:[#allocation52_spill] sm:$0xff] %v14519_v47  ;;  %v8074_v18 = vpop.f32.mrb[207].mxu1 }
 0x91e   : > { %v8077_v0 = vpop.f32.mrb[208].mxu1 }
 0x91f   : > { %v8079_v57 = vpop.f32.mrb[209].mxu1 }
 0x920   : > { %v14521_v60 = vpop.f32.mrb[210].mxu1 }
 0x921   : > { %15036 = vst [vmem:[#allocation53_spill] sm:$0xff] %v14521_v60  ;;  %v8082_v24 = vpop.f32.mrb[211].mxu1 }
 0x926   : > { %v14523_v13 = vpop.f32.mrb[212].mxu1 }
 0x927   : > { %15037 = vst [vmem:[#allocation54_spill] sm:$0xff] %v14523_v13  ;;  %v8087_v30 = vpop.f32.mrb[213].mxu1 }
 0x928   : > { %v8088_v4 = vpop.f32.mrb[214].mxu1 }
 0x929   : > { %v8090_v62 = vpop.f32.mrb[215].mxu1 }
 0x92e   : > { %v14525_v41 = vpop.f32.mrb[216].mxu1 }
 0x92f   : > { %15038 = vst [vmem:[#allocation56_spill] sm:$0xff] %v14525_v41  ;;  %v8095_v28 = vpop.f32.mrb[217].mxu1  ;;  %v14534_v41 = vld [vmem:[#allocation13] ss:$0 sm:$0xff] }
 0x930   : > { %v14527_v29 = vpop.f32.mrb[218].mxu1 }
 0x931   : > { %v8098_v15 = vpop.f32.mrb[219].mxu1 }
 0x936   : > { %v8101_v16 = vpop.f32.mrb[220].mxu1 }
 0x937   : > { %v8103_v42 = vpop.f32.mrb[221].mxu1 }
 0x938   : > { %v14529_v47 = vpop.f32.mrb[222].mxu1 }
 0x939   : > { %v8106_v18 = vpop.f32.mrb[223].mxu1 }
 0x93a   : > { %v14539_v18 = vld [vmem:[#allocation14] ss:$0 sm:$0xff] }
 0x93e   : > { %v14531_v57 = vpop.f32.mrb[224].mxu1 }
 0x93f   : > { %v8111_v0 = vpop.f32.mrb[225].mxu1 }
 0x940   : > { %v8112_v24 = vpop.f32.mrb[226].mxu1 }
 0x941   : > { %v8114_v60 = vpop.f32.mrb[227].mxu1 }
 0x946   : > { %v10413_v13 = vpop.f32.mrb[228].mxu1 }
 0x947   : > { %v8150_v30 = vpop.f32.mrb[229].mxu1 }
 0x948   : > { %v8151_v62 = vadd.f32 %v8150_v30, %v14444_v31  ;;  %v10414_v4 = vpop.f32.mrb[230].mxu1 }
 0x949   : > { %v8162_v28 = vadd.f32 %v10414_v4, %v14453_v40  ;;  %v8153_v15 = vpop.f32.mrb[231].mxu1 }
 0x94a   : > { %v8341_v42 = vadd.f32 %v8151_v62, %v14325_v17  ;;  %v8154_v16 = vadd.f32 %v8153_v15, %v14447_v55 }
 0x94b   : > { %v8344_v0 = vadd.f32 %v8162_v28, %v14328_v6 }
 0x94c   : > { %v8396_v60 = vmul.f32 %v14534_v41, %v8341_v42  ;;  %v8342_v13 = vadd.f32 %v8154_v16, %v14331_v52 }
 0x94d   : > { %v8399_v17 = vmul.f32 %v14534_v41, %v8344_v0 }
 0x94e   : > { %v8451_v31 = vadd.f32 %v14539_v18, %v8396_v60  ;;  %v8397_v24 = vmul.f32 %v14534_v41, %v8342_v13  ;;  %v10417_v30 = vpop.f32.mrb[232].mxu1 }
 0x94f   : > { %v8175_v40 = vadd.f32 %v10417_v30, %v14464_v11  ;;  %v8166_v4 = vpop.f32.mrb[233].mxu1  ;;  %v8454_v0 = vadd.f32 %v14539_v18, %v8399_v17 }
 0x950   : > { %v8452_v55 = vadd.f32 %v14539_v18, %v8397_v24  ;;  %v8167_v62 = vadd.f32 %v8166_v4, %v14458_v44  ;;  %v10418_v6 = vpop.f32.mrb[234].mxu1  ;;  %v8499_v42 = vmax.f32 %v8451_v31, 0.0 }
 0x951   : > { %v8347_v28 = vadd.f32 %v8175_v40, %v14335_v22  ;;  %v8178_v52 = vadd.f32 %v10418_v6, %v14466_v1  ;;  %v8169_v15 = vpop.f32.mrb[235].mxu1  ;;  %v8502_v4 = vmax.f32 %v8454_v0, 0.0 }
 0x952   : > { %v8500_v16 = vmax.f32 %v8452_v55, 0.0  ;;  %v8345_v60 = vadd.f32 %v8167_v62, %v14338_v49 }
 0x953   : > { %v8402_v11 = vmul.f32 %v14534_v41, %v8347_v28  ;;  %v8348_v13 = vadd.f32 %v8178_v52, %v14341_v63 }
 0x954   : > { %v9576_v24 = vpack.c.bf16 %v8500_v16, %v8499_v42  ;;  %v8400_v30 = vmul.f32 %v14534_v41, %v8345_v60 }
 0x955   : > { %v8457_v44 = vadd.f32 %v14539_v18, %v8402_v11  ;;  %v8403_v22 = vmul.f32 %v14534_v41, %v8348_v13 }
 0x956   : > { %9577 = vst [vmem:[%s12136_s17] sm:$0xff] %v9576_v24   ;;  %v8455_v1 = vadd.f32 %v14539_v18, %v8400_v30  ;;  %v10421_v31 = vpop.f32.mrb[236].mxu1 }
 0x957   : > { %v8458_v49 = vadd.f32 %v14539_v18, %v8403_v22  ;;  %v8191_v40 = vadd.f32 %v10421_v31, %v14476_v61  ;;  %v8182_v63 = vpop.f32.mrb[237].mxu1  ;;  %v8505_v62 = vmax.f32 %v8457_v44, 0.0 }
 0x958   : > { %v8503_v17 = vmax.f32 %v8455_v1, 0.0  ;;  %v10422_v55 = vpop.f32.mrb[238].mxu1 }
 0x959   : > { %v8506_v6 = vmax.f32 %v8458_v49, 0.0  ;;  %v8351_v28 = vadd.f32 %v8191_v40, %v14345_v51  ;;  %v8185_v52 = vpop.f32.mrb[239].mxu1 }
 0x95a   : > { %v9581_v15 = vpack.c.bf16 %v8503_v17, %v8502_v4  ;;  %v8186_v42 = vadd.f32 %v8185_v52, %v14472_v45 }
 0x95b   : > { %v9586_v16 = vpack.c.bf16 %v8506_v6, %v8505_v62  ;;  %v8406_v60 = vmul.f32 %v14534_v41, %v8351_v28 }
 0x95c   : > { %9679 = vst [vmem:[%s12136_s17 + $0x8] sm:$0xff] %v9581_v15   ;;  %v8350_v11 = vadd.f32 %v8186_v42, %v14348_v3 }
 0x95d   : > { %9680 = vst [vmem:[%s12136_s17 + $0x10] sm:$0xff] %v9586_v16   ;;  %v8461_v61 = vadd.f32 %v14539_v18, %v8406_v60 }
 0x95e   : > { %v8405_v13 = vmul.f32 %v14534_v41, %v8350_v11  ;;  %v10425_v0 = vpop.f32.mrb[240].mxu1 }
 0x95f   : > { %v8198_v24 = vpop.f32.mrb[241].mxu1  ;;  %v8509_v1 = vmax.f32 %v8461_v61, 0.0 }
 0x960   : > { %v8460_v51 = vadd.f32 %v14539_v18, %v8405_v13  ;;  %v8199_v30 = vadd.f32 %v8198_v24, %v14480_v54  ;;  %v10426_v44 = vpop.f32.mrb[242].mxu1 }
 0x961   : > { %v8210_v45 = vadd.f32 %v10426_v44, %v14486_v56  ;;  %v8201_v22 = vpop.f32.mrb[243].mxu1 }
 0x962   : > { %v8508_v31 = vmax.f32 %v8460_v51, 0.0  ;;  %v8353_v3 = vadd.f32 %v8199_v30, %v14352_v8  ;;  %v8202_v49 = vadd.f32 %v8201_v22, %v14482_v12 }
 0x963   : > { %v8356_v40 = vadd.f32 %v8210_v45, %v14355_v53 }
 0x964   : > { %v9591_v63 = vpack.c.bf16 %v8509_v1, %v8508_v31  ;;  %v8408_v4 = vmul.f32 %v14534_v41, %v8353_v3  ;;  %v8354_v17 = vadd.f32 %v8202_v49, %v14358_v35 }
 0x965   : > { %v8411_v8 = vmul.f32 %v14534_v41, %v8356_v40 }
 0x966   : > { %9681 = vst [vmem:[%s12136_s17 + $0x18] sm:$0xff] %v9591_v63   ;;  %v8463_v54 = vadd.f32 %v14539_v18, %v8408_v4  ;;  %v8409_v55 = vmul.f32 %v14534_v41, %v8354_v17  ;;  %v10429_v56 = vpop.f32.mrb[244].mxu1 }
 0x967   : > { %v8223_v62 = vadd.f32 %v10429_v56, %v14493_v37  ;;  %v8214_v6 = vpop.f32.mrb[245].mxu1  ;;  %v8466_v61 = vadd.f32 %v14539_v18, %v8411_v8 }
 0x968   : > { %v8464_v12 = vadd.f32 %v14539_v18, %v8409_v55  ;;  %v8215_v53 = vadd.f32 %v8214_v6, %v14490_v33  ;;  %v10430_v28 = vpop.f32.mrb[246].mxu1  ;;  %v8511_v42 = vmax.f32 %v8463_v54, 0.0 }
 0x969   : > { %v8359_v52 = vadd.f32 %v8223_v62, %v14362_v36  ;;  %v8226_v35 = vadd.f32 %v10430_v28, %v14495_v26  ;;  %v8217_v15 = vpop.f32.mrb[247].mxu1  ;;  %v8514_v30 = vmax.f32 %v8466_v61, 0.0 }
 0x96a   : > { %v8512_v16 = vmax.f32 %v8464_v12, 0.0  ;;  %v8357_v60 = vadd.f32 %v8215_v53, %v14365_v43 }
 0x96b   : > { %v8414_v37 = vmul.f32 %v14534_v41, %v8359_v52  ;;  %v8360_v11 = vadd.f32 %v8226_v35, %v14368_v25 }
 0x96c   : > { %v9596_v13 = vpack.c.bf16 %v8512_v16, %v8511_v42  ;;  %v8412_v0 = vmul.f32 %v14534_v41, %v8357_v60 }
 0x96d   : > { %v8469_v33 = vadd.f32 %v14539_v18, %v8414_v37  ;;  %v8415_v36 = vmul.f32 %v14534_v41, %v8360_v11 }
 0x96e   : > { %9682 = vst [vmem:[%s12136_s17 + $0x20] sm:$0xff] %v9596_v13   ;;  %v8467_v26 = vadd.f32 %v14539_v18, %v8412_v0  ;;  %v10433_v24 = vpop.f32.mrb[248].mxu1 }
 0x96f   : > { %v8470_v43 = vadd.f32 %v14539_v18, %v8415_v36  ;;  %v8239_v51 = vadd.f32 %v10433_v24, %v14499_v59  ;;  %v8230_v25 = vpop.f32.mrb[249].mxu1  ;;  %v8517_v22 = vmax.f32 %v8469_v33, 0.0 }
 0x970   : > { %v8515_v44 = vmax.f32 %v8467_v26, 0.0  ;;  %v10434_v45 = vpop.f32.mrb[250].mxu1 }
 0x971   : > { %v8518_v1 = vmax.f32 %v8470_v43, 0.0  ;;  %v8363_v31 = vadd.f32 %v8239_v51, %v14372_v32  ;;  %v8233_v3 = vpop.f32.mrb[251].mxu1 }
 0x972   : > { %v9601_v49 = vpack.c.bf16 %v8515_v44, %v8514_v30  ;;  %v8234_v40 = vadd.f32 %v8233_v3, %v14497_v48 }
 0x973   : > { %v9606_v63 = vpack.c.bf16 %v8518_v1, %v8517_v22  ;;  %v8418_v4 = vmul.f32 %v14534_v41, %v8363_v31 }
 0x974   : > { %9683 = vst [vmem:[%s12136_s17 + $0x28] sm:$0xff] %v9601_v49   ;;  %v8362_v17 = vadd.f32 %v8234_v40, %v14375_v20 }
 0x975   : > { %9684 = vst [vmem:[%s12136_s17 + $0x30] sm:$0xff] %v9606_v63   ;;  %v8473_v59 = vadd.f32 %v14539_v18, %v8418_v4 }
 0x976   : > { %v8417_v54 = vmul.f32 %v14534_v41, %v8362_v17  ;;  %v10437_v55 = vpop.f32.mrb[252].mxu1 }
 0x977   : > { %v8246_v56 = vpop.f32.mrb[253].mxu1  ;;  %v8521_v12 = vmax.f32 %v8473_v59, 0.0 }
 0x978   : > { %v8472_v32 = vadd.f32 %v14539_v18, %v8417_v54  ;;  %v8247_v62 = vadd.f32 %v8246_v56, %v14501_v50  ;;  %v10438_v6 = vpop.f32.mrb[254].mxu1 }
 0x979   : > { %v8258_v48 = vadd.f32 %v10438_v6, %v14505_v38  ;;  %v8249_v8 = vpop.f32.mrb[255].mxu1 }
 0x97a   : > { %v8520_v53 = vmax.f32 %v8472_v32, 0.0  ;;  %v8365_v20 = vadd.f32 %v8247_v62, %v14379_v23  ;;  %v8250_v28 = vadd.f32 %v8249_v8, %v14503_v9  ;;  %v15039_v32 = vld [vmem:[#allocation51_spill] sm:$0xff] }
 0x97b   : > { %v8368_v52 = vadd.f32 %v8258_v48, %v14382_v58 }
 0x97c   : > { %v9611_v35 = vpack.c.bf16 %v8521_v12, %v8520_v53  ;;  %v8420_v15 = vmul.f32 %v14534_v41, %v8365_v20  ;;  %v8366_v42 = vadd.f32 %v8250_v28, %v14385_v46  ;;  %v15041_v20 = vld [vmem:[#allocation76_spill] sm:$0xff] }
 0x97d   : > { %v8423_v23 = vmul.f32 %v14534_v41, %v8368_v52  ;;  %v15042_v28 = vld [vmem:[#allocation52_spill] sm:$0xff] }
 0x97e   : > { %9685 = vst [vmem:[%s12136_s17 + $0x38] sm:$0xff] %v9611_v35   ;;  %v8475_v50 = vadd.f32 %v14539_v18, %v8420_v15  ;;  %v8421_v16 = vmul.f32 %v14534_v41, %v8366_v42  ;;  %v10441_v38 = vpop.f32.mrb[0].mxu1  ;;  %v15043_v35 = vld [vmem:[#allocation45_spill] sm:$0xff] }
 0x97f   : > { %v8271_v60 = vadd.f32 %v10441_v38, %v14509_v27  ;;  %v8262_v37 = vpop.f32.mrb[1].mxu1  ;;  %v8478_v24 = vadd.f32 %v14539_v18, %v8423_v23 }
 0x980   : > { %v8476_v9 = vadd.f32 %v14539_v18, %v8421_v16  ;;  %v8263_v58 = vadd.f32 %v8262_v37, %v14507_v21  ;;  %v10442_v11 = vpop.f32.mrb[2].mxu1  ;;  %v8523_v0 = vmax.f32 %v8475_v50, 0.0  ;;  %v15044_v16 = vld [vmem:[#allocation46_spill] sm:$0xff] }
 0x981   : > { %v8371_v61 = vadd.f32 %v8271_v60, %v14389_v14  ;;  %v8274_v46 = vadd.f32 %v10442_v11, %v14511_v2  ;;  %v8265_v13 = vpop.f32.mrb[3].mxu1  ;;  %v8526_v44 = vmax.f32 %v8478_v24, 0.0 }
 0x982   : > { %v8524_v33 = vmax.f32 %v8476_v9, 0.0  ;;  %v8369_v36 = vadd.f32 %v8263_v58, %v14392_v10  ;;  %v15045_v9 = vld [vmem:[#allocation56_spill] sm:$0xff]  ;;  %v15046_v13 = vld [vmem:[#allocation54_spill] sm:$0xff] }
 0x983   : > { %v8426_v27 = vmul.f32 %v14534_v41, %v8371_v61  ;;  %v8372_v26 = vadd.f32 %v8274_v46, %v14395_v5 }
 0x984   : > { %v9616_v43 = vpack.c.bf16 %v8524_v33, %v8523_v0  ;;  %v8424_v51 = vmul.f32 %v14534_v41, %v8369_v36  ;;  %v15047_v36 = vld [vmem:[#allocation77_spill] sm:$0xff] }
 0x985   : > { %v8481_v21 = vadd.f32 %v14539_v18, %v8426_v27  ;;  %v8427_v14 = vmul.f32 %v14534_v41, %v8372_v26 }
 0x986   : > { %9686 = vst [vmem:[%s12136_s17 + $0x40] sm:$0xff] %v9616_v43   ;;  %v8479_v2 = vadd.f32 %v14539_v18, %v8424_v51  ;;  %v10445_v25 = vpop.f32.mrb[4].mxu1 }
 0x987   : > { %v8482_v10 = vadd.f32 %v14539_v18, %v8427_v14  ;;  %v8287_v30 = vadd.f32 %v10445_v25, %v14515_v7  ;;  %v8278_v5 = vpop.f32.mrb[5].mxu1  ;;  %v8529_v1 = vmax.f32 %v8481_v21, 0.0  ;;  %v15048_v21 = vld [vmem:[#allocation47_spill] sm:$0xff]  ;;  %v15049_v25 = vld [vmem:[#allocation48_spill] sm:$0xff] }
 0x988   : > { %v8527_v45 = vmax.f32 %v8479_v2, 0.0  ;;  %v10446_v22 = vpop.f32.mrb[6].mxu1 }
 0x989   : > { %v8530_v31 = vmax.f32 %v8482_v10, 0.0  ;;  %v8375_v3 = vadd.f32 %v8287_v30, %v14400_v19  ;;  %v8281_v49 = vpop.f32.mrb[7].mxu1 }
 0x98a   : > { %v9621_v40 = vpack.c.bf16 %v8527_v45, %v8526_v44  ;;  %v8282_v63 = vadd.f32 %v8281_v49, %v14513_v39  ;;  %v15040_v39 = vld [vmem:[#allocation53_spill] sm:$0xff] }
 0x98b   : > { %v9626_v4 = vpack.c.bf16 %v8530_v31, %v8529_v1  ;;  %v8430_v17 = vmul.f32 %v14534_v41, %v8375_v3 }
 0x98c   : > { %9687 = vst [vmem:[%s12136_s17 + $0x48] sm:$0xff] %v9621_v40   ;;  %v8374_v59 = vadd.f32 %v8282_v63, %v14404_v34 }
 0x98d   : > { %9688 = vst [vmem:[%s12136_s17 + $0x50] sm:$0xff] %v9626_v4   ;;  %v8485_v7 = vadd.f32 %v14539_v18, %v8430_v17 }
 0x98e   : > { %v8429_v54 = vmul.f32 %v14534_v41, %v8374_v59  ;;  %v10449_v55 = vpop.f32.mrb[8].mxu1 }
 0x98f   : > { %v8294_v56 = vpop.f32.mrb[9].mxu1  ;;  %v8533_v12 = vmax.f32 %v8485_v7, 0.0  ;;  %v15050_v7 = vld [vmem:[#allocation49_spill] sm:$0xff] }
 0x990   : > { %v8484_v19 = vadd.f32 %v14539_v18, %v8429_v54  ;;  %v8295_v62 = vadd.f32 %v8294_v56, %v15039_v32  ;;  %v10450_v6 = vpop.f32.mrb[10].mxu1 }
 0x991   : > { %v8306_v48 = vadd.f32 %v10450_v6, %v15040_v39  ;;  %v8297_v8 = vpop.f32.mrb[11].mxu1 }
 0x992   : > { %v8532_v53 = vmax.f32 %v8484_v19, 0.0  ;;  %v8377_v34 = vadd.f32 %v8295_v62, %v15041_v20  ;;  %v8298_v52 = vadd.f32 %v8297_v8, %v15042_v28 }
 0x993   : > { %v8380_v15 = vadd.f32 %v8306_v48, %v15043_v35 }
 0x994   : > { %v9631_v42 = vpack.c.bf16 %v8533_v12, %v8532_v53  ;;  %v8432_v50 = vmul.f32 %v14534_v41, %v8377_v34  ;;  %v8378_v38 = vadd.f32 %v8298_v52, %v15044_v16 }
 0x995   : > { %v8435_v61 = vmul.f32 %v14534_v41, %v8380_v15 }
 0x996   : > { %9689 = vst [vmem:[%s12136_s17 + $0x58] sm:$0xff] %v9631_v42   ;;  %v8487_v60 = vadd.f32 %v14539_v18, %v8432_v50  ;;  %v8433_v37 = vmul.f32 %v14534_v41, %v8378_v38  ;;  %v10453_v23 = vpop.f32.mrb[12].mxu1 }
 0x997   : > { %v8319_v58 = vadd.f32 %v10453_v23, %v15045_v9  ;;  %v8310_v11 = vpop.f32.mrb[13].mxu1  ;;  %v8490_v30 = vadd.f32 %v14539_v18, %v8435_v61 }
 0x998   : > { %v8488_v46 = vadd.f32 %v14539_v18, %v8433_v37  ;;  %v8311_v0 = vadd.f32 %v8310_v11, %v15046_v13  ;;  %v10454_v33 = vpop.f32.mrb[14].mxu1  ;;  %v8535_v43 = vmax.f32 %v8487_v60, 0.0 }
 0x999   : > { %v8383_v27 = vadd.f32 %v8319_v58, %v15047_v36  ;;  %v8322_v26 = vadd.f32 %v10454_v33, %v14527_v29  ;;  %v8313_v24 = vpop.f32.mrb[15].mxu1  ;;  %v8538_v40 = vmax.f32 %v8490_v30, 0.0 }
 0x99a   : > { %v8536_v51 = vmax.f32 %v8488_v46, 0.0  ;;  %v8381_v14 = vadd.f32 %v8311_v0, %v15048_v21 }
 0x99b   : > { %v8438_v2 = vmul.f32 %v14534_v41, %v8383_v27  ;;  %v8384_v10 = vadd.f32 %v8322_v26, %v15049_v25 }
 0x99c   : > { %v9636_v5 = vpack.c.bf16 %v8536_v51, %v8535_v43  ;;  %v8436_v44 = vmul.f32 %v14534_v41, %v8381_v14 }
 0x99d   : > { %v8493_v45 = vadd.f32 %v14539_v18, %v8438_v2  ;;  %v8439_v22 = vmul.f32 %v14534_v41, %v8384_v10 }
 0x99e   : > { %9690 = vst [vmem:[%s12136_s17 + $0x60] sm:$0xff] %v9636_v5   ;;  %v8491_v29 = vadd.f32 %v14539_v18, %v8436_v44  ;;  %v10457_v1 = vpop.f32.mrb[16].mxu1 }
 0x99f   : > { %v8494_v31 = vadd.f32 %v14539_v18, %v8439_v22  ;;  %v8335_v3 = vadd.f32 %v10457_v1, %v14531_v57  ;;  %v8326_v49 = vpop.f32.mrb[17].mxu1  ;;  %v8541_v17 = vmax.f32 %v8493_v45, 0.0  ;;  %v15051_v57 = vld [vmem:[#allocation50_spill] sm:$0xff] }
 0x9a0   : > { %v8539_v63 = vmax.f32 %v8491_v29, 0.0  ;;  %v10458_v4 = vpop.f32.mrb[18].mxu1 }
 0x9a1   : > { %v8542_v59 = vmax.f32 %v8494_v31, 0.0  ;;  %v8387_v54 = vadd.f32 %v8335_v3, %v15050_v7  ;;  %v8329_v55 = vpop.f32.mrb[19].mxu1 }
 0x9a2   : > { %v9641_v56 = vpack.c.bf16 %v8539_v63, %v8538_v40  ;;  %v8330_v19 = vadd.f32 %v8329_v55, %v14529_v47 }
 0x9a3   : > { %v9646_v32 = vpack.c.bf16 %v8542_v59, %v8541_v17  ;;  %v8442_v62 = vmul.f32 %v14534_v41, %v8387_v54 }
 0x9a4   : > { %9691 = vst [vmem:[%s12136_s17 + $0x68] sm:$0xff] %v9641_v56   ;;  %v8386_v6 = vadd.f32 %v8330_v19, %v15051_v57 }
 0x9a5   : > { %9692 = vst [vmem:[%s12136_s17 + $0x70] sm:$0xff] %v9646_v32   ;;  %v8497_v39 = vadd.f32 %v14539_v18, %v8442_v62 }
 0x9a6   : > { %v8441_v48 = vmul.f32 %v14534_v41, %v8386_v6 }
 0x9a7   : > { %v8545_v12 = vmax.f32 %v8497_v39, 0.0 }
 0x9a8   : > { %v8496_v8 = vadd.f32 %v14539_v18, %v8441_v48 }
 0x9aa   : > { %v8544_v47 = vmax.f32 %v8496_v8, 0.0 }
 0x9ac   : > { %v9651_v53 = vpack.c.bf16 %v8545_v12, %v8544_v47 }
 0x9ae   : > { %9693 = vst [vmem:[%s12136_s17 + $0x78] sm:$0xff] %v9651_v53  }
 0x9af   : > { %11726 = shalt.err (!%p11723_p11)
}
 0x9b0   : > { %s11727_s19 = scalar_lea.hbm %s14685_s29, 2048  ;;  %s11731_s20 = scalar_lea.hbm %s14746_s8, 4096 }
 0x9b1   : > { %p11728_p3 = scmp.ne.s32.totalorder %s14685_s29, %s11727_s19  ;;  %p11732_p7 = scmp.lt.u32.totalorder %s14685_s29, %s14746_s8 }
 0x9b2   : > { %p11733_p9 = scmp.lt.u32.totalorder %s11731_s20, %s11727_s19  ;;  %p11735_p0 = scmp.lt.u32.totalorder %s11727_s19, %s14685_s29 }
 0x9b3   : > { %p11729_p5 = pnand %p11728_p3, %p15052_p1 }
 0x9b4   : > { %p11734_p12 = por %p11733_p9, %p11732_p7 }
 0x9b5   : > { %p11730_p6 = pneg %p11729_p5 }
 0x9b6   : > { %p11736_p13 = por %p11735_p0, %p11734_p12 }
 0x9b8   : > { %p11737_p2 = pnand %p11736_p13, %p11730_p6 }
 0x9ba   : > { %11740 = shalt.err (!%p11737_p2)
}
 0x9bb   : > { %s11827_s24 = smov 64   ;;  %s11828_s18 = smov 4  }
 0x9bc   : > { %11005 = dma.vmem_to_hbm [thread:$0]  (%p15052_p1), %s14687_s23, 2048, %s14685_s29, %s14692_s26, %s11827_s24, %s11827_s24, %s11828_s18  }
 0x9bd PF: > { %s15053_s17 = sld [smem:[#allocation33_spill]]  ;;  %p11047_p4 = scmp.ge.s32.totalorder %s11809_s10, 2 }
 0x9be   : > { %s8755_s16 = sand.u32 1, %s11789_s27  }
 0x9bf   : > { %s8756_s21 = scalar_lea.sflag [#allocation7], %s8755_s16 }
 0x9c3   : > { %p15054_p8 = scmp.ne.s32.totalorder %s15053_s17, 0 }
 0x9c5   : > { %p11030_p10 = pnand %p11047_p4, %p15054_p8 }
 0x9c7   : > { %11784 = dma.done.wait (!%p11030_p10), %s8756_s21, 2048  }
 0x9c8   : > { %11786 = vsyncadd (!%p11030_p10), %s8756_s21, 4294965248  ;;  %s25_s10 = sadd.s32 1, %s11809_s10   ;;  %s15055_s11 = sld [smem:[#allocation30_spill]] }
 0x9c9   : > { %p22_p11 = scmp.ge.s32.totalorder %s25_s10, 4   ;;  %s15056_s29 = sld [smem:[#allocation34_spill]] }
 0x9ca   : > { %s15057_s30 = sld [smem:[#allocation31_spill]]  ;;  %s15058_s9 = sld [smem:[#allocation32_spill]] }
 0x9cb   : > { %s15059_s27 = smov %s11793_s28  ;;  %24 = sbr.rel (!%p22_p11) target bundleno = 10 (0xa), region = 137 }
 0x9ce   : > { %s15060_s28 = smov %s15055_s11 }
 0x9d2   :  { %8761 = vsyncpa [#allocation6], 1 }
 0x9d3   :  { %8763 = vsyncpa [#allocation6 + $0x1], 1 }
 0x9d4   :  { %8764 = vsyncpa [#allocation9], 1 }
 0x9d5   :  { %8765 = vsyncpa [#allocation12], 1 }
 0x9d6   :  { %8766 = vsyncpa [#allocation15], 1 }
 0x9d7   :  { %8767 = vsyncpa [#allocation7], 1 }
 0x9d8   :  { %8769 = vsyncpa [#allocation7 + $0x1], 1 }
 0x9d9   :  { %8770 = vsyncmov [#allocation4] }
 0x9dc   :  { %s8771_s15 = vpop.sfrf %8770 }
 0x9dd   :  { %p9346_p1 = scmp.ne.s32.totalorder %s8771_s15, 0 }
 0x9df   :  { %8775 = shalt.err (%p9346_p1)  }
 0x9e0   :  { %8777 = vsyncmov [#allocation4 + $0x1] }
 0x9e3   :  { %s8778_s23 = vpop.sfrf %8777 }
 0x9e4   :  { %p9347_p3 = scmp.ne.s32.totalorder %s8778_s23, 0 }
 0x9e6   :  { %8782 = shalt.err (%p9347_p3)  }

</bundles_post_ra>
